<compile_context>
chip_gen: v5e
topology: v5e:2x2
jax: 0.10.0
libtpu: 0.0.40
codegen_flags: <defaults>
</compile_context>

<pallas_src>
import jax
import jax.numpy as jnp
from jax.experimental import pallas as pl
from jax.experimental.pallas import tpu as pltpu


# ----------------------------------------------------------------------------
# Fused MLP kernel: out = GELU(x @ W1 + b1) @ W2 + b2
# ----------------------------------------------------------------------------
def _erf_poly(x):
    """erf via Abramowitz & Stegun 7.1.26 (max abs err ~1.5e-7), Mosaic-safe."""
    ax = jnp.abs(x)
    t = 1.0 / (1.0 + 0.3275911 * ax)
    poly = t * (0.254829592
                + t * (-0.284496736
                       + t * (1.421413741
                              + t * (-1.453152027
                                     + t * 1.061405429))))
    y = 1.0 - poly * jnp.exp(-ax * ax)
    return jnp.where(x < 0.0, -y, y)


def _gelu_exact(x):
    # Exact (erf-based) GELU, matching torch.nn.GELU() default.
    return 0.5 * x * (1.0 + _erf_poly(x * 0.7071067811865476))


def fused_mlp_kernel(x_ref, w1_ref, b1_ref, w2_ref, b2_ref, o_ref):
    x = x_ref[...].astype(jnp.float32)
    # fc1 (+ bias)
    h = jnp.dot(x, w1_ref[...], preferred_element_type=jnp.float32)
    h = h + b1_ref[...]
    # GELU in-kernel -> hidden activation never leaves VMEM
    h = _gelu_exact(h)
    # fc2 (+ bias)
    o = jnp.dot(h, w2_ref[...], preferred_element_type=jnp.float32)
    o = o + b2_ref[...]
    # NOTE: Dropout(p=0.0) is identity in eval/default config -> omitted.
    o_ref[...] = o.astype(o_ref.dtype)


def _pick_row_tile(m, target=256):
    """Largest divisor of m that is <= target (amortizes per-step overhead)."""
    tm = min(target, m)
    while m % tm != 0:
        tm -= 1
    return tm


def mlp_forward(x, w1, b1, w2, b2, *, row_tile=256):
    """x: (..., C_in); w1: (C_in, H); w2: (H, C_out). Returns (..., C_out)."""
    *lead, c_in = x.shape
    hidden = w1.shape[1]
    c_out = w2.shape[1]
    m = 1
    for d in lead:
        m *= d
    x2d = x.reshape(m, c_in)

    tm = _pick_row_tile(m, row_tile)
    grid = (m // tm,)

    out2d = pl.pallas_call(
        fused_mlp_kernel,
        out_shape=jax.ShapeDtypeStruct((m, c_out), x.dtype),
        grid=grid,
        in_specs=[
            pl.BlockSpec((tm, c_in), lambda i: (i, 0)),      # x rows (streamed)
            pl.BlockSpec((c_in, hidden), lambda i: (0, 0)),  # W1 (VMEM-resident)
            pl.BlockSpec((1, hidden), lambda i: (0, 0)),     # b1
            pl.BlockSpec((hidden, c_out), lambda i: (0, 0)), # W2 (VMEM-resident)
            pl.BlockSpec((1, c_out), lambda i: (0, 0)),      # b2
        ],
        out_specs=pl.BlockSpec((tm, c_out), lambda i: (i, 0)),
        compiler_params=pltpu.CompilerParams(
            dimension_semantics=("parallel",),               # megacore-shardable
        ),
    )(x2d, w1, b1.reshape(1, hidden), w2, b2.reshape(1, c_out))

    return out2d.reshape(*lead, c_out)


# ----------------------------------------------------------------------------
# Main
# ----------------------------------------------------------------------------
if __name__ == "__main__":
    key = jax.random.PRNGKey(0)
    kx, k1, k2, k3, k4 = jax.random.split(key, 5)

    # Small, lane-dense shapes: (B, N, C) tokens, mlp_ratio = 4.
    B, N, C = 2, 256, 128
    hidden = 4 * C

    x = jax.random.normal(kx, (B, N, C), jnp.float32)
    w1 = (0.02 * jax.random.normal(k1, (C, hidden))).astype(jnp.float32)
    b1 = (0.02 * jax.random.normal(k2, (hidden,))).astype(jnp.float32)
    w2 = (0.02 * jax.random.normal(k3, (hidden, C))).astype(jnp.float32)
    b2 = (0.02 * jax.random.normal(k4, (C,))).astype(jnp.float32)

    out = mlp_forward(x, w1, b1, w2, b2)
    jax.block_until_ready(out)
    assert out.shape == (B, N, C)

    # Reference (plain JAX, exact erf GELU) — loose tolerance covers the
    # polynomial-erf (~1e-7) and f32 accumulation-order differences.
    ref = jnp.dot(x, w1) + b1
    ref = jax.nn.gelu(ref, approximate=False)
    ref = jnp.dot(ref, w2) + b2
    max_err = float(jnp.max(jnp.abs(out - ref)))
    assert max_err < 1e-3, f"max abs err {max_err}"

    print("KERNEL_OK")
</pallas_src>

<mosaic_0001>
module attributes {stable_mosaic.version = 11 : i64} {
  func.func @fused_mlp_kernel(%arg0: i32, %arg1: memref<256x128xf32, #tpu.memory_space<vmem>>, %arg2: memref<128x512xf32, #tpu.memory_space<vmem>>, %arg3: memref<1x512xf32, #tpu.memory_space<vmem>>, %arg4: memref<512x128xf32, #tpu.memory_space<vmem>>, %arg5: memref<1x128xf32, #tpu.memory_space<vmem>>, %arg6: memref<256x128xf32, #tpu.memory_space<vmem>>) attributes {dimension_semantics = [#tpu.dimension_semantics<parallel>], iteration_bounds = array<i64: 2>, scalar_prefetch = 0 : i64, scratch_operands = 0 : i64, tpu.core_type = #tpu.core_type<tc>, window_params = [{transform_indices = @transform_0, window_bounds = array<i64: 256, 128>}, {pipeline_mode = #tpu.pipeline_mode<synchronous>, transform_indices = @transform_1, window_bounds = array<i64: 128, 512>}, {pipeline_mode = #tpu.pipeline_mode<synchronous>, transform_indices = @transform_2, window_bounds = array<i64: 1, 512>}, {pipeline_mode = #tpu.pipeline_mode<synchronous>, transform_indices = @transform_3, window_bounds = array<i64: 512, 128>}, {pipeline_mode = #tpu.pipeline_mode<synchronous>, transform_indices = @transform_4, window_bounds = array<i64: 1, 128>}, {transform_indices = @transform_5, window_bounds = array<i64: 256, 128>}]} {
    %c0 = arith.constant 0 : index
    %c0_0 = arith.constant 0 : index
    %0 = vector.load %arg1[%c0, %c0_0] : memref<256x128xf32, #tpu.memory_space<vmem>>, vector<256x128xf32>
    %c0_1 = arith.constant 0 : index
    %c0_2 = arith.constant 0 : index
    %1 = vector.load %arg2[%c0_1, %c0_2] : memref<128x512xf32, #tpu.memory_space<vmem>>, vector<128x512xf32>
    %cst = arith.constant dense<0.000000e+00> : vector<256x512xf32>
    %2 = tpu.matmul %0, %1, %cst {dimension_numbers = #tpu.dot_dimension_numbers<[1], [0], [0], [1], [0, 0, 1, 1], [], []>} : vector<256x128xf32>, vector<128x512xf32>, vector<256x512xf32> -> vector<256x512xf32>
    %c0_3 = arith.constant 0 : index
    %c0_4 = arith.constant 0 : index
    %3 = vector.load %arg3[%c0_3, %c0_4] : memref<1x512xf32, #tpu.memory_space<vmem>>, vector<1x512xf32>
    %4 = vector.broadcast %3 : vector<1x512xf32> to vector<256x512xf32>
    %5 = arith.addf %2, %4 : vector<256x512xf32>
    %cst_5 = arith.constant 5.000000e-01 : f32
    %6 = vector.broadcast %cst_5 : f32 to vector<256x512xf32>
    %7 = arith.mulf %6, %5 : vector<256x512xf32>
    %cst_6 = arith.constant 0.707106769 : f32
    %8 = vector.broadcast %cst_6 : f32 to vector<256x512xf32>
    %9 = arith.mulf %5, %8 : vector<256x512xf32>
    %10 = math.absf %9 : vector<256x512xf32>
    %cst_7 = arith.constant 0.327591091 : f32
    %11 = vector.broadcast %cst_7 : f32 to vector<256x512xf32>
    %12 = arith.mulf %11, %10 : vector<256x512xf32>
    %cst_8 = arith.constant 1.000000e+00 : f32
    %13 = vector.broadcast %cst_8 : f32 to vector<256x512xf32>
    %14 = arith.addf %13, %12 : vector<256x512xf32>
    %cst_9 = arith.constant 1.000000e+00 : f32
    %15 = vector.broadcast %cst_9 : f32 to vector<256x512xf32>
    %16 = arith.divf %15, %14 : vector<256x512xf32>
    %cst_10 = arith.constant 1.06140542 : f32
    %17 = vector.broadcast %cst_10 : f32 to vector<256x512xf32>
    %18 = arith.mulf %16, %17 : vector<256x512xf32>
    %cst_11 = arith.constant -1.45315206 : f32
    %19 = vector.broadcast %cst_11 : f32 to vector<256x512xf32>
    %20 = arith.addf %19, %18 : vector<256x512xf32>
    %21 = arith.mulf %16, %20 : vector<256x512xf32>
    %cst_12 = arith.constant 1.42141378 : f32
    %22 = vector.broadcast %cst_12 : f32 to vector<256x512xf32>
    %23 = arith.addf %22, %21 : vector<256x512xf32>
    %24 = arith.mulf %16, %23 : vector<256x512xf32>
    %cst_13 = arith.constant -0.284496725 : f32
    %25 = vector.broadcast %cst_13 : f32 to vector<256x512xf32>
    %26 = arith.addf %25, %24 : vector<256x512xf32>
    %27 = arith.mulf %16, %26 : vector<256x512xf32>
    %cst_14 = arith.constant 0.254829586 : f32
    %28 = vector.broadcast %cst_14 : f32 to vector<256x512xf32>
    %29 = arith.addf %28, %27 : vector<256x512xf32>
    %30 = arith.mulf %16, %29 : vector<256x512xf32>
    %cst_15 = arith.constant 0.000000e+00 : f32
    %31 = vector.broadcast %cst_15 : f32 to vector<256x512xf32>
    %32 = arith.subf %31, %10 : vector<256x512xf32>
    %33 = arith.mulf %32, %10 : vector<256x512xf32>
    %34 = math.exp %33 : vector<256x512xf32>
    %35 = arith.mulf %30, %34 : vector<256x512xf32>
    %cst_16 = arith.constant 1.000000e+00 : f32
    %36 = vector.broadcast %cst_16 : f32 to vector<256x512xf32>
    %37 = arith.subf %36, %35 : vector<256x512xf32>
    %cst_17 = arith.constant 0.000000e+00 : f32
    %38 = vector.broadcast %cst_17 : f32 to vector<256x512xf32>
    %39 = arith.cmpf olt, %9, %38 : vector<256x512xf32>
    %cst_18 = arith.constant 0.000000e+00 : f32
    %40 = vector.broadcast %cst_18 : f32 to vector<256x512xf32>
    %41 = arith.subf %40, %37 : vector<256x512xf32>
    %42 = arith.select %39, %41, %37 : vector<256x512xi1>, vector<256x512xf32>
    %cst_19 = arith.constant 1.000000e+00 : f32
    %43 = vector.broadcast %cst_19 : f32 to vector<256x512xf32>
    %44 = arith.addf %43, %42 : vector<256x512xf32>
    %45 = arith.mulf %7, %44 : vector<256x512xf32>
    %c0_20 = arith.constant 0 : index
    %c0_21 = arith.constant 0 : index
    %46 = vector.load %arg4[%c0_20, %c0_21] : memref<512x128xf32, #tpu.memory_space<vmem>>, vector<512x128xf32>
    %cst_22 = arith.constant dense<0.000000e+00> : vector<256x128xf32>
    %47 = tpu.matmul %45, %46, %cst_22 {dimension_numbers = #tpu.dot_dimension_numbers<[1], [0], [0], [1], [0, 0, 1, 1], [], []>} : vector<256x512xf32>, vector<512x128xf32>, vector<256x128xf32> -> vector<256x128xf32>
    %c0_23 = arith.constant 0 : index
    %c0_24 = arith.constant 0 : index
    %48 = vector.load %arg5[%c0_23, %c0_24] : memref<1x128xf32, #tpu.memory_space<vmem>>, vector<1x128xf32>
    %49 = vector.broadcast %48 : vector<1x128xf32> to vector<256x128xf32>
    %50 = arith.addf %47, %49 : vector<256x128xf32>
    %c0_25 = arith.constant 0 : index
    %c0_26 = arith.constant 0 : index
    %51 = vector.load %arg6[%c0_25, %c0_26] : memref<256x128xf32, #tpu.memory_space<vmem>>, vector<256x128xf32>
    tpu.vector_store %arg6[%c0_25, %c0_26], %50 {strides = array<i32>} : memref<256x128xf32, #tpu.memory_space<vmem>>, vector<256x128xf32>,
    return
  }
  func.func @transform_0(%arg0: i32) -> (i32, i32) {
    %c0_i32 = arith.constant 0 : i32
    %c0_i32_0 = arith.constant 0 : i32
    return %arg0, %c0_i32 : i32, i32
  }
  func.func @transform_1(%arg0: i32) -> (i32, i32) {
    %c0_i32 = arith.constant 0 : i32
    %c0_i32_0 = arith.constant 0 : i32
    %c0_i32_1 = arith.constant 0 : i32
    return %c0_i32, %c0_i32_0 : i32, i32
  }
  func.func @transform_2(%arg0: i32) -> (i32, i32) {
    %c0_i32 = arith.constant 0 : i32
    %c0_i32_0 = arith.constant 0 : i32
    %c0_i32_1 = arith.constant 0 : i32
    return %c0_i32, %c0_i32_0 : i32, i32
  }
  func.func @transform_3(%arg0: i32) -> (i32, i32) {
    %c0_i32 = arith.constant 0 : i32
    %c0_i32_0 = arith.constant 0 : i32
    %c0_i32_1 = arith.constant 0 : i32
    return %c0_i32, %c0_i32_0 : i32, i32
  }
  func.func @transform_4(%arg0: i32) -> (i32, i32) {
    %c0_i32 = arith.constant 0 : i32
    %c0_i32_0 = arith.constant 0 : i32
    %c0_i32_1 = arith.constant 0 : i32
    return %c0_i32, %c0_i32_0 : i32, i32
  }
  func.func @transform_5(%arg0: i32) -> (i32, i32) {
    %c0_i32 = arith.constant 0 : i32
    %c0_i32_0 = arith.constant 0 : i32
    return %arg0, %c0_i32 : i32, i32
  }
}

</mosaic_0001>

<bundles_post_ra>
// kernel: tpu_custom_call.1
= control target key start
LH: loop header
LB: loop body
LE: loop exit
PB: predicated region body
PF: predicated region fallthrough
CT: control target
= control target key end

     0   :  { %10 = vsyncpa [#allocation3], 0  ;;  %s14508_s0 = inlined_call_operand.hbm [shape: f32[512,128], index: 0, kind: input, shape index: {}]   ;;  %s14509_s1 = inlined_call_operand.hbm [shape: f32[128,512], index: 1, kind: input, shape index: {}]   ;;  %s14510_s2 = inlined_call_operand.hbm [shape: f32[1,512], index: 2, kind: input, shape index: {}]   ;;  %s14511_s3 = inlined_call_operand.hbm [shape: f32[512,128], index: 3, kind: input, shape index: {}]   ;;  %s14512_s4 = inlined_call_operand.vmem [shape: f32[1,128], index: 4, kind: input, shape index: {}]   ;;  %s14513_s5 = inlined_call_operand.hbm [shape: f32[512,128], index: 5, kind: output, shape index: {}]  }
   0x1   :  { %12 = vsyncpa [#allocation3 + $0x1], 0 }
   0x2   :  { %13 = vsyncpa [#allocation6], 0 }
   0x3   :  { %14 = vsyncpa [#allocation9], 0 }
   0x4   :  { %15 = vsyncpa [#allocation4], 0 }
   0x5   :  { %17 = vsyncpa [#allocation4 + $0x1], 0  ;;  %s7499_s18 = smov 0   ;;  %s7501_s19 = smov 0  }
   0x6   :  { %s7503_s20 = smov 0   ;;  %s7505_s21 = smov 0  }
   0x7 LB: > { %s7520_s22 = sadd.s32 4294967295, %s7458_s21   ;;  %s6643_s23 = sadd.s32 4294967294, %s7458_s21   ;;  %s7458_s21 = sphi %s7505_s21, %s16934_s21   ;;  %s7454_s20 = sphi %s7503_s20, %s16933_s20   ;;  %s7450_s19 = sphi %s7501_s19, %s16932_s19   ;;  %s7446_s18 = sphi %s7499_s18, %s16931_s18  }
   0x8   : > { %p43_p0 = scmp.ne.s32.totalorder %s7450_s19, %s7446_s18  ;;  %p44_p1 = scmp.eq.s32.totalorder %s7520_s22, 0 }
   0x9   : > { %p151_p2 = scmp.eq.s32.totalorder %s7520_s22, 1  ;;  %p157_p3 = scmp.eq.s32.totalorder %s6643_s23, 1 }
   0xa   : > { %p7529_p4 = por %p44_p1, %p43_p0  ;;  %p6644_p5 = scmp.ge.s32.totalorder %s7458_s21, 1 }
   0xb   : > { %p7534_p6 = por %p157_p3, %p43_p0  ;;  %p164_p7 = scmp.lt.s32.totalorder %s7458_s21, 3 }
   0xc   : > { %s175_s28 = sshll.u32 %s14509_s1, 4  ;;  %s7460_s30 = smov [#allocation5]   ;;  %s176_s28 = int_to_ptr.hbm [resolvable:$true] %s175_s28 }
   0xd   : > { %p7542_p8 = pnand %p6644_p5, %p164_p7  ;;  %s177_s6 = sshll.u32 %s7460_s30, 4  ;;  %s178_s6 = int_to_ptr.vmem [resolvable:$true] %s177_s6 }
   0xe   : > { %s190_s10 = sshll.u32 %s14510_s2, 4  ;;  %s7461_s11 = smov 512   ;;  %s191_s10 = int_to_ptr.hbm [resolvable:$true] %s190_s10 }
   0xf   : > { %p6681_p9 = pneg %p7542_p8  ;;  %s7462_s12 = smov 32  }
  0x10   : > { %s7463_s13 = smov [#allocation7]   ;;  %s201_s17 = sshll.u32 %s14511_s3, 4  ;;  %s202_s17 = int_to_ptr.hbm [resolvable:$true] %s201_s17 }
  0x11   : > { %p7550_p10 = pnand %p6681_p9, %p44_p1  ;;  %s192_s14 = sshll.u32 %s7463_s13, 4  ;;  %s193_s14 = int_to_ptr.vmem [resolvable:$true] %s192_s14 }
  0x12   : > { %s7464_s23 = smov [#allocation8]   ;;  %s14514_s27 = smov 128  }
  0x13   : > { %6684 = dma.hbm_to_vmem [thread:$0]  (!%p7550_p10), %s176_s28, 8192, %s178_s6, [#allocation6], %s7461_s11, %s7461_s11, %s7462_s12  }
  0x14   : > { %6687 = dma.hbm_to_vmem [thread:$0]  (!%p7550_p10), %s191_s10, 64, %s193_s14, [#allocation6]  }
  0x15   : > { %s203_s26 = sshll.u32 %s7464_s23, 4  ;;  %s7466_s28 = smov 8   ;;  %s204_s26 = int_to_ptr.vmem [resolvable:$true] %s203_s26 }
  0x16   : > { %6690 = dma.hbm_to_vmem [thread:$0]  (!%p7550_p10), %s202_s17, 8192, %s204_s26, [#allocation9], %s14514_s27, %s14514_s27, %s7466_s28  }
  0x17   : > { %s7571_s30 = sadd.s32 1, %s7458_s21   ;;  %s30_s8 = sadd.s32 1, %s7454_s20 }
  0x18   : > { %s27_s6 = ssub.s32 %s7458_s21, %s7571_s30  ;;  %p37_p13 = scmp.ne.s32.totalorder %s7454_s20, %s7450_s19 }
  0x19   : > { %p28_p12 = scmp.eq.s32.totalorder %s27_s6, 0  ;;  %p38_p0 = scmp.eq.s32.totalorder %s7458_s21, 0 }
  0x1a   : > { %p7584_p3 = por %p151_p2, %p37_p13  ;;  %p6702_p5 = scmp.lt.s32.totalorder %s7458_s21, 2 }
  0x1b   : > { %s7580_s9 = scalar_select %p28_p12, %s7454_s20, %s30_s8  }
  0x1c   : > { %s220_s7 = sand.u32 1, %s7454_s20   ;;  %s6663_s11 = sshll.u32 %s7458_s21, 8 }
  0x1d   : > { %p39_p7 = por %p38_p0, %p37_p13  ;;  %s6649_s12 = sshll.u32 %s220_s7, 8 }
  0x1e   : > { %s229_s15 = scalar_lea.hbm %s14508_s0, %s6663_s11  ;;  %s224_s17 = scalar_lea.vmem [#allocation2], %s6649_s12 }
  0x1f   : > { %s230_s16 = sshll.u32 %s229_s15, 4  ;;  %s232_s23 = sshll.u32 %s224_s17, 4  ;;  %s231_s16 = int_to_ptr.hbm [resolvable:$true] %s230_s16  ;;  %s233_s23 = int_to_ptr.vmem [resolvable:$true] %s232_s23 }
  0x20   : > { %p7594_p9 = pnand %p6702_p5, %p39_p7  ;;  %s221_s6 = scalar_lea.sflag [#allocation3], %s220_s7 }
  0x21   : > { %s7354_s8 = sshra.s32 %s231_s16, 4  ;;  %s7361_s12 = scalar_lea.hbm %s14508_s0, 512  ;;  %s7355_s8 = int_to_ptr.hbm [resolvable:$true] %s7354_s8 }
  0x22   : > { %s7356_s27 = scalar_lea.hbm %s7355_s8, 256  ;;  %p7358_p10 = pneg %p7594_p9 }
  0x23   : > { %p7357_p2 = scmp.ne.s32.totalorder %s7355_s8, %s7356_s27  ;;  %p7362_p0 = scmp.lt.s32.totalorder %s7355_s8, %s14508_s0 }
  0x24   : > { %p7363_p5 = scmp.lt.s32.totalorder %s7361_s12, %s7356_s27 }
  0x25   : > { %p7359_p12 = pnand %p7358_p10, %p7357_p2 }
  0x26   : > { %p7364_p7 = por %p7363_p5, %p7362_p0 }
  0x27   : > { %p7360_p13 = pneg %p7359_p12 }
  0x29   : > { %p7365_p11 = pnand %p7364_p7, %p7360_p13 }
  0x2b   : > { %7368 = shalt.err (!%p7365_p11)
}
  0x2c   : > { %s15186_s7 = smov 128   ;;  %244 = sbr.rel (%p7542_p8) target bundleno = 1771 (0x6eb), region = 40 }
  0x2d   : > { %6694 = dma.hbm_to_vmem [thread:$0]  (!%p7594_p9), %s231_s16, 4096, %s233_s23, %s221_s6, %s15186_s7, %s15186_s7, %s7466_s28  }
  0x31   : > { %s7614_s17 = sand.u32 1, %s7450_s19  }
  0x32   : > { %s6653_s27 = sshll.u32 %s7614_s17, 8  ;;  %s247_s8 = scalar_lea.sflag [#allocation3], %s7614_s17 }
  0x33   : > { %s7620_s11 = scalar_lea.vmem [#allocation2], %s6653_s27 }
  0x34   : > { %7429 = dma.done.wait (%p7529_p4), %s247_s8, 4096  }
  0x35   : > { %7431 = vsyncadd (%p7529_p4), %s247_s8, 4294963200 }
  0x36   : > { %7433 = dma.done.wait (%p44_p1), [#allocation6], 8256  }
  0x37   : > { %7435 = vsyncadd (%p44_p1), [#allocation6], 4294959040 }
  0x38   : > { %7437 = dma.done.wait (%p44_p1), [#allocation9], 8192  }
  0x39   : > { %7439 = vsyncadd (%p44_p1), [#allocation9], 4294959104  ;;  %v387_v0 = vld [vmem:[#allocation5 + $0x1e0] sm:$0xff]  ;;  %v388_v1 = vld [vmem:[#allocation5 + $0x1e8] sm:$0xff]  ;;  %s12891_s28 = scalar_lea.vmem [#allocation10], %s6653_s27  ;;  %s6664_s14 = sshll.u32 %s7520_s22, 8 }
  0x3a   : > { %v389_v2 = vld [vmem:[#allocation5 + $0x1f0] sm:$0xff]  ;;  %401 = vmatpush.msra.mxu0 %v387_v0  ;;  %514 = vmatpush.msra.mxu1 %v388_v1  ;;  %v390_v3 = vld [vmem:[#allocation5 + $0x1f8] sm:$0xff]  ;;  %v383_v4 = vld [vmem:[#allocation5 + $0x1c0] sm:$0xff]  ;;  %s6537_s27 = scalar_lea.hbm %s14513_s5, %s6664_s14  ;;  %s6538_s8 = sshll.u32 %s12891_s28, 4  ;;  %s6539_s8 = int_to_ptr.vmem [resolvable:$true] %s6538_s8 }
  0x3b   : > { %v384_v5 = vld [vmem:[#allocation5 + $0x1c8] sm:$0xff]  ;;  %627 = vmatpush.msra.mxu2 %v389_v2  ;;  %740 = vmatpush.msra.mxu3 %v390_v3  ;;  %v385_v6 = vld [vmem:[#allocation5 + $0x1d0] sm:$0xff]  ;;  %v386_v7 = vld [vmem:[#allocation5 + $0x1d8] sm:$0xff]  ;;  %s6526_s24 = scalar_lea.sflag [#allocation4], %s7614_s17  ;;  %s7404_s26 = scalar_lea.hbm %s14513_s5, 512 }
  0x3c   : > { %v379_v8 = vld [vmem:[#allocation5 + $0x1a0] sm:$0xff]  ;;  %402 = vmatpush.msra.mxu0 %v383_v4  ;;  %515 = vmatpush.msra.mxu1 %v384_v5  ;;  %v380_v9 = vld [vmem:[#allocation5 + $0x1a8] sm:$0xff]  ;;  %v381_v10 = vld [vmem:[#allocation5 + $0x1b0] sm:$0xff] }
  0x3d   : > { %v382_v11 = vld [vmem:[#allocation5 + $0x1b8] sm:$0xff]  ;;  %628 = vmatpush.msra.mxu2 %v385_v6  ;;  %741 = vmatpush.msra.mxu3 %v386_v7  ;;  %v375_v12 = vld [vmem:[#allocation5 + $0x180] sm:$0xff]  ;;  %v376_v13 = vld [vmem:[#allocation5 + $0x188] sm:$0xff] }
  0x3e   : > { %403 = vmatpush.msra.mxu0 %v379_v8  ;;  %516 = vmatpush.msra.mxu1 %v380_v9  ;;  %v377_v14 = vld [vmem:[#allocation5 + $0x190] sm:$0xff]  ;;  %v378_v15 = vld [vmem:[#allocation5 + $0x198] sm:$0xff]  ;;  %v371_v16 = vld [vmem:[#allocation5 + $0x160] sm:$0xff] }
  0x3f   : > { %629 = vmatpush.msra.mxu2 %v381_v10  ;;  %742 = vmatpush.msra.mxu3 %v382_v11  ;;  %v372_v17 = vld [vmem:[#allocation5 + $0x168] sm:$0xff]  ;;  %v373_v18 = vld [vmem:[#allocation5 + $0x170] sm:$0xff]  ;;  %v374_v19 = vld [vmem:[#allocation5 + $0x178] sm:$0xff] }
  0x40   : > { %404 = vmatpush.msra.mxu0 %v375_v12  ;;  %517 = vmatpush.msra.mxu1 %v376_v13  ;;  %v367_v20 = vld [vmem:[#allocation5 + $0x140] sm:$0xff]  ;;  %v368_v21 = vld [vmem:[#allocation5 + $0x148] sm:$0xff]  ;;  %v369_v22 = vld [vmem:[#allocation5 + $0x150] sm:$0xff] }
  0x41   : > { %630 = vmatpush.msra.mxu2 %v377_v14  ;;  %743 = vmatpush.msra.mxu3 %v378_v15  ;;  %v370_v23 = vld [vmem:[#allocation5 + $0x158] sm:$0xff]  ;;  %v363_v24 = vld [vmem:[#allocation5 + $0x120] sm:$0xff]  ;;  %v364_v25 = vld [vmem:[#allocation5 + $0x128] sm:$0xff] }
  0x42   : > { %405 = vmatpush.msra.mxu0 %v371_v16  ;;  %518 = vmatpush.msra.mxu1 %v372_v17  ;;  %v365_v26 = vld [vmem:[#allocation5 + $0x130] sm:$0xff]  ;;  %v366_v27 = vld [vmem:[#allocation5 + $0x138] sm:$0xff]  ;;  %v359_v28 = vld [vmem:[#allocation5 + $0x100] sm:$0xff] }
  0x43   : > { %631 = vmatpush.msra.mxu2 %v373_v18  ;;  %744 = vmatpush.msra.mxu3 %v374_v19  ;;  %v360_v29 = vld [vmem:[#allocation5 + $0x108] sm:$0xff]  ;;  %v361_v30 = vld [vmem:[#allocation5 + $0x110] sm:$0xff]  ;;  %v362_v31 = vld [vmem:[#allocation5 + $0x118] sm:$0xff] }
  0x44   : > { %406 = vmatpush.msra.mxu0 %v367_v20  ;;  %519 = vmatpush.msra.mxu1 %v368_v21  ;;  %v355_v32 = vld [vmem:[#allocation5 + $0xe0] sm:$0xff]  ;;  %v356_v33 = vld [vmem:[#allocation5 + $0xe8] sm:$0xff]  ;;  %v357_v34 = vld [vmem:[#allocation5 + $0xf0] sm:$0xff] }
  0x45   : > { %632 = vmatpush.msra.mxu2 %v369_v22  ;;  %745 = vmatpush.msra.mxu3 %v370_v23  ;;  %v358_v35 = vld [vmem:[#allocation5 + $0xf8] sm:$0xff]  ;;  %v351_v36 = vld [vmem:[#allocation5 + $0xc0] sm:$0xff]  ;;  %v352_v37 = vld [vmem:[#allocation5 + $0xc8] sm:$0xff] }
  0x46   : > { %407 = vmatpush.msra.mxu0 %v363_v24  ;;  %520 = vmatpush.msra.mxu1 %v364_v25  ;;  %v353_v38 = vld [vmem:[#allocation5 + $0xd0] sm:$0xff]  ;;  %v354_v39 = vld [vmem:[#allocation5 + $0xd8] sm:$0xff]  ;;  %v347_v40 = vld [vmem:[#allocation5 + $0xa0] sm:$0xff] }
  0x47   : > { %633 = vmatpush.msra.mxu2 %v365_v26  ;;  %746 = vmatpush.msra.mxu3 %v366_v27  ;;  %v348_v41 = vld [vmem:[#allocation5 + $0xa8] sm:$0xff]  ;;  %v349_v42 = vld [vmem:[#allocation5 + $0xb0] sm:$0xff]  ;;  %v350_v43 = vld [vmem:[#allocation5 + $0xb8] sm:$0xff] }
  0x48   : > { %408 = vmatpush.msra.mxu0 %v359_v28  ;;  %521 = vmatpush.msra.mxu1 %v360_v29  ;;  %v343_v44 = vld [vmem:[#allocation5 + $0x80] sm:$0xff]  ;;  %v344_v45 = vld [vmem:[#allocation5 + $0x88] sm:$0xff]  ;;  %v345_v46 = vld [vmem:[#allocation5 + $0x90] sm:$0xff] }
  0x49   : > { %634 = vmatpush.msra.mxu2 %v361_v30  ;;  %747 = vmatpush.msra.mxu3 %v362_v31  ;;  %v346_v47 = vld [vmem:[#allocation5 + $0x98] sm:$0xff]  ;;  %v339_v48 = vld [vmem:[#allocation5 + $0x60] sm:$0xff]  ;;  %v340_v49 = vld [vmem:[#allocation5 + $0x68] sm:$0xff] }
  0x4a   : > { %409 = vmatpush.msra.mxu0 %v355_v32  ;;  %522 = vmatpush.msra.mxu1 %v356_v33  ;;  %v341_v50 = vld [vmem:[#allocation5 + $0x70] sm:$0xff]  ;;  %v342_v51 = vld [vmem:[#allocation5 + $0x78] sm:$0xff]  ;;  %v335_v52 = vld [vmem:[#allocation5 + $0x40] sm:$0xff] }
  0x4b   : > { %635 = vmatpush.msra.mxu2 %v357_v34  ;;  %748 = vmatpush.msra.mxu3 %v358_v35  ;;  %v336_v53 = vld [vmem:[#allocation5 + $0x48] sm:$0xff]  ;;  %v337_v54 = vld [vmem:[#allocation5 + $0x50] sm:$0xff]  ;;  %v338_v55 = vld [vmem:[#allocation5 + $0x58] sm:$0xff] }
  0x4c   : > { %410 = vmatpush.msra.mxu0 %v351_v36  ;;  %523 = vmatpush.msra.mxu1 %v352_v37  ;;  %v331_v56 = vld [vmem:[#allocation5 + $0x20] sm:$0xff]  ;;  %v332_v57 = vld [vmem:[#allocation5 + $0x28] sm:$0xff]  ;;  %v333_v58 = vld [vmem:[#allocation5 + $0x30] sm:$0xff] }
  0x4d   : > { %636 = vmatpush.msra.mxu2 %v353_v38  ;;  %749 = vmatpush.msra.mxu3 %v354_v39  ;;  %v334_v59 = vld [vmem:[#allocation5 + $0x38] sm:$0xff]  ;;  %v327_v60 = vld [vmem:[#allocation5] sm:$0xff]  ;;  %v328_v61 = vld [vmem:[#allocation5 + $0x8] sm:$0xff] }
  0x4e   : > { %411 = vmatpush.msra.mxu0 %v347_v40  ;;  %524 = vmatpush.msra.mxu1 %v348_v41  ;;  %v329_v62 = vld [vmem:[#allocation5 + $0x10] sm:$0xff]  ;;  %v330_v63 = vld [vmem:[#allocation5 + $0x18] sm:$0xff]  ;;  %v295_v0 = vld [vmem:[%s7620_s11] sm:$0xff] }
  0x4f   : > { %637 = vmatpush.msra.mxu2 %v349_v42  ;;  %750 = vmatpush.msra.mxu3 %v350_v43  ;;  %v6020_v1 = vld [vmem:[#allocation8 + $0x178] sm:$0xff]  ;;  %v6019_v5 = vld [vmem:[#allocation8 + $0x170] sm:$0xff]  ;;  %v6018_v9 = vld [vmem:[#allocation8 + $0x168] sm:$0xff] }
  0x50   : > { %412 = vmatpush.msra.mxu0 %v343_v44  ;;  %525 = vmatpush.msra.mxu1 %v344_v45  ;;  %v5988_v2 = vld [vmem:[#allocation8 + $0x78] sm:$0xff]  ;;  %v5987_v6 = vld [vmem:[#allocation8 + $0x70] sm:$0xff]  ;;  %v5986_v10 = vld [vmem:[#allocation8 + $0x68] sm:$0xff] }
  0x51   : > { %638 = vmatpush.msra.mxu2 %v345_v46  ;;  %751 = vmatpush.msra.mxu3 %v346_v47  ;;  %v6036_v3 = vld [vmem:[#allocation8 + $0x1f8] sm:$0xff]  ;;  %v6035_v7 = vld [vmem:[#allocation8 + $0x1f0] sm:$0xff]  ;;  %v6034_v11 = vld [vmem:[#allocation8 + $0x1e8] sm:$0xff] }
  0x52   : > { %413 = vmatpush.msra.mxu0 %v339_v48  ;;  %526 = vmatpush.msra.mxu1 %v340_v49  ;;  %v6004_v4 = vld [vmem:[#allocation8 + $0xf8] sm:$0xff]  ;;  %v6003_v8 = vld [vmem:[#allocation8 + $0xf0] sm:$0xff]  ;;  %v6002_v12 = vld [vmem:[#allocation8 + $0xe8] sm:$0xff] }
  0x53   : > { %639 = vmatpush.msra.mxu2 %v341_v50  ;;  %752 = vmatpush.msra.mxu3 %v342_v51  ;;  %v296_v13 = vld [vmem:[%s7620_s11 + $0x8] sm:$0xff]  ;;  %v297_v14 = vld [vmem:[%s7620_s11 + $0x10] sm:$0xff]  ;;  %v298_v19 = vld [vmem:[%s7620_s11 + $0x18] sm:$0xff] }
  0x54   : > { %414 = vmatpush.msra.mxu0 %v335_v52  ;;  %527 = vmatpush.msra.mxu1 %v336_v53  ;;  %v6017_v15 = vld [vmem:[#allocation8 + $0x160] sm:$0xff]  ;;  %v6016_v21 = vld [vmem:[#allocation8 + $0x158] sm:$0xff]  ;;  %v301_v26 = vld [vmem:[%s7620_s11 + $0x30] sm:$0xff] }
  0x55   : > { %640 = vmatpush.msra.mxu2 %v337_v54  ;;  %753 = vmatpush.msra.mxu3 %v338_v55  ;;  %v5985_v16 = vld [vmem:[#allocation8 + $0x60] sm:$0xff]  ;;  %v5984_v22 = vld [vmem:[#allocation8 + $0x58] sm:$0xff]  ;;  %v6015_v27 = vld [vmem:[#allocation8 + $0x150] sm:$0xff] }
  0x56   : > { %415 = vmatpush.msra.mxu0 %v331_v56  ;;  %528 = vmatpush.msra.mxu1 %v332_v57  ;;  %v6033_v17 = vld [vmem:[#allocation8 + $0x1e0] sm:$0xff]  ;;  %v6032_v23 = vld [vmem:[#allocation8 + $0x1d8] sm:$0xff]  ;;  %v5983_v28 = vld [vmem:[#allocation8 + $0x50] sm:$0xff] }
  0x57   : > { %641 = vmatpush.msra.mxu2 %v333_v58  ;;  %754 = vmatpush.msra.mxu3 %v334_v59  ;;  %v6001_v18 = vld [vmem:[#allocation8 + $0xe0] sm:$0xff]  ;;  %v6000_v24 = vld [vmem:[#allocation8 + $0xd8] sm:$0xff]  ;;  %v6031_v29 = vld [vmem:[#allocation8 + $0x1d0] sm:$0xff] }
  0x58   : > { %416 = vmatpush.msra.mxu0 %v327_v60  ;;  %529 = vmatpush.msra.mxu1 %v328_v61  ;;  %v299_v20 = vld [vmem:[%s7620_s11 + $0x20] sm:$0xff]  ;;  %v300_v25 = vld [vmem:[%s7620_s11 + $0x28] sm:$0xff]  ;;  %v5999_v30 = vld [vmem:[#allocation8 + $0xd0] sm:$0xff] }
  0x59   : > { %642 = vmatpush.msra.mxu2 %v329_v62  ;;  %755 = vmatpush.msra.mxu3 %v330_v63  ;;  %v302_v31 = vld [vmem:[%s7620_s11 + $0x38] sm:$0xff]  ;;  %v303_v32 = vld [vmem:[%s7620_s11 + $0x40] sm:$0xff]  ;;  %v6014_v33 = vld [vmem:[#allocation8 + $0x148] sm:$0xff] }
  0x5a   : > { %417 = vmatmul.f32.vlgmr.msra.gmra.mxu0 %v295_v0  ;;  %530 = vmatmul.f32.vlgmr.msra.gmra.mxu1 %v295_v0  ;;  %v5982_v34 = vld [vmem:[#allocation8 + $0x48] sm:$0xff]  ;;  %v6013_v39 = vld [vmem:[#allocation8 + $0x140] sm:$0xff]  ;;  %v306_v43 = vld [vmem:[%s7620_s11 + $0x58] sm:$0xff] }
  0x5b   : > { %643 = vmatmul.f32.vlgmr.msra.gmra.mxu2 %v295_v0  ;;  %756 = vmatmul.f32.vlgmr.msra.gmra.mxu3 %v295_v0  ;;  %v6030_v35 = vld [vmem:[#allocation8 + $0x1c8] sm:$0xff]  ;;  %v5981_v40 = vld [vmem:[#allocation8 + $0x40] sm:$0xff]  ;;  %v310_v47 = vld [vmem:[%s7620_s11 + $0x78] sm:$0xff] }
  0x5c   : > { %6267 = vmatpush.msrb.mxu2 %v6020_v1  ;;  %6041 = vmatpush.msrb.mxu0 %v5988_v2  ;;  %v5998_v36 = vld [vmem:[#allocation8 + $0xc8] sm:$0xff]  ;;  %v6029_v41 = vld [vmem:[#allocation8 + $0x1c0] sm:$0xff]  ;;  %v391_v50 = vld [vmem:[#allocation7] sm:$0xf] }
  0x5d   : > { %6380 = vmatpush.msrb.mxu3 %v6036_v3  ;;  %6154 = vmatpush.msrb.mxu1 %v6004_v4  ;;  %v304_v37 = vld [vmem:[%s7620_s11 + $0x48] sm:$0xff]  ;;  %v305_v38 = vld [vmem:[%s7620_s11 + $0x50] sm:$0xff]  ;;  %v307_v44 = vld [vmem:[%s7620_s11 + $0x60] sm:$0xff]  ;;  %v7652_v51 = vperm.slane %v391_v50, 0  ;;  %v7654_v53 = vperm.slane %v391_v50, 1  ;;  %v7662_v57 = vperm.slane %v391_v50, 2 }
  0x5e   : > { %6268 = vmatpush.msrb.mxu2 %v6019_v5  ;;  %6042 = vmatpush.msrb.mxu0 %v5987_v6  ;;  %v5997_v42 = vld [vmem:[#allocation8 + $0xc0] sm:$0xff]  ;;  %v309_v46 = vld [vmem:[%s7620_s11 + $0x70] sm:$0xff]  ;;  %v7664_v59 = vperm.slane %v391_v50, 3  ;;  %v6012_v63 = vld [vmem:[#allocation8 + $0x138] sm:$0xff] }
  0x5f   : > { %6381 = vmatpush.msrb.mxu3 %v6035_v7  ;;  %6155 = vmatpush.msrb.mxu1 %v6003_v8  ;;  %v308_v45 = vld [vmem:[%s7620_s11 + $0x68] sm:$0xff]  ;;  %v311_v48 = vld [vmem:[%s7620_s11 + $0x80] sm:$0xff] }
  0x60   : > { %6269 = vmatpush.msrb.mxu2 %v6018_v9  ;;  %6043 = vmatpush.msrb.mxu0 %v5986_v10  ;;  %v312_v49 = vld [vmem:[%s7620_s11 + $0x88] sm:$0xff]  ;;  %v5980_v0 = vld [vmem:[#allocation8 + $0x38] sm:$0xff]  ;;  %v313_v9 = vld [vmem:[%s7620_s11 + $0x90] sm:$0xff] }
  0x61   : > { %6382 = vmatpush.msrb.mxu3 %v6034_v11  ;;  %6156 = vmatpush.msrb.mxu1 %v6002_v12  ;;  %v6028_v1 = vld [vmem:[#allocation8 + $0x1b8] sm:$0xff]  ;;  %v6026_v50 = vld [vmem:[#allocation8 + $0x1a8] sm:$0xff] }
  0x62   : > { %420 = vmatmul.f32.gmra.mxu0 %v296_v13  ;;  %533 = vmatmul.f32.gmra.mxu1 %v296_v13 }
  0x63   : > { %646 = vmatmul.f32.gmra.mxu2 %v296_v13  ;;  %759 = vmatmul.f32.gmra.mxu3 %v296_v13  ;;  %v5996_v13 = vld [vmem:[#allocation8 + $0xb8] sm:$0xff] }
  0x64   : > { %6270 = vmatpush.msrb.mxu2 %v6017_v15  ;;  %6044 = vmatpush.msrb.mxu0 %v5985_v16 }
  0x65   : > { %6383 = vmatpush.msrb.mxu3 %v6033_v17  ;;  %6157 = vmatpush.msrb.mxu1 %v6001_v18 }
  0x66   : > { %6271 = vmatpush.msrb.mxu2 %v6016_v21  ;;  %6045 = vmatpush.msrb.mxu0 %v5984_v22 }
  0x67   : > { %6384 = vmatpush.msrb.mxu3 %v6032_v23  ;;  %6158 = vmatpush.msrb.mxu1 %v6000_v24 }
  0x68   : > { %6272 = vmatpush.msrb.mxu2 %v6015_v27  ;;  %6046 = vmatpush.msrb.mxu0 %v5983_v28  ;;  %v6027_v27 = vld [vmem:[#allocation8 + $0x1b0] sm:$0xff] }
  0x69   : > { %6385 = vmatpush.msrb.mxu3 %v6031_v29  ;;  %6159 = vmatpush.msrb.mxu1 %v5999_v30  ;;  %v314_v29 = vld [vmem:[%s7620_s11 + $0x98] sm:$0xff] }
  0x6a   : > { %423 = vmatmul.f32.gmra.mxu0 %v297_v14  ;;  %536 = vmatmul.f32.gmra.mxu1 %v297_v14 }
  0x6b   : > { %649 = vmatmul.f32.gmra.mxu2 %v297_v14  ;;  %762 = vmatmul.f32.gmra.mxu3 %v297_v14 }
  0x6c   : > { %6273 = vmatpush.msrb.mxu2 %v6014_v33  ;;  %6047 = vmatpush.msrb.mxu0 %v5982_v34  ;;  %v5995_v34 = vld [vmem:[#allocation8 + $0xb0] sm:$0xff] }
  0x6d   : > { %6386 = vmatpush.msrb.mxu3 %v6030_v35  ;;  %6160 = vmatpush.msrb.mxu1 %v5998_v36 }
  0x6e   : > { %6274 = vmatpush.msrb.mxu2 %v6013_v39  ;;  %6048 = vmatpush.msrb.mxu0 %v5981_v40 }
  0x6f   : > { %6387 = vmatpush.msrb.mxu3 %v6029_v41  ;;  %6161 = vmatpush.msrb.mxu1 %v5997_v42 }
  0x70   : > { %6275 = vmatpush.msrb.mxu2 %v6012_v63  ;;  %6049 = vmatpush.msrb.mxu0 %v5980_v0 }
  0x71   : > { %6388 = vmatpush.msrb.mxu3 %v6028_v1  ;;  %6162 = vmatpush.msrb.mxu1 %v5996_v13 }
  0x72   : > { %426 = vmatmul.f32.gmra.mxu0 %v298_v19  ;;  %539 = vmatmul.f32.gmra.mxu1 %v298_v19 }
  0x73   : > { %652 = vmatmul.f32.gmra.mxu2 %v298_v19  ;;  %765 = vmatmul.f32.gmra.mxu3 %v298_v19 }
  0x74   : > { %6389 = vmatpush.msrb.mxu3 %v6027_v27  ;;  %6163 = vmatpush.msrb.mxu1 %v5995_v34 }
  0x76   : > { %6390 = vmatpush.msrb.mxu3 %v6026_v50 }
  0x7a   : > { %429 = vmatmul.f32.gmra.mxu0 %v299_v20  ;;  %542 = vmatmul.f32.gmra.mxu1 %v299_v20 }
  0x7b   : > { %655 = vmatmul.f32.gmra.mxu2 %v299_v20  ;;  %768 = vmatmul.f32.gmra.mxu3 %v299_v20 }
  0x82   : > { %432 = vmatmul.f32.gmra.mxu0 %v300_v25  ;;  %545 = vmatmul.f32.gmra.mxu1 %v300_v25 }
  0x83   : > { %658 = vmatmul.f32.gmra.mxu2 %v300_v25  ;;  %771 = vmatmul.f32.gmra.mxu3 %v300_v25  ;;  %v6011_v25 = vld [vmem:[#allocation8 + $0x130] sm:$0xff] }
  0x84   : > { %6276 = vmatpush.msrb.mxu2 %v6011_v25 }
  0x8a   : > { %435 = vmatmul.f32.gmra.mxu0 %v301_v26  ;;  %548 = vmatmul.f32.gmra.mxu1 %v301_v26 }
  0x8b   : > { %661 = vmatmul.f32.gmra.mxu2 %v301_v26  ;;  %774 = vmatmul.f32.gmra.mxu3 %v301_v26  ;;  %v5979_v26 = vld [vmem:[#allocation8 + $0x30] sm:$0xff] }
  0x8c   : > { %6050 = vmatpush.msrb.mxu0 %v5979_v26 }
  0x92   : > { %438 = vmatmul.f32.gmra.mxu0 %v302_v31  ;;  %551 = vmatmul.f32.gmra.mxu1 %v302_v31 }
  0x93   : > { %664 = vmatmul.f32.gmra.mxu2 %v302_v31  ;;  %777 = vmatmul.f32.gmra.mxu3 %v302_v31 }
  0x9a   : > { %441 = vmatmul.f32.gmra.mxu0 %v303_v32  ;;  %554 = vmatmul.f32.gmra.mxu1 %v303_v32 }
  0x9b   : > { %667 = vmatmul.f32.gmra.mxu2 %v303_v32  ;;  %780 = vmatmul.f32.gmra.mxu3 %v303_v32 }
  0xa2   : > { %444 = vmatmul.f32.gmra.mxu0 %v304_v37  ;;  %557 = vmatmul.f32.gmra.mxu1 %v304_v37 }
  0xa3   : > { %670 = vmatmul.f32.gmra.mxu2 %v304_v37  ;;  %783 = vmatmul.f32.gmra.mxu3 %v304_v37 }
  0xaa   : > { %447 = vmatmul.f32.gmra.mxu0 %v305_v38  ;;  %560 = vmatmul.f32.gmra.mxu1 %v305_v38 }
  0xab   : > { %673 = vmatmul.f32.gmra.mxu2 %v305_v38  ;;  %786 = vmatmul.f32.gmra.mxu3 %v305_v38 }
  0xb2   : > { %450 = vmatmul.f32.gmra.mxu0 %v306_v43  ;;  %563 = vmatmul.f32.gmra.mxu1 %v306_v43 }
  0xb3   : > { %676 = vmatmul.f32.gmra.mxu2 %v306_v43  ;;  %789 = vmatmul.f32.gmra.mxu3 %v306_v43 }
  0xba   : > { %453 = vmatmul.f32.gmra.mxu0 %v307_v44  ;;  %566 = vmatmul.f32.gmra.mxu1 %v307_v44 }
  0xbb   : > { %679 = vmatmul.f32.gmra.mxu2 %v307_v44  ;;  %792 = vmatmul.f32.gmra.mxu3 %v307_v44 }
  0xc2   : > { %456 = vmatmul.f32.gmra.mxu0 %v308_v45  ;;  %569 = vmatmul.f32.gmra.mxu1 %v308_v45 }
  0xc3   : > { %682 = vmatmul.f32.gmra.mxu2 %v308_v45  ;;  %795 = vmatmul.f32.gmra.mxu3 %v308_v45 }
  0xca   : > { %459 = vmatmul.f32.gmra.mxu0 %v309_v46  ;;  %572 = vmatmul.f32.gmra.mxu1 %v309_v46 }
  0xcb   : > { %685 = vmatmul.f32.gmra.mxu2 %v309_v46  ;;  %798 = vmatmul.f32.gmra.mxu3 %v309_v46 }
  0xd2   : > { %462 = vmatmul.f32.gmra.mxu0 %v310_v47  ;;  %575 = vmatmul.f32.gmra.mxu1 %v310_v47 }
  0xd3   : > { %688 = vmatmul.f32.gmra.mxu2 %v310_v47  ;;  %801 = vmatmul.f32.gmra.mxu3 %v310_v47 }
  0xd7   : > { %v418_v52 = vpop.f32.mrf.mxu0  ;;  %v531_v54 = vpop.f32.mrf.mxu1 }
  0xd8   : > { %v7657_v55 = vadd.f32 %v418_v52, %v7652_v51  ;;  %v7660_v56 = vadd.f32 %v531_v54, %v7654_v53 }
  0xda   : > { %465 = vmatmul.f32.gmra.mxu0 %v311_v48  ;;  %578 = vmatmul.f32.gmra.mxu1 %v311_v48  ;;  %v7667_v61 = vmul.f32 0.70710677, %v7657_v55  ;;  %v7670_v62 = vmul.f32 0.70710677, %v7660_v56 }
  0xdb   : > { %691 = vmatmul.f32.gmra.mxu2 %v311_v48  ;;  %804 = vmatmul.f32.gmra.mxu3 %v311_v48 }
  0xdc   : > { %v7679_v4 = vand.u32 2147483647, %v7667_v61  ;;  %v7682_v5 = vand.u32 2147483647, %v7670_v62 }
  0xde   : > { %v644_v58 = vpop.f32.mrf.mxu2  ;;  %v757_v60 = vpop.f32.mrf.mxu3  ;;  %v1237_v8 = vmul.f32 0.3275911, %v7679_v4  ;;  %v1238_v10 = vmul.f32 0.3275911, %v7682_v5 }
  0xdf   : > { %v7673_v2 = vadd.f32 %v644_v58, %v7662_v57  ;;  %v7676_v3 = vadd.f32 %v757_v60, %v7664_v59  ;;  %v315_v60 = vld [vmem:[%s7620_s11 + $0xa0] sm:$0xff] }
  0xe0   : > { %v1365_v14 = vadd.f32 1.0, %v1237_v8  ;;  %v1366_v15 = vadd.f32 1.0, %v1238_v10 }
  0xe1   : > { %v7685_v6 = vmul.f32 0.70710677, %v7673_v2  ;;  %v7688_v7 = vmul.f32 0.70710677, %v7676_v3 }
  0xe2   : > { %468 = vmatmul.f32.gmra.mxu0 %v312_v49  ;;  %581 = vmatmul.f32.gmra.mxu1 %v312_v49  ;;  %6749 = vrcp.f32 %v1365_v14  ;;  %v1502_v39 = vand.u32 2147483647, %v1365_v14  ;;  %v1504_v40 = vand.u32 2147483648, %v1365_v14  ;;  %v1517_v43 = vand.u32 2147483647, %v1366_v15 }
  0xe3   : > { %694 = vmatmul.f32.gmra.mxu2 %v312_v49  ;;  %807 = vmatmul.f32.gmra.mxu3 %v312_v49  ;;  %v7694_v11 = vand.u32 2147483647, %v7685_v6  ;;  %v7697_v12 = vand.u32 2147483647, %v7688_v7  ;;  %6751 = vrcp.f32 %v1366_v15  ;;  %vm1498_vm2 = vweird.f32 %v1365_v14 }
  0xe4   : > { %v1519_v44 = vand.u32 2147483648, %v1366_v15  ;;  %vm1513_vm4 = vweird.f32 %v1366_v15  ;;  %vm7728_vm5 = vcmp.eq.f32.partialorder %v1502_v39, 8.507059e+37  ;;  %v1505_v49 = vor.u32 1.1754944e-38, %v1504_v40 }
  0xe5   : > { %v1239_v16 = vmul.f32 0.3275911, %v7694_v11  ;;  %v1240_v17 = vmul.f32 0.3275911, %v7697_v12  ;;  %vm7741_vm7 = vcmp.eq.f32.partialorder %v1517_v43, 8.507059e+37  ;;  %v5978_v43 = vld [vmem:[#allocation8 + $0x28] sm:$0xff] }
  0xe6   : > { %v1520_v63 = vor.u32 1.1754944e-38, %v1519_v44  ;;  %v4565_v44 = vsub.f32 0.0, %v7679_v4  ;;  %6051 = vmatpush.msrb.mxu0 %v5978_v43  ;;  %v647_v58 = vpop.f32.mrf.mxu2 }
  0xe7   : > { %v7701_v18 = vadd.f32 1.0, %v1239_v16  ;;  %v7703_v19 = vadd.f32 1.0, %v1240_v17 }
  0xe8   : > { %v7706_v20 = vpop.eup %6749 }
  0xe9   : > { %6753 = vrcp.f32 %v7701_v18  ;;  %v6752_v21 = vpop.eup %6751  ;;  %v1494_v22 = vmul.f32 %v7706_v20, %v1365_v14  ;;  %vm1499_vm0 = vweird.f32 %v7706_v20  ;;  %vm1528_vm10 = vweird.f32 %v7701_v18 }
  0xea   : > { %471 = vmatmul.f32.gmra.mxu0 %v313_v9  ;;  %584 = vmatmul.f32.gmra.mxu1 %v313_v9  ;;  %6755 = vrcp.f32 %v7703_v19  ;;  %v1509_v23 = vmul.f32 %v6752_v21, %v1366_v15  ;;  %vm1514_vm1 = vweird.f32 %v6752_v21  ;;  %vm7724_vm3 = vmor %vm1498_vm2, %vm1499_vm0  ;;  %v1532_v8 = vand.u32 2147483647, %v7701_v18 }
  0xeb   : > { %697 = vmatmul.f32.gmra.mxu2 %v313_v9  ;;  %810 = vmatmul.f32.gmra.mxu3 %v313_v9  ;;  %v1495_v30 = vsub.f32 1.0, %v1494_v22  ;;  %vm7732_vm6 = vmor %vm1513_vm4, %vm1514_vm1  ;;  %v1534_v9 = vand.u32 2147483648, %v7701_v18  ;;  %v1549_v10 = vand.u32 2147483648, %v7703_v19  ;;  %vm1543_vm12 = vweird.f32 %v7703_v19 }
  0xec   : > { %v1510_v31 = vsub.f32 1.0, %v1509_v23  ;;  %v1547_v15 = vand.u32 2147483647, %v7703_v19  ;;  %vm1533_vm14 = vcmp.eq.f32.partialorder %v1532_v8, 8.507059e+37  ;;  %vm5333_vm0 = vcmp.lt.f32.partialorder %v7667_v61, 0.0 }
  0xed   : > { %v1496_v35 = vmul.f32 %v7706_v20, %v1495_v30  ;;  %v1550_v22 = vor.u32 1.1754944e-38, %v1549_v10  ;;  %vm5334_vm1 = vcmp.lt.f32.partialorder %v7670_v62, 0.0  ;;  %vm5335_vm2 = vcmp.lt.f32.partialorder %v7685_v6, 0.0 }
  0xee   : > { %v1511_v36 = vmul.f32 %v6752_v21, %v1510_v31  ;;  %vm1548_vm15 = vcmp.eq.f32.partialorder %v1547_v15, 8.507059e+37 }
  0xef   : > { %v7710_v24 = vpop.eup %6753  ;;  %v1497_v41 = vadd.f32 %v7706_v20, %v1496_v35  ;;  %v316_v35 = vld [vmem:[%s7620_s11 + $0xa8] sm:$0xff] }
  0xf0   : > { %v7712_v28 = vpop.eup %6755  ;;  %v1524_v32 = vmul.f32 %v7710_v24, %v7701_v18  ;;  %v1512_v42 = vadd.f32 %v6752_v21, %v1511_v36  ;;  %vm1529_vm8 = vweird.f32 %v7710_v24 }
  0xf1   : > { %v1539_v33 = vmul.f32 %v7712_v28, %v7703_v19  ;;  %v1501_v52 = vsel %vm7724_vm3, %v7706_v20, %v1497_v41  ;;  %vm1544_vm9 = vweird.f32 %v7712_v28  ;;  %vm1530_vm11 = vmor %vm1528_vm10, %vm1529_vm8  ;;  %vm5336_vm3 = vcmp.lt.f32.partialorder %v7688_v7, 0.0 }
  0xf2   : > { %474 = vmatmul.f32.gmra.mxu0 %v314_v29  ;;  %587 = vmatmul.f32.gmra.mxu1 %v314_v29  ;;  %v1525_v37 = vsub.f32 1.0, %v1524_v32  ;;  %v1516_v54 = vsel %vm7732_vm6, %v6752_v21, %v1512_v42  ;;  %v7756_v13 = vsel %vm7728_vm5, %v1505_v49, %v1501_v52  ;;  %vm1545_vm13 = vmor %vm1543_vm12, %vm1544_vm9  ;;  %v1535_v21 = vor.u32 1.1754944e-38, %v1534_v9  ;;  %v534_v32 = vpop.f32.mrf.mxu1  ;;  %v6010_v42 = vld [vmem:[#allocation8 + $0x128] sm:$0xff] }
  0xf3   : > { %700 = vmatmul.f32.gmra.mxu2 %v314_v29  ;;  %813 = vmatmul.f32.gmra.mxu3 %v314_v29  ;;  %v1540_v38 = vsub.f32 1.0, %v1539_v33  ;;  %v7760_v14 = vsel %vm7741_vm7, %v1520_v63, %v1516_v54  ;;  %v3413_v18 = vmul.f32 1.0614054, %v7756_v13  ;;  %v7783_v36 = vadd.f32 %v534_v32, %v7654_v53 }
  0xf4   : > { %v1526_v45 = vmul.f32 %v7710_v24, %v1525_v37  ;;  %v3414_v20 = vmul.f32 1.0614054, %v7760_v14  ;;  %6277 = vmatpush.msrb.mxu2 %v6010_v42 }
  0xf5   : > { %v1541_v46 = vmul.f32 %v7712_v28, %v1540_v38  ;;  %v3541_v26 = vadd.f32 -1.4531521, %v3413_v18  ;;  %v4568_v18 = vsub.f32 0.0, %v7697_v12 }
  0xf6   : > { %v1527_v0 = vadd.f32 %v7710_v24, %v1526_v45  ;;  %v3542_v19 = vadd.f32 -1.4531521, %v3414_v20  ;;  %v4566_v45 = vsub.f32 0.0, %v7682_v5 }
  0xf7   : > { %v1542_v1 = vadd.f32 %v7712_v28, %v1541_v46  ;;  %v3669_v29 = vmul.f32 %v3541_v26, %v7756_v13  ;;  %v7793_v46 = vmul.f32 0.70710677, %v7783_v36 }
  0xf8   : > { %v1531_v16 = vsel %vm1530_vm11, %v7710_v24, %v1527_v0  ;;  %v3670_v30 = vmul.f32 %v3542_v19, %v7760_v14  ;;  %v4694_v63 = vmul.f32 %v4566_v45, %v7682_v5  ;;  %v4567_v0 = vsub.f32 0.0, %v7694_v11 }
  0xf9   : > { %v1546_v17 = vsel %vm1545_vm13, %v7712_v28, %v1542_v1  ;;  %v7770_v23 = vsel %vm1533_vm14, %v1535_v21, %v1531_v16  ;;  %v421_v28 = vpop.f32.mrf.mxu0  ;;  %v3797_v37 = vadd.f32 1.4214138, %v3669_v29  ;;  %v1114_v1 = vand.u32 2147483647, %v7793_v46  ;;  %v5994_v21 = vld [vmem:[#allocation8 + $0xa8] sm:$0xff] }
  0xfa   : > { %477 = vmatmul.f32.gmra.mxu0 %v315_v60  ;;  %590 = vmatmul.f32.gmra.mxu1 %v315_v60  ;;  %v7772_v25 = vsel %vm1548_vm15, %v1550_v22, %v1546_v17  ;;  %v3415_v27 = vmul.f32 1.0614054, %v7770_v23  ;;  %v7779_v31 = vadd.f32 %v421_v28, %v7652_v51  ;;  %v3798_v38 = vadd.f32 1.4214138, %v3670_v30 }
  0xfb   : > { %703 = vmatmul.f32.gmra.mxu2 %v315_v60  ;;  %816 = vmatmul.f32.gmra.mxu3 %v315_v60  ;;  %v3416_v24 = vmul.f32 1.0614054, %v7772_v25  ;;  %v3925_v47 = vmul.f32 %v3797_v37, %v7756_v13  ;;  %v4693_v60 = vmul.f32 %v4565_v44, %v7679_v4  ;;  %v7805_v17 = vadd.f32 %v647_v58, %v7662_v57 }
  0xfc   : > { %v3543_v33 = vadd.f32 -1.4531521, %v3415_v27  ;;  %v7786_v39 = vmul.f32 0.70710677, %v7779_v31  ;;  %v3926_v48 = vmul.f32 %v3798_v38, %v7760_v14  ;;  %v4823_v4 = vmul.f32 1.442695, %v4694_v63  ;;  %6164 = vmatpush.msrb.mxu1 %v5994_v21 }
  0xfd   : > { %v3544_v34 = vadd.f32 -1.4531521, %v3416_v24  ;;  %v4053_v8 = vadd.f32 -0.28449672, %v3925_v47  ;;  %v4821_v20 = vmul.f32 1.442695, %v4693_v60  ;;  %v4695_v5 = vmul.f32 %v4567_v0, %v7694_v11  ;;  %v537_v0 = vpop.f32.mrf.mxu1 }
  0xfe   : > { %v3671_v40 = vmul.f32 %v3543_v33, %v7770_v23  ;;  %v1113_v49 = vand.u32 2147483647, %v7786_v39  ;;  %v4054_v9 = vadd.f32 -0.28449672, %v3926_v48  ;;  %v1242_v27 = vmul.f32 0.3275911, %v1114_v1 }
  0xff   : > { %v3672_v41 = vmul.f32 %v3544_v34, %v7772_v25  ;;  %v4181_v22 = vmul.f32 %v4053_v8, %v7756_v13  ;;  %v7814_v29 = vmul.f32 0.70710677, %v7805_v17  ;;  %v4696_v30 = vmul.f32 %v4568_v18, %v7697_v12  ;;  %v317_v12 = vld [vmem:[%s7620_s11 + $0xb0] sm:$0xff] }
 0x100   : > { %v3799_v52 = vadd.f32 1.4214138, %v3671_v40  ;;  %v1241_v10 = vmul.f32 0.3275911, %v1113_v49  ;;  %v4182_v26 = vmul.f32 %v4054_v9, %v7760_v14  ;;  %6757 = vpow2.f32 %v4821_v20 }
 0x101   : > { %v3800_v54 = vadd.f32 1.4214138, %v3672_v41  ;;  %15195 = vst [vmem:[#allocation15_spill] sm:$0xff] %v7814_v29  ;;  %v4825_v32 = vmul.f32 1.442695, %v4695_v5  ;;  %6759 = vpow2.f32 %v4823_v4  ;;  %v7817_v34 = vadd.f32 1.0, %v1242_v27  ;;  %v424_v48 = vpop.f32.mrf.mxu0 }
 0x102   : > { %480 = vmatmul.f32.gmra.mxu0 %v316_v35  ;;  %593 = vmatmul.f32.gmra.mxu1 %v316_v35  ;;  %v3927_v15 = vmul.f32 %v3799_v52, %v7770_v23  ;;  %v7811_v19 = vadd.f32 1.0, %v1241_v10  ;;  %v4309_v11 = vadd.f32 0.2548296, %v4181_v22  ;;  %v4310_v33 = vadd.f32 0.2548296, %v4182_v26 }
 0x103   : > { %706 = vmatmul.f32.gmra.mxu2 %v316_v35  ;;  %819 = vmatmul.f32.gmra.mxu3 %v316_v35  ;;  %v3928_v16 = vmul.f32 %v3800_v54, %v7772_v25  ;;  %v760_v35 = vpop.f32.mrf.mxu3  ;;  %v7823_v40 = vand.u32 2147483647, %v7814_v29  ;;  %v4827_v41 = vmul.f32 1.442695, %v4696_v30  ;;  %v4569_v42 = vsub.f32 0.0, %v1113_v49 }
 0x104   : > { %v4055_v24 = vadd.f32 -0.28449672, %v3927_v15  ;;  %6761 = vrcp.f32 %v7811_v19  ;;  %v7827_v43 = vadd.f32 %v760_v35, %v7664_v59  ;;  %v4437_v44 = vmul.f32 %v4309_v11, %v7756_v13 }
 0x105   : > { %v4056_v28 = vadd.f32 -0.28449672, %v3928_v16  ;;  %v4438_v45 = vmul.f32 %v4310_v33, %v7760_v14  ;;  %6763 = vpow2.f32 %v4825_v32  ;;  %v4570_v47 = vsub.f32 0.0, %v1114_v1  ;;  %v540_v7 = vpop.f32.mrf.mxu1 }
 0x106   : > { %v4183_v37 = vmul.f32 %v4055_v24, %v7770_v23  ;;  %v6758_v50 = vpop.eup %6757  ;;  %6765 = vrcp.f32 %v7817_v34  ;;  %v1243_v58 = vmul.f32 0.3275911, %v7823_v40  ;;  %v7834_v63 = vmul.f32 0.5, %v7657_v55 }
 0x107   : > { %v4184_v38 = vmul.f32 %v4056_v28, %v7772_v25  ;;  %v6760_v60 = vpop.eup %6759  ;;  %6767 = vpow2.f32 %v4827_v41  ;;  %v4697_v13 = vmul.f32 %v4569_v42, %v1113_v49  ;;  %v7839_v8 = vmul.f32 0.5, %v7660_v56  ;;  %v650_v42 = vpop.f32.mrf.mxu2 }
 0x108   : > { %v4311_v52 = vadd.f32 0.2548296, %v4183_v37  ;;  %v7842_v9 = vmul.f32 0.5, %v7673_v2  ;;  %v7845_v10 = vmul.f32 0.5, %v7676_v3  ;;  %v7848_v15 = vadd.f32 %v424_v48, %v7652_v51 }
 0x109   : > { %v4312_v54 = vadd.f32 0.2548296, %v4184_v38  ;;  %v7850_v16 = vmul.f32 %v6758_v50, %v4437_v44  ;;  %v7852_v55 = vmul.f32 %v6760_v60, %v4438_v45  ;;  %v4698_v49 = vmul.f32 %v4570_v47, %v1114_v1 }
 0x10a   : > { %483 = vmatmul.f32.gmra.mxu0 %v317_v12  ;;  %596 = vmatmul.f32.gmra.mxu1 %v317_v12  ;;  %v7836_v14 = vpop.eup %6761  ;;  %v7855_v18 = vmul.f32 0.70710677, %v7827_v43  ;;  %v4439_v56 = vmul.f32 %v4311_v52, %v7770_v23  ;;  %v7859_v2 = vadd.f32 1.0, %v1243_v58  ;;  %v7862_v3 = vadd.f32 %v537_v0, %v7654_v53  ;;  %v427_v58 = vpop.f32.mrf.mxu0 }
 0x10b   : > { %709 = vmatmul.f32.gmra.mxu2 %v317_v12  ;;  %822 = vmatmul.f32.gmra.mxu3 %v317_v12  ;;  %v4440_v20 = vmul.f32 %v4312_v54, %v7772_v25  ;;  %v6764_v4 = vpop.eup %6763  ;;  %v7865_v5 = vmul.f32 0.5, %v7779_v31  ;;  %v1554_v21 = vmul.f32 %v7836_v14, %v7811_v19  ;;  %v1564_v1 = vand.u32 2147483648, %v7811_v19  ;;  %v763_v48 = vpop.f32.mrf.mxu3 }
 0x10c   : > { %15196 = vst [vmem:[#allocation16_spill] sm:$0xff] %v7855_v18  ;;  %v4829_v22 = vmul.f32 1.442695, %v4697_v13  ;;  %v7870_v26 = vpop.eup %6765  ;;  %v7875_v23 = vmul.f32 0.5, %v7783_v36  ;;  %v1579_v25 = vand.u32 2147483648, %v7817_v34  ;;  %v4571_v31 = vsub.f32 0.0, %v7823_v40 }
 0x10d   : > { %15197 = vst [vmem:[#allocation17_spill] sm:$0xff] %v7865_v5  ;;  %v7880_v27 = vmul.f32 0.70710677, %v7848_v15  ;;  %v6768_v24 = vpop.eup %6767  ;;  %v5205_v28 = vsub.f32 1.0, %v7850_v16  ;;  %v5206_v30 = vsub.f32 1.0, %v7852_v55  ;;  %v7887_v33 = vmul.f32 %v6764_v4, %v4439_v56 }
 0x10e   : > { %15198 = vst [vmem:[#allocation18_spill] sm:$0xff] %v7875_v23  ;;  %v4831_v32 = vmul.f32 1.442695, %v4698_v49  ;;  %v7885_v11 = vand.u32 2147483647, %v7855_v18  ;;  %v7889_v36 = vmul.f32 %v6768_v24, %v4440_v20  ;;  %6769 = vrcp.f32 %v7859_v2 }
 0x10f   : > { %15199 = vst [vmem:[#allocation19_spill] sm:$0xff] %v7880_v27  ;;  %v7893_v35 = vmul.f32 0.70710677, %v7862_v3  ;;  %v1555_v37 = vsub.f32 1.0, %v1554_v21  ;;  %v7895_v38 = vor.u32 1.1754944e-38, %v1564_v1  ;;  %6771 = vpow2.f32 %v4829_v22  ;;  %v318_v22 = vld [vmem:[%s7620_s11 + $0xb8] sm:$0xff] }
 0x110   : > { %v1569_v41 = vmul.f32 %v7870_v26, %v7817_v34  ;;  %v7899_v12 = vor.u32 1.1754944e-38, %v1579_v25  ;;  %v7902_v44 = vmul.f32 0.5, %v7805_v17  ;;  %v4699_v45 = vmul.f32 %v4571_v31, %v7823_v40 }
 0x111   : > { %15200 = vst [vmem:[#allocation20_spill] sm:$0xff] %v7893_v35  ;;  %v1117_v47 = vand.u32 2147483647, %v7880_v27  ;;  %v5461_v50 = vsub.f32 0.0, %v5205_v28  ;;  %v5462_v52 = vsub.f32 0.0, %v5206_v30  ;;  %6773 = vpow2.f32 %v4831_v32 }
 0x112   : > { %15201 = vst [vmem:[#allocation21_spill] sm:$0xff] %v7902_v44  ;;  %v1244_v54 = vmul.f32 0.3275911, %v7885_v11  ;;  %v5207_v60 = vsub.f32 1.0, %v7887_v33  ;;  %v5208_v17 = vsub.f32 1.0, %v7889_v36  ;;  %v7915_v13 = vadd.f32 %v650_v42, %v7662_v57  ;;  %486 = vmatmul.f32.gmra.mxu0 %v318_v22  ;;  %599 = vmatmul.f32.gmra.mxu1 %v318_v22 }
 0x113   : > { %v7912_v40 = vand.u32 2147483647, %v7893_v35  ;;  %v7918_v0 = vmul.f32 %v7836_v14, %v1555_v37  ;;  %v1570_v16 = vsub.f32 1.0, %v1569_v41  ;;  %v7921_v55 = vmul.f32 0.5, %v7827_v43  ;;  %712 = vmatmul.f32.gmra.mxu2 %v318_v22  ;;  %825 = vmatmul.f32.gmra.mxu3 %v318_v22 }
 0x114   : > { %v7924_v49 = vadd.f32 %v763_v48, %v7664_v59  ;;  %v7926_v56 = vpop.eup %6769  ;;  %v1594_v20 = vand.u32 2147483648, %v7859_v2  ;;  %v4833_v4 = vmul.f32 1.442695, %v4699_v45  ;;  %v1245_v21 = vmul.f32 0.3275911, %v1117_v47  ;;  %v6009_v45 = vld [vmem:[#allocation8 + $0x120] sm:$0xff] }
 0x115   : > { %15202 = vst [vmem:[#allocation22_spill] sm:$0xff] %v7921_v55  ;;  %v7930_v1 = vadd.f32 %v427_v58, %v7652_v51  ;;  %v7933_v25 = vpop.eup %6771  ;;  %v5589_v31 = vsel %vm5333_vm0, %v5461_v50, %v5205_v28  ;;  %v5590_v43 = vsel %vm5334_vm1, %v5462_v52, %v5206_v30  ;;  %v7939_v24 = vadd.f32 1.0, %v1244_v54  ;;  %v5977_v48 = vld [vmem:[#allocation8 + $0x20] sm:$0xff]  ;;  %6278 = vmatpush.msrb.mxu2 %v6009_v45 }
 0x116   : > { %v4572_v32 = vsub.f32 0.0, %v7885_v11  ;;  %v5463_v33 = vsub.f32 0.0, %v5207_v60  ;;  %v5464_v36 = vsub.f32 0.0, %v5208_v17  ;;  %v1246_v37 = vmul.f32 0.3275911, %v7912_v40  ;;  %v6025_v50 = vld [vmem:[#allocation8 + $0x1a0] sm:$0xff]  ;;  %6052 = vmatpush.msrb.mxu0 %v5977_v48 }
 0x117   : > { %v7944_v41 = vmul.f32 0.70710677, %v7915_v13  ;;  %v7946_v61 = vpop.eup %6773  ;;  %v7949_v62 = vmul.f32 %v7870_v26, %v1570_v16  ;;  %v1584_v28 = vmul.f32 %v7926_v56, %v7859_v2  ;;  %v4573_v30 = vsub.f32 0.0, %v1117_v47  ;;  %6391 = vmatpush.msrb.mxu3 %v6025_v50 }
 0x118   : > { %15204 = vst [vmem:[#allocation24_spill] sm:$0xff] %v7946_v61  ;;  %v7954_v42 = vmul.f32 0.70710677, %v7924_v49  ;;  %v5717_v52 = vadd.f32 1.0, %v5589_v31  ;;  %v7957_v54 = vmul.f32 0.5, %v7848_v15  ;;  %v7959_v58 = vadd.f32 1.0, %v1245_v21 }
 0x119   : > { %15203 = vst [vmem:[#allocation23_spill] sm:$0xff] %v7944_v41  ;;  %v7962_v22 = vmul.f32 0.70710677, %v7930_v1  ;;  %v5718_v16 = vadd.f32 1.0, %v5590_v43  ;;  %v7964_v35 = vor.u32 1.1754944e-38, %v1594_v20  ;;  %6775 = vrcp.f32 %v7939_v24 }
 0x11a   : > { %15205 = vst [vmem:[#allocation25_spill] sm:$0xff] %v7954_v42  ;;  %v4700_v27 = vmul.f32 %v4572_v32, %v7885_v11  ;;  %v5591_v31 = vsel %vm5335_vm2, %v5463_v33, %v5207_v60  ;;  %v5592_v15 = vsel %vm5336_vm3, %v5464_v36, %v5208_v17  ;;  %v7972_v21 = vadd.f32 1.0, %v1246_v37 }
 0x11b   : > { %15206 = vst [vmem:[#allocation26_spill] sm:$0xff] %v7957_v54  ;;  %v1119_v54 = vand.u32 2147483647, %v7944_v41  ;;  %v1585_v45 = vsub.f32 1.0, %v1584_v28  ;;  %6777 = vpow2.f32 %v4833_v4  ;;  %v4701_v43 = vmul.f32 %v4573_v30, %v1117_v47  ;;  %v653_v47 = vpop.f32.mrf.mxu2  ;;  %v5993_v41 = vld [vmem:[#allocation8 + $0xa0] sm:$0xff] }
 0x11c   : > { %15207 = vst [vmem:[#allocation27_spill] sm:$0xff] %v7959_v58  ;;  %v1120_v20 = vand.u32 2147483647, %v7954_v42  ;;  %v7977_v48 = vmul.f32 %v5717_v52, %v7834_v63  ;;  %v1609_v11 = vand.u32 2147483648, %v7939_v24  ;;  %6779 = vrcp.f32 %v7959_v58  ;;  %6165 = vmatpush.msrb.mxu1 %v5993_v41 }
 0x11d   : > { %15208 = vst [vmem:[#allocation28_spill] sm:$0xff] %v7962_v22  ;;  %v7982_v6 = vand.u32 2147483647, %v7962_v22  ;;  %v7985_v60 = vmul.f32 %v5718_v16, %v7839_v8  ;;  %v5719_v17 = vadd.f32 1.0, %v5591_v31  ;;  %v5720_v32 = vadd.f32 1.0, %v5592_v15 }
 0x11e   : > { %15209 = vst [vmem:[#allocation29_spill] sm:$0xff] %v7972_v21  ;;  %v4835_v4 = vmul.f32 1.442695, %v4700_v27  ;;  %v1624_v33 = vand.u32 2147483648, %v7959_v58  ;;  %v7989_v63 = vmul.f32 0.5, %v7862_v3  ;;  %6781 = vrcp.f32 %v7972_v21  ;;  %v766_v27 = vpop.f32.mrf.mxu3 }
 0x11f   : > { %v1247_v36 = vmul.f32 0.3275911, %v1119_v54  ;;  %v7992_v37 = vpop.eup %6775  ;;  %v7995_v28 = vmul.f32 %v7926_v56, %v1585_v45  ;;  %v4837_v30 = vmul.f32 1.442695, %v4701_v43  ;;  %v1248_v8 = vmul.f32 0.3275911, %v1120_v20 }
 0x120   : > { %15210 = vst [vmem:[#allocation30_spill] sm:$0xff] %v7989_v63  ;;  %v7998_v50 = vadd.f32 %v540_v7, %v7654_v53  ;;  %v8000_v52 = vor.u32 1.1754944e-38, %v1609_v11  ;;  %v4574_v16 = vsub.f32 0.0, %v7912_v40  ;;  %v1249_v3 = vmul.f32 0.3275911, %v7982_v6 }
 0x121   : > { %v8005_v31 = vadd.f32 %v653_v47, %v7662_v57  ;;  %v8007_v15 = vpop.eup %6777  ;;  %v8010_v45 = vmul.f32 %v5719_v17, %v7842_v9  ;;  %v8013_v43 = vmul.f32 %v5720_v32, %v7845_v10  ;;  %6783 = vpow2.f32 %v4835_v4 }
 0x122   : > { %15211 = vst [vmem:[#allocation31_spill] sm:$0xff] %v8007_v15  ;;  %v4575_v7 = vsub.f32 0.0, %v1119_v54  ;;  %v8015_v22 = vpop.eup %6779  ;;  %v1599_v11 = vmul.f32 %v7992_v37, %v7939_v24  ;;  %v8019_v63 = vor.u32 1.1754944e-38, %v1624_v33  ;;  %v8021_v42 = vadd.f32 1.0, %v1247_v36 }
 0x123   : > { %15212 = vst [vmem:[#allocation32_spill] sm:$0xff] %v8015_v22  ;;  %v8024_v47 = vadd.f32 %v766_v27, %v7664_v59  ;;  %6785 = vpow2.f32 %v4837_v30  ;;  %v8026_v9 = vadd.f32 1.0, %v1248_v8  ;;  %v4576_v10 = vsub.f32 0.0, %v1120_v20  ;;  %v656_v5 = vpop.f32.mrf.mxu2 }
 0x124   : > { %15213 = vst [vmem:[#allocation33_spill] sm:$0xff] %v8019_v63  ;;  %v8029_v17 = vmul.f32 0.70710677, %v7998_v50  ;;  %v8031_v32 = vpop.eup %6781  ;;  %v4702_v4 = vmul.f32 %v4574_v16, %v7912_v40  ;;  %v8035_v33 = vmul.f32 0.5, %v7915_v13  ;;  %v8037_v36 = vadd.f32 1.0, %v1249_v3  ;;  %v430_v3 = vpop.f32.mrf.mxu0 }
 0x125   : > { %15214 = vst [vmem:[#allocation34_spill] sm:$0xff] %v8021_v42  ;;  %v8040_v27 = vmul.f32 0.70710677, %v8005_v31  ;;  %v1614_v30 = vmul.f32 %v8015_v22, %v7959_v58  ;;  %v4703_v8 = vmul.f32 %v4575_v7, %v1119_v54  ;;  %v8045_v63 = vmul.f32 0.5, %v7924_v49 }
 0x126   : > { %15215 = vst [vmem:[#allocation35_spill] sm:$0xff] %v8026_v9  ;;  %v8048_v41 = vmul.f32 0.5, %v7930_v1  ;;  %v1600_v55 = vsub.f32 1.0, %v1599_v11  ;;  %v1639_v40 = vand.u32 2147483648, %v7972_v21  ;;  %6787 = vrcp.f32 %v8021_v42 }
 0x127   : > { %15216 = vst [vmem:[#allocation36_spill] sm:$0xff] %v8029_v17  ;;  %v8053_v13 = vmul.f32 0.70710677, %v8024_v47  ;;  %v8055_v16 = vpop.eup %6783  ;;  %v1629_v54 = vmul.f32 %v8031_v32, %v7972_v21  ;;  %6789 = vrcp.f32 %v8026_v9  ;;  %v4704_v49 = vmul.f32 %v4576_v10, %v1120_v20  ;;  %v543_v20 = vpop.f32.mrf.mxu1  ;;  %v319_v10 = vld [vmem:[%s7620_s11 + $0xc0] sm:$0xff] }
 0x128   : > { %15217 = vst [vmem:[#allocation37_spill] sm:$0xff] %v8031_v32  ;;  %v1122_v1 = vand.u32 2147483647, %v8029_v17  ;;  %v4839_v7 = vmul.f32 1.442695, %v4702_v4  ;;  %6791 = vrcp.f32 %v8037_v36  ;;  %v4577_v11 = vsub.f32 0.0, %v7982_v6  ;;  %489 = vmatmul.f32.gmra.mxu0 %v319_v10  ;;  %602 = vmatmul.f32.gmra.mxu1 %v319_v10 }
 0x129   : > { %15218 = vst [vmem:[#allocation38_spill] sm:$0xff] %v8035_v33  ;;  %v1615_v33 = vsub.f32 1.0, %v1614_v30  ;;  %v1654_v44 = vand.u32 2147483648, %v8021_v42  ;;  %v4841_v23 = vmul.f32 1.442695, %v4703_v8  ;;  %v1669_v21 = vand.u32 2147483648, %v8026_v9  ;;  %715 = vmatmul.f32.gmra.mxu2 %v319_v10  ;;  %828 = vmatmul.f32.gmra.mxu3 %v319_v10 }
 0x12a   : > { %15219 = vst [vmem:[#allocation39_spill] sm:$0xff] %v8037_v36  ;;  %v8072_v17 = vmul.f32 %v7992_v37, %v1600_v55  ;;  %v8074_v4 = vor.u32 1.1754944e-38, %v1639_v40  ;;  %v1630_v30 = vsub.f32 1.0, %v1629_v54  ;;  %v1684_v8 = vand.u32 2147483648, %v8037_v36 }
 0x12b   : > { %15220 = vst [vmem:[#allocation40_spill] sm:$0xff] %v8040_v27  ;;  %v1250_v15 = vmul.f32 0.3275911, %v1122_v1  ;;  %6793 = vpow2.f32 %v4839_v7  ;;  %v4705_v40 = vmul.f32 %v4577_v11, %v7982_v6  ;;  %v8093_v54 = vmul.f32 %v8015_v22, %v1615_v33  ;;  %v320_v22 = vld [vmem:[%s7620_s11 + $0xc8] sm:$0xff] }
 0x12c   : > { %15221 = vst [vmem:[#allocation41_spill] sm:$0xff] %v8045_v63  ;;  %v8066_v63 = vpop.eup %6785  ;;  %6795 = vpow2.f32 %v4841_v23  ;;  %v8097_v18 = vor.u32 1.1754944e-38, %v1669_v21  ;;  %v4578_v7 = vsub.f32 0.0, %v1122_v1  ;;  %v8109_v58 = vmul.f32 %v8031_v32, %v1630_v30 }
 0x12d   : > { %15222 = vst [vmem:[#allocation42_spill] sm:$0xff] %v8048_v41  ;;  %v8064_v41 = vand.u32 2147483647, %v8040_v27  ;;  %v8080_v27 = vadd.f32 %v430_v3, %v7652_v51  ;;  %v8083_v55 = vpop.eup %6787  ;;  %v8088_v3 = vadd.f32 %v543_v20, %v7654_v53  ;;  %v8106_v20 = vadd.f32 %v656_v5, %v7662_v57 }
 0x12e   : > { %15223 = vst [vmem:[#allocation43_spill] sm:$0xff] %v8053_v13  ;;  %v8113_v23 = vadd.f32 1.0, %v1250_v15  ;;  %v1644_v21 = vmul.f32 %v8083_v55, %v8021_v42  ;;  %v4845_v33 = vmul.f32 1.442695, %v4705_v40  ;;  %v4706_v40 = vmul.f32 %v4578_v7, %v1122_v1 }
 0x12f   : > { %15224 = vst [vmem:[#allocation44_spill] sm:$0xff] %v8055_v16  ;;  %v8077_v16 = vand.u32 2147483647, %v8053_v13  ;;  %v1251_v13 = vmul.f32 0.3275911, %v8064_v41  ;;  %v4579_v15 = vsub.f32 0.0, %v8064_v41  ;;  %vm1558_vm4 = vweird.f32 %v7811_v19 }
 0x130   : > { %15225 = vst [vmem:[#allocation45_spill] sm:$0xff] %v8066_v63  ;;  %v4843_v63 = vmul.f32 1.442695, %v4704_v49  ;;  %v8095_v49 = vor.u32 1.1754944e-38, %v1654_v44  ;;  %v8103_v11 = vmul.f32 0.70710677, %v8080_v27  ;;  %492 = vmatmul.f32.gmra.mxu0 %v320_v22  ;;  %605 = vmatmul.f32.gmra.mxu1 %v320_v22  ;;  %vm1573_vm5 = vweird.f32 %v7817_v34 }
 0x131   : > { %15226 = vst [vmem:[#allocation46_spill] sm:$0xff] %v8074_v4  ;;  %v8090_v4 = vpop.eup %6789  ;;  %v1252_v6 = vmul.f32 0.3275911, %v8077_v16  ;;  %v8111_v44 = vor.u32 1.1754944e-38, %v1684_v8  ;;  %v769_v8 = vpop.f32.mrf.mxu3  ;;  %v4580_v1 = vsub.f32 0.0, %v8077_v16  ;;  %v1645_v7 = vsub.f32 1.0, %v1644_v21  ;;  %718 = vmatmul.f32.gmra.mxu2 %v320_v22  ;;  %831 = vmatmul.f32.gmra.mxu3 %v320_v22 }
 0x132   : > { %15227 = vst [vmem:[#allocation47_spill] sm:$0xff] %v8083_v55  ;;  %v8099_v10 = vpop.eup %6791  ;;  %6797 = vpow2.f32 %v4843_v63  ;;  %v1659_v5 = vmul.f32 %v8090_v4, %v8026_v9  ;;  %v8127_v63 = vmul.f32 0.5, %v7998_v50  ;;  %v8135_v32 = vand.u32 2147483647, %v8103_v11 }
 0x133   : > { %15228 = vst [vmem:[#allocation48_spill] sm:$0xff] %v8090_v4  ;;  %v1674_v30 = vmul.f32 %v8099_v10, %v8037_v36  ;;  %6799 = vrcp.f32 %v8113_v23  ;;  %v8144_v50 = vmul.f32 0.5, %v8005_v31  ;;  %v1699_v31 = vand.u32 2147483648, %v8113_v23 }
 0x134   : > { %15229 = vst [vmem:[#allocation49_spill] sm:$0xff] %v8093_v54  ;;  %v1660_v36 = vsub.f32 1.0, %v1659_v5  ;;  %v1253_v21 = vmul.f32 0.3275911, %v8135_v32  ;;  %v8223_v22 = vmul.f32 0.5, %v8088_v3  ;;  %vm1588_vm6 = vweird.f32 %v7859_v2 }
 0x135   : > { %15230 = vst [vmem:[#allocation50_spill] sm:$0xff] %v8095_v49  ;;  %v8120_v49 = vmul.f32 0.70710677, %v8088_v3  ;;  %v1675_v42 = vsub.f32 1.0, %v1674_v30  ;;  %vm1559_vm7 = vweird.f32 %v7836_v14  ;;  %vm1574_vm10 = vweird.f32 %v7870_v26 }
 0x136   : > { %15231 = vst [vmem:[#allocation51_spill] sm:$0xff] %v8097_v18  ;;  %v8117_v18 = vadd.f32 1.0, %v1251_v13  ;;  %v8132_v13 = vadd.f32 1.0, %v1252_v6  ;;  %vm9466_vm8 = vmor %vm1558_vm4, %vm1559_vm7  ;;  %vm1603_vm11 = vweird.f32 %v7939_v24  ;;  %vm1589_vm14 = vweird.f32 %v7926_v56 }
 0x137   : > { %15232 = vst [vmem:[#allocation52_spill] sm:$0xff] %v8099_v10  ;;  %v1126_v6 = vand.u32 2147483647, %v8120_v49  ;;  %vm1575_vm12 = vmor %vm1573_vm5, %vm1574_vm10  ;;  %vm1604_vm1 = vweird.f32 %v7992_v37  ;;  %vm5337_vm4 = vcmp.lt.f32.partialorder %v7786_v39, 0.0  ;;  %vm5338_vm5 = vcmp.lt.f32.partialorder %v7793_v46, 0.0  ;;  %v15581_v39 = vld [vmem:[#allocation31_spill] sm:$0xff] }
 0x138   : > { %15233 = vst [vmem:[#allocation53_spill] sm:$0xff] %v8103_v11  ;;  %6801 = vrcp.f32 %v8117_v18  ;;  %v8153_v11 = vadd.f32 %v769_v8, %v7664_v59  ;;  %v1714_v8 = vand.u32 2147483648, %v8117_v18  ;;  %vm9514_vm15 = vmor %vm1588_vm6, %vm1589_vm14 }
 0x139   : > { %15234 = vst [vmem:[#allocation54_spill] sm:$0xff] %v8109_v58  ;;  %v8138_v58 = vmul.f32 0.70710677, %v8106_v20  ;;  %6803 = vrcp.f32 %v8132_v13  ;;  %v1254_v30 = vmul.f32 0.3275911, %v1126_v6  ;;  %vm1605_vm2 = vmor %vm1603_vm11, %vm1604_vm1 }
 0x13a   : > { %15235 = vst [vmem:[#allocation55_spill] sm:$0xff] %v8111_v44  ;;  %v8130_v44 = vpop.eup %6793  ;;  %6805 = vpow2.f32 %v4845_v33  ;;  %v8181_v33 = vmul.f32 %v8090_v4, %v1660_v36  ;;  %v8195_v54 = vor.u32 1.1754944e-38, %v1714_v8  ;;  %v4582_v4 = vsub.f32 0.0, %v1126_v6 }
 0x13b   : > { %15236 = vst [vmem:[#allocation56_spill] sm:$0xff] %v8113_v23  ;;  %v8140_v9 = vpop.eup %6795 }
 0x13c   : > { %15237 = vst [vmem:[#allocation57_spill] sm:$0xff] %v8117_v18 }
 0x13d   : > { %15238 = vst [vmem:[#allocation58_spill] sm:$0xff] %v8120_v49  ;;  %v8162_v49 = vand.u32 2147483647, %v8138_v58 }
 0x13e   : > { %15239 = vst [vmem:[#allocation59_spill] sm:$0xff] %v8127_v63  ;;  %v8147_v63 = vmul.f32 0.5, %v8024_v47  ;;  %v4707_v47 = vmul.f32 %v4579_v15, %v8064_v41  ;;  %v8170_v41 = vmul.f32 %v8083_v55, %v1645_v7  ;;  %v8173_v15 = vmul.f32 0.70710677, %v8153_v11 }
 0x13f   : > { %15240 = vst [vmem:[#allocation60_spill] sm:$0xff] %v8130_v44  ;;  %v433_v44 = vpop.f32.mrf.mxu0  ;;  %v8190_v55 = vadd.f32 1.0, %v1253_v21 }
 0x140   : > { %15241 = vst [vmem:[#allocation61_spill] sm:$0xff] %v8132_v13  ;;  %v8167_v5 = vadd.f32 %v433_v44, %v7652_v51  ;;  %v8186_v44 = vor.u32 1.1754944e-38, %v1699_v31  ;;  %v8206_v21 = vand.u32 2147483647, %v8173_v15 }
 0x141   : > { %15242 = vst [vmem:[#allocation62_spill] sm:$0xff] %v8138_v58 }
 0x142   : > { %15243 = vst [vmem:[#allocation63_spill] sm:$0xff] %v8140_v9  ;;  %v8155_v9 = vpop.eup %6797  ;;  %v1256_v3 = vmul.f32 0.3275911, %v8206_v21 }
 0x143   : > { %15244 = vst [vmem:[#allocation64_spill] sm:$0xff] %v8144_v50  ;;  %v4847_v50 = vmul.f32 1.442695, %v4706_v40  ;;  %v8178_v58 = vpop.eup %6799 }
 0x144   : > { %15245 = vst [vmem:[#allocation65_spill] sm:$0xff] %v8147_v63  ;;  %v546_v63 = vpop.f32.mrf.mxu1  ;;  %v8188_v7 = vpop.eup %6801  ;;  %v1689_v8 = vmul.f32 %v8178_v58, %v8113_v23 }
 0x145   : > { %15246 = vst [vmem:[#allocation66_spill] sm:$0xff] %v8155_v9  ;;  %v4708_v9 = vmul.f32 %v4580_v1, %v8077_v16  ;;  %v8176_v40 = vadd.f32 %v546_v63, %v7654_v53  ;;  %v8184_v16 = vmul.f32 %v8099_v10, %v1675_v42  ;;  %v4849_v1 = vmul.f32 1.442695, %v4707_v47  ;;  %v8200_v31 = vpop.eup %6803  ;;  %v6008_v10 = vld [vmem:[#allocation8 + $0x118] sm:$0xff]  ;;  %v659_v23 = vpop.f32.mrf.mxu2 }
 0x146   : > { %15247 = vst [vmem:[#allocation67_spill] sm:$0xff] %v8170_v41  ;;  %6807 = vpow2.f32 %v4847_v50  ;;  %v4581_v41 = vsub.f32 0.0, %v8135_v32  ;;  %v1255_v63 = vmul.f32 0.3275911, %v8162_v49  ;;  %v8198_v42 = vmul.f32 0.70710677, %v8167_v5  ;;  %6279 = vmatpush.msrb.mxu2 %v6008_v10 }
 0x147   : > { %15248 = vst [vmem:[#allocation68_spill] sm:$0xff] %v8173_v15  ;;  %v4851_v36 = vmul.f32 1.442695, %v4708_v9  ;;  %v1729_v50 = vand.u32 2147483648, %v8132_v13  ;;  %v8203_v47 = vadd.f32 1.0, %v1254_v30  ;;  %v8211_v9 = vpop.eup %6805  ;;  %6809 = vpow2.f32 %v4849_v1  ;;  %v5976_v15 = vld [vmem:[#allocation8 + $0x18] sm:$0xff] }
 0x148   : > { %15249 = vst [vmem:[#allocation69_spill] sm:$0xff] %v8178_v58  ;;  %v8218_v30 = vmul.f32 0.5, %v8080_v27  ;;  %6811 = vrcp.f32 %v8190_v55  ;;  %6053 = vmatpush.msrb.mxu0 %v5976_v15  ;;  %v1719_v1 = vmul.f32 %v8200_v31, %v8132_v13  ;;  %v4710_v27 = vmul.f32 %v4582_v4, %v1126_v6 }
 0x149   : > { %15250 = vst [vmem:[#allocation70_spill] sm:$0xff] %v8181_v33  ;;  %v4709_v33 = vmul.f32 %v4581_v41, %v8135_v32  ;;  %6813 = vpow2.f32 %v4851_v36  ;;  %v8234_v32 = vor.u32 1.1754944e-38, %v1729_v50  ;;  %v1690_v41 = vsub.f32 1.0, %v1689_v8 }
 0x14a   : > { %15251 = vst [vmem:[#allocation71_spill] sm:$0xff] %v8184_v16  ;;  %v6024_v16 = vld [vmem:[#allocation8 + $0x198] sm:$0xff]  ;;  %6815 = vrcp.f32 %v8203_v47  ;;  %v1744_v4 = vand.u32 2147483648, %v8190_v55  ;;  %v8243_v6 = vadd.f32 %v659_v23, %v7662_v57  ;;  %v8253_v8 = vmul.f32 0.5, %v8106_v20 }
 0x14b   : > { %15252 = vst [vmem:[#allocation72_spill] sm:$0xff] %v8186_v44  ;;  %v8209_v44 = vmul.f32 0.70710677, %v8176_v40  ;;  %6392 = vmatpush.msrb.mxu3 %v6024_v16  ;;  %v4583_v16 = vsub.f32 0.0, %v8162_v49  ;;  %v1759_v23 = vand.u32 2147483648, %v8203_v47 }
 0x14c   : > { %15253 = vst [vmem:[#allocation73_spill] sm:$0xff] %v8188_v7  ;;  %v8232_v29 = vpop.eup %6807 }
 0x14d   : > { %15254 = vst [vmem:[#allocation74_spill] sm:$0xff] %v8190_v55  ;;  %v8239_v10 = vand.u32 2147483647, %v8209_v44  ;;  %v8250_v50 = vpop.eup %6809 }
 0x14e   : > { %15255 = vst [vmem:[#allocation75_spill] sm:$0xff] %v8195_v54  ;;  %v1704_v54 = vmul.f32 %v8188_v7, %v8117_v18  ;;  %v772_v18 = vpop.f32.mrf.mxu3 }
 0x14f   : > { %15256 = vst [vmem:[#allocation76_spill] sm:$0xff] %v8198_v42  ;;  %v8248_v36 = vadd.f32 %v772_v18, %v7664_v59  ;;  %v1258_v18 = vmul.f32 0.3275911, %v8239_v10 }
 0x150   : > { %15257 = vst [vmem:[#allocation77_spill] sm:$0xff] %v8200_v31  ;;  %v1705_v15 = vsub.f32 1.0, %v1704_v54 }
 0x151   : > { %15258 = vst [vmem:[#allocation78_spill] sm:$0xff] %v8203_v47 }
 0x152   : > { %15259 = vst [vmem:[#allocation79_spill] sm:$0xff] %v8209_v44  ;;  %v4855_v44 = vmul.f32 1.442695, %v4710_v27  ;;  %v8271_v20 = vmul.f32 %v8188_v7, %v1705_v15  ;;  %v8273_v27 = vor.u32 1.1754944e-38, %v1744_v4 }
 0x153   : > { %15260 = vst [vmem:[#allocation80_spill] sm:$0xff] %v8211_v9  ;;  %v8225_v9 = vadd.f32 1.0, %v1255_v63  ;;  %v4853_v63 = vmul.f32 1.442695, %v4709_v33  ;;  %v8260_v33 = vmul.f32 0.5, %v8153_v11 }
 0x154   : > { %15261 = vst [vmem:[#allocation81_spill] sm:$0xff] %v8218_v30  ;;  %v8230_v30 = vand.u32 2147483647, %v8198_v42  ;;  %v1720_v42 = vsub.f32 1.0, %v1719_v1  ;;  %v8268_v1 = vmul.f32 %v8178_v58, %v1690_v41 }
 0x155   : > { %15262 = vst [vmem:[#allocation82_spill] sm:$0xff] %v8223_v22  ;;  %6817 = vrcp.f32 %v8225_v9  ;;  %v8256_v22 = vpop.eup %6811 }
 0x156   : > { %15263 = vst [vmem:[#allocation83_spill] sm:$0xff] %v8225_v9  ;;  %v1257_v54 = vmul.f32 0.3275911, %v8230_v30  ;;  %6819 = vpow2.f32 %v4853_v63  ;;  %v8286_v41 = vmul.f32 %v8200_v31, %v1720_v42  ;;  %v1734_v15 = vmul.f32 %v8256_v22, %v8190_v55  ;;  %v549_v42 = vpop.f32.mrf.mxu1 }
 0x157   : > { %15264 = vst [vmem:[#allocation84_spill] sm:$0xff] %v8232_v29  ;;  %v8262_v29 = vadd.f32 1.0, %v1256_v3  ;;  %v4711_v3 = vmul.f32 %v4583_v16, %v8162_v49  ;;  %6821 = vpow2.f32 %v4855_v44  ;;  %v8294_v63 = vor.u32 1.1754944e-38, %v1759_v23 }
 0x158   : > { %15265 = vst [vmem:[#allocation85_spill] sm:$0xff] %v8234_v32  ;;  %v5992_v32 = vld [vmem:[#allocation8 + $0x98] sm:$0xff]  ;;  %v8290_v4 = vadd.f32 1.0, %v1257_v54  ;;  %v4585_v49 = vsub.f32 0.0, %v8230_v30  ;;  %v8298_v16 = vadd.f32 1.0, %v1258_v18  ;;  %v1774_v44 = vand.u32 2147483648, %v8225_v9 }
 0x159   : > { %15266 = vst [vmem:[#allocation86_spill] sm:$0xff] %v8250_v50  ;;  %v8265_v50 = vpop.eup %6813  ;;  %6166 = vmatpush.msrb.mxu1 %v5992_v32  ;;  %v436_v32 = vpop.f32.mrf.mxu0  ;;  %6823 = vrcp.f32 %v8262_v29  ;;  %v8304_v54 = vmul.f32 0.5, %v8167_v5  ;;  %v4857_v23 = vmul.f32 1.442695, %v4711_v3  ;;  %v1735_v13 = vsub.f32 1.0, %v1734_v15 }
 0x15a   : > { %15267 = vst [vmem:[#allocation87_spill] sm:$0xff] %v8253_v8  ;;  %v8276_v8 = vmul.f32 0.70710677, %v8243_v6  ;;  %v8278_v11 = vpop.eup %6815  ;;  %v8312_v18 = vadd.f32 %v436_v32, %v7652_v51  ;;  %6825 = vrcp.f32 %v8290_v4  ;;  %v8319_v5 = vadd.f32 %v549_v42, %v7654_v53 }
 0x15b   : > { %15268 = vst [vmem:[#allocation88_spill] sm:$0xff] %v8256_v22  ;;  %v1749_v31 = vmul.f32 %v8278_v11, %v8203_v47  ;;  %6827 = vrcp.f32 %v8298_v16  ;;  %v8331_v42 = vor.u32 1.1754944e-38, %v1774_v44  ;;  %v8348_v44 = vmul.f32 %v8256_v22, %v1735_v13 }
 0x15c   : > { %15269 = vst [vmem:[#allocation89_spill] sm:$0xff] %v8260_v33  ;;  %v4584_v33 = vsub.f32 0.0, %v8206_v21  ;;  %v1131_v55 = vand.u32 2147483647, %v8276_v8  ;;  %6829 = vpow2.f32 %v4857_v23 }
 0x15d   : > { %15270 = vst [vmem:[#allocation90_spill] sm:$0xff] %v8262_v29 }
 0x15e   : > { %15271 = vst [vmem:[#allocation91_spill] sm:$0xff] %v8265_v50  ;;  %v8283_v50 = vmul.f32 0.70710677, %v8248_v36 }
 0x15f   : > { %15272 = vst [vmem:[#allocation92_spill] sm:$0xff] %v8268_v1  ;;  %v4587_v1 = vsub.f32 0.0, %v1131_v55 }
 0x160   : > { %15273 = vst [vmem:[#allocation93_spill] sm:$0xff] %v8271_v20  ;;  %v8309_v7 = vand.u32 2147483647, %v8283_v50  ;;  %v321_v20 = vld [vmem:[%s7620_s11 + $0xd0] sm:$0xff] }
 0x161   : > { %15274 = vst [vmem:[#allocation94_spill] sm:$0xff] %v8273_v27  ;;  %v8292_v27 = vpop.eup %6817  ;;  %495 = vmatmul.f32.gmra.mxu0 %v321_v20  ;;  %608 = vmatmul.f32.gmra.mxu1 %v321_v20 }
 0x162   : > { %15275 = vst [vmem:[#allocation95_spill] sm:$0xff] %v8276_v8  ;;  %v1764_v47 = vmul.f32 %v8292_v27, %v8225_v9  ;;  %v8321_v3 = vpop.eup %6819  ;;  %721 = vmatmul.f32.gmra.mxu2 %v321_v20  ;;  %834 = vmatmul.f32.gmra.mxu3 %v321_v20  ;;  %v1259_v8 = vmul.f32 0.3275911, %v1131_v55  ;;  %v8338_v9 = vmul.f32 0.70710677, %v8312_v18  ;;  %v1804_v20 = vand.u32 2147483648, %v8290_v4 }
 0x163   : > { %15276 = vst [vmem:[#allocation96_spill] sm:$0xff] %v8278_v11  ;;  %v8329_v32 = vpop.eup %6821 }
 0x164   : > { %15277 = vst [vmem:[#allocation97_spill] sm:$0xff] %v8283_v50  ;;  %v1789_v50 = vand.u32 2147483648, %v8262_v29 }
 0x165   : > { %15278 = vst [vmem:[#allocation98_spill] sm:$0xff] %v8286_v41  ;;  %v662_v41 = vpop.f32.mrf.mxu2 }
 0x166   : > { %15279 = vst [vmem:[#allocation99_spill] sm:$0xff] %v8290_v4  ;;  %v8327_v15 = vadd.f32 %v662_v41, %v7662_v57  ;;  %v1765_v41 = vsub.f32 1.0, %v1764_v47  ;;  %v8365_v13 = vor.u32 1.1754944e-38, %v1789_v50 }
 0x167   : > { %15280 = vst [vmem:[#allocation100_spill] sm:$0xff] %v8292_v27 }
 0x168   : > { %15281 = vst [vmem:[#allocation101_spill] sm:$0xff] %v8294_v63  ;;  %v4712_v63 = vmul.f32 %v4584_v33, %v8206_v21  ;;  %v4713_v21 = vmul.f32 %v4585_v49, %v8230_v30  ;;  %v4586_v33 = vsub.f32 0.0, %v8239_v10  ;;  %v1260_v49 = vmul.f32 0.3275911, %v8309_v7 }
 0x169   : > { %15282 = vst [vmem:[#allocation102_spill] sm:$0xff] %v8298_v16  ;;  %v8352_v23 = vmul.f32 0.70710677, %v8327_v15 }
 0x16a   : > { %15283 = vst [vmem:[#allocation103_spill] sm:$0xff] %v8304_v54  ;;  %v1750_v54 = vsub.f32 1.0, %v1749_v31  ;;  %v4859_v30 = vmul.f32 1.442695, %v4712_v63  ;;  %v8345_v31 = vmul.f32 0.70710677, %v8319_v5  ;;  %v4714_v63 = vmul.f32 %v4586_v33, %v8239_v10 }
 0x16b   : > { %15284 = vst [vmem:[#allocation104_spill] sm:$0xff] %v8321_v3  ;;  %v8334_v3 = vpop.eup %6823  ;;  %v8367_v10 = vadd.f32 1.0, %v1260_v49  ;;  %v8371_v33 = vmul.f32 %v8292_v27, %v1765_v41  ;;  %v8384_v49 = vand.u32 2147483647, %v8352_v23  ;;  %v439_v41 = vpop.f32.mrf.mxu0 }
 0x16c   : > { %15285 = vst [vmem:[#allocation105_spill] sm:$0xff] %v8329_v32  ;;  %v8342_v32 = vmul.f32 0.5, %v8176_v40  ;;  %v8354_v58 = vpop.eup %6825  ;;  %v8357_v47 = vmul.f32 %v8278_v11, %v1750_v54  ;;  %v1779_v40 = vmul.f32 %v8334_v3, %v8262_v29  ;;  %6831 = vpow2.f32 %v4859_v30 }
 0x16d   : > { %15286 = vst [vmem:[#allocation106_spill] sm:$0xff] %v8331_v42  ;;  %v4861_v42 = vmul.f32 1.442695, %v4713_v21  ;;  %v8363_v61 = vpop.eup %6827  ;;  %v1133_v21 = vand.u32 2147483647, %v8338_v9  ;;  %v8373_v54 = vor.u32 1.1754944e-38, %v1804_v20  ;;  %v1794_v50 = vmul.f32 %v8354_v58, %v8290_v4 }
 0x16e   : > { %15287 = vst [vmem:[#allocation107_spill] sm:$0xff] %v8334_v3  ;;  %v1819_v11 = vand.u32 2147483648, %v8298_v16  ;;  %v8379_v29 = vpop.eup %6829  ;;  %v4863_v30 = vmul.f32 1.442695, %v4714_v63  ;;  %v1809_v20 = vmul.f32 %v8363_v61, %v8298_v16  ;;  %v8401_v16 = vadd.f32 %v439_v41, %v7652_v51 }
 0x16f   : > { %15288 = vst [vmem:[#allocation108_spill] sm:$0xff] %v8338_v9  ;;  %6833 = vpow2.f32 %v4861_v42  ;;  %v1780_v9 = vsub.f32 1.0, %v1779_v40  ;;  %v552_v42 = vpop.f32.mrf.mxu1  ;;  %v4589_v27 = vsub.f32 0.0, %v1133_v21 }
 0x170   : > { %15289 = vst [vmem:[#allocation109_spill] sm:$0xff] %v8342_v32  ;;  %v8361_v32 = vadd.f32 1.0, %v1259_v8  ;;  %v8377_v8 = vand.u32 2147483647, %v8345_v31  ;;  %v8394_v63 = vor.u32 1.1754944e-38, %v1819_v11 }
 0x171   : > { %15290 = vst [vmem:[#allocation110_spill] sm:$0xff] %v8345_v31  ;;  %v4715_v31 = vmul.f32 %v4587_v1, %v1131_v55  ;;  %v1795_v1 = vsub.f32 1.0, %v1794_v50  ;;  %v8415_v41 = vmul.f32 %v8334_v3, %v1780_v9 }
 0x172   : > { %15291 = vst [vmem:[#allocation111_spill] sm:$0xff] %v8352_v23  ;;  %6835 = vrcp.f32 %v8361_v32  ;;  %v8397_v23 = vmul.f32 0.5, %v8243_v6  ;;  %v1262_v40 = vmul.f32 0.3275911, %v8377_v8  ;;  %v8403_v55 = vpop.eup %6831  ;;  %v8410_v6 = vadd.f32 %v552_v42, %v7654_v53 }
 0x173   : > { %15292 = vst [vmem:[#allocation112_spill] sm:$0xff] %v8354_v58  ;;  %6837 = vrcp.f32 %v8367_v10  ;;  %v4865_v11 = vmul.f32 1.442695, %v4715_v31  ;;  %v8427_v31 = vmul.f32 0.5, %v8312_v18  ;;  %v8432_v42 = vmul.f32 0.70710677, %v8401_v16 }
 0x174   : > { %15293 = vst [vmem:[#allocation113_spill] sm:$0xff] %v8357_v47  ;;  %v775_v47 = vpop.f32.mrf.mxu3  ;;  %6839 = vpow2.f32 %v4863_v30  ;;  %v1834_v30 = vand.u32 2147483648, %v8361_v32  ;;  %v4590_v18 = vsub.f32 0.0, %v8377_v8 }
 0x175   : > { %15294 = vst [vmem:[#allocation114_spill] sm:$0xff] %v8361_v32  ;;  %v8392_v4 = vadd.f32 %v775_v47, %v7664_v59  ;;  %v1263_v47 = vmul.f32 0.3275911, %v8384_v49  ;;  %6841 = vpow2.f32 %v4865_v11  ;;  %v8465_v11 = vand.u32 2147483647, %v8432_v42 }
 0x176   : > { %15295 = vst [vmem:[#allocation115_spill] sm:$0xff] %v8363_v61 }
 0x177   : > { %15296 = vst [vmem:[#allocation116_spill] sm:$0xff] %v8365_v13  ;;  %v8406_v13 = vmul.f32 0.5, %v8248_v36  ;;  %v8421_v36 = vmul.f32 0.70710677, %v8392_v4 }
 0x178   : > { %15297 = vst [vmem:[#allocation117_spill] sm:$0xff] %v8367_v10 }
 0x179   : > { %15298 = vst [vmem:[#allocation118_spill] sm:$0xff] %v8371_v33  ;;  %v1810_v33 = vsub.f32 1.0, %v1809_v20  ;;  %v8429_v20 = vadd.f32 1.0, %v1262_v40  ;;  %v8449_v40 = vmul.f32 0.70710677, %v8410_v6 }
 0x17a   : > { %15299 = vst [vmem:[#allocation119_spill] sm:$0xff] %v8373_v54  ;;  %v4588_v54 = vsub.f32 0.0, %v8309_v7 }
 0x17b   : > { %15300 = vst [vmem:[#allocation120_spill] sm:$0xff] %v8379_v29  ;;  %v1261_v29 = vmul.f32 0.3275911, %v1133_v21 }
 0x17c   : > { %15301 = vst [vmem:[#allocation121_spill] sm:$0xff] %v8394_v63  ;;  %v4716_v63 = vmul.f32 %v4588_v54, %v8309_v7  ;;  %v4717_v7 = vmul.f32 %v4589_v27, %v1133_v21  ;;  %v8440_v54 = vmul.f32 0.5, %v8319_v5  ;;  %v8455_v27 = vand.u32 2147483647, %v8421_v36  ;;  %v665_v5 = vpop.f32.mrf.mxu2 }
 0x17d   : > { %15302 = vst [vmem:[#allocation122_spill] sm:$0xff] %v8397_v23  ;;  %v8412_v23 = vpop.eup %6833  ;;  %v8418_v50 = vadd.f32 1.0, %v1261_v29  ;;  %v8437_v29 = vmul.f32 %v8354_v58, %v1795_v1  ;;  %v8477_v3 = vadd.f32 %v665_v5, %v7662_v57  ;;  %v1265_v5 = vmul.f32 0.3275911, %v8465_v11 }
 0x17e   : > { %15303 = vst [vmem:[#allocation123_spill] sm:$0xff] %v8403_v55  ;;  %v8445_v55 = vmul.f32 %v8363_v61, %v1810_v33  ;;  %v4867_v1 = vmul.f32 1.442695, %v4716_v63  ;;  %v8459_v33 = vor.u32 1.1754944e-38, %v1834_v30  ;;  %v778_v63 = vpop.f32.mrf.mxu3  ;;  %v5975_v61 = vld [vmem:[#allocation8 + $0x10] sm:$0xff]  ;;  %v442_v30 = vpop.f32.mrf.mxu0 }
 0x17f   : > { %15304 = vst [vmem:[#allocation124_spill] sm:$0xff] %v8406_v13  ;;  %v8423_v13 = vpop.eup %6835  ;;  %6843 = vrcp.f32 %v8418_v50  ;;  %v1864_v58 = vand.u32 2147483648, %v8418_v50  ;;  %6054 = vmatpush.msrb.mxu0 %v5975_v61  ;;  %v8484_v61 = vadd.f32 %v778_v63, %v7664_v59  ;;  %v1879_v63 = vand.u32 2147483648, %v8429_v20 }
 0x180   : > { %15305 = vst [vmem:[#allocation125_spill] sm:$0xff] %v8412_v23  ;;  %v8434_v9 = vpop.eup %6837  ;;  %v8442_v23 = vadd.f32 1.0, %v1263_v47  ;;  %6845 = vrcp.f32 %v8429_v20 }
 0x181   : > { %15306 = vst [vmem:[#allocation126_spill] sm:$0xff] %v8415_v41  ;;  %v8457_v21 = vpop.eup %6839  ;;  %v1839_v47 = vmul.f32 %v8434_v9, %v8367_v10 }
 0x182   : > { %15307 = vst [vmem:[#allocation127_spill] sm:$0xff] %v8418_v50  ;;  %6847 = vrcp.f32 %v8442_v23 }
 0x183   : > { %15308 = vst [vmem:[#allocation128_spill] sm:$0xff] %v8421_v36  ;;  %v1849_v36 = vand.u32 2147483648, %v8367_v10  ;;  %6849 = vpow2.f32 %v4867_v1 }
 0x184   : > { %15309 = vst [vmem:[#allocation129_spill] sm:$0xff] %v8423_v13 }
 0x185   : > { %15310 = vst [vmem:[#allocation130_spill] sm:$0xff] %v8427_v31  ;;  %v1824_v31 = vmul.f32 %v8423_v13, %v8361_v32  ;;  %v8474_v32 = vand.u32 2147483647, %v8449_v40 }
 0x186   : > { %15311 = vst [vmem:[#allocation131_spill] sm:$0xff] %v8429_v20 }
 0x187   : > { %15312 = vst [vmem:[#allocation132_spill] sm:$0xff] %v8432_v42  ;;  %v4591_v42 = vsub.f32 0.0, %v8384_v49  ;;  %v1825_v10 = vsub.f32 1.0, %v1824_v31 }
 0x188   : > { %15313 = vst [vmem:[#allocation133_spill] sm:$0xff] %v8434_v9 }
 0x189   : > { %15314 = vst [vmem:[#allocation134_spill] sm:$0xff] %v8437_v29  ;;  %v4718_v29 = vmul.f32 %v4590_v18, %v8377_v8  ;;  %v8486_v8 = vpop.eup %6841  ;;  %v1840_v18 = vsub.f32 1.0, %v1839_v47  ;;  %v4719_v1 = vmul.f32 %v4591_v42, %v8384_v49  ;;  %v1266_v47 = vmul.f32 0.3275911, %v8474_v32 }
 0x18a   : > { %15315 = vst [vmem:[#allocation135_spill] sm:$0xff] %v8440_v54  ;;  %v6007_v54 = vld [vmem:[#allocation8 + $0x110] sm:$0xff]  ;;  %v8492_v31 = vpop.eup %6843  ;;  %v8522_v42 = vadd.f32 1.0, %v1265_v5 }
 0x18b   : > { %15316 = vst [vmem:[#allocation136_spill] sm:$0xff] %v8442_v23  ;;  %6280 = vmatpush.msrb.mxu2 %v6007_v54  ;;  %v1264_v54 = vmul.f32 0.3275911, %v8455_v27  ;;  %v1854_v49 = vmul.f32 %v8492_v31, %v8418_v50  ;;  %v8537_v5 = vadd.f32 1.0, %v1266_v47 }
 0x18c   : > { %15317 = vst [vmem:[#allocation137_spill] sm:$0xff] %v8445_v55  ;;  %v6023_v55 = vld [vmem:[#allocation8 + $0x190] sm:$0xff] }
 0x18d   : > { %15318 = vst [vmem:[#allocation138_spill] sm:$0xff] %v8449_v40  ;;  %6393 = vmatpush.msrb.mxu3 %v6023_v55  ;;  %v8490_v55 = vadd.f32 %v442_v30, %v7652_v51  ;;  %v8496_v40 = vor.u32 1.1754944e-38, %v1864_v58  ;;  %v8504_v30 = vmul.f32 0.70710677, %v8477_v3  ;;  %v8511_v58 = vadd.f32 1.0, %v1264_v54 }
 0x18e   : > { %15319 = vst [vmem:[#allocation139_spill] sm:$0xff] %v8457_v21  ;;  %v4869_v21 = vmul.f32 1.442695, %v4717_v7  ;;  %v8480_v7 = vmul.f32 0.5, %v8327_v15  ;;  %v8494_v15 = vor.u32 1.1754944e-38, %v1849_v36  ;;  %v8509_v36 = vmul.f32 %v8423_v13, %v1825_v10 }
 0x18f   : > { %15320 = vst [vmem:[#allocation140_spill] sm:$0xff] %v8459_v33  ;;  %v322_v33 = vld [vmem:[%s7620_s11 + $0xd8] sm:$0xff]  ;;  %v8529_v54 = vor.u32 1.1754944e-38, %v1879_v63  ;;  %v1894_v13 = vand.u32 2147483648, %v8442_v23  ;;  %v8540_v50 = vand.u32 2147483647, %v8504_v30 }
 0x190   : > { %498 = vmatmul.f32.gmra.mxu0 %v322_v33  ;;  %15321 = vst [vmem:[#allocation141_spill] sm:$0xff] %v8480_v7  ;;  %611 = vmatmul.f32.gmra.mxu1 %v322_v33  ;;  %6851 = vpow2.f32 %v4869_v21  ;;  %v8499_v7 = vpop.eup %6845  ;;  %v4592_v21 = vsub.f32 0.0, %v8455_v27 }
 0x191   : > { %724 = vmatmul.f32.gmra.mxu2 %v322_v33  ;;  %15322 = vst [vmem:[#allocation142_spill] sm:$0xff] %v8486_v8  ;;  %837 = vmatmul.f32.gmra.mxu3 %v322_v33  ;;  %v4871_v8 = vmul.f32 1.442695, %v4718_v29  ;;  %v8506_v33 = vpop.eup %6847  ;;  %v8518_v29 = vmul.f32 %v8434_v9, %v1840_v18  ;;  %v1869_v10 = vmul.f32 %v8499_v7, %v8429_v20  ;;  %v4873_v20 = vmul.f32 1.442695, %v4719_v1 }
 0x192   : > { %15323 = vst [vmem:[#allocation143_spill] sm:$0xff] %v8492_v31  ;;  %v8533_v41 = vpop.eup %6849  ;;  %v1884_v18 = vmul.f32 %v8506_v33, %v8442_v23  ;;  %v4720_v63 = vmul.f32 %v4592_v21, %v8455_v27  ;;  %v4594_v21 = vsub.f32 0.0, %v8474_v32 }
 0x193   : > { %15324 = vst [vmem:[#allocation144_spill] sm:$0xff] %v8494_v15  ;;  %v8525_v15 = vmul.f32 0.70710677, %v8490_v55  ;;  %6853 = vpow2.f32 %v4871_v8  ;;  %v1855_v8 = vsub.f32 1.0, %v1854_v49  ;;  %v1870_v1 = vsub.f32 1.0, %v1869_v10 }
 0x194   : > { %15325 = vst [vmem:[#allocation145_spill] sm:$0xff] %v8496_v40  ;;  %v8515_v40 = vmul.f32 0.70710677, %v8484_v61  ;;  %6855 = vrcp.f32 %v8511_v58  ;;  %v1885_v23 = vsub.f32 1.0, %v1884_v18  ;;  %v1909_v49 = vand.u32 2147483648, %v8511_v58 }
 0x195   : > { %15326 = vst [vmem:[#allocation146_spill] sm:$0xff] %v8499_v7  ;;  %6857 = vrcp.f32 %v8522_v42  ;;  %v8554_v47 = vand.u32 2147483647, %v8525_v15 }
 0x196   : > { %15327 = vst [vmem:[#allocation147_spill] sm:$0xff] %v8504_v30  ;;  %v8542_v9 = vpop.eup %6851  ;;  %v555_v30 = vpop.f32.mrf.mxu1  ;;  %6859 = vrcp.f32 %v8537_v5 }
 0x197   : > { %15328 = vst [vmem:[#allocation148_spill] sm:$0xff] %v8506_v33  ;;  %6861 = vpow2.f32 %v4873_v20  ;;  %v1269_v18 = vmul.f32 0.3275911, %v8554_v47 }
 0x198   : > { %15329 = vst [vmem:[#allocation149_spill] sm:$0xff] %v8509_v36  ;;  %v4593_v36 = vsub.f32 0.0, %v8465_v11 }
 0x199   : > { %15330 = vst [vmem:[#allocation150_spill] sm:$0xff] %v8515_v40  ;;  %v8567_v10 = vpop.eup %6853 }
 0x19a   : > { %15331 = vst [vmem:[#allocation151_spill] sm:$0xff] %v8518_v29  ;;  %v8550_v29 = vmul.f32 0.5, %v8392_v4  ;;  %v4721_v27 = vmul.f32 %v4593_v36, %v8465_v11  ;;  %v1267_v4 = vmul.f32 0.3275911, %v8540_v50  ;;  %v8570_v11 = vmul.f32 %v8492_v31, %v1855_v8  ;;  %v8579_v20 = vpop.eup %6855  ;;  %v323_v31 = vld [vmem:[%s7620_s11 + $0xe0] sm:$0xff] }
 0x19b   : > { %15332 = vst [vmem:[#allocation152_spill] sm:$0xff] %v8522_v42  ;;  %v8573_v36 = vmul.f32 0.5, %v8401_v16  ;;  %v4722_v8 = vmul.f32 %v4594_v21, %v8474_v32  ;;  %v8589_v16 = vpop.eup %6857  ;;  %501 = vmatmul.f32.gmra.mxu0 %v323_v31  ;;  %614 = vmatmul.f32.gmra.mxu1 %v323_v31  ;;  %v8608_v21 = vadd.f32 1.0, %v1269_v18  ;;  %v8625_v18 = vmul.f32 0.5, %v8477_v3 }
 0x19c   : > { %15333 = vst [vmem:[#allocation153_spill] sm:$0xff] %v8525_v15  ;;  %v4875_v15 = vmul.f32 1.442695, %v4720_v63  ;;  %v8582_v63 = vmul.f32 %v8499_v7, %v1870_v1  ;;  %v8597_v22 = vadd.f32 1.0, %v1267_v4  ;;  %727 = vmatmul.f32.gmra.mxu2 %v323_v31  ;;  %840 = vmatmul.f32.gmra.mxu3 %v323_v31  ;;  %v1914_v31 = vmul.f32 %v8589_v16, %v8522_v42 }
 0x19d   : > { %15334 = vst [vmem:[#allocation154_spill] sm:$0xff] %v8529_v54  ;;  %v8547_v54 = vand.u32 2147483647, %v8515_v40  ;;  %v668_v40 = vpop.f32.mrf.mxu2 }
 0x19e   : > { %15335 = vst [vmem:[#allocation155_spill] sm:$0xff] %v8533_v41  ;;  %v5991_v41 = vld [vmem:[#allocation8 + $0x90] sm:$0xff]  ;;  %6863 = vpow2.f32 %v4875_v15 }
 0x19f   : > { %15336 = vst [vmem:[#allocation156_spill] sm:$0xff] %v8537_v5  ;;  %6167 = vmatpush.msrb.mxu1 %v5991_v41  ;;  %v1268_v41 = vmul.f32 0.3275911, %v8547_v54 }
 0x1a0   : > { %15337 = vst [vmem:[#allocation157_spill] sm:$0xff] %v8542_v9  ;;  %v8556_v9 = vor.u32 1.1754944e-38, %v1894_v13  ;;  %v8565_v13 = vadd.f32 %v555_v30, %v7654_v53  ;;  %v4877_v30 = vmul.f32 1.442695, %v4721_v27  ;;  %v1939_v27 = vand.u32 2147483648, %v8537_v5 }
 0x1a1   : > { %15338 = vst [vmem:[#allocation158_spill] sm:$0xff] %v8550_v29  ;;  %v8577_v29 = vadd.f32 %v668_v40, %v7662_v57  ;;  %v8594_v40 = vor.u32 1.1754944e-38, %v1909_v49  ;;  %v8600_v1 = vadd.f32 1.0, %v1268_v41  ;;  %v1899_v41 = vmul.f32 %v8579_v20, %v8511_v58 }
 0x1a2   : > { %15339 = vst [vmem:[#allocation159_spill] sm:$0xff] %v8556_v9  ;;  %v8585_v9 = vmul.f32 0.5, %v8410_v6  ;;  %v4595_v6 = vsub.f32 0.0, %v8540_v50  ;;  %v8603_v32 = vmul.f32 0.70710677, %v8565_v13  ;;  %6865 = vpow2.f32 %v4877_v30  ;;  %v445_v30 = vpop.f32.mrf.mxu0 }
 0x1a3   : > { %15340 = vst [vmem:[#allocation160_spill] sm:$0xff] %v8567_v10  ;;  %v781_v10 = vpop.f32.mrf.mxu3  ;;  %v8611_v49 = vmul.f32 0.70710677, %v8577_v29  ;;  %6867 = vrcp.f32 %v8597_v22 }
 0x1a4   : > { %15341 = vst [vmem:[#allocation161_spill] sm:$0xff] %v8570_v11  ;;  %v1924_v11 = vand.u32 2147483648, %v8522_v42  ;;  %v8614_v15 = vadd.f32 %v781_v10, %v7664_v59  ;;  %v4596_v10 = vsub.f32 0.0, %v8547_v54  ;;  %6869 = vrcp.f32 %v8600_v1 }
 0x1a5   : > { %15342 = vst [vmem:[#allocation162_spill] sm:$0xff] %v8573_v36  ;;  %v8592_v36 = vmul.f32 %v8506_v33, %v1885_v23  ;;  %v8605_v23 = vpop.eup %6859  ;;  %v4723_v33 = vmul.f32 %v4595_v6, %v8540_v50  ;;  %v8634_v42 = vand.u32 2147483647, %v8603_v32  ;;  %6871 = vrcp.f32 %v8608_v21 }
 0x1a6   : > { %15343 = vst [vmem:[#allocation163_spill] sm:$0xff] %v8579_v20  ;;  %v8616_v4 = vpop.eup %6861  ;;  %v8640_v3 = vand.u32 2147483647, %v8611_v49  ;;  %v1915_v50 = vsub.f32 1.0, %v1914_v31  ;;  %v4597_v6 = vsub.f32 0.0, %v8554_v47 }
 0x1a7   : > { %15344 = vst [vmem:[#allocation164_spill] sm:$0xff] %v8582_v63  ;;  %v1270_v31 = vmul.f32 0.3275911, %v8634_v42 }
 0x1a8   : > { %15345 = vst [vmem:[#allocation165_spill] sm:$0xff] %v8585_v9  ;;  %v4879_v9 = vmul.f32 1.442695, %v4722_v8  ;;  %v8643_v8 = vmul.f32 0.70710677, %v8614_v15 }
 0x1a9   : > { %15346 = vst [vmem:[#allocation166_spill] sm:$0xff] %v8589_v16 }
 0x1aa   : > { %15347 = vst [vmem:[#allocation167_spill] sm:$0xff] %v8592_v36  ;;  %6873 = vpow2.f32 %v4879_v9  ;;  %v671_v36 = vpop.f32.mrf.mxu2  ;;  %v8659_v9 = vmul.f32 0.5, %v8490_v55 }
 0x1ab   : > { %15348 = vst [vmem:[#allocation168_spill] sm:$0xff] %v8594_v40  ;;  %v8622_v40 = vor.u32 1.1754944e-38, %v1924_v11  ;;  %v8636_v11 = vor.u32 1.1754944e-38, %v1939_v27  ;;  %v8650_v27 = vmul.f32 0.5, %v8484_v61  ;;  %v8665_v61 = vmul.f32 0.5, %v8565_v13 }
 0x1ac   : > { %15349 = vst [vmem:[#allocation169_spill] sm:$0xff] %v8597_v22  ;;  %v8684_v13 = vadd.f32 %v671_v36, %v7662_v57  ;;  %v8700_v36 = vadd.f32 1.0, %v1270_v31 }
 0x1ad   : > { %15350 = vst [vmem:[#allocation170_spill] sm:$0xff] %v8600_v1 }
 0x1ae   : > { %15351 = vst [vmem:[#allocation171_spill] sm:$0xff] %v8603_v32  ;;  %v558_v32 = vpop.f32.mrf.mxu1  ;;  %v8716_v31 = vmul.f32 0.70710677, %v8684_v13 }
 0x1af   : > { %15352 = vst [vmem:[#allocation172_spill] sm:$0xff] %v8605_v23 }
 0x1b0   : > { %15353 = vst [vmem:[#allocation173_spill] sm:$0xff] %v8608_v21 }
 0x1b1   : > { %15354 = vst [vmem:[#allocation174_spill] sm:$0xff] %v8611_v49  ;;  %v8654_v49 = vadd.f32 %v445_v30, %v7652_v51  ;;  %v8672_v30 = vadd.f32 %v558_v32, %v7654_v53  ;;  %v1969_v32 = vand.u32 2147483648, %v8600_v1 }
 0x1b2   : > { %15355 = vst [vmem:[#allocation175_spill] sm:$0xff] %v8616_v4  ;;  %v1929_v4 = vmul.f32 %v8605_v23, %v8537_v5  ;;  %v1954_v5 = vand.u32 2147483648, %v8597_v22 }
 0x1b3   : > { %15356 = vst [vmem:[#allocation176_spill] sm:$0xff] %v8622_v40  ;;  %v1900_v40 = vsub.f32 1.0, %v1899_v41  ;;  %v4881_v41 = vmul.f32 1.442695, %v4723_v33  ;;  %v8680_v33 = vmul.f32 %v8589_v16, %v1915_v50 }
 0x1b4   : > { %15357 = vst [vmem:[#allocation177_spill] sm:$0xff] %v8625_v18  ;;  %v8645_v18 = vpop.eup %6863 }
 0x1b5   : > { %15358 = vst [vmem:[#allocation178_spill] sm:$0xff] %v8636_v11  ;;  %v4724_v11 = vmul.f32 %v4596_v10, %v8547_v54  ;;  %v8656_v7 = vpop.eup %6865  ;;  %v1271_v54 = vmul.f32 0.3275911, %v8640_v3  ;;  %v8669_v10 = vand.u32 2147483647, %v8643_v8  ;;  %v8677_v55 = vmul.f32 %v8579_v20, %v1900_v40  ;;  %v5974_v20 = vld [vmem:[#allocation8 + $0x8] sm:$0xff] }
 0x1b6   : > { %15359 = vst [vmem:[#allocation179_spill] sm:$0xff] %v8643_v8  ;;  %v8662_v63 = vpop.eup %6867  ;;  %v8688_v8 = vor.u32 1.1754944e-38, %v1954_v5  ;;  %6875 = vpow2.f32 %v4881_v41  ;;  %v4598_v41 = vsub.f32 0.0, %v8634_v42  ;;  %6055 = vmatpush.msrb.mxu0 %v5974_v20 }
 0x1b7   : > { %15360 = vst [vmem:[#allocation180_spill] sm:$0xff] %v8645_v18  ;;  %v1930_v18 = vsub.f32 1.0, %v1929_v4  ;;  %v8674_v4 = vpop.eup %6869  ;;  %v1944_v5 = vmul.f32 %v8662_v63, %v8597_v22 }
 0x1b8   : > { %15361 = vst [vmem:[#allocation181_spill] sm:$0xff] %v8650_v27  ;;  %v4883_v27 = vmul.f32 1.442695, %v4724_v11  ;;  %v1272_v11 = vmul.f32 0.3275911, %v8669_v10 }
 0x1b9   : > { %15362 = vst [vmem:[#allocation182_spill] sm:$0xff] %v8656_v7  ;;  %v8692_v7 = vmul.f32 0.70710677, %v8654_v49  ;;  %v8697_v50 = vmul.f32 %v8605_v23, %v1930_v18  ;;  %v324_v23 = vld [vmem:[%s7620_s11 + $0xe8] sm:$0xff] }
 0x1ba   : > { %15363 = vst [vmem:[#allocation183_spill] sm:$0xff] %v8659_v9  ;;  %v4725_v9 = vmul.f32 %v4597_v6, %v8554_v47  ;;  %v1984_v47 = vand.u32 2147483648, %v8608_v21  ;;  %v8704_v6 = vadd.f32 1.0, %v1271_v54  ;;  %6877 = vpow2.f32 %v4883_v27  ;;  %504 = vmatmul.f32.gmra.mxu0 %v324_v23  ;;  %617 = vmatmul.f32.gmra.mxu1 %v324_v23 }
 0x1bb   : > { %15364 = vst [vmem:[#allocation184_spill] sm:$0xff] %v8662_v63  ;;  %v8722_v22 = vand.u32 2147483647, %v8692_v7  ;;  %6879 = vrcp.f32 %v8700_v36  ;;  %730 = vmatmul.f32.gmra.mxu2 %v324_v23  ;;  %843 = vmatmul.f32.gmra.mxu3 %v324_v23  ;;  %v8732_v27 = vadd.f32 1.0, %v1272_v11  ;;  %v4600_v23 = vsub.f32 0.0, %v8669_v10 }
 0x1bc   : > { %15365 = vst [vmem:[#allocation185_spill] sm:$0xff] %v8665_v61  ;;  %v8686_v61 = vpop.eup %6871  ;;  %v4885_v54 = vmul.f32 1.442695, %v4725_v9  ;;  %v8724_v16 = vor.u32 1.1754944e-38, %v1984_v47  ;;  %6881 = vrcp.f32 %v8704_v6  ;;  %v448_v47 = vpop.f32.mrf.mxu0 }
 0x1bd   : > { %15366 = vst [vmem:[#allocation186_spill] sm:$0xff] %v8674_v4  ;;  %v8694_v40 = vpop.eup %6873  ;;  %v1974_v18 = vmul.f32 %v8686_v61, %v8608_v21  ;;  %v8728_v21 = vmul.f32 0.5, %v8577_v29  ;;  %v4726_v29 = vmul.f32 %v4598_v41, %v8634_v42  ;;  %v8753_v42 = vmul.f32 0.5, %v8654_v49 }
 0x1be   : > { %15367 = vst [vmem:[#allocation187_spill] sm:$0xff] %v8677_v55  ;;  %6883 = vpow2.f32 %v4885_v54  ;;  %v6022_v55 = vld [vmem:[#allocation8 + $0x188] sm:$0xff]  ;;  %v1999_v54 = vand.u32 2147483648, %v8700_v36 }
 0x1bf   : > { %15368 = vst [vmem:[#allocation188_spill] sm:$0xff] %v8680_v33  ;;  %v784_v33 = vpop.f32.mrf.mxu3  ;;  %6885 = vrcp.f32 %v8732_v27  ;;  %6394 = vmatpush.msrb.mxu3 %v6022_v55  ;;  %v4887_v20 = vmul.f32 1.442695, %v4726_v29  ;;  %v4601_v55 = vsub.f32 0.0, %v8722_v22 }
 0x1c0   : > { %15369 = vst [vmem:[#allocation189_spill] sm:$0xff] %v8686_v61  ;;  %v8746_v11 = vadd.f32 %v784_v33, %v7664_v59 }
 0x1c1   : > { %15370 = vst [vmem:[#allocation190_spill] sm:$0xff] %v8688_v8  ;;  %v8708_v8 = vmul.f32 0.70710677, %v8672_v30  ;;  %6887 = vpow2.f32 %v4887_v20 }
 0x1c2   : > { %15371 = vst [vmem:[#allocation191_spill] sm:$0xff] %v8692_v7  ;;  %v8737_v7 = vpop.eup %6875 }
 0x1c3   : > { %15372 = vst [vmem:[#allocation192_spill] sm:$0xff] %v8694_v40  ;;  %v1959_v40 = vmul.f32 %v8674_v4, %v8600_v1  ;;  %v4599_v1 = vsub.f32 0.0, %v8640_v3  ;;  %v8735_v9 = vand.u32 2147483647, %v8708_v8  ;;  %v8758_v41 = vpop.eup %6877 }
 0x1c4   : > { %15373 = vst [vmem:[#allocation193_spill] sm:$0xff] %v8697_v50  ;;  %v8719_v50 = vor.u32 1.1754944e-38, %v1969_v32  ;;  %v1945_v32 = vsub.f32 1.0, %v1944_v5  ;;  %v1273_v5 = vmul.f32 0.3275911, %v8722_v22 }
 0x1c5   : > { %15374 = vst [vmem:[#allocation194_spill] sm:$0xff] %v8700_v36 }
 0x1c6   : > { %15375 = vst [vmem:[#allocation195_spill] sm:$0xff] %v8704_v6  ;;  %v8761_v33 = vmul.f32 %v8662_v63, %v1945_v32  ;;  %v561_v32 = vpop.f32.mrf.mxu1 }
 0x1c7   : > { %15376 = vst [vmem:[#allocation196_spill] sm:$0xff] %v8708_v8  ;;  %v6006_v8 = vld [vmem:[#allocation8 + $0x108] sm:$0xff] }
 0x1c8   : > { %15377 = vst [vmem:[#allocation197_spill] sm:$0xff] %v8716_v31  ;;  %6281 = vmatpush.msrb.mxu2 %v6006_v8 }
 0x1c9   : > { %15378 = vst [vmem:[#allocation198_spill] sm:$0xff] %v8719_v50  ;;  %v1975_v50 = vsub.f32 1.0, %v1974_v18  ;;  %v8756_v18 = vadd.f32 %v448_v47, %v7652_v51 }
 0x1ca   : > { %15379 = vst [vmem:[#allocation199_spill] sm:$0xff] %v8724_v16  ;;  %v1960_v16 = vsub.f32 1.0, %v1959_v40  ;;  %v8750_v40 = vmul.f32 0.5, %v8614_v15  ;;  %v8766_v15 = vpop.eup %6879 }
 0x1cb   : > { %15380 = vst [vmem:[#allocation200_spill] sm:$0xff] %v8728_v21  ;;  %v8741_v21 = vand.u32 2147483647, %v8716_v31  ;;  %v8775_v47 = vpop.eup %6881  ;;  %v8778_v31 = vadd.f32 1.0, %v1273_v5  ;;  %v8787_v29 = vmul.f32 0.70710677, %v8756_v18 }
 0x1cc   : > { %15381 = vst [vmem:[#allocation201_spill] sm:$0xff] %v8732_v27  ;;  %v8769_v49 = vmul.f32 %v8674_v4, %v1960_v16  ;;  %v2014_v16 = vand.u32 2147483648, %v8704_v6  ;;  %v4602_v4 = vsub.f32 0.0, %v8735_v9 }
 0x1cd   : > { %15382 = vst [vmem:[#allocation202_spill] sm:$0xff] %v8737_v7  ;;  %v4727_v7 = vmul.f32 %v4599_v1, %v8640_v3  ;;  %v1274_v1 = vmul.f32 0.3275911, %v8735_v9  ;;  %v8772_v3 = vmul.f32 %v8686_v61, %v1975_v50  ;;  %v1275_v8 = vmul.f32 0.3275911, %v8741_v21  ;;  %v8789_v61 = vpop.eup %6883 }
 0x1ce   : > { %15383 = vst [vmem:[#allocation203_spill] sm:$0xff] %v8750_v40  ;;  %v8782_v40 = vmul.f32 0.70710677, %v8746_v11  ;;  %v2029_v50 = vand.u32 2147483648, %v8732_v27  ;;  %v8805_v63 = vpop.eup %6885  ;;  %6889 = vrcp.f32 %v8778_v31 }
 0x1cf   : > { %15384 = vst [vmem:[#allocation204_spill] sm:$0xff] %v8753_v42  ;;  %v4728_v42 = vmul.f32 %v4600_v23, %v8669_v10  ;;  %v1989_v10 = vmul.f32 %v8766_v15, %v8700_v36  ;;  %v8793_v23 = vor.u32 1.1754944e-38, %v1999_v54  ;;  %v8795_v5 = vadd.f32 1.0, %v1274_v1 }
 0x1d0   : > { %15385 = vst [vmem:[#allocation205_spill] sm:$0xff] %v8758_v41  ;;  %v4889_v41 = vmul.f32 1.442695, %v4727_v7  ;;  %v2004_v7 = vmul.f32 %v8775_v47, %v8704_v6  ;;  %v4729_v54 = vmul.f32 %v4601_v55, %v8722_v22  ;;  %v8810_v1 = vand.u32 2147483647, %v8782_v40  ;;  %v674_v22 = vpop.f32.mrf.mxu2 }
 0x1d1   : > { %15386 = vst [vmem:[#allocation206_spill] sm:$0xff] %v8761_v33  ;;  %v8814_v20 = vor.u32 1.1754944e-38, %v2029_v50  ;;  %v1990_v6 = vsub.f32 1.0, %v1989_v10  ;;  %v2044_v50 = vand.u32 2147483648, %v8778_v31  ;;  %v451_v33 = vpop.f32.mrf.mxu0 }
 0x1d2   : > { %15387 = vst [vmem:[#allocation207_spill] sm:$0xff] %v8766_v15  ;;  %6891 = vpow2.f32 %v4889_v41  ;;  %v2005_v55 = vsub.f32 1.0, %v2004_v7  ;;  %v2019_v41 = vmul.f32 %v8805_v63, %v8732_v27  ;;  %v4893_v10 = vmul.f32 1.442695, %v4729_v54 }
 0x1d3   : > { %15388 = vst [vmem:[#allocation208_spill] sm:$0xff] %v8769_v49  ;;  %v8803_v49 = vadd.f32 1.0, %v1275_v8  ;;  %v5990_v8 = vld [vmem:[#allocation8 + $0x88] sm:$0xff]  ;;  %6893 = vrcp.f32 %v8795_v5  ;;  %v8836_v7 = vmul.f32 0.5, %v8684_v13 }
 0x1d4   : > { %15389 = vst [vmem:[#allocation209_spill] sm:$0xff] %v8772_v3  ;;  %v8798_v3 = vadd.f32 %v561_v32, %v7654_v53  ;;  %v8812_v32 = vor.u32 1.1754944e-38, %v2014_v16  ;;  %6168 = vmatpush.msrb.mxu1 %v5990_v8  ;;  %v4730_v16 = vmul.f32 %v4602_v4, %v8735_v9  ;;  %v675_v4 = vadd.f32 %v674_v22, %v7662_v57 }
 0x1d5   : > { %15390 = vst [vmem:[#allocation210_spill] sm:$0xff] %v8775_v47  ;;  %6895 = vrcp.f32 %v8803_v49  ;;  %v8853_v13 = vmul.f32 %v8775_v47, %v2005_v55 }
 0x1d6   : > { %15391 = vst [vmem:[#allocation211_spill] sm:$0xff] %v8778_v31  ;;  %v8822_v36 = vmul.f32 0.70710677, %v8798_v3  ;;  %v4895_v22 = vmul.f32 1.442695, %v4730_v16 }
 0x1d7   : > { %15392 = vst [vmem:[#allocation212_spill] sm:$0xff] %v8782_v40  ;;  %v787_v40 = vpop.f32.mrf.mxu3  ;;  %v8873_v16 = vmul.f32 0.70710677, %v675_v4 }
 0x1d8   : > { %15393 = vst [vmem:[#allocation213_spill] sm:$0xff] %v8787_v29  ;;  %v8856_v27 = vadd.f32 %v787_v40, %v7664_v59 }
 0x1d9   : > { %15394 = vst [vmem:[#allocation214_spill] sm:$0xff] %v8789_v61  ;;  %v4891_v61 = vmul.f32 1.442695, %v4728_v42  ;;  %v4603_v42 = vsub.f32 0.0, %v8741_v21 }
 0x1da   : > { %15395 = vst [vmem:[#allocation215_spill] sm:$0xff] %v8793_v23  ;;  %v8817_v23 = vand.u32 2147483647, %v8787_v29  ;;  %v1276_v29 = vmul.f32 0.3275911, %v8810_v1 }
 0x1db   : > { %15396 = vst [vmem:[#allocation216_spill] sm:$0xff] %v8795_v5  ;;  %6897 = vpow2.f32 %v4891_v61  ;;  %v8843_v61 = vmul.f32 %v8766_v15, %v1990_v6  ;;  %v4731_v54 = vmul.f32 %v4603_v42, %v8741_v21  ;;  %v8860_v15 = vor.u32 1.1754944e-38, %v2044_v50  ;;  %v325_v42 = vld [vmem:[%s7620_s11 + $0xf0] sm:$0xff] }
 0x1dc   : > { %15397 = vst [vmem:[#allocation217_spill] sm:$0xff] %v8803_v49  ;;  %v1277_v8 = vmul.f32 0.3275911, %v8817_v23  ;;  %6899 = vpow2.f32 %v4893_v10  ;;  %v2059_v21 = vand.u32 2147483648, %v8795_v5  ;;  %507 = vmatmul.f32.gmra.mxu0 %v325_v42  ;;  %620 = vmatmul.f32.gmra.mxu1 %v325_v42 }
 0x1dd   : > { %15398 = vst [vmem:[#allocation218_spill] sm:$0xff] %v8805_v63  ;;  %v4897_v10 = vmul.f32 1.442695, %v4731_v54  ;;  %733 = vmatmul.f32.gmra.mxu2 %v325_v42  ;;  %846 = vmatmul.f32.gmra.mxu3 %v325_v42  ;;  %6901 = vpow2.f32 %v4895_v22  ;;  %v1151_v22 = vand.u32 2147483647, %v8873_v16 }
 0x1de   : > { %15399 = vst [vmem:[#allocation219_spill] sm:$0xff] %v8812_v32  ;;  %v8833_v32 = vmul.f32 0.5, %v8672_v30  ;;  %v1150_v30 = vand.u32 2147483647, %v8822_v36  ;;  %v8871_v40 = vadd.f32 1.0, %v1277_v8  ;;  %v4605_v8 = vsub.f32 0.0, %v8817_v23 }
 0x1df   : > { %15400 = vst [vmem:[#allocation220_spill] sm:$0xff] %v8814_v20  ;;  %v8830_v20 = vpop.eup %6887  ;;  %v8893_v42 = vor.u32 1.1754944e-38, %v2059_v21 }
 0x1e0   : > { %15401 = vst [vmem:[#allocation221_spill] sm:$0xff] %v8822_v36  ;;  %v8840_v9 = vpop.eup %6889  ;;  %v4733_v21 = vmul.f32 %v4605_v8, %v8817_v23  ;;  %v1279_v23 = vmul.f32 0.3275911, %v1151_v22 }
 0x1e1   : > { %15402 = vst [vmem:[#allocation222_spill] sm:$0xff] %v8830_v20  ;;  %v8847_v20 = vmul.f32 0.5, %v8746_v11  ;;  %v8863_v11 = vadd.f32 1.0, %v1276_v29  ;;  %v2034_v55 = vmul.f32 %v8840_v9, %v8778_v31  ;;  %v4604_v29 = vsub.f32 0.0, %v8810_v1 }
 0x1e2   : > { %15403 = vst [vmem:[#allocation223_spill] sm:$0xff] %v8833_v32  ;;  %v8850_v32 = vpop.eup %6891 }
 0x1e3   : > { %15404 = vst [vmem:[#allocation224_spill] sm:$0xff] %v8836_v7  ;;  %v2020_v7 = vsub.f32 1.0, %v2019_v41  ;;  %v8858_v6 = vpop.eup %6893  ;;  %v2074_v41 = vand.u32 2147483648, %v8803_v49  ;;  %6903 = vrcp.f32 %v8863_v11  ;;  %v2035_v47 = vsub.f32 1.0, %v2034_v55 }
 0x1e4   : > { %15405 = vst [vmem:[#allocation225_spill] sm:$0xff] %v8840_v9  ;;  %v8866_v36 = vpop.eup %6895  ;;  %v2049_v31 = vmul.f32 %v8858_v6, %v8795_v5  ;;  %6905 = vrcp.f32 %v8871_v40 }
 0x1e5   : > { %15406 = vst [vmem:[#allocation226_spill] sm:$0xff] %v8843_v61  ;;  %v8875_v50 = vpop.eup %6897  ;;  %v2064_v54 = vmul.f32 %v8866_v36, %v8803_v49  ;;  %6907 = vpow2.f32 %v4897_v10 }
 0x1e6   : > { %15407 = vst [vmem:[#allocation227_spill] sm:$0xff] %v8847_v20  ;;  %v1278_v20 = vmul.f32 0.3275911, %v1150_v30  ;;  %v8897_v5 = vpop.eup %6899  ;;  %v2050_v61 = vsub.f32 1.0, %v2049_v31  ;;  %v8922_v31 = vmul.f32 0.5, %v675_v4  ;;  %v2089_v4 = vand.u32 2147483648, %v8863_v11 }
 0x1e7   : > { %15408 = vst [vmem:[#allocation228_spill] sm:$0xff] %v8850_v32  ;;  %v8885_v32 = vmul.f32 0.70710677, %v8856_v27 }
 0x1e8   : > { %15409 = vst [vmem:[#allocation229_spill] sm:$0xff] %v8853_v13  ;;  %v8899_v13 = vor.u32 1.1754944e-38, %v2074_v41  ;;  %v8912_v41 = vmul.f32 0.5, %v8756_v18 }
 0x1e9   : > { %15410 = vst [vmem:[#allocation230_spill] sm:$0xff] %v8858_v6  ;;  %v8909_v55 = vand.u32 2147483647, %v8885_v32 }
 0x1ea   : > { %15411 = vst [vmem:[#allocation231_spill] sm:$0xff] %v8860_v15  ;;  %v8879_v15 = vadd.f32 %v451_v33, %v7652_v51  ;;  %v4606_v33 = vsub.f32 0.0, %v1150_v30 }
 0x1eb   : > { %15412 = vst [vmem:[#allocation232_spill] sm:$0xff] %v8863_v11 }
 0x1ec   : > { %15413 = vst [vmem:[#allocation233_spill] sm:$0xff] %v8866_v36  ;;  %v8905_v49 = vmul.f32 0.70710677, %v8879_v15 }
 0x1ed   : > { %15414 = vst [vmem:[#allocation234_spill] sm:$0xff] %v8871_v40 }
 0x1ee   : > { %15415 = vst [vmem:[#allocation235_spill] sm:$0xff] %v8873_v16  ;;  %v677_v16 = vpop.f32.mrf.mxu2  ;;  %v8931_v18 = vand.u32 2147483647, %v8905_v49 }
 0x1ef   : > { %15416 = vst [vmem:[#allocation236_spill] sm:$0xff] %v8875_v50  ;;  %v8888_v50 = vmul.f32 %v8805_v63, %v2020_v7  ;;  %v4732_v7 = vmul.f32 %v4604_v29, %v8810_v1  ;;  %v8902_v63 = vadd.f32 1.0, %v1278_v20  ;;  %v8915_v1 = vmul.f32 0.5, %v8798_v3  ;;  %v8917_v29 = vpop.eup %6901 }
 0x1f0   : > { %15417 = vst [vmem:[#allocation237_spill] sm:$0xff] %v8885_v32  ;;  %v4734_v20 = vmul.f32 %v4606_v33, %v1150_v30  ;;  %v8927_v8 = vpop.eup %6903  ;;  %v8934_v3 = vadd.f32 %v677_v16, %v7662_v57  ;;  %v1280_v33 = vmul.f32 0.3275911, %v8909_v55  ;;  %v790_v32 = vpop.f32.mrf.mxu3 }
 0x1f1   : > { %15418 = vst [vmem:[#allocation238_spill] sm:$0xff] %v8888_v50  ;;  %v564_v50 = vpop.f32.mrf.mxu1  ;;  %6909 = vrcp.f32 %v8902_v63  ;;  %v8936_v30 = vpop.eup %6905 }
 0x1f2   : > { %15419 = vst [vmem:[#allocation239_spill] sm:$0xff] %v8893_v42  ;;  %v2065_v42 = vsub.f32 1.0, %v2064_v54  ;;  %v8925_v10 = vadd.f32 %v564_v50, %v7654_v53  ;;  %v4899_v54 = vmul.f32 1.442695, %v4732_v7  ;;  %v4901_v50 = vmul.f32 1.442695, %v4733_v21  ;;  %v8947_v16 = vpop.eup %6907 }
 0x1f3   : > { %15420 = vst [vmem:[#allocation240_spill] sm:$0xff] %v8897_v5  ;;  %v8920_v5 = vmul.f32 %v8840_v9, %v2035_v47  ;;  %v8939_v47 = vmul.f32 %v8858_v6, %v2050_v61  ;;  %v2119_v61 = vand.u32 2147483648, %v8902_v63  ;;  %v5973_v6 = vld [vmem:[#allocation8] sm:$0xff]  ;;  %v4608_v9 = vsub.f32 0.0, %v8909_v55 }
 0x1f4   : > { %15421 = vst [vmem:[#allocation241_spill] sm:$0xff] %v8899_v13  ;;  %v8944_v7 = vmul.f32 %v8866_v36, %v2065_v42  ;;  %v8955_v21 = vmul.f32 0.70710677, %v8925_v10  ;;  %6911 = vpow2.f32 %v4899_v54  ;;  %v2094_v42 = vmul.f32 %v8936_v30, %v8871_v40  ;;  %v6021_v54 = vld [vmem:[#allocation8 + $0x180] sm:$0xff]  ;;  %6056 = vmatpush.msrb.mxu0 %v5973_v6 }
 0x1f5   : > { %15422 = vst [vmem:[#allocation242_spill] sm:$0xff] %v8902_v63  ;;  %v8961_v13 = vmul.f32 0.70710677, %v8934_v3  ;;  %6913 = vpow2.f32 %v4901_v50  ;;  %v8965_v36 = vadd.f32 1.0, %v1280_v33  ;;  %v8975_v33 = vor.u32 1.1754944e-38, %v2119_v61  ;;  %6395 = vmatpush.msrb.mxu3 %v6021_v54 }
 0x1f6   : > { %15423 = vst [vmem:[#allocation243_spill] sm:$0xff] %v8905_v49  ;;  %v4903_v49 = vmul.f32 1.442695, %v4734_v20  ;;  %v1281_v20 = vmul.f32 0.3275911, %v8931_v18 }
 0x1f7   : > { %15424 = vst [vmem:[#allocation244_spill] sm:$0xff] %v8912_v41  ;;  %v2079_v41 = vmul.f32 %v8927_v8, %v8863_v11  ;;  %v8988_v6 = vand.u32 2147483647, %v8961_v13 }
 0x1f8   : > { %15425 = vst [vmem:[#allocation245_spill] sm:$0xff] %v8915_v1  ;;  %v4607_v1 = vsub.f32 0.0, %v1151_v22  ;;  %6915 = vpow2.f32 %v4903_v49  ;;  %v8983_v49 = vmul.f32 0.5, %v8856_v27 }
 0x1f9   : > { %15426 = vst [vmem:[#allocation246_spill] sm:$0xff] %v8917_v29  ;;  %v8952_v29 = vadd.f32 1.0, %v1279_v23  ;;  %v8968_v23 = vadd.f32 %v790_v32, %v7664_v59  ;;  %v2080_v50 = vsub.f32 1.0, %v2079_v41  ;;  %v8979_v32 = vand.u32 2147483647, %v8955_v21  ;;  %v454_v41 = vpop.f32.mrf.mxu0  ;;  %v567_v27 = vpop.f32.mrf.mxu1 }
 0x1fa   : > { %15427 = vst [vmem:[#allocation247_spill] sm:$0xff] %v8922_v31  ;;  %v2104_v31 = vand.u32 2147483648, %v8871_v40  ;;  %v4735_v11 = vmul.f32 %v4607_v1, %v1151_v22  ;;  %v8985_v22 = vadd.f32 1.0, %v1281_v20 }
 0x1fb   : > { %15428 = vst [vmem:[#allocation248_spill] sm:$0xff] %v8927_v8  ;;  %6917 = vrcp.f32 %v8952_v29  ;;  %v8995_v61 = vmul.f32 0.70710677, %v8968_v23  ;;  %v2134_v20 = vand.u32 2147483648, %v8952_v29 }
 0x1fc   : > { %15429 = vst [vmem:[#allocation249_spill] sm:$0xff] %v8936_v30  ;;  %v8972_v40 = vor.u32 1.1754944e-38, %v2104_v31  ;;  %v2095_v31 = vsub.f32 1.0, %v2094_v42  ;;  %6919 = vrcp.f32 %v8965_v36  ;;  %v4905_v54 = vmul.f32 1.442695, %v4735_v11 }
 0x1fd   : > { %15430 = vst [vmem:[#allocation250_spill] sm:$0xff] %v8939_v47  ;;  %v8970_v47 = vpop.eup %6909  ;;  %6921 = vrcp.f32 %v8985_v22  ;;  %v9022_v11 = vadd.f32 %v567_v27, %v7654_v53  ;;  %v2149_v27 = vand.u32 2147483648, %v8965_v36 }
 0x1fe   : > { %15431 = vst [vmem:[#allocation251_spill] sm:$0xff] %v8944_v7  ;;  %v6005_v7 = vld [vmem:[#allocation8 + $0x100] sm:$0xff]  ;;  %v2109_v1 = vmul.f32 %v8970_v47, %v8902_v63  ;;  %v8997_v42 = vpop.eup %6911  ;;  %v455_v63 = vadd.f32 %v454_v41, %v7652_v51  ;;  %6923 = vpow2.f32 %v4905_v54 }
 0x1ff   : > { %15432 = vst [vmem:[#allocation252_spill] sm:$0xff] %v8947_v16  ;;  %v8963_v16 = vor.u32 1.1754944e-38, %v2089_v4  ;;  %6282 = vmatpush.msrb.mxu2 %v6005_v7  ;;  %v5989_v4 = vld [vmem:[#allocation8 + $0x80] sm:$0xff]  ;;  %v4609_v7 = vsub.f32 0.0, %v8931_v18  ;;  %v9048_v54 = vmul.f32 0.70710677, %v9022_v11 }
 0x200   : > { %15433 = vst [vmem:[#allocation253_spill] sm:$0xff] %v8952_v29  ;;  %6169 = vmatpush.msrb.mxu1 %v5989_v4  ;;  %v4736_v4 = vmul.f32 %v4608_v9, %v8909_v55  ;;  %v9017_v9 = vmul.f32 %v8936_v30, %v2095_v31  ;;  %v2164_v30 = vand.u32 2147483648, %v8985_v22 }
 0x201   : > { %15434 = vst [vmem:[#allocation254_spill] sm:$0xff] %v8955_v21  ;;  %v680_v21 = vpop.f32.mrf.mxu2 }
 0x202   : > { %15435 = vst [vmem:[#allocation255_spill] sm:$0xff] %v8961_v13  ;;  %v9002_v13 = vmul.f32 0.5, %v8879_v15  ;;  %v1283_v15 = vmul.f32 0.3275911, %v8988_v6  ;;  %v9029_v41 = vadd.f32 %v680_v21, %v7662_v57  ;;  %v4907_v31 = vmul.f32 1.442695, %v4736_v4 }
 0x203   : > { %15436 = vst [vmem:[#allocation256_spill] sm:$0xff] %v8963_v16  ;;  %v326_v16 = vld [vmem:[%s7620_s11 + $0xf8] sm:$0xff]  ;;  %s6540_s11 = sshll.u32 %s6537_s27, 4  ;;  %s6541_s11 = int_to_ptr.hbm [resolvable:$true] %s6540_s11 }
 0x204   : > { %15437 = vst [vmem:[#allocation257_spill] sm:$0xff] %v8965_v36  ;;  %510 = vmatmul.f32.gmra.mxu0 %v326_v16  ;;  %623 = vmatmul.f32.gmra.mxu1 %v326_v16  ;;  %6925 = vpow2.f32 %v4907_v31  ;;  %v1158_v31 = vand.u32 2147483647, %v9048_v54  ;;  %s7398_s29 = sshra.s32 %s6541_s11, 4  ;;  %s7399_s29 = int_to_ptr.hbm [resolvable:$true] %s7398_s29 }
 0x205   : > { %15438 = vst [vmem:[#allocation258_spill] sm:$0xff] %v8970_v47  ;;  %736 = vmatmul.f32.gmra.mxu2 %v326_v16  ;;  %849 = vmatmul.f32.gmra.mxu3 %v326_v16  ;;  %v1282_v16 = vmul.f32 0.3275911, %v8979_v32  ;;  %s7400_s22 = scalar_lea.hbm %s7399_s29, 256  ;;  %p7405_p11 = scmp.lt.s32.totalorder %s7399_s29, %s14513_s5 }
 0x206   : > { %15439 = vst [vmem:[#allocation259_spill] sm:$0xff] %v8972_v40  ;;  %v9010_v40 = vmul.f32 0.5, %v8925_v10  ;;  %v2110_v10 = vsub.f32 1.0, %v2109_v1  ;;  %p7401_p1 = scmp.ne.s32.totalorder %s7399_s29, %s7400_s22  ;;  %p7406_p9 = scmp.lt.s32.totalorder %s7404_s26, %s7400_s22 }
 0x207   : > { %15440 = vst [vmem:[#allocation260_spill] sm:$0xff] %v8975_v33  ;;  %v9007_v33 = vmul.f32 %v8927_v8, %v2080_v50  ;;  %v4737_v50 = vmul.f32 %v4609_v7, %v8931_v18  ;;  %v9038_v1 = vadd.f32 1.0, %v1282_v16  ;;  %v9040_v18 = vmul.f32 0.70710677, %v455_v63 }
 0x208   : > { %15441 = vst [vmem:[#allocation261_spill] sm:$0xff] %v8983_v49  ;;  %v9004_v49 = vpop.eup %6913  ;;  %v9044_v7 = vadd.f32 1.0, %v1283_v15  ;;  %v9053_v4 = vmul.f32 %v8970_v47, %v2110_v10  ;;  %v9065_v10 = vor.u32 1.1754944e-38, %v2149_v27  ;;  %v457_v27 = vpop.f32.mrf.mxu0  ;;  %p7402_p4 = pnand %p7401_p1, %p7584_p3  ;;  %p7407_p2 = por %p7406_p9, %p7405_p11 }
 0x209   : > { %15442 = vst [vmem:[#allocation262_spill] sm:$0xff] %v8985_v22  ;;  %v4909_v16 = vmul.f32 1.442695, %v4737_v50  ;;  %v9067_v50 = vor.u32 1.1754944e-38, %v2164_v30  ;;  %6927 = vrcp.f32 %v9038_v1  ;;  %v1157_v47 = vand.u32 2147483647, %v9040_v18 }
 0x20a   : > { %15443 = vst [vmem:[#allocation263_spill] sm:$0xff] %v8995_v61  ;;  %6929 = vrcp.f32 %v9044_v7  ;;  %p7403_p8 = pneg %p7402_p4 }
 0x20b   : > { %15444 = vst [vmem:[#allocation264_spill] sm:$0xff] %v8997_v42  ;;  %v9014_v42 = vpop.eup %6915  ;;  %6931 = vpow2.f32 %v4909_v16 }
 0x20c   : > { %15445 = vst [vmem:[#allocation265_spill] sm:$0xff] %v9002_v13  ;;  %v9024_v55 = vpop.eup %6917  ;;  %v9031_v13 = vor.u32 1.1754944e-38, %v2134_v20  ;;  %v4611_v20 = vsub.f32 0.0, %v8988_v6  ;;  %6057 = vmatmul.f32.vlgmr.msrb.gmra.mxu0 %v7977_v48  ;;  %6170 = vmatmul.f32.vlgmr.msrb.gmra.mxu1 %v7985_v60  ;;  %p7408_p10 = pnand %p7407_p2, %p7403_p8 }
 0x20d   : > { %15446 = vst [vmem:[#allocation266_spill] sm:$0xff] %v9004_v49  ;;  %v9034_v49 = vpop.eup %6919  ;;  %v2124_v21 = vmul.f32 %v9024_v55, %v8952_v29  ;;  %6283 = vmatmul.f32.vlgmr.msrb.gmra.mxu2 %v8010_v45  ;;  %6396 = vmatmul.f32.vlgmr.msrb.gmra.mxu3 %v8013_v43 }
 0x20e   : > { %15447 = vst [vmem:[#allocation267_spill] sm:$0xff] %v9010_v40  ;;  %v1156_v40 = vand.u32 2147483647, %v8995_v61  ;;  %v9060_v15 = vpop.eup %6921  ;;  %v2139_v29 = vmul.f32 %v9034_v49, %v8965_v36  ;;  %v793_v36 = vpop.f32.mrf.mxu3 }
 0x20f   : > { %15448 = vst [vmem:[#allocation268_spill] sm:$0xff] %v9014_v42  ;;  %v4610_v42 = vsub.f32 0.0, %v8979_v32  ;;  %v9071_v45 = vpop.eup %6923  ;;  %v2125_v43 = vsub.f32 1.0, %v2124_v21  ;;  %v9084_v21 = vmul.f32 0.5, %v8934_v3  ;;  %v9092_v16 = vadd.f32 %v793_v36, %v7664_v59 }
 0x210   : > { %15449 = vst [vmem:[#allocation269_spill] sm:$0xff] %v9017_v9  ;;  %v1284_v61 = vmul.f32 0.3275911, %v1156_v40  ;;  %v4612_v60 = vsub.f32 0.0, %v1156_v40  ;;  %v9100_v3 = vadd.f32 %v457_v27, %v7652_v51 }
 0x211   : > { %15450 = vst [vmem:[#allocation270_spill] sm:$0xff] %v9024_v55  ;;  %v4738_v48 = vmul.f32 %v4610_v42, %v8979_v32  ;;  %v2154_v32 = vmul.f32 %v9060_v15, %v8985_v22  ;;  %v9119_v22 = vmul.f32 0.70710677, %v9092_v16 }
 0x212   : > { %15451 = vst [vmem:[#allocation271_spill] sm:$0xff] %v9031_v13  ;;  %v9056_v13 = vmul.f32 0.70710677, %v9029_v41  ;;  %v9078_v30 = vadd.f32 1.0, %v1284_v61  ;;  %v9094_v61 = vpop.eup %6925 }
 0x213   : > { %15452 = vst [vmem:[#allocation272_spill] sm:$0xff] %v9034_v49 }
 0x214   : > { %15453 = vst [vmem:[#allocation273_spill] sm:$0xff] %v9038_v1  ;;  %v9081_v42 = vand.u32 2147483647, %v9056_v13  ;;  %6933 = vrcp.f32 %v9078_v30 }
 0x215   : > { %15454 = vst [vmem:[#allocation274_spill] sm:$0xff] %v9040_v18  ;;  %v2140_v18 = vsub.f32 1.0, %v2139_v29 }
 0x216   : > { %15455 = vst [vmem:[#allocation275_spill] sm:$0xff] %v9044_v7  ;;  %v1287_v36 = vmul.f32 0.3275911, %v9081_v42 }
 0x217   : > { %15456 = vst [vmem:[#allocation276_spill] sm:$0xff] %v9048_v54  ;;  %v1285_v54 = vmul.f32 0.3275911, %v1157_v47 }
 0x218   : > { %15457 = vst [vmem:[#allocation277_spill] sm:$0xff] %v9053_v4  ;;  %v4739_v4 = vmul.f32 %v4611_v20, %v8988_v6  ;;  %v9087_v6 = vmul.f32 0.5, %v8968_v23  ;;  %v9089_v20 = vmul.f32 0.5, %v455_v63  ;;  %v2155_v23 = vsub.f32 1.0, %v2154_v32 }
 0x219   : > { %15458 = vst [vmem:[#allocation278_spill] sm:$0xff] %v9056_v13  ;;  %v9097_v13 = vmul.f32 %v9024_v55, %v2125_v43  ;;  %v2179_v63 = vand.u32 2147483648, %v9038_v1  ;;  %v9110_v43 = vmul.f32 %v9034_v49, %v2140_v18  ;;  %v2209_v32 = vand.u32 2147483648, %v9078_v30 }
 0x21a   : > { %15459 = vst [vmem:[#allocation279_spill] sm:$0xff] %v9060_v15  ;;  %v4913_v29 = vmul.f32 1.442695, %v4739_v4  ;;  %v2194_v4 = vand.u32 2147483648, %v9044_v7  ;;  %v9124_v18 = vmul.f32 0.70710677, %v9100_v3 }
 0x21b   : > { %15460 = vst [vmem:[#allocation280_spill] sm:$0xff] %v9065_v10  ;;  %v9133_v49 = vadd.f32 1.0, %v1287_v36  ;;  %v683_v36 = vpop.f32.mrf.mxu2 }
 0x21c   : > { %15461 = vst [vmem:[#allocation281_spill] sm:$0xff] %v9067_v50  ;;  %v4911_v50 = vmul.f32 1.442695, %v4738_v48  ;;  %v1286_v48 = vmul.f32 0.3275911, %v1158_v31 }
 0x21d   : > { %15462 = vst [vmem:[#allocation282_spill] sm:$0xff] %v9071_v45  ;;  %v4740_v45 = vmul.f32 %v4612_v60, %v1156_v40  ;;  %v9102_v40 = vpop.eup %6927  ;;  %v570_v60 = vpop.f32.mrf.mxu1 }
 0x21e   : > { %15463 = vst [vmem:[#allocation283_spill] sm:$0xff] %v9078_v30  ;;  %6935 = vpow2.f32 %v4911_v50  ;;  %v9121_v10 = vadd.f32 1.0, %v1286_v48  ;;  %v9127_v50 = vadd.f32 %v570_v60, %v7654_v53  ;;  %v4615_v48 = vsub.f32 0.0, %v9081_v42 }
 0x21f   : > { %15464 = vst [vmem:[#allocation284_spill] sm:$0xff] %v9084_v21  ;;  %v4915_v27 = vmul.f32 1.442695, %v4740_v45  ;;  %v9116_v21 = vadd.f32 1.0, %v1285_v54  ;;  %6937 = vpow2.f32 %v4913_v29  ;;  %v2169_v45 = vmul.f32 %v9102_v40, %v9038_v1 }
 0x220   : > { %15465 = vst [vmem:[#allocation285_spill] sm:$0xff] %v9087_v6  ;;  %v9138_v29 = vor.u32 1.1754944e-38, %v2179_v63  ;;  %v9143_v60 = vor.u32 1.1754944e-38, %v2194_v4  ;;  %v9155_v63 = vand.u32 2147483647, %v9124_v18  ;;  %v796_v4 = vpop.f32.mrf.mxu3 }
 0x221   : > { %15466 = vst [vmem:[#allocation286_spill] sm:$0xff] %v9089_v20  ;;  %v9107_v20 = vpop.eup %6929  ;;  %6939 = vpow2.f32 %v4915_v27  ;;  %v9158_v27 = vmul.f32 0.70710677, %v9127_v50 }
 0x222   : > { %15467 = vst [vmem:[#allocation287_spill] sm:$0xff] %v9094_v61  ;;  %v9113_v6 = vpop.eup %6931  ;;  %v4613_v61 = vsub.f32 0.0, %v1157_v47  ;;  %v2184_v54 = vmul.f32 %v9107_v20, %v9044_v7  ;;  %6941 = vrcp.f32 %v9116_v21  ;;  %v9147_v7 = vand.u32 2147483647, %v9119_v22 }
 0x223   : > { %15468 = vst [vmem:[#allocation288_spill] sm:$0xff] %v9097_v13  ;;  %v9141_v55 = vpop.eup %6933  ;;  %6943 = vrcp.f32 %v9121_v10 }
 0x224   : > { %15469 = vst [vmem:[#allocation289_spill] sm:$0xff] %v9102_v40  ;;  %v4741_v1 = vmul.f32 %v4613_v61, %v1157_v47  ;;  %v9149_v13 = vpop.eup %6935  ;;  %6945 = vrcp.f32 %v9133_v49  ;;  %v460_v61 = vpop.f32.mrf.mxu0 }
 0x225   : > { %15470 = vst [vmem:[#allocation290_spill] sm:$0xff] %v9107_v20 }
 0x226   : > { %15471 = vst [vmem:[#allocation291_spill] sm:$0xff] %v9110_v43  ;;  %v9136_v43 = vmul.f32 %v9060_v15, %v2155_v23  ;;  %v9151_v23 = vor.u32 1.1754944e-38, %v2209_v32  ;;  %v2199_v32 = vmul.f32 %v9141_v55, %v9078_v30  ;;  %v4917_v15 = vmul.f32 1.442695, %v4741_v1  ;;  %v573_v30 = vpop.f32.mrf.mxu1 }
 0x227   : > { %15472 = vst [vmem:[#allocation292_spill] sm:$0xff] %v9113_v6  ;;  %v4614_v6 = vsub.f32 0.0, %v1158_v31  ;;  %v9185_v1 = vadd.f32 %v460_v61, %v7652_v51 }
 0x228   : > { %15473 = vst [vmem:[#allocation293_spill] sm:$0xff] %v9116_v21  ;;  %6947 = vpow2.f32 %v4917_v15  ;;  %v4616_v15 = vsub.f32 0.0, %v9147_v7 }
 0x229   : > { %15474 = vst [vmem:[#allocation294_spill] sm:$0xff] %v9119_v22  ;;  %v4742_v47 = vmul.f32 %v4614_v6, %v1158_v31  ;;  %v9161_v22 = vpop.eup %6937  ;;  %v1288_v31 = vmul.f32 0.3275911, %v9147_v7  ;;  %v9173_v6 = vadd.f32 %v796_v4, %v7664_v59 }
 0x22a   : > { %15475 = vst [vmem:[#allocation295_spill] sm:$0xff] %v9121_v10 }
 0x22b   : > { %15476 = vst [vmem:[#allocation296_spill] sm:$0xff] %v9124_v18  ;;  %v4743_v18 = vmul.f32 %v4615_v48, %v9081_v42  ;;  %v9182_v42 = vand.u32 2147483647, %v9158_v27  ;;  %v4919_v4 = vmul.f32 1.442695, %v4742_v47 }
 0x22c   : > { %15477 = vst [vmem:[#allocation297_spill] sm:$0xff] %v9133_v49  ;;  %v9210_v47 = vmul.f32 0.70710677, %v9173_v6 }
 0x22d   : > { %15478 = vst [vmem:[#allocation298_spill] sm:$0xff] %v9136_v43  ;;  %v9169_v43 = vmul.f32 0.5, %v9022_v11  ;;  %6949 = vpow2.f32 %v4919_v4 }
 0x22e   : > { %15479 = vst [vmem:[#allocation299_spill] sm:$0xff] %v9138_v29  ;;  %v2185_v29 = vsub.f32 1.0, %v2184_v54  ;;  %v9178_v54 = vmul.f32 0.5, %v9029_v41  ;;  %v9196_v41 = vmul.f32 0.5, %v9092_v16  ;;  %v2254_v16 = vand.u32 2147483648, %v9133_v49 }
 0x22f   : > { %15480 = vst [vmem:[#allocation300_spill] sm:$0xff] %v9141_v55  ;;  %v9237_v4 = vand.u32 2147483647, %v9210_v47 }
 0x230   : > { %15481 = vst [vmem:[#allocation301_spill] sm:$0xff] %v9143_v60  ;;  %v2170_v60 = vsub.f32 1.0, %v2169_v45  ;;  %v9175_v45 = vpop.eup %6939 }
 0x231   : > { %15482 = vst [vmem:[#allocation302_spill] sm:$0xff] %v9149_v13  ;;  %v2224_v13 = vand.u32 2147483648, %v9116_v21  ;;  %v9187_v11 = vpop.eup %6941 }
 0x232   : > { %15483 = vst [vmem:[#allocation303_spill] sm:$0xff] %v9151_v23  ;;  %v684_v23 = vadd.f32 %v683_v36, %v7662_v57  ;;  %v9190_v48 = vmul.f32 %v9102_v40, %v2170_v60  ;;  %v9193_v36 = vmul.f32 %v9107_v20, %v2185_v29  ;;  %v2239_v60 = vand.u32 2147483648, %v9121_v10 }
 0x233   : > { %15484 = vst [vmem:[#allocation304_spill] sm:$0xff] %v9158_v27  ;;  %v9200_v27 = vor.u32 1.1754944e-38, %v2224_v13  ;;  %v9207_v29 = vadd.f32 1.0, %v1288_v31  ;;  %v1290_v13 = vmul.f32 0.3275911, %v9182_v42  ;;  %v9223_v31 = vadd.f32 %v573_v30, %v7654_v53 }
 0x234   : > { %15485 = vst [vmem:[#allocation305_spill] sm:$0xff] %v9161_v22  ;;  %v1289_v22 = vmul.f32 0.3275911, %v9155_v63  ;;  %v9202_v61 = vmul.f32 0.70710677, %v684_v23  ;;  %v9233_v40 = vor.u32 1.1754944e-38, %v2239_v60  ;;  %v4744_v60 = vmul.f32 %v4616_v15, %v9147_v7 }
 0x235   : > { %15486 = vst [vmem:[#allocation306_spill] sm:$0xff] %v9169_v43  ;;  %v2200_v43 = vsub.f32 1.0, %v2199_v32  ;;  %v2214_v32 = vmul.f32 %v9187_v11, %v9116_v21  ;;  %v9239_v30 = vor.u32 1.1754944e-38, %v2254_v16  ;;  %v4618_v21 = vsub.f32 0.0, %v9182_v42 }
 0x236   : > { %15487 = vst [vmem:[#allocation307_spill] sm:$0xff] %v9175_v45  ;;  %v4921_v45 = vmul.f32 1.442695, %v4743_v18  ;;  %v9217_v18 = vmul.f32 0.70710677, %v9185_v1  ;;  %v9262_v7 = vmul.f32 0.5, %v9127_v50 }
 0x237   : > { %15488 = vst [vmem:[#allocation308_spill] sm:$0xff] %v9178_v54  ;;  %v9198_v54 = vpop.eup %6943  ;;  %v1163_v20 = vand.u32 2147483647, %v9202_v61  ;;  %v4923_v50 = vmul.f32 1.442695, %v4744_v60 }
 0x238   : > { %15489 = vst [vmem:[#allocation309_spill] sm:$0xff] %v9190_v48  ;;  %v9204_v9 = vpop.eup %6945  ;;  %6951 = vpow2.f32 %v4921_v45  ;;  %v9245_v45 = vand.u32 2147483647, %v9217_v18 }
 0x239   : > { %15490 = vst [vmem:[#allocation310_spill] sm:$0xff] %v9193_v36  ;;  %v9231_v36 = vmul.f32 %v9141_v55, %v2200_v43  ;;  %6953 = vrcp.f32 %v9207_v29  ;;  %v2215_v43 = vsub.f32 1.0, %v2214_v32  ;;  %v1292_v32 = vmul.f32 0.3275911, %v9237_v4 }
 0x23a   : > { %15491 = vst [vmem:[#allocation311_spill] sm:$0xff] %v9196_v41  ;;  %v9213_v41 = vadd.f32 1.0, %v1289_v22  ;;  %v2244_v22 = vmul.f32 %v9204_v9, %v9133_v49  ;;  %v9252_v49 = vmul.f32 0.70710677, %v9223_v31 }
 0x23b   : > { %15492 = vst [vmem:[#allocation312_spill] sm:$0xff] %v9198_v54 }
 0x23c   : > { %15493 = vst [vmem:[#allocation313_spill] sm:$0xff] %v9200_v27  ;;  %v2229_v27 = vmul.f32 %v9198_v54, %v9121_v10  ;;  %6955 = vrcp.f32 %v9213_v41  ;;  %v9242_v10 = vadd.f32 1.0, %v1290_v13  ;;  %v1291_v13 = vmul.f32 0.3275911, %v1163_v20 }
 0x23d   : > { %15494 = vst [vmem:[#allocation314_spill] sm:$0xff] %v9202_v61  ;;  %v9247_v61 = vpop.eup %6947  ;;  %v2284_v60 = vand.u32 2147483648, %v9213_v41 }
 0x23e   : > { %15495 = vst [vmem:[#allocation315_spill] sm:$0xff] %v9204_v9  ;;  %v2230_v16 = vsub.f32 1.0, %v2229_v27  ;;  %v9255_v55 = vpop.eup %6949  ;;  %6957 = vrcp.f32 %v9242_v10  ;;  %v9268_v27 = vmul.f32 0.5, %v684_v23  ;;  %v9292_v8 = vadd.f32 1.0, %v1291_v13 }
 0x23f   : > { %15496 = vst [vmem:[#allocation316_spill] sm:$0xff] %v9207_v29  ;;  %v9265_v15 = vpop.eup %6951  ;;  %6959 = vpow2.f32 %v4923_v50  ;;  %v4621_v50 = vsub.f32 0.0, %v9245_v45 }
 0x240   : > { %15497 = vst [vmem:[#allocation317_spill] sm:$0xff] %v9210_v47  ;;  %v686_v47 = vpop.f32.mrf.mxu2  ;;  %v9274_v48 = vpop.eup %6953  ;;  %v9286_v23 = vmul.f32 %v9198_v54, %v2230_v16  ;;  %6961 = vrcp.f32 %v9292_v8 }
 0x241   : > { %15498 = vst [vmem:[#allocation318_spill] sm:$0xff] %v9213_v41  ;;  %v2259_v16 = vmul.f32 %v9274_v48, %v9207_v29 }
 0x242   : > { %15499 = vst [vmem:[#allocation319_spill] sm:$0xff] %v9217_v18  ;;  %v2269_v18 = vand.u32 2147483648, %v9207_v29  ;;  %v9333_v29 = vmul.f32 0.5, %v9173_v6 }
 0x243   : > { %15500 = vst [vmem:[#allocation320_spill] sm:$0xff] %v9231_v36  ;;  %v799_v36 = vpop.f32.mrf.mxu3 }
 0x244   : > { %15501 = vst [vmem:[#allocation321_spill] sm:$0xff] %v9233_v40  ;;  %v4617_v40 = vsub.f32 0.0, %v9155_v63 }
 0x245   : > { %15502 = vst [vmem:[#allocation322_spill] sm:$0xff] %v9239_v30  ;;  %v2245_v30 = vsub.f32 1.0, %v2244_v22  ;;  %v1293_v22 = vmul.f32 0.3275911, %v9245_v45 }
 0x246   : > { %15503 = vst [vmem:[#allocation323_spill] sm:$0xff] %v9242_v10 }
 0x247   : > { %15504 = vst [vmem:[#allocation324_spill] sm:$0xff] %v9247_v61  ;;  %v9259_v61 = vmul.f32 0.5, %v9100_v3  ;;  %v9277_v3 = vmul.f32 %v9187_v11, %v2215_v43  ;;  %v9294_v43 = vor.u32 1.1754944e-38, %v2269_v18  ;;  %v9304_v54 = vadd.f32 1.0, %v1293_v22 }
 0x248   : > { %15505 = vst [vmem:[#allocation325_spill] sm:$0xff] %v9252_v49  ;;  %v4620_v22 = vsub.f32 0.0, %v9237_v4 }
 0x249   : > { %15506 = vst [vmem:[#allocation326_spill] sm:$0xff] %v9255_v55  ;;  %v9272_v55 = vadd.f32 %v686_v47, %v7662_v57  ;;  %v9289_v47 = vmul.f32 %v9204_v9, %v2245_v30 }
 0x24a   : > { %15507 = vst [vmem:[#allocation327_spill] sm:$0xff] %v9259_v61  ;;  %v9281_v61 = vand.u32 2147483647, %v9252_v49  ;;  %v4619_v49 = vsub.f32 0.0, %v1163_v20 }
 0x24b   : > { %15508 = vst [vmem:[#allocation328_spill] sm:$0xff] %v9262_v7  ;;  %v4745_v7 = vmul.f32 %v4617_v40, %v9155_v63  ;;  %v9297_v40 = vadd.f32 1.0, %v1292_v32  ;;  %v9300_v63 = vadd.f32 %v799_v36, %v7664_v59  ;;  %v9307_v30 = vmul.f32 0.70710677, %v9272_v55 }
 0x24c   : > { %15509 = vst [vmem:[#allocation329_spill] sm:$0xff] %v9265_v15  ;;  %v9283_v15 = vpop.eup %6955  ;;  %v1294_v18 = vmul.f32 0.3275911, %v9281_v61  ;;  %v2299_v36 = vand.u32 2147483648, %v9242_v10  ;;  %v4747_v9 = vmul.f32 %v4619_v49, %v1163_v20  ;;  %v2314_v20 = vand.u32 2147483648, %v9292_v8 }
 0x24d   : > { %15510 = vst [vmem:[#allocation330_spill] sm:$0xff] %v9268_v27  ;;  %v4746_v27 = vmul.f32 %v4618_v21, %v9182_v42  ;;  %v2274_v21 = vmul.f32 %v9283_v15, %v9213_v41  ;;  %v4925_v42 = vmul.f32 1.442695, %v4745_v7  ;;  %v9312_v13 = vpop.eup %6957  ;;  %6963 = vrcp.f32 %v9297_v40 }
 0x24e   : > { %15511 = vst [vmem:[#allocation331_spill] sm:$0xff] %v9274_v48  ;;  %v9322_v41 = vmul.f32 0.70710677, %v9300_v63  ;;  %v2260_v7 = vsub.f32 1.0, %v2259_v16  ;;  %6965 = vrcp.f32 %v9304_v54  ;;  %v4748_v16 = vmul.f32 %v4620_v22, %v9237_v4  ;;  %v9336_v49 = vpop.eup %6959 }
 0x24f   : > { %15512 = vst [vmem:[#allocation332_spill] sm:$0xff] %v9283_v15  ;;  %v4927_v32 = vmul.f32 1.442695, %v4746_v27  ;;  %v2275_v27 = vsub.f32 1.0, %v2274_v21  ;;  %6967 = vpow2.f32 %v4925_v42  ;;  %v9340_v21 = vmul.f32 0.5, %v9185_v1 }
 0x250   : > { %15513 = vst [vmem:[#allocation333_spill] sm:$0xff] %v9286_v23  ;;  %v2289_v23 = vmul.f32 %v9312_v13, %v9242_v10  ;;  %v4749_v42 = vmul.f32 %v4621_v50, %v9245_v45  ;;  %v4929_v6 = vmul.f32 1.442695, %v4747_v9  ;;  %v9350_v4 = vmul.f32 0.5, %v9223_v31 }
 0x251   : > { %15514 = vst [vmem:[#allocation334_spill] sm:$0xff] %v9289_v47  ;;  %v1167_v47 = vand.u32 2147483647, %v9307_v30  ;;  %6969 = vpow2.f32 %v4927_v32  ;;  %v9347_v32 = vmul.f32 %v9274_v48, %v2260_v7  ;;  %v9355_v1 = vmul.f32 %v9283_v15, %v2275_v27  ;;  %v576_v48 = vpop.f32.mrf.mxu1 }
 0x252   : > { %15515 = vst [vmem:[#allocation335_spill] sm:$0xff] %v9294_v43  ;;  %v9317_v43 = vor.u32 1.1754944e-38, %v2284_v60  ;;  %v9328_v60 = vadd.f32 1.0, %v1294_v18  ;;  %v1168_v18 = vand.u32 2147483647, %v9322_v41  ;;  %v2329_v45 = vand.u32 2147483648, %v9297_v40 }
 0x253   : > { %15516 = vst [vmem:[#allocation336_spill] sm:$0xff] %v9307_v30  ;;  %v463_v30 = vpop.f32.mrf.mxu0  ;;  %v1295_v22 = vmul.f32 0.3275911, %v1167_v47  ;;  %v2344_v7 = vand.u32 2147483648, %v9304_v54  ;;  %v4622_v9 = vsub.f32 0.0, %v9281_v61  ;;  %v4623_v15 = vsub.f32 0.0, %v1167_v47 }
 0x254   : > { %15517 = vst [vmem:[#allocation337_spill] sm:$0xff] %v9312_v13  ;;  %6971 = vrcp.f32 %v9328_v60  ;;  %v464_v31 = vadd.f32 %v463_v30, %v7652_v51  ;;  %v4933_v27 = vmul.f32 1.442695, %v4749_v42 }
 0x255   : > { %15518 = vst [vmem:[#allocation338_spill] sm:$0xff] %v9317_v43  ;;  %v9330_v43 = vor.u32 1.1754944e-38, %v2299_v36  ;;  %v9344_v36 = vpop.eup %6961  ;;  %6973 = vpow2.f32 %v4929_v6  ;;  %v4750_v6 = vmul.f32 %v4622_v9, %v9281_v61  ;;  %v2359_v9 = vand.u32 2147483648, %v9328_v60 }
 0x256   : > { %15519 = vst [vmem:[#allocation339_spill] sm:$0xff] %v9322_v41  ;;  %v4931_v41 = vmul.f32 1.442695, %v4748_v16  ;;  %v2304_v10 = vmul.f32 %v9344_v36, %v9292_v8  ;;  %v9372_v16 = vadd.f32 1.0, %v1295_v22  ;;  %v9386_v22 = vmul.f32 0.70710677, %v464_v31 }
 0x257   : > { %15520 = vst [vmem:[#allocation340_spill] sm:$0xff] %v9328_v60 }
 0x258   : > { %15521 = vst [vmem:[#allocation341_spill] sm:$0xff] %v9330_v43  ;;  %v9366_v43 = vor.u32 1.1754944e-38, %v2314_v20  ;;  %v9379_v20 = vor.u32 1.1754944e-38, %v2329_v45  ;;  %6975 = vpow2.f32 %v4931_v41  ;;  %v577_v45 = vadd.f32 %v576_v48, %v7654_v53 }
 0x259   : > { %15522 = vst [vmem:[#allocation342_spill] sm:$0xff] %v9333_v29  ;;  %v9352_v29 = vpop.eup %6963  ;;  %6977 = vpow2.f32 %v4933_v27 }
 0x25a   : > { %15523 = vst [vmem:[#allocation343_spill] sm:$0xff] %v9336_v49  ;;  %v9359_v50 = vpop.eup %6965  ;;  %v4624_v49 = vsub.f32 0.0, %v1168_v18  ;;  %v2319_v30 = vmul.f32 %v9352_v29, %v9297_v40  ;;  %6979 = vrcp.f32 %v9372_v16 }
 0x25b   : > { %15524 = vst [vmem:[#allocation344_spill] sm:$0xff] %v9340_v21  ;;  %v2290_v21 = vsub.f32 1.0, %v2289_v23  ;;  %v1296_v23 = vmul.f32 0.3275911, %v1168_v18  ;;  %v2334_v42 = vmul.f32 %v9359_v50, %v9304_v54 }
 0x25c   : > { %15525 = vst [vmem:[#allocation345_spill] sm:$0xff] %v9347_v32  ;;  %v4752_v41 = vmul.f32 %v4624_v49, %v1168_v18  ;;  %v2320_v61 = vsub.f32 1.0, %v2319_v30  ;;  %v9408_v18 = vmul.f32 0.70710677, %v577_v45 }
 0x25d   : > { %15526 = vst [vmem:[#allocation346_spill] sm:$0xff] %v9350_v4  ;;  %v9364_v4 = vpop.eup %6967  ;;  %v9375_v32 = vmul.f32 %v9312_v13, %v2290_v21  ;;  %v4751_v21 = vmul.f32 %v4623_v15, %v1167_v47  ;;  %v9390_v13 = vadd.f32 1.0, %v1296_v23  ;;  %v1169_v47 = vand.u32 2147483647, %v9386_v22 }
 0x25e   : > { %15527 = vst [vmem:[#allocation347_spill] sm:$0xff] %v9355_v1  ;;  %v9368_v1 = vpop.eup %6969 }
 0x25f   : > { %15528 = vst [vmem:[#allocation348_spill] sm:$0xff] %v9364_v4  ;;  %v689_v4 = vpop.f32.mrf.mxu2  ;;  %v4937_v23 = vmul.f32 1.442695, %v4751_v21  ;;  %6981 = vrcp.f32 %v9390_v13  ;;  %v2389_v49 = vand.u32 2147483648, %v9390_v13 }
 0x260   : > { %15529 = vst [vmem:[#allocation349_spill] sm:$0xff] %v9366_v43  ;;  %v9388_v43 = vpop.eup %6971  ;;  %v690_v27 = vadd.f32 %v689_v4, %v7662_v57 }
 0x261   : > { %15530 = vst [vmem:[#allocation350_spill] sm:$0xff] %v9368_v1  ;;  %v9383_v1 = vor.u32 1.1754944e-38, %v2344_v7  ;;  %v2335_v7 = vsub.f32 1.0, %v2334_v42  ;;  %v9400_v15 = vpop.eup %6973  ;;  %v2349_v48 = vmul.f32 %v9388_v43, %v9328_v60  ;;  %v9417_v42 = vmul.f32 0.5, %v9300_v63 }
 0x262   : > { %15531 = vst [vmem:[#allocation351_spill] sm:$0xff] %v9375_v32  ;;  %v9394_v32 = vmul.f32 0.5, %v9272_v55  ;;  %v2374_v55 = vand.u32 2147483648, %v9372_v16  ;;  %v9410_v30 = vpop.eup %6975  ;;  %v9429_v60 = vor.u32 1.1754944e-38, %v2359_v9  ;;  %v9442_v9 = vmul.f32 0.5, %v690_v27 }
 0x263   : > { %15532 = vst [vmem:[#allocation352_spill] sm:$0xff] %v9379_v20  ;;  %v2305_v20 = vsub.f32 1.0, %v2304_v10  ;;  %v4935_v10 = vmul.f32 1.442695, %v4750_v6  ;;  %v4939_v6 = vmul.f32 1.442695, %v4752_v41  ;;  %v9421_v21 = vpop.eup %6977 }
 0x264   : > { %15533 = vst [vmem:[#allocation353_spill] sm:$0xff] %v9383_v1  ;;  %v9427_v1 = vmul.f32 %v9359_v50, %v2335_v7  ;;  %v2350_v63 = vsub.f32 1.0, %v2349_v48  ;;  %v9435_v41 = vor.u32 1.1754944e-38, %v2374_v55  ;;  %v9440_v7 = vmul.f32 0.5, %v577_v45 }
 0x265   : > { %15534 = vst [vmem:[#allocation354_spill] sm:$0xff] %v9386_v22  ;;  %v9414_v4 = vmul.f32 %v9344_v36, %v2305_v20  ;;  %v9424_v22 = vmul.f32 %v9352_v29, %v2320_v61  ;;  %v802_v20 = vpop.f32.mrf.mxu3  ;;  %6983 = vpow2.f32 %v4935_v10  ;;  %v4625_v61 = vsub.f32 0.0, %v1169_v47 }
 0x266   : > { %15535 = vst [vmem:[#allocation355_spill] sm:$0xff] %v9394_v32  ;;  %v9419_v32 = vmul.f32 0.5, %v464_v31  ;;  %v1297_v31 = vmul.f32 0.3275911, %v1169_v47  ;;  %6985 = vpow2.f32 %v4937_v23  ;;  %v1557_v55 = vadd.f32 %v7836_v14, %v7918_v0 }
 0x267   : > { %15536 = vst [vmem:[#allocation356_spill] sm:$0xff] %v9400_v15  ;;  %v9433_v15 = vpop.eup %6979  ;;  %6987 = vpow2.f32 %v4939_v6  ;;  %v9457_v45 = vmul.f32 %v9388_v43, %v2350_v63  ;;  %v1562_v6 = vand.u32 2147483647, %v7811_v19 }
 0x268   : > { %15537 = vst [vmem:[#allocation357_spill] sm:$0xff] %v9408_v18  ;;  %v2364_v48 = vmul.f32 %v9433_v15, %v9372_v16  ;;  %v1561_v63 = vsel %vm9466_vm8, %v7836_v14, %v1557_v55 }
 0x269   : > { %15538 = vst [vmem:[#allocation358_spill] sm:$0xff] %v9410_v30  ;;  %v9431_v30 = vmul.f32 0.70710677, %v690_v27  ;;  %v9459_v27 = vadd.f32 1.0, %v1297_v31  ;;  %v1572_v31 = vadd.f32 %v7870_v26, %v7949_v62  ;;  %vm1563_vm9 = vcmp.eq.f32.partialorder %v1562_v6, 8.507059e+37 }
 0x26a   : > { %15539 = vst [vmem:[#allocation359_spill] sm:$0xff] %v9417_v42  ;;  %v1170_v42 = vand.u32 2147483647, %v9408_v18  ;;  %v9486_v55 = vsel %vm1563_vm9, %v7895_v38, %v1561_v63  ;;  %v1587_v38 = vadd.f32 %v7926_v56, %v7995_v28 }
 0x26b   : > { %15540 = vst [vmem:[#allocation360_spill] sm:$0xff] %v9419_v32  ;;  %v9437_v32 = vor.u32 1.1754944e-38, %v2389_v49  ;;  %v1171_v10 = vand.u32 2147483647, %v9431_v30  ;;  %v2404_v49 = vand.u32 2147483648, %v9459_v27  ;;  %v1576_v18 = vsel %vm1575_vm12, %v7870_v26, %v1572_v31 }
 0x26c   : > { %15541 = vst [vmem:[#allocation361_spill] sm:$0xff] %v9421_v21  ;;  %v9445_v21 = vadd.f32 %v802_v20, %v7664_v59  ;;  %v4753_v20 = vmul.f32 %v4625_v61, %v1169_v47  ;;  %v1298_v0 = vmul.f32 0.3275911, %v1170_v42  ;;  %v2365_v47 = vsub.f32 1.0, %v2364_v48 }
 0x26d   : > { %15542 = vst [vmem:[#allocation362_spill] sm:$0xff] %v9429_v60  ;;  %v9447_v60 = vpop.eup %6981  ;;  %v4626_v61 = vsub.f32 0.0, %v1170_v42  ;;  %v1299_v14 = vmul.f32 0.3275911, %v1171_v10  ;;  %v4627_v6 = vsub.f32 0.0, %v1171_v10  ;;  %6989 = vrcp.f32 %v9459_v27 }
 0x26e   : > { %15543 = vst [vmem:[#allocation363_spill] sm:$0xff] %v9431_v30  ;;  %v9462_v23 = vmul.f32 0.5, %v9445_v21  ;;  %v3417_v30 = vmul.f32 1.0614054, %v9486_v55 }
 0x26f   : > { %15544 = vst [vmem:[#allocation364_spill] sm:$0xff] %v9437_v32  ;;  %v4754_v26 = vmul.f32 %v4626_v61, %v1170_v42  ;;  %v1591_v42 = vsel %vm9514_vm15, %v7926_v56, %v1587_v38  ;;  %v1602_v61 = vadd.f32 %v7992_v37, %v8072_v17  ;;  %v15583_v32 = vld [vmem:[#allocation44_spill] sm:$0xff] }
 0x270   : > { %15545 = vst [vmem:[#allocation365_spill] sm:$0xff] %v9440_v7  ;;  %v1577_v7 = vand.u32 2147483647, %v7817_v34  ;;  %v3545_v63 = vadd.f32 -1.4531521, %v3417_v30 }
 0x271   : > { %15546 = vst [vmem:[#allocation366_spill] sm:$0xff] %v9442_v9  ;;  %v9476_v9 = vpop.eup %6983 }
 0x272   : > { %15547 = vst [vmem:[#allocation367_spill] sm:$0xff] %v9447_v60  ;;  %v9482_v19 = vpop.eup %6985  ;;  %vm1578_vm13 = vcmp.eq.f32.partialorder %v1577_v7, 8.507059e+37  ;;  %v3673_v28 = vmul.f32 %v3545_v63, %v9486_v55 }
 0x273   : > { %15548 = vst [vmem:[#allocation368_spill] sm:$0xff] %v9459_v27  ;;  %v9490_v62 = vpop.eup %6987  ;;  %v9500_v34 = vsel %vm1578_vm13, %v7899_v12, %v1576_v18  ;;  %v9518_v18 = vor.u32 1.1754944e-38, %v2404_v49 }
 0x274   : > { %15549 = vst [vmem:[#allocation369_spill] sm:$0xff] %v9462_v23  ;;  %v2379_v23 = vmul.f32 %v9447_v60, %v9390_v13  ;;  %v3418_v30 = vmul.f32 1.0614054, %v9500_v34  ;;  %v3801_v31 = vadd.f32 1.4214138, %v3673_v28  ;;  %v9540_v38 = vpop.eup %6989 }
 0x275   : > { %15552 = vst [vmem:[#allocation370_spill] sm:$0xff] %v9476_v9  ;;  %v9495_v9 = vadd.f32 1.0, %v1298_v0  ;;  %v4755_v0 = vmul.f32 %v4627_v6, %v1171_v10 }
 0x276   : > { %15553 = vst [vmem:[#allocation371_spill] sm:$0xff] %v9482_v19  ;;  %v4941_v19 = vmul.f32 1.442695, %v4753_v20  ;;  %v2380_v48 = vsub.f32 1.0, %v2379_v23  ;;  %v9507_v20 = vadd.f32 1.0, %v1299_v14  ;;  %v3929_v56 = vmul.f32 %v3801_v31, %v9486_v55 }
 0x277   : > { %15554 = vst [vmem:[#allocation372_spill] sm:$0xff] %v9490_v62  ;;  %v9504_v62 = vmul.f32 %v9433_v15, %v2365_v47  ;;  %v2419_v7 = vand.u32 2147483648, %v9495_v9  ;;  %v1592_v23 = vand.u32 2147483647, %v7859_v2  ;;  %v3546_v47 = vadd.f32 -1.4531521, %v3418_v30 }
 0x278   : > { %15555 = vst [vmem:[#allocation373_spill] sm:$0xff] %v9495_v9  ;;  %6991 = vpow2.f32 %v4941_v19  ;;  %v9525_v10 = vmul.f32 %v9447_v60, %v2380_v48  ;;  %v4943_v14 = vmul.f32 1.442695, %v4754_v26  ;;  %v1607_v19 = vand.u32 2147483647, %v7939_v24  ;;  %v466_v48 = vpop.f32.mrf.mxu0 }
 0x279   : > { %15556 = vst [vmem:[#allocation374_spill] sm:$0xff] %v9507_v20  ;;  %vm1593_vm0 = vcmp.eq.f32.partialorder %v1592_v23, 8.507059e+37  ;;  %v9531_v49 = vor.u32 1.1754944e-38, %v2419_v7  ;;  %v3674_v2 = vmul.f32 %v3546_v47, %v9500_v34  ;;  %v2434_v17 = vand.u32 2147483648, %v9507_v20 }
 0x27a   : > { %15559 = vst [vmem:[#allocation375_spill] sm:$0xff] %v9518_v18  ;;  %v9536_v6 = vsel %vm1593_vm0, %v7964_v35, %v1591_v42  ;;  %v1606_v26 = vsel %vm1605_vm2, %v7992_v37, %v1602_v61  ;;  %vm1608_vm3 = vcmp.eq.f32.partialorder %v1607_v19, 8.507059e+37  ;;  %v4945_v7 = vmul.f32 1.442695, %v4755_v0  ;;  %v579_v42 = vpop.f32.mrf.mxu1  ;;  %v692_v61 = vpop.f32.mrf.mxu2  ;;  %v15577_v18 = vld [vmem:[#allocation15_spill] sm:$0xff] }
 0x27b   : > { %15560 = vst [vmem:[#allocation376_spill] sm:$0xff] %v9531_v49  ;;  %v3419_v63 = vmul.f32 1.0614054, %v9536_v6  ;;  %v4057_v28 = vadd.f32 -0.28449672, %v3929_v56  ;;  %v9546_v12 = vsel %vm1608_vm3, %v8000_v52, %v1606_v26  ;;  %6993 = vrcp.f32 %v9495_v9 }
 0x27c   : > { %15561 = vst [vmem:[#allocation377_spill] sm:$0xff] %v9540_v38  ;;  %v3802_v30 = vadd.f32 1.4214138, %v3674_v2  ;;  %v9552_v24 = vmul.f32 0.70710677, %v9445_v21  ;;  %6995 = vrcp.f32 %v9507_v20  ;;  %v467_v37 = vadd.f32 %v466_v48, %v7652_v51 }
 0x27d   : > { %v3547_v23 = vadd.f32 -1.4531521, %v3419_v63  ;;  %v3420_v31 = vmul.f32 1.0614054, %v9546_v12  ;;  %v4185_v0 = vmul.f32 %v4057_v28, %v9486_v55  ;;  %v2394_v47 = vmul.f32 %v9540_v38, %v9459_v27 }
 0x27e   : > { %v9548_v35 = vpop.eup %6991  ;;  %15563 = vst [vmem:[#allocation379_spill] sm:$0xff] %v9552_v24  ;;  %v3930_v52 = vmul.f32 %v3802_v30, %v9500_v34  ;;  %6997 = vpow2.f32 %v4943_v14  ;;  %v9562_v56 = vor.u32 1.1754944e-38, %v2434_v17  ;;  %v580_v2 = vadd.f32 %v579_v42, %v7654_v53 }
 0x27f   : > { %15562 = vst [vmem:[#allocation378_spill] sm:$0xff] %v9548_v35  ;;  %v3675_v21 = vmul.f32 %v3547_v23, %v9536_v6  ;;  %v3548_v19 = vadd.f32 -1.4531521, %v3420_v31  ;;  %v4313_v63 = vadd.f32 0.2548296, %v4185_v0  ;;  %6999 = vpow2.f32 %v4945_v7 }
 0x280   : > { %15564 = vst [vmem:[#allocation380_spill] sm:$0xff] %v9562_v56  ;;  %v4058_v26 = vadd.f32 -0.28449672, %v3930_v52  ;;  %v1172_v48 = vand.u32 2147483647, %v9552_v24  ;;  %v9571_v14 = vadd.f32 %v692_v61, %v7662_v57  ;;  %v2395_v31 = vsub.f32 1.0, %v2394_v47 }
 0x281   : > { %v3803_v28 = vadd.f32 1.4214138, %v3675_v21  ;;  %v3676_v30 = vmul.f32 %v3548_v19, %v9546_v12  ;;  %v9568_v35 = vmul.f32 0.70710677, %v467_v37  ;;  %v4441_v17 = vmul.f32 %v4313_v63, %v9486_v55  ;;  %v9575_v42 = vpop.eup %6993 }
 0x282   : > { %v4186_v23 = vmul.f32 %v4058_v26, %v9500_v34  ;;  %15566 = vst [vmem:[#allocation382_spill] sm:$0xff] %v9575_v42  ;;  %v9577_v0 = vmul.f32 0.5, %v467_v37  ;;  %v9580_v21 = vpop.eup %6995  ;;  %v9582_v19 = vmul.f32 0.5, %v580_v2  ;;  %v9584_v24 = vmul.f32 0.70710677, %v580_v2 }
 0x283   : > { %15565 = vst [vmem:[#allocation381_spill] sm:$0xff] %v9568_v35  ;;  %v3931_v7 = vmul.f32 %v3803_v28, %v9536_v6  ;;  %v3804_v52 = vadd.f32 1.4214138, %v3676_v30  ;;  %v5081_v61 = vmul.f32 %v7933_v25, %v4441_v17  ;;  %v1300_v63 = vmul.f32 0.3275911, %v1172_v48 }
 0x284   : > { %15567 = vst [vmem:[#allocation383_spill] sm:$0xff] %v9577_v0  ;;  %v4314_v56 = vadd.f32 0.2548296, %v4186_v23  ;;  %v9587_v55 = vpop.eup %6997  ;;  %v4628_v47 = vsub.f32 0.0, %v1172_v48  ;;  %v2409_v28 = vmul.f32 %v9575_v42, %v9495_v9  ;;  %v1173_v30 = vand.u32 2147483647, %v9568_v35 }
 0x285   : > { %15568 = vst [vmem:[#allocation384_spill] sm:$0xff] %v9580_v21  ;;  %v4059_v37 = vadd.f32 -0.28449672, %v3931_v7  ;;  %v3932_v26 = vmul.f32 %v3804_v52, %v9546_v12  ;;  %v9595_v0 = vpop.eup %6999  ;;  %v9598_v25 = vmul.f32 %v9540_v38, %v2395_v31  ;;  %v9601_v17 = vmul.f32 0.5, %v9571_v14 }
 0x286   : > { %15569 = vst [vmem:[#allocation385_spill] sm:$0xff] %v9582_v19  ;;  %v5209_v19 = vsub.f32 1.0, %v5081_v61  ;;  %v4442_v2 = vmul.f32 %v4314_v56, %v9500_v34  ;;  %v2424_v52 = vmul.f32 %v9580_v21, %v9507_v20  ;;  %v15575_v61 = vld [vmem:[#allocation24_spill] sm:$0xff]  ;;  %v9608_v34 = vadd.f32 1.0, %v1300_v63  ;;  %v15578_v20 = vld [vmem:[#allocation27_spill] sm:$0xff] }
 0x287   : > { %15570 = vst [vmem:[#allocation386_spill] sm:$0xff] %v9584_v24  ;;  %v4187_v23 = vmul.f32 %v4059_v37, %v9536_v6  ;;  %v4060_v7 = vadd.f32 -0.28449672, %v3932_v26  ;;  %v4756_v56 = vmul.f32 %v4628_v47, %v1172_v48  ;;  %vm5339_vm6 = vcmp.lt.f32.partialorder %v15577_v18, 0.0 }
 0x288   : > { %15571 = vst [vmem:[#allocation387_spill] sm:$0xff] %v9587_v55  ;;  %v1174_v55 = vand.u32 2147483647, %v9584_v24  ;;  %v5465_v35 = vsub.f32 0.0, %v5209_v19  ;;  %v5082_v49 = vmul.f32 %v15575_v61, %v4442_v2  ;;  %v4629_v9 = vsub.f32 0.0, %v1173_v30  ;;  %v15579_v61 = vld [vmem:[#allocation16_spill] sm:$0xff] }
 0x289   : > { %15572 = vst [vmem:[#allocation388_spill] sm:$0xff] %v9595_v0  ;;  %v4315_v0 = vadd.f32 0.2548296, %v4187_v23  ;;  %v4188_v31 = vmul.f32 %v4060_v7, %v9546_v12  ;;  %vm1618_vm7 = vweird.f32 %v15578_v20  ;;  %v1301_v24 = vmul.f32 0.3275911, %v1173_v30 }
 0x28a   : > { %15573 = vst [vmem:[#allocation389_spill] sm:$0xff] %v9598_v25  ;;  %v5593_v37 = vsel %vm5337_vm4, %v5465_v35, %v5209_v19  ;;  %v5210_v26 = vsub.f32 1.0, %v5082_v49  ;;  %vm5340_vm8 = vcmp.lt.f32.partialorder %v15579_v61, 0.0  ;;  %v2425_v48 = vsub.f32 1.0, %v2424_v52  ;;  %v15599_v61 = vld [vmem:[#allocation35_spill] sm:$0xff] }
 0x28b   : > { %15574 = vst [vmem:[#allocation390_spill] sm:$0xff] %v9601_v17  ;;  %v2410_v17 = vsub.f32 1.0, %v2409_v28  ;;  %v5721_v38 = vadd.f32 1.0, %v5593_v37  ;;  %v4443_v2 = vmul.f32 %v4315_v0, %v9536_v6  ;;  %v4316_v63 = vadd.f32 0.2548296, %v4188_v31  ;;  %v15580_v28 = vld [vmem:[#allocation17_spill] sm:$0xff] }
 0x28c   : > { %15576 = vst [vmem:[#allocation24_spill] sm:$0xff] %v9608_v34  ;;  %v1302_v47 = vmul.f32 0.3275911, %v1174_v55  ;;  %v4630_v23 = vsub.f32 0.0, %v1174_v55  ;;  %v5466_v7 = vsub.f32 0.0, %v5210_v26  ;;  %7001 = vrcp.f32 %v9608_v34 }
 0x28d   : > { %v5849_v25 = vmul.f32 %v5721_v38, %v15580_v28  ;;  %v5083_v35 = vmul.f32 %v15581_v39, %v4443_v2  ;;  %v4444_v49 = vmul.f32 %v4316_v63, %v9546_v12  ;;  %v9622_v19 = vmul.f32 %v9575_v42, %v2410_v17  ;;  %v15584_v38 = vld [vmem:[#allocation29_spill] sm:$0xff]  ;;  %v15588_v28 = vld [vmem:[#allocation32_spill] sm:$0xff] }
 0x28e   : > { %v2449_v6 = vand.u32 2147483648, %v9608_v34  ;;  %v4757_v0 = vmul.f32 %v4629_v9, %v1173_v30  ;;  %v5594_v52 = vsel %vm5338_vm5, %v5466_v7, %v5210_v26  ;;  %v4947_v31 = vmul.f32 1.442695, %v4756_v56  ;;  %v15587_v63 = vld [vmem:[#allocation49_spill] sm:$0xff]  ;;  %v15589_v30 = vld [vmem:[#allocation18_spill] sm:$0xff] }
 0x28f   : > { %15582 = vst [vmem:[#allocation15_spill] sm:$0xff] %v9622_v19  ;;  %6060 = vmatmul.f32.gmra.mxu0 %v5849_v25  ;;  %v5722_v37 = vadd.f32 1.0, %v5594_v52  ;;  %v5211_v27 = vsub.f32 1.0, %v5083_v35  ;;  %v5084_v60 = vmul.f32 %v15583_v32, %v4444_v49  ;;  %vm1633_vm9 = vweird.f32 %v15584_v38  ;;  %v15593_v35 = vld [vmem:[#allocation34_spill] sm:$0xff] }
 0x290   : > { %v9630_v2 = vmul.f32 %v9580_v21, %v2425_v48  ;;  %v9632_v12 = vadd.f32 1.0, %v1301_v24  ;;  %v4758_v17 = vmul.f32 %v4630_v23, %v1174_v55  ;;  %v1617_v9 = vadd.f32 %v15588_v28, %v15587_v63  ;;  %v805_v48 = vpop.f32.mrf.mxu3  ;;  %v15598_v63 = vld [vmem:[#allocation21_spill] sm:$0xff] }
 0x291   : > { %v5850_v46 = vmul.f32 %v5722_v37, %v15589_v30  ;;  %v5467_v26 = vsub.f32 0.0, %v5211_v27  ;;  %v5212_v56 = vsub.f32 1.0, %v5084_v60  ;;  %vm1619_vm10 = vweird.f32 %v15588_v28 }
 0x292   : > { %15585 = vst [vmem:[#allocation27_spill] sm:$0xff] %v9630_v2  ;;  %v9638_v25 = vor.u32 1.1754944e-38, %v2449_v6  ;;  %v2464_v32 = vand.u32 2147483648, %v9632_v12  ;;  %v4949_v7 = vmul.f32 1.442695, %v4757_v0  ;;  %v9641_v39 = vadd.f32 1.0, %v1302_v47  ;;  %v9643_v24 = vpop.eup %7001  ;;  %v469_v47 = vpop.f32.mrf.mxu0  ;;  %vm9655_vm12 = vmor %vm1618_vm7, %vm1619_vm10 }
 0x293   : > { %15586 = vst [vmem:[#allocation16_spill] sm:$0xff] %v9632_v12  ;;  %7003 = vpow2.f32 %v4947_v31  ;;  %6173 = vmatmul.f32.gmra.mxu1 %v5850_v46  ;;  %v5595_v55 = vsel %vm5339_vm6, %v5467_v26, %v5211_v27  ;;  %v5468_v23 = vsub.f32 0.0, %v5212_v56  ;;  %v1622_v60 = vand.u32 2147483647, %v15578_v20  ;;  %v582_v20 = vpop.f32.mrf.mxu1 }
 0x294   : > { %15590 = vst [vmem:[#allocation17_spill] sm:$0xff] %v9638_v25  ;;  %vm1648_vm11 = vweird.f32 %v15593_v35  ;;  %7005 = vrcp.f32 %v9632_v12  ;;  %v2479_v49 = vand.u32 2147483648, %v9641_v39  ;;  %v4951_v6 = vmul.f32 1.442695, %v4758_v17 }
 0x295   : > { %15591 = vst [vmem:[#allocation31_spill] sm:$0xff] %v9641_v39  ;;  %v5723_v0 = vadd.f32 1.0, %v5595_v55  ;;  %v9660_v27 = vmul.f32 0.70710677, %v9571_v14  ;;  %v806_v18 = vadd.f32 %v805_v48, %v7664_v59  ;;  %v5596_v31 = vsel %vm5340_vm8, %v5468_v23, %v5212_v56  ;;  %v15600_v56 = vld [vmem:[#allocation22_spill] sm:$0xff]  ;;  %v15603_v48 = vld [vmem:[#allocation37_spill] sm:$0xff] }
 0x296   : > { %15592 = vst [vmem:[#allocation44_spill] sm:$0xff] %v9643_v24  ;;  %v1621_v37 = vsel %vm9655_vm12, %v15588_v28, %v1617_v9  ;;  %v9668_v17 = vor.u32 1.1754944e-38, %v2464_v32  ;;  %7007 = vpow2.f32 %v4949_v7  ;;  %v5724_v46 = vadd.f32 1.0, %v5596_v31  ;;  %v15601_v9 = vld [vmem:[#allocation33_spill] sm:$0xff]  ;;  %v15602_v7 = vld [vmem:[#allocation54_spill] sm:$0xff] }
 0x297   : > { %15596 = vst [vmem:[#allocation29_spill] sm:$0xff] %v9660_v27  ;;  %v5851_v30 = vmul.f32 %v5723_v0, %v15598_v63  ;;  %v2439_v14 = vmul.f32 %v9643_v24, %v9608_v34  ;;  %7009 = vrcp.f32 %v9641_v39  ;;  %v470_v26 = vadd.f32 %v469_v47, %v7652_v51 }
 0x298   : > { %15597 = vst [vmem:[#allocation49_spill] sm:$0xff] %v9668_v17  ;;  %vm1623_vm13 = vcmp.eq.f32.partialorder %v1622_v60, 8.507059e+37  ;;  %vm1663_vm14 = vweird.f32 %v15599_v61  ;;  %v5852_v28 = vmul.f32 %v5724_v46, %v15600_v56  ;;  %v1632_v55 = vadd.f32 %v15603_v48, %v15602_v7  ;;  %v15610_v46 = vld [vmem:[#allocation67_spill] sm:$0xff]  ;;  %v15619_v17 = vld [vmem:[#allocation70_spill] sm:$0xff] }
 0x299   : > { %6286 = vmatmul.f32.gmra.mxu2 %v5851_v30  ;;  %v9678_v32 = vsel %vm1623_vm13, %v15601_v9, %v1621_v37  ;;  %vm1634_vm15 = vweird.f32 %v15603_v48  ;;  %v9683_v23 = vpop.eup %7003  ;;  %v9685_v0 = vor.u32 1.1754944e-38, %v2479_v49  ;;  %v1175_v47 = vand.u32 2147483647, %v9660_v27 }
 0x29a   : > { %15604 = vst [vmem:[#allocation32_spill] sm:$0xff] %v9683_v23  ;;  %v9688_v60 = vmul.f32 0.70710677, %v806_v18  ;;  %v9691_v52 = vadd.f32 %v582_v20, %v7654_v53  ;;  %vm9695_vm0 = vmor %vm1633_vm9, %vm1634_vm15  ;;  %v9699_v37 = vpop.eup %7005  ;;  %6399 = vmatmul.f32.gmra.mxu3 %v5852_v28  ;;  %v3421_v63 = vmul.f32 1.0614054, %v9678_v32  ;;  %v15611_v20 = vld [vmem:[#allocation47_spill] sm:$0xff]  ;;  %7011 = vpow2.f32 %v4951_v6 }
 0x29b   : > { %15605 = vst [vmem:[#allocation18_spill] sm:$0xff] %v9685_v0  ;;  %v1636_v49 = vsel %vm9695_vm0, %v15603_v48, %v1632_v55  ;;  %v1637_v30 = vand.u32 2147483647, %v15584_v38  ;;  %v1647_v56 = vadd.f32 %v15611_v20, %v15610_v46  ;;  %v2440_v9 = vsub.f32 1.0, %v2439_v14 }
 0x29c   : > { %15606 = vst [vmem:[#allocation34_spill] sm:$0xff] %v9688_v60  ;;  %v9708_v7 = vmul.f32 0.5, %v806_v18  ;;  %v9710_v27 = vmul.f32 0.5, %v470_v26  ;;  %v9712_v0 = vmul.f32 0.70710677, %v470_v26  ;;  %v9714_v23 = vpop.eup %7007  ;;  %vm1649_vm2 = vweird.f32 %v15611_v20  ;;  %v15617_v18 = vld [vmem:[#allocation46_spill] sm:$0xff] }
 0x29d   : > { %15609 = vst [vmem:[#allocation21_spill] sm:$0xff] %v9699_v37  ;;  %v3549_v28 = vadd.f32 -1.4531521, %v3421_v63  ;;  %vm1638_vm1 = vcmp.eq.f32.partialorder %v1637_v30, 8.507059e+37  ;;  %v1652_v48 = vand.u32 2147483647, %v15593_v35  ;;  %v9718_v55 = vpop.eup %7009  ;;  %vm1650_vm3 = vmor %vm1648_vm11, %vm1649_vm2 }
 0x29e   : > { %15612 = vst [vmem:[#allocation35_spill] sm:$0xff] %v9708_v7  ;;  %v1303_v38 = vmul.f32 0.3275911, %v1175_v47  ;;  %v4631_v31 = vsub.f32 0.0, %v1175_v47  ;;  %v1176_v14 = vand.u32 2147483647, %v9688_v60  ;;  %v9722_v46 = vsel %vm1638_vm1, %v15617_v18, %v1636_v49 }
 0x29f   : > { %15613 = vst [vmem:[#allocation22_spill] sm:$0xff] %v9710_v27  ;;  %v3677_v26 = vmul.f32 %v3549_v28, %v9678_v32  ;;  %v3422_v63 = vmul.f32 1.0614054, %v9722_v46  ;;  %v1651_v30 = vsel %vm1650_vm3, %v15611_v20, %v1647_v56  ;;  %vm1653_vm4 = vcmp.eq.f32.partialorder %v1652_v48, 8.507059e+37  ;;  %v15618_v7 = vld [vmem:[#allocation50_spill] sm:$0xff]  ;;  %v15620_v60 = vld [vmem:[#allocation48_spill] sm:$0xff] }
 0x2a0   : > { %15614 = vst [vmem:[#allocation33_spill] sm:$0xff] %v9712_v0  ;;  %v1177_v27 = vand.u32 2147483647, %v9712_v0  ;;  %v1662_v25 = vadd.f32 %v15620_v60, %v15619_v17  ;;  %vm1664_vm5 = vweird.f32 %v15620_v60  ;;  %v2454_v18 = vmul.f32 %v9699_v37, %v9632_v12 }
 0x2a1   : > { %15615 = vst [vmem:[#allocation54_spill] sm:$0xff] %v9714_v23  ;;  %v9731_v23 = vsel %vm1653_vm4, %v15618_v7, %v1651_v30  ;;  %v3805_v35 = vadd.f32 1.4214138, %v3677_v26  ;;  %v3550_v49 = vadd.f32 -1.4531521, %v3422_v63  ;;  %v9740_v56 = vmul.f32 0.5, %v9691_v52  ;;  %vm9744_vm6 = vmor %vm1663_vm14, %vm1664_vm5  ;;  %v9763_v7 = vpop.eup %7011 }
 0x2a2   : > { %15616 = vst [vmem:[#allocation37_spill] sm:$0xff] %v9718_v55  ;;  %v3423_v28 = vmul.f32 1.0614054, %v9731_v23  ;;  %v1304_v20 = vmul.f32 0.3275911, %v1176_v14  ;;  %v1666_v63 = vsel %vm9744_vm6, %v15620_v60, %v1662_v25  ;;  %v9755_v30 = vmul.f32 %v9643_v24, %v2440_v9  ;;  %v15635_v24 = vld [vmem:[#allocation20_spill] sm:$0xff] }
 0x2a3   : > { %15621 = vst [vmem:[#allocation67_spill] sm:$0xff] %v9740_v56  ;;  %v1667_v17 = vand.u32 2147483647, %v15599_v61  ;;  %v3933_v6 = vmul.f32 %v3805_v35, %v9678_v32  ;;  %v3678_v48 = vmul.f32 %v3550_v49, %v9722_v46  ;;  %v9757_v56 = vadd.f32 1.0, %v1303_v38 }
 0x2a4   : > { %v3551_v26 = vadd.f32 -1.4531521, %v3423_v28  ;;  %15624 = vst [vmem:[#allocation47_spill] sm:$0xff] %v9755_v30  ;;  %v4759_v0 = vmul.f32 %v4631_v31, %v1175_v47  ;;  %v1305_v12 = vmul.f32 0.3275911, %v1177_v27  ;;  %v2455_v35 = vsub.f32 1.0, %v2454_v18 }
 0x2a5   : > { %15625 = vst [vmem:[#allocation46_spill] sm:$0xff] %v9757_v56  ;;  %v4061_v21 = vadd.f32 -0.28449672, %v3933_v6  ;;  %v3806_v2 = vadd.f32 1.4214138, %v3678_v48  ;;  %vm1668_vm7 = vcmp.eq.f32.partialorder %v1667_v17, 8.507059e+37  ;;  %v2469_v38 = vmul.f32 %v9718_v55, %v9641_v39 }
 0x2a6   : > { %v3679_v61 = vmul.f32 %v3551_v26, %v9731_v23  ;;  %v4632_v34 = vsub.f32 0.0, %v1176_v14  ;;  %v4633_v49 = vsub.f32 0.0, %v1177_v27  ;;  %v15626_v28 = vld [vmem:[#allocation51_spill] sm:$0xff]  ;;  %15627 = vst [vmem:[#allocation50_spill] sm:$0xff] %v9763_v7  ;;  %v9765_v25 = vadd.f32 1.0, %v1304_v20 }
 0x2a7   : > { %v9761_v42 = vsel %vm1668_vm7, %v15626_v28, %v1666_v63  ;;  %v4189_v60 = vmul.f32 %v4061_v21, %v9678_v32  ;;  %v3934_v47 = vmul.f32 %v3806_v2, %v9722_v46  ;;  %7013 = vrcp.f32 %v9757_v56  ;;  %v15630_v26 = vld [vmem:[#allocation19_spill] sm:$0xff] }
 0x2a8   : > { %15628 = vst [vmem:[#allocation70_spill] sm:$0xff] %v9765_v25  ;;  %v3807_v9 = vadd.f32 1.4214138, %v3679_v61  ;;  %v2494_v31 = vand.u32 2147483648, %v9757_v56  ;;  %v3424_v18 = vmul.f32 1.0614054, %v9761_v42  ;;  %v4760_v2 = vmul.f32 %v4632_v34, %v1176_v14 }
 0x2a9   : > { %v9774_v17 = vadd.f32 1.0, %v1305_v12  ;;  %v4317_v6 = vadd.f32 0.2548296, %v4189_v60  ;;  %v4062_v48 = vadd.f32 -0.28449672, %v3934_v47  ;;  %vm5341_vm8 = vcmp.lt.f32.partialorder %v15630_v26, 0.0 }
 0x2aa   : > { %v3935_v20 = vmul.f32 %v3807_v9, %v9731_v23  ;;  %v4953_v21 = vmul.f32 1.442695, %v4759_v0  ;;  %v9779_v63 = vmul.f32 0.70710677, %v9691_v52  ;;  %v3552_v61 = vadd.f32 -1.4531521, %v3424_v18 }
 0x2ab   : > { %15629 = vst [vmem:[#allocation48_spill] sm:$0xff] %v9774_v17  ;;  %7015 = vrcp.f32 %v9765_v25  ;;  %v4445_v28 = vmul.f32 %v4317_v6, %v9678_v32  ;;  %v4190_v7 = vmul.f32 %v4062_v48, %v9722_v46  ;;  %v2470_v39 = vsub.f32 1.0, %v2469_v38  ;;  %v15633_v34 = vld [vmem:[#allocation45_spill] sm:$0xff]  ;;  %v15646_v26 = vld [vmem:[#allocation52_spill] sm:$0xff] }
 0x2ac   : > { %15631 = vst [vmem:[#allocation51_spill] sm:$0xff] %v9779_v63  ;;  %v4063_v12 = vadd.f32 -0.28449672, %v3935_v20  ;;  %v9784_v60 = vor.u32 1.1754944e-38, %v2494_v31  ;;  %v4761_v47 = vmul.f32 %v4633_v49, %v1177_v27  ;;  %v3680_v9 = vmul.f32 %v3552_v61, %v9761_v42  ;;  %v15637_v49 = vld [vmem:[#allocation39_spill] sm:$0xff] }
 0x2ad   : > { %7017 = vrcp.f32 %v9774_v17  ;;  %v5085_v0 = vmul.f32 %v15633_v34, %v4445_v28  ;;  %v4318_v52 = vadd.f32 0.2548296, %v4190_v7  ;;  %v9790_v18 = vpop.eup %7013  ;;  %vm5342_vm9 = vcmp.lt.f32.partialorder %v15635_v24, 0.0  ;;  %v15638_v20 = vld [vmem:[#allocation23_spill] sm:$0xff]  ;;  %v695_v34 = vpop.f32.mrf.mxu2 }
 0x2ae   : > { %15632 = vst [vmem:[#allocation19_spill] sm:$0xff] %v9784_v60  ;;  %v4191_v14 = vmul.f32 %v4063_v12, %v9731_v23  ;;  %v9794_v32 = vmul.f32 %v9699_v37, %v2455_v35  ;;  %v4955_v38 = vmul.f32 1.442695, %v4760_v2  ;;  %v1178_v31 = vand.u32 2147483647, %v9779_v63  ;;  %v15645_v37 = vld [vmem:[#allocation71_spill] sm:$0xff] }
 0x2af   : > { %15634 = vst [vmem:[#allocation45_spill] sm:$0xff] %v9790_v18  ;;  %v3808_v27 = vadd.f32 1.4214138, %v3680_v9  ;;  %vm1678_vm10 = vweird.f32 %v15637_v49  ;;  %7019 = vpow2.f32 %v4953_v21  ;;  %v5213_v6 = vsub.f32 1.0, %v5085_v0  ;;  %v15641_v0 = vld [vmem:[#allocation60_spill] sm:$0xff] }
 0x2b0   : > { %15636 = vst [vmem:[#allocation20_spill] sm:$0xff] %v9794_v32  ;;  %v4446_v48 = vmul.f32 %v4318_v52, %v9722_v46  ;;  %v4319_v7 = vadd.f32 0.2548296, %v4191_v14  ;;  %vm5343_vm11 = vcmp.lt.f32.partialorder %v15638_v20, 0.0  ;;  %v9801_v61 = vmul.f32 %v9718_v55, %v2470_v39 }
 0x2b1   : > { %v3936_v2 = vmul.f32 %v3808_v27, %v9761_v42  ;;  %v9806_v12 = vpop.eup %7015  ;;  %v4957_v9 = vmul.f32 1.442695, %v4761_v47  ;;  %v5469_v21 = vsub.f32 0.0, %v5213_v6  ;;  %v2484_v52 = vmul.f32 %v9790_v18, %v9757_v56  ;;  %v15643_v47 = vld [vmem:[#allocation63_spill] sm:$0xff] }
 0x2b2   : > { %15639 = vst [vmem:[#allocation39_spill] sm:$0xff] %v9801_v61  ;;  %v5086_v63 = vmul.f32 %v15641_v0, %v4446_v48  ;;  %v4447_v46 = vmul.f32 %v4319_v7, %v9731_v23  ;;  %7021 = vpow2.f32 %v4955_v38  ;;  %v1306_v39 = vmul.f32 0.3275911, %v1178_v31  ;;  %v808_v7 = vpop.f32.mrf.mxu3 }
 0x2b3   : > { %15640 = vst [vmem:[#allocation23_spill] sm:$0xff] %v9806_v12  ;;  %v4064_v14 = vadd.f32 -0.28449672, %v3936_v2  ;;  %v9812_v28 = vpop.eup %7017  ;;  %v4634_v35 = vsub.f32 0.0, %v1178_v31  ;;  %v5597_v27 = vsel %vm5341_vm8, %v5469_v21, %v5213_v6  ;;  %v2499_v48 = vmul.f32 %v9806_v12, %v9765_v25 }
 0x2b4   : > { %15642 = vst [vmem:[#allocation60_spill] sm:$0xff] %v9812_v28  ;;  %v5214_v60 = vsub.f32 1.0, %v5086_v63  ;;  %v5087_v55 = vmul.f32 %v15643_v47, %v4447_v46  ;;  %v9820_v23 = vadd.f32 %v695_v34, %v7662_v57  ;;  %v5725_v0 = vadd.f32 1.0, %v5597_v27  ;;  %v15648_v34 = vld [vmem:[#allocation26_spill] sm:$0xff]  ;;  %v15649_v27 = vld [vmem:[#allocation25_spill] sm:$0xff] }
 0x2b5   : > { %v4192_v38 = vmul.f32 %v4064_v14, %v9761_v42  ;;  %v9823_v2 = vpop.eup %7019  ;;  %v1677_v6 = vadd.f32 %v15646_v26, %v15645_v37  ;;  %vm1679_vm12 = vweird.f32 %v15646_v26  ;;  %v2514_v63 = vmul.f32 %v9812_v28, %v9774_v17  ;;  %v15650_v14 = vld [vmem:[#allocation56_spill] sm:$0xff] }
 0x2b6   : > { %15644 = vst [vmem:[#allocation63_spill] sm:$0xff] %v9823_v2  ;;  %v5470_v56 = vsub.f32 0.0, %v5214_v60  ;;  %v5215_v61 = vsub.f32 1.0, %v5087_v55  ;;  %v9830_v21 = vadd.f32 1.0, %v1306_v39  ;;  %v5853_v46 = vmul.f32 %v5725_v0, %v15648_v34  ;;  %vm9851_vm15 = vmor %vm1678_vm10, %vm1679_vm12 }
 0x2b7   : > { %v4320_v47 = vadd.f32 0.2548296, %v4192_v38  ;;  %vm5344_vm13 = vcmp.lt.f32.partialorder %v15649_v27, 0.0  ;;  %vm1693_vm14 = vweird.f32 %v15650_v14  ;;  %v9836_v2 = vadd.f32 %v808_v7, %v7664_v59  ;;  %v15673_v27 = vld [vmem:[#allocation72_spill] sm:$0xff] }
 0x2b8   : > { %15647 = vst [vmem:[#allocation71_spill] sm:$0xff] %v9830_v21  ;;  %v5598_v37 = vsel %vm5342_vm9, %v5470_v56, %v5214_v60  ;;  %v5471_v55 = vsub.f32 0.0, %v5215_v61  ;;  %v1682_v32 = vand.u32 2147483647, %v15637_v49  ;;  %v9841_v30 = vpop.eup %7021  ;;  %v2485_v39 = vsub.f32 1.0, %v2484_v52  ;;  %6063 = vmatmul.f32.gmra.mxu0 %v5853_v46  ;;  %v15655_v46 = vld [vmem:[#allocation30_spill] sm:$0xff] }
 0x2b9   : > { %15651 = vst [vmem:[#allocation52_spill] sm:$0xff] %v9841_v30  ;;  %v9844_v19 = vmul.f32 0.70710677, %v9820_v23  ;;  %v5726_v0 = vadd.f32 1.0, %v5598_v37  ;;  %v4448_v38 = vmul.f32 %v4320_v47, %v9761_v42  ;;  %v2500_v56 = vsub.f32 1.0, %v2499_v48  ;;  %v15656_v37 = vld [vmem:[#allocation66_spill] sm:$0xff] }
 0x2ba   : > { %v4762_v60 = vmul.f32 %v4634_v35, %v1178_v31  ;;  %v5599_v52 = vsel %vm5343_vm11, %v5471_v55, %v5215_v61  ;;  %v1681_v7 = vsel %vm9851_vm15, %v15646_v26, %v1677_v6  ;;  %v2515_v34 = vsub.f32 1.0, %v2514_v63  ;;  %v15657_v49 = vld [vmem:[#allocation57_spill] sm:$0xff]  ;;  %v15659_v61 = vld [vmem:[#allocation38_spill] sm:$0xff]  ;;  %v15660_v6 = vld [vmem:[#allocation55_spill] sm:$0xff] }
 0x2bb   : > { %15652 = vst [vmem:[#allocation26_spill] sm:$0xff] %v9844_v19  ;;  %v5854_v42 = vmul.f32 %v5726_v0, %v15655_v46  ;;  %v5727_v47 = vadd.f32 1.0, %v5599_v52  ;;  %v5088_v30 = vmul.f32 %v15656_v37, %v4448_v38  ;;  %vm1708_vm0 = vweird.f32 %v15657_v49  ;;  %v15666_v52 = vld [vmem:[#allocation69_spill] sm:$0xff] }
 0x2bc   : > { %7023 = vrcp.f32 %v9830_v21  ;;  %v2539_v48 = vand.u32 2147483648, %v9830_v21  ;;  %v9866_v31 = vmul.f32 0.70710677, %v9836_v2  ;;  %vm1683_vm1 = vcmp.eq.f32.partialorder %v1682_v32, 8.507059e+37  ;;  %v15665_v32 = vld [vmem:[#allocation92_spill] sm:$0xff] }
 0x2bd   : > { %v9869_v20 = vand.u32 2147483647, %v9844_v19  ;;  %6176 = vmatmul.f32.gmra.mxu1 %v5854_v42  ;;  %v5855_v35 = vmul.f32 %v5727_v47, %v15659_v61  ;;  %v5216_v26 = vsub.f32 1.0, %v5088_v30  ;;  %v9873_v63 = vsel %vm1683_vm1, %v15660_v6, %v1681_v7  ;;  %v472_v61 = vpop.f32.mrf.mxu0  ;;  %v585_v6 = vpop.f32.mrf.mxu1 }
 0x2be   : > { %15658 = vst [vmem:[#allocation25_spill] sm:$0xff] %v9866_v31  ;;  %v15661_v55 = vand.u32 2147483648, %v9765_v25  ;;  %v15663_v38 = vand.u32 2147483648, %v9774_v17  ;;  %7025 = vpow2.f32 %v4957_v9  ;;  %v1692_v46 = vadd.f32 %v15666_v52, %v15665_v32 }
 0x2bf   : > { %v9886_v42 = vmul.f32 %v9790_v18, %v2485_v39  ;;  %v9889_v30 = vmul.f32 %v9806_v12, %v2500_v56  ;;  %v4959_v7 = vmul.f32 1.442695, %v4762_v60  ;;  %6289 = vmatmul.f32.gmra.mxu2 %v5855_v35  ;;  %v5472_v47 = vsub.f32 0.0, %v5216_v26  ;;  %v15672_v35 = vld [vmem:[#allocation61_spill] sm:$0xff]  ;;  %v15841_v18 = vld [vmem:[#allocation131_spill] sm:$0xff] }
 0x2c0   : > { %v9877_v0 = vor.u32 1.1754944e-38, %v15661_v55  ;;  %v9881_v24 = vor.u32 1.1754944e-38, %v15663_v38  ;;  %v9892_v37 = vmul.f32 %v9812_v28, %v2515_v34  ;;  %v3425_v55 = vmul.f32 1.0614054, %v9873_v63  ;;  %v15677_v28 = vld [vmem:[#allocation41_spill] sm:$0xff] }
 0x2c1   : > { %15667 = vst [vmem:[#allocation66_spill] sm:$0xff] %v9886_v42  ;;  %vm1694_vm2 = vweird.f32 %v15666_v52  ;;  %v1697_v9 = vand.u32 2147483647, %v15650_v14  ;;  %v9897_v38 = vor.u32 1.1754944e-38, %v2539_v48  ;;  %v1307_v39 = vmul.f32 0.3275911, %v9869_v20 }
 0x2c2   : > { %15662 = vst [vmem:[#allocation56_spill] sm:$0xff] %v9877_v0  ;;  %v1180_v56 = vand.u32 2147483647, %v9866_v31  ;;  %v5600_v60 = vsel %vm5344_vm13, %v5472_v47, %v5216_v26  ;;  %vm1695_vm3 = vmor %vm1693_vm14, %vm1694_vm2  ;;  %v9905_v34 = vpop.eup %7023  ;;  %vm1723_vm4 = vweird.f32 %v15672_v35  ;;  %v3553_v19 = vadd.f32 -1.4531521, %v3425_v55  ;;  %v15674_v14 = vld [vmem:[#allocation93_spill] sm:$0xff] }
 0x2c3   : > { %15664 = vst [vmem:[#allocation30_spill] sm:$0xff] %v9881_v24  ;;  %v5728_v32 = vadd.f32 1.0, %v5600_v60  ;;  %v1696_v24 = vsel %vm1695_vm3, %v15666_v52, %v1692_v46  ;;  %vm1698_vm5 = vcmp.eq.f32.partialorder %v1697_v9, 8.507059e+37  ;;  %v9910_v48 = vadd.f32 %v472_v61, %v7652_v51  ;;  %v15675_v47 = vld [vmem:[#allocation73_spill] sm:$0xff] }
 0x2c4   : > { %15668 = vst [vmem:[#allocation57_spill] sm:$0xff] %v9889_v30  ;;  %v9913_v31 = vadd.f32 %v585_v6, %v7654_v53  ;;  %v9916_v26 = vsel %vm1698_vm5, %v15673_v27, %v1696_v24  ;;  %v9920_v0 = vpop.eup %7025  ;;  %v3681_v55 = vmul.f32 %v3553_v19, %v9873_v63  ;;  %vm1709_vm6 = vweird.f32 %v15675_v47 }
 0x2c5   : > { %15669 = vst [vmem:[#allocation38_spill] sm:$0xff] %v9892_v37  ;;  %v5856_v60 = vmul.f32 %v5728_v32, %v15677_v28  ;;  %v3426_v52 = vmul.f32 1.0614054, %v9916_v26  ;;  %v2529_v46 = vmul.f32 %v9905_v34, %v9830_v21  ;;  %v9928_v61 = vadd.f32 1.0, %v1307_v39  ;;  %vm9932_vm7 = vmor %vm1708_vm0, %vm1709_vm6 }
 0x2c6   : > { %15670 = vst [vmem:[#allocation55_spill] sm:$0xff] %v9897_v38  ;;  %v1707_v38 = vadd.f32 %v15675_v47, %v15674_v14  ;;  %v1308_v24 = vmul.f32 0.3275911, %v1180_v56  ;;  %v1712_v28 = vand.u32 2147483647, %v15657_v49  ;;  %v9938_v19 = vmul.f32 0.5, %v9820_v23 }
 0x2c7   : > { %15671 = vst [vmem:[#allocation92_spill] sm:$0xff] %v9905_v34  ;;  %6402 = vmatmul.f32.gmra.mxu3 %v5856_v60  ;;  %v3809_v9 = vadd.f32 1.4214138, %v3681_v55  ;;  %v3554_v32 = vadd.f32 -1.4531521, %v3426_v52  ;;  %v4635_v27 = vsub.f32 0.0, %v9869_v20  ;;  %7027 = vrcp.f32 %v9928_v61 }
 0x2c8   : > { %15676 = vst [vmem:[#allocation69_spill] sm:$0xff] %v9920_v0  ;;  %v1711_v39 = vsel %vm9932_vm7, %v15675_v47, %v1707_v38  ;;  %v4636_v14 = vsub.f32 0.0, %v1180_v56  ;;  %v9945_v0 = vmul.f32 0.70710677, %v9910_v48  ;;  %v9948_v37 = vmul.f32 0.70710677, %v9913_v31 }
 0x2c9   : > { %15678 = vst [vmem:[#allocation61_spill] sm:$0xff] %v9928_v61  ;;  %v3937_v49 = vmul.f32 %v3809_v9, %v9873_v63  ;;  %v3682_v23 = vmul.f32 %v3554_v32, %v9916_v26  ;;  %vm1713_vm8 = vcmp.eq.f32.partialorder %v1712_v28, 8.507059e+37  ;;  %v15684_v60 = vld [vmem:[#allocation98_spill] sm:$0xff]  ;;  %v15685_v55 = vld [vmem:[#allocation77_spill] sm:$0xff]  ;;  %v9955_v38 = vadd.f32 1.0, %v1308_v24  ;;  %v15687_v47 = vld [vmem:[#allocation75_spill] sm:$0xff] }
 0x2ca   : > { %15681 = vst [vmem:[#allocation72_spill] sm:$0xff] %v9938_v19  ;;  %v1722_v52 = vadd.f32 %v15685_v55, %v15684_v60  ;;  %v9958_v6 = vsel %vm1713_vm8, %v15687_v47, %v1711_v39  ;;  %vm1724_vm9 = vweird.f32 %v15685_v55  ;;  %7029 = vpow2.f32 %v4959_v7 }
 0x2cb   : > { %15682 = vst [vmem:[#allocation93_spill] sm:$0xff] %v9945_v0  ;;  %v4065_v19 = vadd.f32 -0.28449672, %v3937_v49  ;;  %v3810_v21 = vadd.f32 1.4214138, %v3682_v23  ;;  %v4763_v32 = vmul.f32 %v4635_v27, %v9869_v20  ;;  %vm9971_vm10 = vmor %vm1723_vm4, %vm1724_vm9  ;;  %v2530_v27 = vsub.f32 1.0, %v2529_v46 }
 0x2cc   : > { %15683 = vst [vmem:[#allocation73_spill] sm:$0xff] %v9948_v37  ;;  %v3427_v9 = vmul.f32 1.0614054, %v9958_v6  ;;  %v9964_v28 = vand.u32 2147483647, %v9945_v0  ;;  %v1726_v20 = vsel %vm9971_vm10, %v15685_v55, %v1722_v52  ;;  %v9982_v47 = vmul.f32 0.5, %v9836_v2 }
 0x2cd   : > { %15686 = vst [vmem:[#allocation41_spill] sm:$0xff] %v9955_v38  ;;  %v9967_v60 = vand.u32 2147483647, %v9948_v37  ;;  %v1727_v7 = vand.u32 2147483647, %v15672_v35  ;;  %v4193_v39 = vmul.f32 %v4065_v19, %v9873_v63  ;;  %v3938_v49 = vmul.f32 %v3810_v21, %v9916_v26  ;;  %v9986_v19 = vpop.eup %7027  ;;  %v15692_v21 = vld [vmem:[#allocation28_spill] sm:$0xff] }
 0x2ce   : > { %v3555_v23 = vadd.f32 -1.4531521, %v3427_v9  ;;  %15690 = vst [vmem:[#allocation98_spill] sm:$0xff] %v9982_v47  ;;  %7031 = vrcp.f32 %v9955_v38  ;;  %v4764_v37 = vmul.f32 %v4636_v14, %v1180_v56  ;;  %vm5345_vm12 = vcmp.lt.f32.partialorder %v15692_v21, 0.0  ;;  %v15693_v55 = vld [vmem:[#allocation85_spill] sm:$0xff] }
 0x2cf   : > { %v4321_v0 = vadd.f32 0.2548296, %v4193_v39  ;;  %v4066_v12 = vadd.f32 -0.28449672, %v3938_v49  ;;  %vm1728_vm11 = vcmp.eq.f32.partialorder %v1727_v7, 8.507059e+37  ;;  %15691 = vst [vmem:[#allocation77_spill] sm:$0xff] %v9986_v19  ;;  %v10000_v49 = vmul.f32 %v9905_v34, %v2530_v27  ;;  %v698_v34 = vpop.f32.mrf.mxu2 }
 0x2d0   : > { %v3683_v35 = vmul.f32 %v3555_v23, %v9958_v6  ;;  %v2554_v9 = vand.u32 2147483648, %v9928_v61  ;;  %v4961_v24 = vmul.f32 1.442695, %v4763_v32  ;;  %v1309_v46 = vmul.f32 0.3275911, %v9964_v28  ;;  %v9994_v52 = vpop.eup %7029 }
 0x2d1   : > { %v9992_v2 = vsel %vm1728_vm11, %v15693_v55, %v1726_v20  ;;  %15694 = vst [vmem:[#allocation75_spill] sm:$0xff] %v9994_v52  ;;  %v1310_v56 = vmul.f32 0.3275911, %v9967_v60  ;;  %v4449_v14 = vmul.f32 %v4321_v0, %v9873_v63  ;;  %v4194_v7 = vmul.f32 %v4066_v12, %v9916_v26  ;;  %v15696_v55 = vld [vmem:[#allocation80_spill] sm:$0xff] }
 0x2d2   : > { %v3811_v39 = vadd.f32 1.4214138, %v3683_v35  ;;  %15695 = vst [vmem:[#allocation28_spill] sm:$0xff] %v10000_v49  ;;  %v2569_v23 = vand.u32 2147483648, %v9955_v38  ;;  %v4963_v32 = vmul.f32 1.442695, %v4764_v37  ;;  %v2544_v20 = vmul.f32 %v9986_v19, %v9928_v61 }
 0x2d3   : > { %v3428_v47 = vmul.f32 1.0614054, %v9992_v2  ;;  %v5089_v52 = vmul.f32 %v15696_v55, %v4449_v14  ;;  %v4322_v30 = vadd.f32 0.2548296, %v4194_v7  ;;  %v15698_v12 = vld [vmem:[#allocation36_spill] sm:$0xff]  ;;  %v10011_v0 = vor.u32 1.1754944e-38, %v2554_v9 }
 0x2d4   : > { %v3939_v17 = vmul.f32 %v3811_v39, %v9958_v6  ;;  %v10008_v63 = vpop.eup %7031  ;;  %vm5346_vm13 = vcmp.lt.f32.partialorder %v15698_v12, 0.0  ;;  %7033 = vpow2.f32 %v4961_v24  ;;  %v10013_v27 = vadd.f32 1.0, %v1309_v46  ;;  %v15704_v55 = vld [vmem:[#allocation74_spill] sm:$0xff]  ;;  %v811_v46 = vpop.f32.mrf.mxu3 }
 0x2d5   : > { %15697 = vst [vmem:[#allocation85_spill] sm:$0xff] %v10008_v63  ;;  %v3556_v37 = vadd.f32 -1.4531521, %v3428_v47  ;;  %v10015_v35 = vadd.f32 1.0, %v1310_v56  ;;  %v5217_v49 = vsub.f32 1.0, %v5089_v52  ;;  %v4450_v61 = vmul.f32 %v4322_v30, %v9916_v26  ;;  %v15705_v56 = vld [vmem:[#allocation84_spill] sm:$0xff] }
 0x2d6   : > { %15699 = vst [vmem:[#allocation80_spill] sm:$0xff] %v10011_v0  ;;  %v4067_v14 = vadd.f32 -0.28449672, %v3939_v17  ;;  %v10018_v7 = vor.u32 1.1754944e-38, %v2569_v23  ;;  %7035 = vpow2.f32 %v4963_v32  ;;  %v10021_v39 = vmul.f32 0.5, %v9910_v48 }
 0x2d7   : > { %15700 = vst [vmem:[#allocation36_spill] sm:$0xff] %v10013_v27  ;;  %v3684_v9 = vmul.f32 %v3556_v37, %v9992_v2  ;;  %vm1738_vm14 = vweird.f32 %v15704_v55  ;;  %v2545_v24 = vsub.f32 1.0, %v2544_v20  ;;  %v5473_v47 = vsub.f32 0.0, %v5217_v49 }
 0x2d8   : > { %15701 = vst [vmem:[#allocation391_spill] sm:$0xff] %v10015_v35  ;;  %v5090_v0 = vmul.f32 %v15705_v56, %v4450_v61  ;;  %v4195_v52 = vmul.f32 %v4067_v14, %v9958_v6  ;;  %v2559_v17 = vmul.f32 %v10008_v63, %v9955_v38  ;;  %7037 = vrcp.f32 %v10013_v27  ;;  %v15707_v61 = vld [vmem:[#allocation40_spill] sm:$0xff] }
 0x2d9   : > { %15702 = vst [vmem:[#allocation392_spill] sm:$0xff] %v10018_v7  ;;  %v10031_v30 = vadd.f32 %v698_v34, %v7662_v57  ;;  %v3812_v48 = vadd.f32 1.4214138, %v3684_v9  ;;  %7039 = vrcp.f32 %v10015_v35  ;;  %v5601_v26 = vsel %vm5345_vm12, %v5473_v47, %v5217_v49 }
 0x2da   : > { %15703 = vst [vmem:[#allocation393_spill] sm:$0xff] %v10021_v39  ;;  %v5218_v23 = vsub.f32 1.0, %v5090_v0  ;;  %v4323_v32 = vadd.f32 0.2548296, %v4195_v52  ;;  %v10036_v20 = vpop.eup %7033  ;;  %vm5347_vm15 = vcmp.lt.f32.partialorder %v15707_v61, 0.0  ;;  %v10040_v37 = vmul.f32 0.5, %v9913_v31 }
 0x2db   : > { %15706 = vst [vmem:[#allocation74_spill] sm:$0xff] %v10036_v20  ;;  %v10043_v14 = vadd.f32 %v811_v46, %v7664_v59  ;;  %v5729_v34 = vadd.f32 1.0, %v5601_v26  ;;  %v3940_v9 = vmul.f32 %v3812_v48, %v9992_v2  ;;  %v10047_v56 = vmul.f32 %v9986_v19, %v2545_v24  ;;  %v15712_v46 = vld [vmem:[#allocation42_spill] sm:$0xff]  ;;  %v15714_v20 = vld [vmem:[#allocation88_spill] sm:$0xff]  ;;  %v475_v19 = vpop.f32.mrf.mxu0 }
 0x2dc   : > { %15708 = vst [vmem:[#allocation84_spill] sm:$0xff] %v10040_v37  ;;  %v4637_v21 = vsub.f32 0.0, %v9964_v28  ;;  %v5474_v49 = vsub.f32 0.0, %v5218_v23  ;;  %v4451_v0 = vmul.f32 %v4323_v32, %v9958_v6  ;;  %v10051_v47 = vpop.eup %7035  ;;  %v4638_v52 = vsub.f32 0.0, %v9967_v60  ;;  %v15713_v24 = vld [vmem:[#allocation86_spill] sm:$0xff] }
 0x2dd   : > { %15709 = vst [vmem:[#allocation40_spill] sm:$0xff] %v10047_v56  ;;  %v10055_v31 = vmul.f32 0.70710677, %v10031_v30  ;;  %v5857_v37 = vmul.f32 %v5729_v34, %v15712_v46  ;;  %v4068_v26 = vadd.f32 -0.28449672, %v3940_v9  ;;  %v1737_v7 = vadd.f32 %v15714_v20, %v8348_v44 }
 0x2de   : > { %15710 = vst [vmem:[#allocation394_spill] sm:$0xff] %v10051_v47  ;;  %v5602_v48 = vsel %vm5346_vm13, %v5474_v49, %v5218_v23  ;;  %v5091_v39 = vmul.f32 %v15713_v24, %v4451_v0  ;;  %vm1739_vm0 = vweird.f32 %v15714_v20  ;;  %v10064_v6 = vpop.eup %7037  ;;  %v2560_v32 = vsub.f32 1.0, %v2559_v17  ;;  %v15718_v24 = vld [vmem:[#allocation59_spill] sm:$0xff] }
 0x2df   : > { %15711 = vst [vmem:[#allocation395_spill] sm:$0xff] %v10055_v31  ;;  %v10067_v47 = vmul.f32 0.70710677, %v10043_v14  ;;  %6066 = vmatmul.f32.gmra.mxu0 %v5857_v37  ;;  %v5730_v34 = vadd.f32 1.0, %v5602_v48  ;;  %v4196_v9 = vmul.f32 %v4068_v26, %v9992_v2  ;;  %v10070_v12 = vpop.eup %7039  ;;  %v2584_v23 = vand.u32 2147483648, %v10013_v27  ;;  %vm10082_vm1 = vmor %vm1738_vm14, %vm1739_vm0  ;;  %v15721_v26 = vld [vmem:[#allocation43_spill] sm:$0xff]  ;;  %v588_v37 = vpop.f32.mrf.mxu1 }
 0x2e0   : > { %15715 = vst [vmem:[#allocation42_spill] sm:$0xff] %v10064_v6  ;;  %v4765_v49 = vmul.f32 %v4637_v21, %v9964_v28  ;;  %v5219_v44 = vsub.f32 1.0, %v5091_v39  ;;  %v1742_v0 = vand.u32 2147483647, %v15704_v55  ;;  %v4766_v46 = vmul.f32 %v4638_v52, %v9967_v60  ;;  %v15722_v52 = vld [vmem:[#allocation78_spill] sm:$0xff] }
 0x2e1   : > { %15716 = vst [vmem:[#allocation86_spill] sm:$0xff] %v10067_v47  ;;  %v1183_v17 = vand.u32 2147483647, %v10055_v31  ;;  %v5858_v56 = vmul.f32 %v5730_v34, %v15718_v24  ;;  %v4324_v38 = vadd.f32 0.2548296, %v4196_v9  ;;  %vm5348_vm2 = vcmp.lt.f32.partialorder %v15721_v26, 0.0 }
 0x2e2   : > { %15717 = vst [vmem:[#allocation88_spill] sm:$0xff] %v10070_v12  ;;  %v2574_v28 = vmul.f32 %v10064_v6, %v10013_v27  ;;  %v10090_v60 = vadd.f32 %v475_v19, %v7652_v51  ;;  %v5475_v39 = vsub.f32 0.0, %v5219_v44  ;;  %v1741_v21 = vsel %vm10082_vm1, %v15714_v20, %v1737_v7  ;;  %v15725_v31 = vld [vmem:[#allocation91_spill] sm:$0xff] }
 0x2e3   : > { %vm1753_vm3 = vweird.f32 %v15722_v52  ;;  %v10097_v55 = vmul.f32 %v10008_v63, %v2560_v32  ;;  %v2589_v48 = vmul.f32 %v10070_v12, %v10015_v35  ;;  %v10102_v34 = vand.u32 2147483647, %v10067_v47  ;;  %6179 = vmatmul.f32.gmra.mxu1 %v5858_v56  ;;  %v15726_v63 = vld [vmem:[#allocation94_spill] sm:$0xff]  ;;  %v15727_v47 = vld [vmem:[#allocation83_spill] sm:$0xff] }
 0x2e4   : > { %v4452_v19 = vmul.f32 %v4324_v38, %v9992_v2  ;;  %v10105_v9 = vor.u32 1.1754944e-38, %v2584_v23  ;;  %v4965_v24 = vmul.f32 1.442695, %v4765_v49  ;;  %v5603_v7 = vsel %vm5347_vm15, %v5475_v39, %v5219_v44  ;;  %v15729_v44 = vld [vmem:[#allocation64_spill] sm:$0xff] }
 0x2e5   : > { %15723 = vst [vmem:[#allocation59_spill] sm:$0xff] %v10097_v55  ;;  %vm1743_vm4 = vcmp.eq.f32.partialorder %v1742_v0, 8.507059e+37  ;;  %v1311_v20 = vmul.f32 0.3275911, %v1183_v17  ;;  %v5731_v32 = vadd.f32 1.0, %v5603_v7  ;;  %vm1768_vm5 = vweird.f32 %v15727_v47  ;;  %v15732_v7 = vld [vmem:[#allocation113_spill] sm:$0xff] }
 0x2e6   : > { %15724 = vst [vmem:[#allocation43_spill] sm:$0xff] %v10105_v9  ;;  %v5092_v27 = vmul.f32 %v15725_v31, %v4452_v19  ;;  %v10111_v55 = vsel %vm1743_vm4, %v15726_v63, %v1741_v21  ;;  %v2575_v56 = vsub.f32 1.0, %v2574_v28  ;;  %v2599_v38 = vand.u32 2147483648, %v10015_v35  ;;  %v15730_v28 = vld [vmem:[#allocation90_spill] sm:$0xff] }
 0x2e7   : > { %v4967_v2 = vmul.f32 1.442695, %v4766_v46  ;;  %v10116_v23 = vmul.f32 0.70710677, %v10090_v60  ;;  %v2590_v61 = vsub.f32 1.0, %v2589_v48  ;;  %v5859_v0 = vmul.f32 %v5731_v32, %v15729_v44  ;;  %v15733_v48 = vld [vmem:[#allocation96_spill] sm:$0xff] }
 0x2e8   : > { %v1312_v49 = vmul.f32 0.3275911, %v10102_v34  ;;  %v5220_v39 = vsub.f32 1.0, %v5092_v27  ;;  %7041 = vpow2.f32 %v4965_v24  ;;  %v4639_v31 = vsub.f32 0.0, %v1183_v17 }
 0x2e9   : > { %15728 = vst [vmem:[#allocation78_spill] sm:$0xff] %v10116_v23  ;;  %v10121_v63 = vadd.f32 %v588_v37, %v7654_v53  ;;  %v3429_v21 = vmul.f32 1.0614054, %v10111_v55  ;;  %vm1783_vm6 = vweird.f32 %v15730_v28  ;;  %v10125_v19 = vadd.f32 1.0, %v1311_v20  ;;  %6292 = vmatmul.f32.gmra.mxu2 %v5859_v0 }
 0x2ea   : > { %v5476_v46 = vsub.f32 0.0, %v5220_v39  ;;  %v1752_v9 = vadd.f32 %v15733_v48, %v15732_v7  ;;  %vm1754_vm7 = vweird.f32 %v15733_v48  ;;  %v10131_v27 = vmul.f32 %v10064_v6, %v2575_v56 }
 0x2eb   : > { %15731 = vst [vmem:[#allocation91_spill] sm:$0xff] %v10125_v19  ;;  %v10133_v24 = vor.u32 1.1754944e-38, %v2599_v38  ;;  %7043 = vpow2.f32 %v4967_v2  ;;  %v10136_v37 = vand.u32 2147483647, %v10116_v23  ;;  %v10139_v32 = vmul.f32 %v10070_v12, %v2590_v61  ;;  %vm10151_vm8 = vmor %vm1753_vm3, %vm1754_vm7 }
 0x2ec   : > { %15734 = vst [vmem:[#allocation94_spill] sm:$0xff] %v10131_v27  ;;  %v10141_v20 = vadd.f32 1.0, %v1312_v49  ;;  %v5604_v44 = vsel %vm5348_vm2, %v5476_v46, %v5220_v39  ;;  %v3557_v0 = vadd.f32 -1.4531521, %v3429_v21  ;;  %v4767_v7 = vmul.f32 %v4639_v31, %v1183_v17  ;;  %v15742_v31 = vld [vmem:[#allocation65_spill] sm:$0xff]  ;;  %v15743_v46 = vld [vmem:[#allocation118_spill] sm:$0xff] }
 0x2ed   : > { %15735 = vst [vmem:[#allocation83_spill] sm:$0xff] %v10133_v24  ;;  %v4640_v35 = vsub.f32 0.0, %v10102_v34  ;;  %v10147_v56 = vmul.f32 0.70710677, %v10121_v63  ;;  %v5732_v38 = vadd.f32 1.0, %v5604_v44  ;;  %7045 = vrcp.f32 %v10125_v19  ;;  %v15744_v44 = vld [vmem:[#allocation100_spill] sm:$0xff] }
 0x2ee   : > { %15736 = vst [vmem:[#allocation64_spill] sm:$0xff] %v10139_v32  ;;  %v3685_v61 = vmul.f32 %v3557_v0, %v10111_v55  ;;  %v1756_v17 = vsel %vm10151_vm8, %v15733_v48, %v1752_v9  ;;  %v1757_v26 = vand.u32 2147483647, %v15722_v52  ;;  %v10161_v49 = vpop.eup %7041  ;;  %v1313_v39 = vmul.f32 0.3275911, %v10136_v37  ;;  %v15756_v32 = vld [vmem:[#allocation116_spill] sm:$0xff] }
 0x2ef   : > { %15737 = vst [vmem:[#allocation90_spill] sm:$0xff] %v10141_v20  ;;  %v5860_v21 = vmul.f32 %v5732_v38, %v15742_v31  ;;  %v1767_v23 = vadd.f32 %v15744_v44, %v15743_v46  ;;  %vm1769_vm9 = vweird.f32 %v15744_v44  ;;  %7047 = vrcp.f32 %v10141_v20  ;;  %v15746_v38 = vld [vmem:[#allocation101_spill] sm:$0xff]  ;;  %v15747_v46 = vld [vmem:[#allocation126_spill] sm:$0xff] }
 0x2f0   : > { %15738 = vst [vmem:[#allocation113_spill] sm:$0xff] %v10147_v56  ;;  %v3813_v0 = vadd.f32 1.4214138, %v3685_v61  ;;  %vm1758_vm10 = vcmp.eq.f32.partialorder %v1757_v26, 8.507059e+37  ;;  %vm1770_vm11 = vmor %vm1768_vm5, %vm1769_vm9  ;;  %v1772_v52 = vand.u32 2147483647, %v15727_v47 }
 0x2f1   : > { %15741 = vst [vmem:[#allocation96_spill] sm:$0xff] %v10161_v49  ;;  %v10172_v9 = vpop.eup %7043  ;;  %v10175_v48 = vand.u32 2147483647, %v10147_v56  ;;  %6405 = vmatmul.f32.gmra.mxu3 %v5860_v21  ;;  %v10178_v2 = vsel %vm1758_vm10, %v15746_v38, %v1756_v17  ;;  %v1771_v31 = vsel %vm1770_vm11, %v15744_v44, %v1767_v23  ;;  %v15748_v49 = vld [vmem:[#allocation107_spill] sm:$0xff]  ;;  %v2614_v47 = vand.u32 2147483648, %v10125_v19 }
 0x2f2   : > { %15745 = vst [vmem:[#allocation65_spill] sm:$0xff] %v10172_v9  ;;  %v1782_v61 = vadd.f32 %v15748_v49, %v15747_v46  ;;  %v3941_v26 = vmul.f32 %v3813_v0, %v10111_v55  ;;  %v3430_v24 = vmul.f32 1.0614054, %v10178_v2  ;;  %vm1773_vm12 = vcmp.eq.f32.partialorder %v1772_v52, 8.507059e+37  ;;  %v15749_v9 = vld [vmem:[#allocation106_spill] sm:$0xff] }
 0x2f3   : > { %vm1784_vm13 = vweird.f32 %v15748_v49  ;;  %v4969_v56 = vmul.f32 1.442695, %v4767_v7  ;;  %v10188_v21 = vsel %vm1773_vm12, %v15749_v9, %v1771_v31  ;;  %v1787_v17 = vand.u32 2147483647, %v15730_v28  ;;  %v10197_v44 = vpop.eup %7045 }
 0x2f4   : > { %vm10192_vm14 = vmor %vm1783_vm6, %vm1784_vm13  ;;  %15752 = vst [vmem:[#allocation118_spill] sm:$0xff] %v10197_v44  ;;  %v4069_v0 = vadd.f32 -0.28449672, %v3941_v26  ;;  %v3558_v52 = vadd.f32 -1.4531521, %v3430_v24  ;;  %v10204_v9 = vmul.f32 0.5, %v10031_v30 }
 0x2f5   : > { %v3431_v38 = vmul.f32 1.0614054, %v10188_v21  ;;  %v1786_v7 = vsel %vm10192_vm14, %v15748_v49, %v1782_v61  ;;  %v10206_v31 = vadd.f32 1.0, %v1313_v39  ;;  %v1314_v46 = vmul.f32 0.3275911, %v10175_v48  ;;  %v10209_v12 = vpop.eup %7047  ;;  %v701_v49 = vpop.f32.mrf.mxu2 }
 0x2f6   : > { %15753 = vst [vmem:[#allocation100_spill] sm:$0xff] %v10204_v9  ;;  %vm1788_vm15 = vcmp.eq.f32.partialorder %v1787_v17, 8.507059e+37  ;;  %v4197_v28 = vmul.f32 %v4069_v0, %v10111_v55  ;;  %v3686_v24 = vmul.f32 %v3558_v52, %v10178_v2  ;;  %v10216_v23 = vor.u32 1.1754944e-38, %v2614_v47  ;;  %v15759_v52 = vld [vmem:[#allocation53_spill] sm:$0xff] }
 0x2f7   : > { %15754 = vst [vmem:[#allocation101_spill] sm:$0xff] %v10206_v31  ;;  %v3559_v26 = vadd.f32 -1.4531521, %v3431_v38  ;;  %v10214_v6 = vsel %vm1788_vm15, %v15756_v32, %v1786_v7  ;;  %7049 = vpow2.f32 %v4969_v56  ;;  %v10219_v30 = vmul.f32 0.5, %v10043_v14 }
 0x2f8   : > { %15755 = vst [vmem:[#allocation126_spill] sm:$0xff] %v10209_v12  ;;  %v3432_v39 = vmul.f32 1.0614054, %v10214_v6  ;;  %v4768_v61 = vmul.f32 %v4640_v35, %v10102_v34  ;;  %v4325_v17 = vadd.f32 0.2548296, %v4197_v28  ;;  %vm5349_vm0 = vcmp.lt.f32.partialorder %v15759_v52, 0.0 }
 0x2f9   : > { %15757 = vst [vmem:[#allocation107_spill] sm:$0xff] %v10216_v23  ;;  %v3814_v9 = vadd.f32 1.4214138, %v3686_v24  ;;  %v3687_v0 = vmul.f32 %v3559_v26, %v10188_v21  ;;  %v2604_v32 = vmul.f32 %v10197_v44, %v10125_v19  ;;  %7051 = vrcp.f32 %v10206_v31 }
 0x2fa   : > { %15758 = vst [vmem:[#allocation106_spill] sm:$0xff] %v10219_v30  ;;  %v10228_v56 = vadd.f32 1.0, %v1314_v46  ;;  %v3560_v14 = vadd.f32 -1.4531521, %v3432_v39  ;;  %v10231_v47 = vadd.f32 %v701_v49, %v7662_v57  ;;  %v4453_v38 = vmul.f32 %v4325_v17, %v10111_v55  ;;  %v15762_v39 = vld [vmem:[#allocation104_spill] sm:$0xff] }
 0x2fb   : > { %v3942_v35 = vmul.f32 %v3814_v9, %v10178_v2  ;;  %v3815_v34 = vadd.f32 1.4214138, %v3687_v0  ;;  %v2619_v7 = vmul.f32 %v10209_v12, %v10141_v20  ;;  %v2629_v28 = vand.u32 2147483648, %v10141_v20  ;;  %v814_v0 = vpop.f32.mrf.mxu3 }
 0x2fc   : > { %15760 = vst [vmem:[#allocation116_spill] sm:$0xff] %v10228_v56  ;;  %v10239_v24 = vmul.f32 0.5, %v10090_v60  ;;  %v3688_v46 = vmul.f32 %v3560_v14, %v10214_v6  ;;  %v4971_v26 = vmul.f32 1.442695, %v4768_v61  ;;  %v5093_v30 = vmul.f32 %v15762_v39, %v4453_v38 }
 0x2fd   : > { %v4070_v49 = vadd.f32 -0.28449672, %v3942_v35  ;;  %v3943_v23 = vmul.f32 %v3815_v34, %v10188_v21  ;;  %v10244_v55 = vpop.eup %7049  ;;  %v2605_v9 = vsub.f32 1.0, %v2604_v32  ;;  %v4641_v17 = vsub.f32 0.0, %v10136_v37 }
 0x2fe   : > { %15761 = vst [vmem:[#allocation53_spill] sm:$0xff] %v10239_v24  ;;  %7053 = vrcp.f32 %v10228_v56  ;;  %v3816_v20 = vadd.f32 1.4214138, %v3688_v46  ;;  %v10249_v60 = vmul.f32 0.70710677, %v10231_v47  ;;  %v5221_v24 = vsub.f32 1.0, %v5093_v30 }
 0x2ff   : > { %15763 = vst [vmem:[#allocation104_spill] sm:$0xff] %v10244_v55  ;;  %v4198_v61 = vmul.f32 %v4070_v49, %v10178_v2  ;;  %v4071_v14 = vadd.f32 -0.28449672, %v3943_v23  ;;  %v10252_v38 = vpop.eup %7051  ;;  %v2620_v35 = vsub.f32 1.0, %v2619_v7  ;;  %v10254_v34 = vor.u32 1.1754944e-38, %v2629_v28  ;;  %v15767_v30 = vld [vmem:[#allocation58_spill] sm:$0xff] }
 0x300   : > { %15764 = vst [vmem:[#allocation396_spill] sm:$0xff] %v10249_v60  ;;  %v4642_v32 = vsub.f32 0.0, %v10175_v48  ;;  %v3944_v39 = vmul.f32 %v3816_v20, %v10214_v6  ;;  %v10259_v55 = vadd.f32 %v814_v0, %v7664_v59  ;;  %v5477_v46 = vsub.f32 0.0, %v5221_v24 }
 0x301   : > { %15765 = vst [vmem:[#allocation397_spill] sm:$0xff] %v10252_v38  ;;  %v4326_v19 = vadd.f32 0.2548296, %v4198_v61  ;;  %v4199_v27 = vmul.f32 %v4071_v14, %v10188_v21  ;;  %vm5350_vm1 = vcmp.lt.f32.partialorder %v15767_v30, 0.0  ;;  %v10264_v23 = vmul.f32 %v10197_v44, %v2605_v9  ;;  %v15770_v14 = vld [vmem:[#allocation62_spill] sm:$0xff]  ;;  %v15776_v44 = vld [vmem:[#allocation120_spill] sm:$0xff]  ;;  %v591_v30 = vpop.f32.mrf.mxu1 }
 0x302   : > { %15766 = vst [vmem:[#allocation398_spill] sm:$0xff] %v10254_v34  ;;  %7055 = vpow2.f32 %v4971_v26  ;;  %v4769_v7 = vmul.f32 %v4641_v17, %v10136_v37  ;;  %v4072_v28 = vadd.f32 -0.28449672, %v3944_v39  ;;  %v10268_v49 = vand.u32 2147483647, %v10249_v60 }
 0x303   : > { %15768 = vst [vmem:[#allocation58_spill] sm:$0xff] %v10264_v23  ;;  %v5605_v20 = vsel %vm5349_vm0, %v5477_v46, %v5221_v24  ;;  %v4454_v0 = vmul.f32 %v4326_v19, %v10178_v2  ;;  %v4327_v61 = vadd.f32 0.2548296, %v4199_v27  ;;  %vm5351_vm2 = vcmp.lt.f32.partialorder %v15770_v14, 0.0  ;;  %v15773_v19 = vld [vmem:[#allocation105_spill] sm:$0xff] }
 0x304   : > { %v10273_v34 = vpop.eup %7053  ;;  %v10277_v9 = vmul.f32 %v10209_v12, %v2620_v35  ;;  %v2634_v37 = vmul.f32 %v10252_v38, %v10206_v31  ;;  %v5733_v26 = vadd.f32 1.0, %v5605_v20  ;;  %v4200_v17 = vmul.f32 %v4072_v28, %v10214_v6  ;;  %v15774_v35 = vld [vmem:[#allocation81_spill] sm:$0xff] }
 0x305   : > { %15769 = vst [vmem:[#allocation399_spill] sm:$0xff] %v10273_v34  ;;  %v4770_v39 = vmul.f32 %v4642_v32, %v10175_v48  ;;  %v10284_v52 = vmul.f32 0.70710677, %v10259_v55  ;;  %v5094_v27 = vmul.f32 %v15773_v19, %v4454_v0  ;;  %v4455_v2 = vmul.f32 %v4327_v61, %v10188_v21  ;;  %v478_v32 = vpop.f32.mrf.mxu0 }
 0x306   : > { %15771 = vst [vmem:[#allocation62_spill] sm:$0xff] %v10277_v9  ;;  %v2644_v24 = vand.u32 2147483648, %v10206_v31  ;;  %v4973_v46 = vmul.f32 1.442695, %v4769_v7  ;;  %v5861_v60 = vmul.f32 %v5733_v26, %v15774_v35  ;;  %v4328_v12 = vadd.f32 0.2548296, %v4200_v17 }
 0x307   : > { %15772 = vst [vmem:[#allocation400_spill] sm:$0xff] %v10284_v52  ;;  %v15775_v9 = vld [vmem:[#allocation68_spill] sm:$0xff]  ;;  %v2649_v28 = vmul.f32 %v10273_v34, %v10228_v56  ;;  %v1315_v48 = vmul.f32 0.3275911, %v10268_v49  ;;  %v5222_v20 = vsub.f32 1.0, %v5094_v27  ;;  %v5095_v23 = vmul.f32 %v15776_v44, %v4455_v2  ;;  %v15779_v27 = vld [vmem:[#allocation99_spill] sm:$0xff] }
 0x308   : > { %vm5352_vm3 = vcmp.lt.f32.partialorder %v15775_v9, 0.0  ;;  %v10295_v0 = vpop.eup %7055  ;;  %v2635_v21 = vsub.f32 1.0, %v2634_v37  ;;  %v10298_v61 = vmul.f32 0.5, %v10121_v63  ;;  %v2659_v7 = vand.u32 2147483648, %v10228_v56  ;;  %6069 = vmatmul.f32.gmra.mxu0 %v5861_v60  ;;  %v15781_v63 = vld [vmem:[#allocation123_spill] sm:$0xff] }
 0x309   : > { %15777 = vst [vmem:[#allocation105_spill] sm:$0xff] %v10295_v0  ;;  %v4456_v26 = vmul.f32 %v4328_v12, %v10214_v6  ;;  %v4975_v17 = vmul.f32 1.442695, %v4770_v39  ;;  %v10303_v19 = vand.u32 2147483647, %v10284_v52  ;;  %v5478_v35 = vsub.f32 0.0, %v5222_v20 }
 0x30a   : > { %15778 = vst [vmem:[#allocation81_spill] sm:$0xff] %v10298_v61  ;;  %v5223_v31 = vsub.f32 1.0, %v5095_v23  ;;  %vm1798_vm4 = vweird.f32 %v15779_v27  ;;  %v10306_v44 = vor.u32 1.1754944e-38, %v2644_v24  ;;  %7057 = vpow2.f32 %v4973_v46  ;;  %v15782_v61 = vld [vmem:[#allocation102_spill] sm:$0xff] }
 0x30b   : > { %v479_v37 = vadd.f32 %v478_v32, %v7652_v51  ;;  %v5096_v2 = vmul.f32 %v15781_v63, %v4456_v26  ;;  %vm1813_vm5 = vweird.f32 %v15782_v61  ;;  %v2650_v60 = vsub.f32 1.0, %v2649_v28 }
 0x30c   : > { %15780 = vst [vmem:[#allocation68_spill] sm:$0xff] %v10306_v44  ;;  %v10311_v0 = vadd.f32 1.0, %v1315_v48  ;;  %v5606_v6 = vsel %vm5350_vm1, %v5478_v35, %v5222_v20  ;;  %v5479_v12 = vsub.f32 0.0, %v5223_v31  ;;  %v10316_v23 = vmul.f32 %v10252_v38, %v2635_v21  ;;  %v15787_v20 = vld [vmem:[#allocation82_spill] sm:$0xff]  ;;  %v817_v38 = vpop.f32.mrf.mxu3 }
 0x30d   : > { %v4643_v39 = vsub.f32 0.0, %v10268_v49  ;;  %v5734_v24 = vadd.f32 1.0, %v5606_v6  ;;  %v5224_v46 = vsub.f32 1.0, %v5096_v2  ;;  %v10319_v52 = vor.u32 1.1754944e-38, %v2659_v7  ;;  %v15793_v6 = vld [vmem:[#allocation87_spill] sm:$0xff] }
 0x30e   : > { %15783 = vst [vmem:[#allocation120_spill] sm:$0xff] %v10311_v0  ;;  %7059 = vpow2.f32 %v4975_v17  ;;  %v1316_v32 = vmul.f32 0.3275911, %v10303_v19  ;;  %v5607_v28 = vsel %vm5351_vm2, %v5479_v12, %v5223_v31  ;;  %v10324_v48 = vmul.f32 0.70710677, %v479_v37  ;;  %v15792_v31 = vld [vmem:[#allocation114_spill] sm:$0xff] }
 0x30f   : > { %15784 = vst [vmem:[#allocation99_spill] sm:$0xff] %v10316_v23  ;;  %v5862_v26 = vmul.f32 %v5734_v24, %v15787_v20  ;;  %v5735_v35 = vadd.f32 1.0, %v5607_v28  ;;  %v5480_v21 = vsub.f32 0.0, %v5224_v46  ;;  %v10328_v63 = vmul.f32 %v10273_v34, %v2650_v60  ;;  %v15794_v24 = vld [vmem:[#allocation134_spill] sm:$0xff]  ;;  %v15834_v23 = vld [vmem:[#allocation97_spill] sm:$0xff] }
 0x310   : > { %15785 = vst [vmem:[#allocation123_spill] sm:$0xff] %v10319_v52  ;;  %v10331_v2 = vmul.f32 0.5, %v10231_v47  ;;  %7061 = vrcp.f32 %v10311_v0  ;;  %v10335_v7 = vmul.f32 0.5, %v10259_v55  ;;  %v10337_v14 = vpop.eup %7057  ;;  %vm1828_vm6 = vweird.f32 %v15792_v31  ;;  %v15795_v47 = vld [vmem:[#allocation112_spill] sm:$0xff] }
 0x311   : > { %15786 = vst [vmem:[#allocation102_spill] sm:$0xff] %v10324_v48  ;;  %v4771_v17 = vmul.f32 %v4643_v39, %v10268_v49  ;;  %6182 = vmatmul.f32.gmra.mxu1 %v5862_v26  ;;  %v5863_v12 = vmul.f32 %v5735_v35, %v15793_v6  ;;  %v5608_v60 = vsel %vm5352_vm3, %v5480_v21, %v5224_v46  ;;  %v2674_v20 = vand.u32 2147483648, %v10311_v0  ;;  %v15801_v35 = vld [vmem:[#allocation115_spill] sm:$0xff] }
 0x312   : > { %15788 = vst [vmem:[#allocation82_spill] sm:$0xff] %v10328_v63  ;;  %v1797_v28 = vadd.f32 %v15795_v47, %v15794_v24  ;;  %v10350_v55 = vadd.f32 %v591_v30, %v7654_v53  ;;  %v4644_v49 = vsub.f32 0.0, %v10303_v19  ;;  %v10355_v39 = vand.u32 2147483647, %v10324_v48  ;;  %v15800_v30 = vld [vmem:[#allocation137_spill] sm:$0xff] }
 0x313   : > { %15789 = vst [vmem:[#allocation401_spill] sm:$0xff] %v10331_v2  ;;  %v10347_v2 = vadd.f32 1.0, %v1316_v32  ;;  %6295 = vmatmul.f32.gmra.mxu2 %v5863_v12  ;;  %vm1799_vm8 = vweird.f32 %v15795_v47  ;;  %v1802_v9 = vand.u32 2147483647, %v15779_v27  ;;  %v15799_v32 = vld [vmem:[#allocation89_spill] sm:$0xff]  ;;  %v1812_v21 = vadd.f32 %v15801_v35, %v15800_v30  ;;  %v15805_v30 = vld [vmem:[#allocation119_spill] sm:$0xff] }
 0x314   : > { %15790 = vst [vmem:[#allocation402_spill] sm:$0xff] %v10335_v7  ;;  %v5736_v7 = vadd.f32 1.0, %v5608_v60  ;;  %v10359_v46 = vpop.eup %7059  ;;  %vm1800_vm9 = vmor %vm1798_vm4, %vm1799_vm8  ;;  %vm1814_vm10 = vweird.f32 %v15801_v35  ;;  %v1817_v6 = vand.u32 2147483647, %v15782_v61  ;;  %v10369_v60 = vmul.f32 0.5, %v479_v37 }
 0x315   : > { %15791 = vst [vmem:[#allocation403_spill] sm:$0xff] %v10337_v14  ;;  %v15797_v14 = vld [vmem:[#allocation117_spill] sm:$0xff]  ;;  %v2689_v12 = vand.u32 2147483648, %v10347_v2  ;;  %v1801_v24 = vsel %vm1800_vm9, %v15795_v47, %v1797_v28  ;;  %vm1803_vm11 = vcmp.eq.f32.partialorder %v1802_v9, 8.507059e+37  ;;  %vm1815_vm12 = vmor %vm1813_vm5, %vm1814_vm10  ;;  %v4977_v27 = vmul.f32 1.442695, %v4771_v17 }
 0x316   : > { %15796 = vst [vmem:[#allocation114_spill] sm:$0xff] %v10347_v2  ;;  %vm1843_vm7 = vweird.f32 %v15797_v14  ;;  %v5864_v26 = vmul.f32 %v5736_v7, %v15799_v32  ;;  %v10374_v7 = vpop.eup %7061  ;;  %v10377_v32 = vmul.f32 0.70710677, %v10350_v55  ;;  %v10380_v48 = vsel %vm1803_vm11, %v15805_v30, %v1801_v24  ;;  %v15807_v28 = vld [vmem:[#allocation121_spill] sm:$0xff] }
 0x317   : > { %15798 = vst [vmem:[#allocation87_spill] sm:$0xff] %v10359_v46  ;;  %v1816_v46 = vsel %vm1815_vm12, %v15801_v35, %v1812_v21  ;;  %v10383_v37 = vor.u32 1.1754944e-38, %v2674_v20  ;;  %7063 = vrcp.f32 %v10347_v2  ;;  %v4772_v47 = vmul.f32 %v4644_v49, %v10303_v19  ;;  %v704_v21 = vpop.f32.mrf.mxu2 }
 0x318   : > { %15802 = vst [vmem:[#allocation134_spill] sm:$0xff] %v10369_v60  ;;  %6408 = vmatmul.f32.gmra.mxu3 %v5864_v26  ;;  %vm1818_vm13 = vcmp.eq.f32.partialorder %v1817_v6, 8.507059e+37  ;;  %v1317_v61 = vmul.f32 0.3275911, %v10355_v39  ;;  %v3433_v17 = vmul.f32 1.0614054, %v10380_v48  ;;  %v2664_v35 = vmul.f32 %v10374_v7, %v10311_v0 }
 0x319   : > { %15803 = vst [vmem:[#allocation112_spill] sm:$0xff] %v10374_v7  ;;  %v10390_v9 = vsel %vm1818_vm13, %v15807_v28, %v1816_v46  ;;  %v15808_v26 = vld [vmem:[#allocation149_spill] sm:$0xff]  ;;  %v10396_v20 = vor.u32 1.1754944e-38, %v2689_v12  ;;  %v10401_v19 = vand.u32 2147483647, %v10377_v32  ;;  %v15811_v6 = vld [vmem:[#allocation151_spill] sm:$0xff]  ;;  %7065 = vpow2.f32 %v4977_v27 }
 0x31a   : > { %15804 = vst [vmem:[#allocation117_spill] sm:$0xff] %v10377_v32  ;;  %v15809_v60 = vld [vmem:[#allocation129_spill] sm:$0xff]  ;;  %v3434_v30 = vmul.f32 1.0614054, %v10390_v9  ;;  %v3561_v49 = vadd.f32 -1.4531521, %v3433_v17  ;;  %v10414_v32 = vadd.f32 %v704_v21, %v7662_v57  ;;  %vm1873_vm9 = vweird.f32 %v15841_v18 }
 0x31b   : > { %15806 = vst [vmem:[#allocation89_spill] sm:$0xff] %v10383_v37  ;;  %v1827_v24 = vadd.f32 %v15809_v60, %v15808_v26  ;;  %vm1829_vm14 = vweird.f32 %v15809_v60  ;;  %v1832_v46 = vand.u32 2147483647, %v15792_v31  ;;  %v15812_v28 = vld [vmem:[#allocation133_spill] sm:$0xff]  ;;  %v10411_v52 = vadd.f32 1.0, %v1317_v61 }
 0x31c   : > { %15810 = vst [vmem:[#allocation137_spill] sm:$0xff] %v10396_v20  ;;  %vm1830_vm15 = vmor %vm1828_vm6, %vm1829_vm14  ;;  %v1842_v26 = vadd.f32 %v15812_v28, %v15811_v6  ;;  %v3562_v37 = vadd.f32 -1.4531521, %v3434_v30  ;;  %vm1844_vm0 = vweird.f32 %v15812_v28  ;;  %v1847_v20 = vand.u32 2147483647, %v15797_v14 }
 0x31d   : > { %v1831_v12 = vsel %vm1830_vm15, %v15809_v60, %v1827_v24  ;;  %15813 = vst [vmem:[#allocation115_spill] sm:$0xff] %v10411_v52  ;;  %v3689_v17 = vmul.f32 %v3561_v49, %v10380_v48  ;;  %vm1833_vm1 = vcmp.eq.f32.partialorder %v1832_v46, 8.507059e+37  ;;  %vm1845_vm2 = vmor %vm1843_vm7, %vm1844_vm0  ;;  %v10419_v31 = vpop.eup %7063  ;;  %v15815_v60 = vld [vmem:[#allocation140_spill] sm:$0xff]  ;;  %v1318_v61 = vmul.f32 0.3275911, %v10401_v19 }
 0x31e   : > { %15814 = vst [vmem:[#allocation119_spill] sm:$0xff] %v10419_v31  ;;  %v3690_v30 = vmul.f32 %v3562_v37, %v10390_v9  ;;  %v10423_v24 = vsel %vm1833_vm1, %v15815_v60, %v1831_v12  ;;  %v1846_v6 = vsel %vm1845_vm2, %v15812_v28, %v1842_v26  ;;  %vm1848_vm3 = vcmp.eq.f32.partialorder %v1847_v20, 8.507059e+37  ;;  %v15816_v49 = vld [vmem:[#allocation144_spill] sm:$0xff] }
 0x31f   : > { %v3817_v21 = vadd.f32 1.4214138, %v3689_v17  ;;  %v3435_v44 = vmul.f32 1.0614054, %v10423_v24  ;;  %v10429_v46 = vsel %vm1848_vm3, %v15816_v49, %v1846_v6  ;;  %v4979_v14 = vmul.f32 1.442695, %v4772_v47 }
 0x320   : > { %v3818_v34 = vadd.f32 1.4214138, %v3690_v30  ;;  %v3436_v63 = vmul.f32 1.0614054, %v10429_v46  ;;  %v2679_v37 = vmul.f32 %v10419_v31, %v10347_v2  ;;  %v4645_v12 = vsub.f32 0.0, %v10355_v39 }
 0x321   : > { %v3945_v20 = vmul.f32 %v3817_v21, %v10380_v48  ;;  %v3563_v28 = vadd.f32 -1.4531521, %v3435_v44  ;;  %7067 = vrcp.f32 %v10411_v52  ;;  %v10438_v26 = vmul.f32 0.70710677, %v10414_v32 }
 0x322   : > { %v3946_v17 = vmul.f32 %v3818_v34, %v10390_v9  ;;  %v3564_v27 = vadd.f32 -1.4531521, %v3436_v63  ;;  %v2665_v47 = vsub.f32 1.0, %v2664_v35  ;;  %v10441_v30 = vadd.f32 1.0, %v1318_v61  ;;  %v10450_v35 = vpop.eup %7065 }
 0x323   : > { %15817 = vst [vmem:[#allocation121_spill] sm:$0xff] %v10438_v26  ;;  %v4073_v60 = vadd.f32 -0.28449672, %v3945_v20  ;;  %v3691_v6 = vmul.f32 %v3563_v28, %v10423_v24  ;;  %7069 = vpow2.f32 %v4979_v14  ;;  %v10445_v49 = vmul.f32 0.5, %v10350_v55 }
 0x324   : > { %15818 = vst [vmem:[#allocation149_spill] sm:$0xff] %v10441_v30  ;;  %v4074_v21 = vadd.f32 -0.28449672, %v3946_v17  ;;  %v3692_v44 = vmul.f32 %v3564_v27, %v10429_v46  ;;  %v2680_v2 = vsub.f32 1.0, %v2679_v37  ;;  %v4773_v0 = vmul.f32 %v4645_v12, %v10355_v39  ;;  %v15823_v17 = vld [vmem:[#allocation76_spill] sm:$0xff] }
 0x325   : > { %15819 = vst [vmem:[#allocation129_spill] sm:$0xff] %v10445_v49  ;;  %v4201_v34 = vmul.f32 %v4073_v60, %v10380_v48  ;;  %v3819_v63 = vadd.f32 1.4214138, %v3691_v6  ;;  %v4646_v61 = vsub.f32 0.0, %v10401_v19  ;;  %v10454_v20 = vand.u32 2147483647, %v10438_v26 }
 0x326   : > { %15820 = vst [vmem:[#allocation151_spill] sm:$0xff] %v10450_v35  ;;  %v4202_v55 = vmul.f32 %v4074_v21, %v10390_v9  ;;  %v3820_v14 = vadd.f32 1.4214138, %v3692_v44  ;;  %v10458_v28 = vmul.f32 %v10374_v7, %v2665_v47  ;;  %7071 = vrcp.f32 %v10441_v30  ;;  %v15824_v44 = vld [vmem:[#allocation79_spill] sm:$0xff] }
 0x327   : > { %v4329_v39 = vadd.f32 0.2548296, %v4201_v34  ;;  %v3947_v37 = vmul.f32 %v3819_v63, %v10423_v24  ;;  %v10462_v12 = vpop.eup %7067  ;;  %vm5353_vm4 = vcmp.lt.f32.partialorder %v15823_v17, 0.0  ;;  %v2704_v27 = vand.u32 2147483648, %v10411_v52 }
 0x328   : > { %15821 = vst [vmem:[#allocation133_spill] sm:$0xff] %v10458_v28  ;;  %v10467_v60 = vadd.f32 %v817_v38, %v7664_v59  ;;  %v4330_v6 = vadd.f32 0.2548296, %v4202_v55  ;;  %v3948_v21 = vmul.f32 %v3820_v14, %v10429_v46  ;;  %vm5354_vm5 = vcmp.lt.f32.partialorder %v15824_v44, 0.0  ;;  %v481_v38 = vpop.f32.mrf.mxu0 }
 0x329   : > { %15822 = vst [vmem:[#allocation140_spill] sm:$0xff] %v10462_v12  ;;  %v10472_v47 = vmul.f32 %v10419_v31, %v2680_v2  ;;  %v4981_v34 = vmul.f32 1.442695, %v4773_v0  ;;  %v4457_v63 = vmul.f32 %v4329_v39, %v10380_v48  ;;  %v4075_v49 = vadd.f32 -0.28449672, %v3947_v37  ;;  %v10475_v26 = vpop.eup %7069  ;;  %v15827_v31 = vld [vmem:[#allocation125_spill] sm:$0xff] }
 0x32a   : > { %15826 = vst [vmem:[#allocation76_spill] sm:$0xff] %v10475_v26  ;;  %v4774_v35 = vmul.f32 %v4646_v61, %v10401_v19  ;;  %v1319_v7 = vmul.f32 0.3275911, %v10454_v20  ;;  %v4458_v55 = vmul.f32 %v4330_v6, %v10390_v9  ;;  %v4076_v28 = vadd.f32 -0.28449672, %v3948_v21  ;;  %v15830_v19 = vld [vmem:[#allocation139_spill] sm:$0xff] }
 0x32b   : > { %15825 = vst [vmem:[#allocation144_spill] sm:$0xff] %v10472_v47  ;;  %v2694_v14 = vmul.f32 %v10462_v12, %v10411_v52  ;;  %v2719_v2 = vand.u32 2147483648, %v10441_v30  ;;  %v5097_v0 = vmul.f32 %v15827_v31, %v4457_v63  ;;  %v4203_v48 = vmul.f32 %v4075_v49, %v10423_v24  ;;  %v15832_v31 = vld [vmem:[#allocation95_spill] sm:$0xff]  ;;  %v594_v63 = vpop.f32.mrf.mxu1 }
 0x32c   : > { %v10485_v39 = vor.u32 1.1754944e-38, %v2704_v27  ;;  %v10488_v37 = vmul.f32 0.70710677, %v10467_v60  ;;  %v5098_v61 = vmul.f32 %v15830_v19, %v4458_v55  ;;  %v4204_v26 = vmul.f32 %v4076_v28, %v10429_v46  ;;  %v10492_v9 = vpop.eup %7071 }
 0x32d   : > { %15831 = vst [vmem:[#allocation139_spill] sm:$0xff] %v10492_v9  ;;  %7073 = vpow2.f32 %v4981_v34  ;;  %v10495_v6 = vadd.f32 %v481_v38, %v7652_v51  ;;  %v5225_v21 = vsub.f32 1.0, %v5097_v0  ;;  %v4331_v52 = vadd.f32 0.2548296, %v4203_v48  ;;  %v15836_v38 = vld [vmem:[#allocation127_spill] sm:$0xff] }
 0x32e   : > { %15828 = vst [vmem:[#allocation79_spill] sm:$0xff] %v10485_v39  ;;  %vm5355_vm6 = vcmp.lt.f32.partialorder %v15832_v31, 0.0  ;;  %v4983_v49 = vmul.f32 1.442695, %v4774_v35  ;;  %v10498_v27 = vadd.f32 1.0, %v1319_v7  ;;  %v5226_v39 = vsub.f32 1.0, %v5098_v61 }
 0x32f   : > { %15829 = vst [vmem:[#allocation125_spill] sm:$0xff] %v10488_v37  ;;  %v4332_v47 = vadd.f32 0.2548296, %v4204_v26  ;;  %vm5356_vm7 = vcmp.lt.f32.partialorder %v15834_v23, 0.0  ;;  %v2695_v55 = vsub.f32 1.0, %v2694_v14  ;;  %v10501_v28 = vor.u32 1.1754944e-38, %v2719_v2 }
 0x330   : > { %15833 = vst [vmem:[#allocation95_spill] sm:$0xff] %v10498_v27  ;;  %v5481_v19 = vsub.f32 0.0, %v5225_v21  ;;  %v4459_v34 = vmul.f32 %v4331_v52, %v10423_v24  ;;  %vm1858_vm8 = vweird.f32 %v15836_v38  ;;  %v2709_v0 = vmul.f32 %v10492_v9, %v10441_v30  ;;  %v15838_v52 = vld [vmem:[#allocation142_spill] sm:$0xff] }
 0x331   : > { %15835 = vst [vmem:[#allocation97_spill] sm:$0xff] %v10501_v28  ;;  %v1192_v35 = vand.u32 2147483647, %v10488_v37  ;;  %v5482_v7 = vsub.f32 0.0, %v5226_v39  ;;  %v4460_v48 = vmul.f32 %v4332_v47, %v10429_v46  ;;  %v10510_v26 = vmul.f32 0.70710677, %v10495_v6 }
 0x332   : > { %v10513_v14 = vadd.f32 %v594_v63, %v7654_v53  ;;  %v5609_v2 = vsel %vm5353_vm4, %v5481_v19, %v5225_v21  ;;  %v5099_v24 = vmul.f32 %v15838_v52, %v4459_v34  ;;  %7075 = vrcp.f32 %v10498_v27  ;;  %v15839_v28 = vld [vmem:[#allocation155_spill] sm:$0xff] }
 0x333   : > { %15837 = vst [vmem:[#allocation127_spill] sm:$0xff] %v10510_v26  ;;  %v5737_v61 = vadd.f32 1.0, %v5609_v2  ;;  %v5610_v37 = vsel %vm5354_vm5, %v5482_v7, %v5226_v39  ;;  %v5100_v30 = vmul.f32 %v15839_v28, %v4460_v48  ;;  %v10522_v46 = vpop.eup %7073  ;;  %7077 = vpow2.f32 %v4983_v49  ;;  %v15842_v19 = vld [vmem:[#allocation103_spill] sm:$0xff]  ;;  %v15844_v39 = vld [vmem:[#allocation109_spill] sm:$0xff] }
 0x334   : > { %15840 = vst [vmem:[#allocation142_spill] sm:$0xff] %v10522_v46  ;;  %v4647_v47 = vsub.f32 0.0, %v10454_v20  ;;  %v5738_v63 = vadd.f32 1.0, %v5610_v37  ;;  %v5227_v56 = vsub.f32 1.0, %v5099_v24  ;;  %v2710_v17 = vsub.f32 1.0, %v2709_v0  ;;  %v15846_v48 = vld [vmem:[#allocation161_spill] sm:$0xff] }
 0x335   : > { %v1320_v21 = vmul.f32 0.3275911, %v1192_v35  ;;  %v5865_v34 = vmul.f32 %v5737_v61, %v15842_v19  ;;  %v5228_v52 = vsub.f32 1.0, %v5100_v30  ;;  %v10528_v2 = vand.u32 2147483647, %v10510_v26  ;;  %v15847_v0 = vld [vmem:[#allocation143_spill] sm:$0xff] }
 0x336   : > { %v10531_v44 = vmul.f32 0.70710677, %v10513_v14  ;;  %v5866_v28 = vmul.f32 %v5738_v63, %v15844_v39  ;;  %v5483_v49 = vsub.f32 0.0, %v5227_v56  ;;  %v10535_v7 = vmul.f32 %v10462_v12, %v2695_v55  ;;  %v15850_v55 = vld [vmem:[#allocation136_spill] sm:$0xff]  ;;  %v15963_v12 = vld [vmem:[#allocation209_spill] sm:$0xff] }
 0x337   : > { %6072 = vmatmul.f32.gmra.mxu0 %v5865_v34  ;;  %v5484_v37 = vsub.f32 0.0, %v5228_v52  ;;  %v1857_v24 = vadd.f32 %v15847_v0, %v15846_v48  ;;  %vm1859_vm10 = vweird.f32 %v15847_v0  ;;  %v10541_v30 = vmul.f32 0.5, %v10414_v32 }
 0x338   : > { %15843 = vst [vmem:[#allocation155_spill] sm:$0xff] %v10531_v44  ;;  %v4775_v61 = vmul.f32 %v4647_v47, %v10454_v20  ;;  %v4648_v19 = vsub.f32 0.0, %v1192_v35  ;;  %6185 = vmatmul.f32.gmra.mxu1 %v5866_v28  ;;  %v5611_v63 = vsel %vm5355_vm6, %v5483_v49, %v5227_v56  ;;  %v10546_v39 = vpop.eup %7075  ;;  %vm1888_vm11 = vweird.f32 %v15850_v55  ;;  %vm10567_vm12 = vmor %vm1858_vm8, %vm1859_vm10 }
 0x339   : > { %15845 = vst [vmem:[#allocation131_spill] sm:$0xff] %v10535_v7  ;;  %v10549_v34 = vadd.f32 1.0, %v1320_v21  ;;  %v5739_v26 = vadd.f32 1.0, %v5611_v63  ;;  %v5612_v48 = vsel %vm5356_vm7, %v5484_v37, %v5228_v52  ;;  %v1862_v32 = vand.u32 2147483647, %v15836_v38  ;;  %v15964_v7 = vld [vmem:[#allocation189_spill] sm:$0xff] }
 0x33a   : > { %15848 = vst [vmem:[#allocation103_spill] sm:$0xff] %v10541_v30  ;;  %v10554_v30 = vpop.eup %7077  ;;  %v10557_v20 = vmul.f32 %v10492_v9, %v2710_v17  ;;  %v1321_v31 = vmul.f32 0.3275911, %v10528_v2  ;;  %v10561_v56 = vand.u32 2147483647, %v10531_v44  ;;  %v5740_v47 = vadd.f32 1.0, %v5612_v48 }
 0x33b   : > { %15849 = vst [vmem:[#allocation109_spill] sm:$0xff] %v10546_v39  ;;  %v2734_v21 = vand.u32 2147483648, %v10498_v27  ;;  %v10573_v52 = vmul.f32 0.5, %v10467_v60  ;;  %v15857_v17 = vld [vmem:[#allocation122_spill] sm:$0xff]  ;;  %v1861_v49 = vsel %vm10567_vm12, %v15847_v0, %v1857_v24  ;;  %v2724_v37 = vmul.f32 %v10546_v39, %v10498_v27  ;;  %v15858_v48 = vld [vmem:[#allocation124_spill] sm:$0xff] }
 0x33c   : > { %15851 = vst [vmem:[#allocation161_spill] sm:$0xff] %v10549_v34  ;;  %v5867_v28 = vmul.f32 %v5739_v26, %v15857_v17  ;;  %v4985_v63 = vmul.f32 1.442695, %v4775_v61  ;;  %v4776_v38 = vmul.f32 %v4648_v19, %v1192_v35  ;;  %v5868_v44 = vmul.f32 %v5740_v47, %v15858_v48  ;;  %v15859_v60 = vld [vmem:[#allocation164_spill] sm:$0xff]  ;;  %v15862_v35 = vld [vmem:[#allocation145_spill] sm:$0xff]  ;;  %v15865_v17 = vld [vmem:[#allocation167_spill] sm:$0xff] }
 0x33d   : > { %15852 = vst [vmem:[#allocation143_spill] sm:$0xff] %v10554_v30  ;;  %vm1903_vm13 = vweird.f32 %v8511_v58  ;;  %7079 = vrcp.f32 %v10549_v34  ;;  %vm1863_vm14 = vcmp.eq.f32.partialorder %v1862_v32, 8.507059e+37  ;;  %v2749_v0 = vand.u32 2147483648, %v10549_v34  ;;  %v707_v30 = vpop.f32.mrf.mxu2 }
 0x33e   : > { %15853 = vst [vmem:[#allocation136_spill] sm:$0xff] %v10557_v20  ;;  %6298 = vmatmul.f32.gmra.mxu2 %v5867_v28  ;;  %v10588_v24 = vadd.f32 1.0, %v1321_v31  ;;  %v1322_v61 = vmul.f32 0.3275911, %v10561_v56  ;;  %6411 = vmatmul.f32.gmra.mxu3 %v5868_v44  ;;  %v10592_v19 = vsel %vm1863_vm14, %v15862_v35, %v1861_v49  ;;  %v1877_v31 = vand.u32 2147483647, %v15841_v18 }
 0x33f   : > { %15856 = vst [vmem:[#allocation404_spill] sm:$0xff] %v10573_v52  ;;  %v15860_v52 = vld [vmem:[#allocation146_spill] sm:$0xff]  ;;  %v3437_v32 = vmul.f32 1.0614054, %v10592_v19  ;;  %v15866_v28 = vld [vmem:[#allocation148_spill] sm:$0xff]  ;;  %v2725_v48 = vsub.f32 1.0, %v2724_v37  ;;  %v1977_v42 = vadd.f32 %v15964_v7, %v15963_v12 }
 0x340   : > { %v1872_v26 = vadd.f32 %v15860_v52, %v15859_v60  ;;  %vm1874_vm15 = vweird.f32 %v15860_v52  ;;  %15861 = vst [vmem:[#allocation122_spill] sm:$0xff] %v10588_v24  ;;  %v1887_v44 = vadd.f32 %v15866_v28, %v15865_v17  ;;  %v10607_v49 = vor.u32 1.1754944e-38, %v2734_v21  ;;  %v15871_v37 = vld [vmem:[#allocation154_spill] sm:$0xff]  ;;  %v15875_v17 = vld [vmem:[#allocation163_spill] sm:$0xff] }
 0x341   : > { %vm10596_vm0 = vmor %vm1873_vm9, %vm1874_vm15  ;;  %v4987_v60 = vmul.f32 1.442695, %v4776_v38  ;;  %v10610_v35 = vmul.f32 0.5, %v10495_v6  ;;  %v3565_v46 = vadd.f32 -1.4531521, %v3437_v32  ;;  %vm1878_vm1 = vcmp.eq.f32.partialorder %v1877_v31, 8.507059e+37 }
 0x342   : > { %v1876_v23 = vsel %vm10596_vm0, %v15860_v52, %v1872_v26  ;;  %15867 = vst [vmem:[#allocation124_spill] sm:$0xff] %v10607_v49  ;;  %vm1889_vm2 = vweird.f32 %v15866_v28  ;;  %v1892_v47 = vand.u32 2147483647, %v15850_v55  ;;  %v10614_v52 = vor.u32 1.1754944e-38, %v2749_v0  ;;  %v15890_v20 = vld [vmem:[#allocation110_spill] sm:$0xff] }
 0x343   : > { %15868 = vst [vmem:[#allocation164_spill] sm:$0xff] %v10610_v35  ;;  %7081 = vrcp.f32 %v10588_v24  ;;  %v10617_v18 = vadd.f32 1.0, %v1322_v61  ;;  %v10620_v21 = vsel %vm1878_vm1, %v15871_v37, %v1876_v23  ;;  %vm1890_vm3 = vmor %vm1888_vm11, %vm1889_vm2  ;;  %v10624_v6 = vpop.eup %7079  ;;  %v3693_v38 = vmul.f32 %v3565_v46, %v10592_v19  ;;  %v15873_v61 = vld [vmem:[#allocation159_spill] sm:$0xff] }
 0x344   : > { %15869 = vst [vmem:[#allocation146_spill] sm:$0xff] %v10614_v52  ;;  %v3438_v26 = vmul.f32 1.0614054, %v10620_v21  ;;  %v1891_v32 = vsel %vm1890_vm3, %v15866_v28, %v1887_v44  ;;  %vm1893_vm4 = vcmp.eq.f32.partialorder %v1892_v47, 8.507059e+37  ;;  %v10630_v0 = vadd.f32 %v707_v30, %v7662_v57  ;;  %v15874_v23 = vld [vmem:[#allocation187_spill] sm:$0xff] }
 0x345   : > { %15870 = vst [vmem:[#allocation145_spill] sm:$0xff] %v10617_v18  ;;  %v10633_v31 = vsel %vm1893_vm4, %v15873_v61, %v1891_v32  ;;  %v1902_v37 = vadd.f32 %v15875_v17, %v15874_v23  ;;  %vm1904_vm5 = vweird.f32 %v15875_v17  ;;  %7083 = vpow2.f32 %v4985_v63  ;;  %v820_v32 = vpop.f32.mrf.mxu3 }
 0x346   : > { %15872 = vst [vmem:[#allocation167_spill] sm:$0xff] %v10624_v6  ;;  %v3821_v55 = vadd.f32 1.4214138, %v3693_v38  ;;  %v3566_v35 = vadd.f32 -1.4531521, %v3438_v26  ;;  %v2739_v28 = vmul.f32 %v10624_v6, %v10549_v34  ;;  %7085 = vpow2.f32 %v4987_v60  ;;  %vm10644_vm6 = vmor %vm1903_vm13, %vm1904_vm5 }
 0x347   : > { %v3439_v46 = vmul.f32 1.0614054, %v10633_v31  ;;  %v4649_v30 = vsub.f32 0.0, %v10528_v2  ;;  %v1907_v47 = vand.u32 2147483647, %v8511_v58  ;;  %v1906_v60 = vsel %vm10644_vm6, %v15875_v17, %v1902_v37 }
 0x348   : > { %v3949_v63 = vmul.f32 %v3821_v55, %v10592_v19  ;;  %v3694_v38 = vmul.f32 %v3566_v35, %v10620_v21  ;;  %v10657_v23 = vmul.f32 %v10546_v39, %v2725_v48  ;;  %7087 = vrcp.f32 %v10617_v18  ;;  %v15881_v48 = vld [vmem:[#allocation168_spill] sm:$0xff] }
 0x349   : > { %v3567_v26 = vadd.f32 -1.4531521, %v3439_v46  ;;  %v10654_v61 = vpop.eup %7081  ;;  %v4650_v52 = vsub.f32 0.0, %v10561_v56  ;;  %v10662_v58 = vmul.f32 0.70710677, %v10630_v0  ;;  %vm1908_vm7 = vcmp.eq.f32.partialorder %v1907_v47, 8.507059e+37 }
 0x34a   : > { %15878 = vst [vmem:[#allocation148_spill] sm:$0xff] %v10654_v61  ;;  %v4077_v55 = vadd.f32 -0.28449672, %v3949_v63  ;;  %v3822_v49 = vadd.f32 1.4214138, %v3694_v38  ;;  %v2740_v46 = vsub.f32 1.0, %v2739_v28  ;;  %v4777_v17 = vmul.f32 %v4649_v30, %v10528_v2 }
 0x34b   : > { %15879 = vst [vmem:[#allocation154_spill] sm:$0xff] %v10657_v23  ;;  %v3695_v35 = vmul.f32 %v3567_v26, %v10633_v31  ;;  %v10667_v37 = vadd.f32 %v820_v32, %v7664_v59  ;;  %v10670_v44 = vsel %vm1908_vm7, %v15881_v48, %v1906_v60  ;;  %v10672_v39 = vpop.eup %7083  ;;  %v10675_v23 = vmul.f32 0.5, %v10513_v14 }
 0x34c   : > { %15880 = vst [vmem:[#allocation159_spill] sm:$0xff] %v10662_v58  ;;  %v4205_v63 = vmul.f32 %v4077_v55, %v10592_v19  ;;  %v3950_v38 = vmul.f32 %v3822_v49, %v10620_v21  ;;  %v10679_v47 = vpop.eup %7085  ;;  %v2754_v2 = vmul.f32 %v10654_v61, %v10588_v24  ;;  %v4778_v28 = vmul.f32 %v4650_v52, %v10561_v56 }
 0x34d   : > { %15882 = vst [vmem:[#allocation187_spill] sm:$0xff] %v10672_v39  ;;  %v3823_v26 = vadd.f32 1.4214138, %v3695_v35  ;;  %v10685_v30 = vand.u32 2147483647, %v10662_v58  ;;  %v2764_v14 = vand.u32 2147483648, %v10588_v24 }
 0x34e   : > { %15883 = vst [vmem:[#allocation163_spill] sm:$0xff] %v10675_v23  ;;  %v3440_v32 = vmul.f32 1.0614054, %v10670_v44  ;;  %v4333_v60 = vadd.f32 0.2548296, %v4205_v63  ;;  %v10690_v49 = vpop.eup %7087  ;;  %v15886_v35 = vld [vmem:[#allocation108_spill] sm:$0xff]  ;;  %v10694_v23 = vmul.f32 %v10624_v6, %v2740_v46 }
 0x34f   : > { %15884 = vst [vmem:[#allocation168_spill] sm:$0xff] %v10679_v47  ;;  %v4078_v48 = vadd.f32 -0.28449672, %v3950_v38  ;;  %v3951_v55 = vmul.f32 %v3823_v26, %v10633_v31  ;;  %vm5357_vm8 = vcmp.lt.f32.partialorder %v15886_v35, 0.0  ;;  %v4989_v47 = vmul.f32 1.442695, %v4777_v17 }
 0x350   : > { %15885 = vst [vmem:[#allocation405_spill] sm:$0xff] %v10690_v49  ;;  %v10697_v56 = vmul.f32 0.70710677, %v10667_v37  ;;  %v3568_v52 = vadd.f32 -1.4531521, %v3440_v32  ;;  %v2779_v58 = vand.u32 2147483648, %v10617_v18  ;;  %v4461_v39 = vmul.f32 %v4333_v60, %v10592_v19 }
 0x351   : > { %15887 = vst [vmem:[#allocation108_spill] sm:$0xff] %v10694_v23  ;;  %v4206_v63 = vmul.f32 %v4078_v48, %v10620_v21  ;;  %v4079_v38 = vadd.f32 -0.28449672, %v3951_v55  ;;  %v2755_v26 = vsub.f32 1.0, %v2754_v2  ;;  %v4991_v24 = vmul.f32 1.442695, %v4778_v28  ;;  %v484_v55 = vpop.f32.mrf.mxu0 }
 0x352   : > { %15888 = vst [vmem:[#allocation406_spill] sm:$0xff] %v10697_v56  ;;  %v1323_v34 = vmul.f32 0.3275911, %v10685_v30  ;;  %v3696_v9 = vmul.f32 %v3568_v52, %v10670_v44  ;;  %v2769_v46 = vmul.f32 %v10690_v49, %v10617_v18  ;;  %v15889_v17 = vld [vmem:[#allocation157_spill] sm:$0xff]  ;;  %vm5358_vm9 = vcmp.lt.f32.partialorder %v15890_v20, 0.0  ;;  %v15892_v60 = vld [vmem:[#allocation152_spill] sm:$0xff] }
 0x353   : > { %v5101_v6 = vmul.f32 %v15889_v17, %v4461_v39  ;;  %v4334_v23 = vadd.f32 0.2548296, %v4206_v63  ;;  %v4207_v32 = vmul.f32 %v4079_v38, %v10633_v31  ;;  %v10709_v19 = vor.u32 1.1754944e-38, %v2764_v14  ;;  %v15894_v63 = vld [vmem:[#allocation111_spill] sm:$0xff] }
 0x354   : > { %7089 = vpow2.f32 %v4989_v47  ;;  %v1196_v2 = vand.u32 2147483647, %v10697_v56  ;;  %v3824_v28 = vadd.f32 1.4214138, %v3696_v9  ;;  %vm1918_vm10 = vweird.f32 %v15892_v60  ;;  %v15897_v56 = vld [vmem:[#allocation160_spill] sm:$0xff] }
 0x355   : > { %15891 = vst [vmem:[#allocation157_spill] sm:$0xff] %v10709_v19  ;;  %v10713_v48 = vor.u32 1.1754944e-38, %v2779_v58  ;;  %v5229_v52 = vsub.f32 1.0, %v5101_v6  ;;  %v4462_v18 = vmul.f32 %v4334_v23, %v10620_v21  ;;  %v4335_v39 = vadd.f32 0.2548296, %v4207_v32 }
 0x356   : > { %vm5359_vm11 = vcmp.lt.f32.partialorder %v15894_v63, 0.0  ;;  %v10718_v38 = vmul.f32 %v10654_v61, %v2755_v26  ;;  %7091 = vpow2.f32 %v4991_v24  ;;  %v10720_v14 = vadd.f32 1.0, %v1323_v34  ;;  %v15901_v61 = vld [vmem:[#allocation188_spill] sm:$0xff] }
 0x357   : > { %15893 = vst [vmem:[#allocation110_spill] sm:$0xff] %v10713_v48  ;;  %v3952_v47 = vmul.f32 %v3824_v28, %v10670_v44  ;;  %v2770_v9 = vsub.f32 1.0, %v2769_v46  ;;  %v5485_v17 = vsub.f32 0.0, %v5229_v52  ;;  %v5102_v58 = vmul.f32 %v15897_v56, %v4462_v18  ;;  %v15899_v28 = vld [vmem:[#allocation175_spill] sm:$0xff] }
 0x358   : > { %15895 = vst [vmem:[#allocation152_spill] sm:$0xff] %v10718_v38  ;;  %v4463_v48 = vmul.f32 %v4335_v39, %v10633_v31  ;;  %v4651_v6 = vsub.f32 0.0, %v10685_v30  ;;  %v4652_v21 = vsub.f32 0.0, %v1196_v2  ;;  %v485_v23 = vadd.f32 %v484_v55, %v7652_v51  ;;  %v597_v39 = vpop.f32.mrf.mxu1 }
 0x359   : > { %15896 = vst [vmem:[#allocation111_spill] sm:$0xff] %v10720_v14  ;;  %v4080_v32 = vadd.f32 -0.28449672, %v3952_v47  ;;  %v10728_v26 = vmul.f32 0.5, %v10630_v0  ;;  %v5613_v34 = vsel %vm5357_vm8, %v5485_v17, %v5229_v52  ;;  %v5230_v24 = vsub.f32 1.0, %v5102_v58  ;;  %v15902_v0 = vld [vmem:[#allocation166_spill] sm:$0xff] }
 0x35a   : > { %v5103_v46 = vmul.f32 %v15899_v28, %v4463_v48  ;;  %v10733_v19 = vpop.eup %7089  ;;  %7093 = vrcp.f32 %v10720_v14  ;;  %v1324_v18 = vmul.f32 0.3275911, %v1196_v2  ;;  %v5741_v31 = vadd.f32 1.0, %v5613_v34  ;;  %v15904_v17 = vld [vmem:[#allocation130_spill] sm:$0xff]  ;;  %v15906_v34 = vld [vmem:[#allocation156_spill] sm:$0xff] }
 0x35b   : > { %15898 = vst [vmem:[#allocation160_spill] sm:$0xff] %v10728_v26  ;;  %v4208_v56 = vmul.f32 %v4080_v32, %v10670_v44  ;;  %v5486_v55 = vsub.f32 0.0, %v5230_v24  ;;  %v1917_v26 = vadd.f32 %v15902_v0, %v15901_v61  ;;  %vm1919_vm12 = vweird.f32 %v15902_v0 }
 0x35c   : > { %15900 = vst [vmem:[#allocation175_spill] sm:$0xff] %v10733_v19  ;;  %v5231_v47 = vsub.f32 1.0, %v5103_v46  ;;  %v10740_v35 = vpop.eup %7091  ;;  %v4779_v48 = vmul.f32 %v4651_v6, %v10685_v30  ;;  %v4780_v52 = vmul.f32 %v4652_v21, %v1196_v2  ;;  %v5869_v58 = vmul.f32 %v5741_v31, %v15904_v17  ;;  %v15905_v19 = vld [vmem:[#allocation128_spill] sm:$0xff]  ;;  %vm10760_vm15 = vmor %vm1918_vm10, %vm1919_vm12 }
 0x35d   : > { %15903 = vst [vmem:[#allocation188_spill] sm:$0xff] %v10740_v35  ;;  %v4336_v28 = vadd.f32 0.2548296, %v4208_v56  ;;  %vm5360_vm13 = vcmp.lt.f32.partialorder %v15905_v19, 0.0  ;;  %vm1933_vm14 = vweird.f32 %v15906_v34  ;;  %v10746_v32 = vmul.f32 0.70710677, %v485_v23 }
 0x35e   : > { %v5614_v46 = vsel %vm5358_vm9, %v5486_v55, %v5230_v24  ;;  %v5487_v61 = vsub.f32 0.0, %v5231_v47  ;;  %v1922_v38 = vand.u32 2147483647, %v15892_v60  ;;  %v10752_v35 = vmul.f32 %v10690_v49, %v2770_v9  ;;  %6075 = vmatmul.f32.gmra.mxu0 %v5869_v58  ;;  %v15914_v17 = vld [vmem:[#allocation180_spill] sm:$0xff]  ;;  %v15927_v19 = vld [vmem:[#allocation206_spill] sm:$0xff] }
 0x35f   : > { %15907 = vst [vmem:[#allocation166_spill] sm:$0xff] %v10746_v32  ;;  %v598_v30 = vadd.f32 %v597_v39, %v7654_v53  ;;  %v5742_v2 = vadd.f32 1.0, %v5614_v46  ;;  %v4464_v6 = vmul.f32 %v4336_v28, %v10670_v44  ;;  %v2794_v20 = vand.u32 2147483648, %v10720_v14  ;;  %v15913_v39 = vld [vmem:[#allocation135_spill] sm:$0xff]  ;;  %v15915_v28 = vld [vmem:[#allocation169_spill] sm:$0xff] }
 0x360   : > { %15908 = vst [vmem:[#allocation130_spill] sm:$0xff] %v10752_v35  ;;  %v10765_v24 = vadd.f32 1.0, %v1324_v18  ;;  %v5615_v9 = vsel %vm5359_vm11, %v5487_v61, %v5231_v47  ;;  %v1921_v31 = vsel %vm10760_vm15, %v15902_v0, %v1917_v26  ;;  %v10772_v44 = vpop.eup %7093  ;;  %v4993_v56 = vmul.f32 1.442695, %v4779_v48  ;;  %v15917_v26 = vld [vmem:[#allocation141_spill] sm:$0xff]  ;;  %v15918_v61 = vld [vmem:[#allocation176_spill] sm:$0xff] }
 0x361   : > { %15912 = vst [vmem:[#allocation156_spill] sm:$0xff] %v10772_v44  ;;  %v5870_v60 = vmul.f32 %v5742_v2, %v15913_v39  ;;  %v5743_v55 = vadd.f32 1.0, %v5615_v9  ;;  %v5104_v58 = vmul.f32 %v15914_v17, %v4464_v6  ;;  %vm1948_vm0 = vweird.f32 %v15915_v28  ;;  %v15922_v9 = vld [vmem:[#allocation172_spill] sm:$0xff]  ;;  %v823_v17 = vpop.f32.mrf.mxu3 }
 0x362   : > { %15911 = vst [vmem:[#allocation128_spill] sm:$0xff] %v10765_v24  ;;  %v2809_v18 = vand.u32 2147483648, %v10765_v24  ;;  %v4995_v46 = vmul.f32 1.442695, %v4780_v52  ;;  %v10779_v63 = vand.u32 2147483647, %v10746_v32  ;;  %7095 = vrcp.f32 %v10765_v24 }
 0x363   : > { %vm1923_vm1 = vcmp.eq.f32.partialorder %v1922_v38, 8.507059e+37  ;;  %v10781_v47 = vmul.f32 0.70710677, %v598_v30  ;;  %6188 = vmatmul.f32.gmra.mxu1 %v5870_v60  ;;  %v5871_v0 = vmul.f32 %v5743_v55, %v15917_v26  ;;  %v5232_v48 = vsub.f32 1.0, %v5104_v58  ;;  %v15921_v52 = vld [vmem:[#allocation193_spill] sm:$0xff]  ;;  %v15930_v32 = vld [vmem:[#allocation158_spill] sm:$0xff] }
 0x364   : > { %v10785_v2 = vsel %vm1923_vm1, %v15918_v61, %v1921_v31  ;;  %v10788_v6 = vmul.f32 0.5, %v10667_v37  ;;  %v10791_v21 = vmul.f32 0.5, %v485_v23  ;;  %v1932_v39 = vadd.f32 %v15922_v9, %v15921_v52  ;;  %v710_v37 = vpop.f32.mrf.mxu2 }
 0x365   : > { %15916 = vst [vmem:[#allocation135_spill] sm:$0xff] %v10781_v47  ;;  %v10797_v38 = vmul.f32 %v10772_v44, %v10720_v14  ;;  %v10799_v60 = vor.u32 1.1754944e-38, %v2794_v20  ;;  %7097 = vpow2.f32 %v4993_v56  ;;  %6301 = vmatmul.f32.gmra.mxu2 %v5871_v0  ;;  %v5488_v31 = vsub.f32 0.0, %v5232_v48  ;;  %v15925_v56 = vld [vmem:[#allocation170_spill] sm:$0xff] }
 0x366   : > { %15919 = vst [vmem:[#allocation180_spill] sm:$0xff] %v10788_v6  ;;  %v10801_v55 = vor.u32 1.1754944e-38, %v2809_v18  ;;  %v3441_v58 = vmul.f32 1.0614054, %v10785_v2  ;;  %vm1934_vm2 = vweird.f32 %v15922_v9  ;;  %v1937_v23 = vand.u32 2147483647, %v15906_v34 }
 0x367   : > { %15920 = vst [vmem:[#allocation169_spill] sm:$0xff] %v10791_v21  ;;  %7099 = vpow2.f32 %v4995_v46  ;;  %v1325_v26 = vmul.f32 0.3275911, %v10779_v63  ;;  %v1198_v61 = vand.u32 2147483647, %v10781_v47  ;;  %v5616_v20 = vsel %vm5360_vm13, %v5488_v31, %v5232_v48  ;;  %vm1935_vm3 = vmor %vm1933_vm14, %vm1934_vm2  ;;  %v15926_v47 = vld [vmem:[#allocation178_spill] sm:$0xff] }
 0x368   : > { %15923 = vst [vmem:[#allocation141_spill] sm:$0xff] %v10799_v60  ;;  %vm1963_vm4 = vweird.f32 %v15925_v56  ;;  %v5744_v18 = vadd.f32 1.0, %v5616_v20  ;;  %v3569_v0 = vadd.f32 -1.4531521, %v3441_v58  ;;  %v1936_v52 = vsel %vm1935_vm3, %v15922_v9, %v1932_v39  ;;  %v15928_v48 = vld [vmem:[#allocation184_spill] sm:$0xff]  ;;  %v10825_v31 = vpop.eup %7095 }
 0x369   : > { %15924 = vst [vmem:[#allocation176_spill] sm:$0xff] %v10801_v55  ;;  %vm1938_vm5 = vcmp.eq.f32.partialorder %v1937_v23, 8.507059e+37  ;;  %v10815_v21 = vadd.f32 %v710_v37, %v7662_v57  ;;  %v10818_v46 = vadd.f32 %v823_v17, %v7664_v59  ;;  %v1947_v34 = vadd.f32 %v15928_v48, %v15927_v19  ;;  %v15942_v55 = vld [vmem:[#allocation190_spill] sm:$0xff] }
 0x36a   : > { %v10821_v6 = vsel %vm1938_vm5, %v15926_v47, %v1936_v52  ;;  %15929 = vst [vmem:[#allocation193_spill] sm:$0xff] %v10825_v31  ;;  %v5872_v20 = vmul.f32 %v5744_v18, %v15930_v32  ;;  %v3697_v58 = vmul.f32 %v3569_v0, %v10785_v2  ;;  %vm1949_vm6 = vweird.f32 %v15928_v48 }
 0x36b   : > { %v3442_v9 = vmul.f32 1.0614054, %v10821_v6  ;;  %v10831_v39 = vpop.eup %7097  ;;  %v2785_v37 = vsub.f32 1.0, %v10797_v38  ;;  %v10834_v17 = vmul.f32 0.5, %v598_v30  ;;  %v1326_v47 = vmul.f32 0.3275911, %v1198_v61  ;;  %vm10838_vm7 = vmor %vm1948_vm0, %vm1949_vm6 }
 0x36c   : > { %15931 = vst [vmem:[#allocation172_spill] sm:$0xff] %v10831_v39  ;;  %v1952_v32 = vand.u32 2147483647, %v15915_v28  ;;  %v4653_v18 = vsub.f32 0.0, %v10779_v63  ;;  %6414 = vmatmul.f32.gmra.mxu3 %v5872_v20  ;;  %v3825_v0 = vadd.f32 1.4214138, %v3697_v58  ;;  %v1951_v38 = vsel %vm10838_vm7, %v15928_v48, %v1947_v34 }
 0x36d   : > { %15932 = vst [vmem:[#allocation170_spill] sm:$0xff] %v10834_v17  ;;  %v3570_v52 = vadd.f32 -1.4531521, %v3442_v9  ;;  %v10847_v30 = vpop.eup %7099  ;;  %v2799_v19 = vmul.f32 %v10825_v31, %v10765_v24  ;;  %v10851_v17 = vadd.f32 1.0, %v1325_v26  ;;  %v10854_v39 = vmul.f32 0.70710677, %v10815_v21  ;;  %v487_v24 = vpop.f32.mrf.mxu0 }
 0x36e   : > { %15935 = vst [vmem:[#allocation178_spill] sm:$0xff] %v10847_v30  ;;  %v10857_v28 = vmul.f32 0.70710677, %v10818_v46  ;;  %v3953_v20 = vmul.f32 %v3825_v0, %v10785_v2  ;;  %vm1953_vm8 = vcmp.eq.f32.partialorder %v1952_v32, 8.507059e+37  ;;  %v15939_v9 = vld [vmem:[#allocation208_spill] sm:$0xff]  ;;  %v15940_v48 = vld [vmem:[#allocation186_spill] sm:$0xff]  ;;  %v4781_v60 = vmul.f32 %v4653_v18, %v10779_v63 }
 0x36f   : > { %15936 = vst [vmem:[#allocation206_spill] sm:$0xff] %v10851_v17  ;;  %v3698_v58 = vmul.f32 %v3570_v52, %v10821_v6  ;;  %v1962_v34 = vadd.f32 %v15940_v48, %v15939_v9  ;;  %v10863_v23 = vadd.f32 1.0, %v1326_v47  ;;  %v4654_v30 = vsub.f32 0.0, %v1198_v61 }
 0x370   : > { %15937 = vst [vmem:[#allocation184_spill] sm:$0xff] %v10854_v39  ;;  %v10866_v26 = vsel %vm1953_vm8, %v15942_v55, %v1951_v38  ;;  %vm1964_vm9 = vweird.f32 %v15940_v48  ;;  %v4081_v49 = vadd.f32 -0.28449672, %v3953_v20  ;;  %7101 = vrcp.f32 %v10851_v17 }
 0x371   : > { %15938 = vst [vmem:[#allocation158_spill] sm:$0xff] %v10857_v28  ;;  %v3826_v35 = vadd.f32 1.4214138, %v3698_v58  ;;  %v3443_v0 = vmul.f32 1.0614054, %v10866_v26  ;;  %vm10880_vm10 = vmor %vm1963_vm4, %vm1964_vm9  ;;  %v2800_v58 = vsub.f32 1.0, %v2799_v19  ;;  %7103 = vrcp.f32 %v10863_v23 }
 0x372   : > { %15941 = vst [vmem:[#allocation208_spill] sm:$0xff] %v10863_v23  ;;  %v10873_v32 = vand.u32 2147483647, %v10854_v39  ;;  %v10876_v47 = vand.u32 2147483647, %v10857_v28  ;;  %v4209_v18 = vmul.f32 %v4081_v49, %v10785_v2  ;;  %v1966_v20 = vsel %vm10880_vm10, %v15940_v48, %v1962_v34  ;;  %v15945_v49 = vld [vmem:[#allocation132_spill] sm:$0xff] }
 0x373   : > { %v1967_v63 = vand.u32 2147483647, %v15925_v56  ;;  %v3954_v52 = vmul.f32 %v3826_v35, %v10821_v6  ;;  %v3571_v38 = vadd.f32 -1.4531521, %v3443_v0  ;;  %v4782_v9 = vmul.f32 %v4654_v30, %v1198_v61  ;;  %v15947_v19 = vld [vmem:[#allocation198_spill] sm:$0xff] }
 0x374   : > { %v10892_v28 = vadd.f32 %v487_v24, %v7652_v51  ;;  %v4337_v39 = vadd.f32 0.2548296, %v4209_v18  ;;  %vm5361_vm12 = vcmp.lt.f32.partialorder %v15945_v49, 0.0  ;;  %v10897_v35 = vmul.f32 %v10772_v44, %v2785_v37 }
 0x375   : > { %v4082_v14 = vadd.f32 -0.28449672, %v3954_v52  ;;  %v3699_v56 = vmul.f32 %v3571_v38, %v10866_v26  ;;  %vm1968_vm11 = vcmp.eq.f32.partialorder %v1967_v63, 8.507059e+37  ;;  %v4997_v0 = vmul.f32 1.442695, %v4781_v60 }
 0x376   : > { %15946 = vst [vmem:[#allocation186_spill] sm:$0xff] %v10897_v35  ;;  %v1327_v48 = vmul.f32 0.3275911, %v10873_v32  ;;  %v10901_v34 = vsel %vm1968_vm11, %v15947_v19, %v1966_v20  ;;  %v1328_v61 = vmul.f32 0.3275911, %v10876_v47  ;;  %v4465_v24 = vmul.f32 %v4337_v39, %v10785_v2  ;;  %v10906_v18 = vpop.eup %7101  ;;  %v15950_v20 = vld [vmem:[#allocation182_spill] sm:$0xff] }
 0x377   : > { %v4210_v30 = vmul.f32 %v4082_v14, %v10821_v6  ;;  %v3827_v55 = vadd.f32 1.4214138, %v3699_v56  ;;  %v10909_v63 = vmul.f32 %v10825_v31, %v2800_v58  ;;  %v2824_v37 = vand.u32 2147483648, %v10851_v17  ;;  %v10918_v14 = vpop.eup %7103  ;;  %v15952_v39 = vld [vmem:[#allocation138_spill] sm:$0xff] }
 0x378   : > { %v4999_v60 = vmul.f32 1.442695, %v4782_v9  ;;  %v3444_v52 = vmul.f32 1.0614054, %v10901_v34  ;;  %v10914_v38 = vmul.f32 0.70710677, %v10892_v28  ;;  %v5105_v19 = vmul.f32 %v15950_v20, %v4465_v24 }
 0x379   : > { %15948 = vst [vmem:[#allocation190_spill] sm:$0xff] %v10909_v63  ;;  %v4338_v44 = vadd.f32 0.2548296, %v4210_v30  ;;  %v3955_v2 = vmul.f32 %v3827_v55, %v10866_v26  ;;  %vm5362_vm13 = vcmp.lt.f32.partialorder %v15952_v39, 0.0  ;;  %7105 = vpow2.f32 %v4997_v0  ;;  %v15955_v0 = vld [vmem:[#allocation173_spill] sm:$0xff]  ;;  %v15956_v20 = vld [vmem:[#allocation192_spill] sm:$0xff] }
 0x37a   : > { %15949 = vst [vmem:[#allocation132_spill] sm:$0xff] %v10914_v38  ;;  %v2839_v58 = vand.u32 2147483648, %v10863_v23  ;;  %v10922_v56 = vadd.f32 1.0, %v1327_v48  ;;  %v3572_v9 = vadd.f32 -1.4531521, %v3444_v52  ;;  %v10924_v31 = vadd.f32 1.0, %v1328_v61  ;;  %v600_v52 = vpop.f32.mrf.mxu1 }
 0x37b   : > { %15951 = vst [vmem:[#allocation198_spill] sm:$0xff] %v10918_v14  ;;  %v5233_v63 = vsub.f32 1.0, %v5105_v19  ;;  %v4466_v35 = vmul.f32 %v4338_v44, %v10821_v6  ;;  %v4083_v27 = vadd.f32 -0.28449672, %v3955_v2  ;;  %v2814_v24 = vmul.f32 %v10906_v18, %v10851_v17 }
 0x37c   : > { %15953 = vst [vmem:[#allocation182_spill] sm:$0xff] %v10924_v31  ;;  %v10929_v30 = vor.u32 1.1754944e-38, %v2824_v37  ;;  %7107 = vpow2.f32 %v4999_v60  ;;  %v3700_v55 = vmul.f32 %v3572_v9, %v10901_v34  ;;  %vm1978_vm14 = vweird.f32 %v15955_v0 }
 0x37d   : > { %v10934_v48 = vand.u32 2147483647, %v10914_v38  ;;  %v5489_v61 = vsub.f32 0.0, %v5233_v63  ;;  %v5106_v19 = vmul.f32 %v15956_v20, %v4466_v35  ;;  %v4211_v44 = vmul.f32 %v4083_v27, %v10866_v26  ;;  %v15959_v35 = vld [vmem:[#allocation147_spill] sm:$0xff] }
 0x37e   : > { %15954 = vst [vmem:[#allocation138_spill] sm:$0xff] %v10929_v30  ;;  %v2829_v6 = vmul.f32 %v10918_v14, %v10863_v23  ;;  %v10940_v2 = vor.u32 1.1754944e-38, %v2839_v58  ;;  %7109 = vrcp.f32 %v10922_v56  ;;  %v3828_v37 = vadd.f32 1.4214138, %v3700_v55 }
 0x37f   : > { %7111 = vrcp.f32 %v10924_v31  ;;  %v5617_v60 = vsel %vm5361_vm12, %v5489_v61, %v5233_v63  ;;  %v5234_v9 = vsub.f32 1.0, %v5106_v19  ;;  %v4339_v38 = vadd.f32 0.2548296, %v4211_v44  ;;  %v10946_v30 = vpop.eup %7105  ;;  %v15961_v44 = vld [vmem:[#allocation162_spill] sm:$0xff] }
 0x380   : > { %15957 = vst [vmem:[#allocation173_spill] sm:$0xff] %v10940_v2  ;;  %vm5363_vm15 = vcmp.lt.f32.partialorder %v15959_v35, 0.0  ;;  %v2815_v27 = vsub.f32 1.0, %v2814_v24  ;;  %v10950_v20 = vadd.f32 %v600_v52, %v7654_v53  ;;  %v5745_v58 = vadd.f32 1.0, %v5617_v60  ;;  %v15962_v60 = vld [vmem:[#allocation202_spill] sm:$0xff] }
 0x381   : > { %15958 = vst [vmem:[#allocation192_spill] sm:$0xff] %v10946_v30  ;;  %v3956_v2 = vmul.f32 %v3828_v37, %v10901_v34  ;;  %v4655_v55 = vsub.f32 0.0, %v10873_v32  ;;  %v1329_v23 = vmul.f32 0.3275911, %v10934_v48  ;;  %v5490_v17 = vsub.f32 0.0, %v5234_v9 }
 0x382   : > { %v4467_v49 = vmul.f32 %v4339_v38, %v10866_v26  ;;  %v10956_v63 = vpop.eup %7107  ;;  %v2830_v61 = vsub.f32 1.0, %v2829_v6  ;;  %v4656_v19 = vsub.f32 0.0, %v10876_v47  ;;  %v5873_v24 = vmul.f32 %v5745_v58, %v15961_v44  ;;  %v15970_v44 = vld [vmem:[#allocation165_spill] sm:$0xff] }
 0x383   : > { %15960 = vst [vmem:[#allocation147_spill] sm:$0xff] %v10956_v63  ;;  %v4084_v30 = vadd.f32 -0.28449672, %v3956_v2  ;;  %v5618_v52 = vsel %vm5362_vm13, %v5490_v17, %v5234_v9  ;;  %vm1979_vm0 = vweird.f32 %v15964_v7  ;;  %v10969_v26 = vmul.f32 %v10906_v18, %v2815_v27  ;;  %v15977_v63 = vld [vmem:[#allocation199_spill] sm:$0xff] }
 0x384   : > { %v5107_v37 = vmul.f32 %v15962_v60, %v4467_v49  ;;  %v10966_v25 = vpop.eup %7109  ;;  %v10972_v38 = vmul.f32 0.70710677, %v10950_v20  ;;  %6078 = vmatmul.f32.gmra.mxu0 %v5873_v24  ;;  %v5746_v6 = vadd.f32 1.0, %v5618_v52  ;;  %v4783_v2 = vmul.f32 %v4655_v55, %v10873_v32  ;;  %vm10992_vm1 = vmor %vm1978_vm14, %vm1979_vm0  ;;  %v15974_v60 = vld [vmem:[#allocation194_spill] sm:$0xff] }
 0x385   : > { %15965 = vst [vmem:[#allocation162_spill] sm:$0xff] %v10966_v25  ;;  %v4212_v39 = vmul.f32 %v4084_v30, %v10901_v34  ;;  %v10975_v17 = vpop.eup %7111  ;;  %v10978_v9 = vadd.f32 1.0, %v1329_v23  ;;  %v1982_v58 = vand.u32 2147483647, %v15955_v0  ;;  %v10982_v49 = vmul.f32 %v10918_v14, %v2830_v61  ;;  %v15973_v23 = vld [vmem:[#allocation150_spill] sm:$0xff]  ;;  %v16163_v14 = vld [vmem:[#allocation275_spill] sm:$0xff] }
 0x386   : > { %15966 = vst [vmem:[#allocation202_spill] sm:$0xff] %v10972_v38  ;;  %v5235_v12 = vsub.f32 1.0, %v5107_v37  ;;  %v10985_v27 = vmul.f32 0.5, %v10815_v21  ;;  %v5874_v24 = vmul.f32 %v5746_v6, %v15970_v44  ;;  %vm5364_vm2 = vcmp.lt.f32.partialorder %v15973_v23, 0.0 }
 0x387   : > { %15967 = vst [vmem:[#allocation209_spill] sm:$0xff] %v10975_v17  ;;  %v4340_v52 = vadd.f32 0.2548296, %v4212_v39  ;;  %v2844_v30 = vmul.f32 %v10966_v25, %v10922_v56  ;;  %v4784_v55 = vmul.f32 %v4656_v19, %v10876_v47  ;;  %v1981_v61 = vsel %vm10992_vm1, %v15964_v7, %v1977_v42  ;;  %v15976_v19 = vld [vmem:[#allocation205_spill] sm:$0xff] }
 0x388   : > { %15968 = vst [vmem:[#allocation189_spill] sm:$0xff] %v10978_v9  ;;  %v5491_v21 = vsub.f32 0.0, %v5235_v12  ;;  %vm1993_vm3 = vweird.f32 %v15974_v60  ;;  %v2854_v0 = vand.u32 2147483648, %v10922_v56  ;;  %v2859_v37 = vmul.f32 %v10975_v17, %v10924_v31  ;;  %6191 = vmatmul.f32.gmra.mxu1 %v5874_v24  ;;  %v15978_v24 = vld [vmem:[#allocation195_spill] sm:$0xff] }
 0x389   : > { %15969 = vst [vmem:[#allocation407_spill] sm:$0xff] %v10985_v27  ;;  %v11008_v6 = vand.u32 2147483647, %v10972_v38  ;;  %v4468_v39 = vmul.f32 %v4340_v52, %v10901_v34  ;;  %v5001_v44 = vmul.f32 1.442695, %v4783_v2  ;;  %7113 = vrcp.f32 %v10978_v9  ;;  %v713_v27 = vpop.f32.mrf.mxu2 }
 0x38a   : > { %v5619_v47 = vsel %vm5363_vm15, %v5491_v21, %v5235_v12  ;;  %vm1983_vm4 = vcmp.eq.f32.partialorder %v1982_v58, 8.507059e+37  ;;  %v11015_v42 = vmul.f32 0.5, %v10818_v46  ;;  %vm2008_vm5 = vweird.f32 %v15978_v24  ;;  %v15979_v46 = vld [vmem:[#allocation177_spill] sm:$0xff] }
 0x38b   : > { %v5747_v7 = vadd.f32 1.0, %v5619_v47  ;;  %v5108_v32 = vmul.f32 %v15976_v19, %v4468_v39  ;;  %v11019_v38 = vsel %vm1983_vm4, %v15977_v63, %v1981_v61  ;;  %v2845_v34 = vsub.f32 1.0, %v2844_v30  ;;  %v15981_v30 = vld [vmem:[#allocation201_spill] sm:$0xff]  ;;  %v15983_v39 = vld [vmem:[#allocation226_spill] sm:$0xff]  ;;  %v15984_v19 = vld [vmem:[#allocation207_spill] sm:$0xff] }
 0x38c   : > { %15975 = vst [vmem:[#allocation165_spill] sm:$0xff] %v11015_v42  ;;  %v2869_v2 = vand.u32 2147483648, %v10924_v31  ;;  %v5003_v52 = vmul.f32 1.442695, %v4784_v55  ;;  %v4657_v35 = vsub.f32 0.0, %v10934_v48  ;;  %v2860_v12 = vsub.f32 1.0, %v2859_v37 }
 0x38d   : > { %v1330_v58 = vmul.f32 0.3275911, %v11008_v6  ;;  %v5875_v21 = vmul.f32 %v5747_v7, %v15979_v46  ;;  %v5236_v47 = vsub.f32 1.0, %v5108_v32  ;;  %v11026_v42 = vor.u32 1.1754944e-38, %v2854_v0 }
 0x38e   : > { %7115 = vpow2.f32 %v5001_v44  ;;  %v11029_v63 = vadd.f32 %v713_v27, %v7662_v57  ;;  %v3445_v61 = vmul.f32 1.0614054, %v11019_v38  ;;  %vm2023_vm6 = vweird.f32 %v15981_v30 }
 0x38f   : > { %15980 = vst [vmem:[#allocation150_spill] sm:$0xff] %v11026_v42  ;;  %v11034_v55 = vmul.f32 0.5, %v10892_v28  ;;  %6304 = vmatmul.f32.gmra.mxu2 %v5875_v21  ;;  %v5492_v37 = vsub.f32 0.0, %v5236_v47  ;;  %v1992_v31 = vadd.f32 %v15984_v19, %v15983_v39  ;;  %vm1994_vm7 = vweird.f32 %v15984_v19  ;;  %v11039_v0 = vpop.eup %7113  ;;  %v826_v21 = vpop.f32.mrf.mxu3 }
 0x390   : > { %15985 = vst [vmem:[#allocation205_spill] sm:$0xff] %v11039_v0  ;;  %v11042_v44 = vmul.f32 %v10966_v25, %v2845_v34  ;;  %v11044_v27 = vor.u32 1.1754944e-38, %v2869_v2  ;;  %7117 = vpow2.f32 %v5003_v52  ;;  %v4785_v7 = vmul.f32 %v4657_v35, %v10934_v48  ;;  %vm11063_vm8 = vmor %vm1993_vm3, %vm1994_vm7 }
 0x391   : > { %15982 = vst [vmem:[#allocation194_spill] sm:$0xff] %v11034_v55  ;;  %v11048_v28 = vmul.f32 %v10975_v17, %v2860_v12  ;;  %v11050_v32 = vadd.f32 1.0, %v1330_v58  ;;  %v5620_v46 = vsel %vm5364_vm2, %v5492_v37, %v5236_v47  ;;  %v3573_v39 = vadd.f32 -1.4531521, %v3445_v61  ;;  %v15994_v47 = vld [vmem:[#allocation181_spill] sm:$0xff] }
 0x392   : > { %15986 = vst [vmem:[#allocation199_spill] sm:$0xff] %v11042_v44  ;;  %v2884_v55 = vand.u32 2147483648, %v10978_v9  ;;  %v4658_v34 = vsub.f32 0.0, %v11008_v6  ;;  %v5748_v42 = vadd.f32 1.0, %v5620_v46  ;;  %v11057_v2 = vmul.f32 0.70710677, %v11029_v63 }
 0x393   : > { %15987 = vst [vmem:[#allocation195_spill] sm:$0xff] %v11044_v27  ;;  %v2874_v23 = vmul.f32 %v11039_v0, %v10978_v9  ;;  %v3701_v52 = vmul.f32 %v3573_v39, %v11019_v38  ;;  %v1996_v35 = vsel %vm11063_vm8, %v15984_v19, %v1992_v31  ;;  %v1997_v12 = vand.u32 2147483647, %v15974_v60  ;;  %v15995_v46 = vld [vmem:[#allocation229_spill] sm:$0xff]  ;;  %v15996_v27 = vld [vmem:[#allocation210_spill] sm:$0xff]  ;;  %v15998_v19 = vld [vmem:[#allocation215_spill] sm:$0xff] }
 0x394   : > { %15988 = vst [vmem:[#allocation177_spill] sm:$0xff] %v11048_v28  ;;  %v11074_v58 = vpop.eup %7115  ;;  %v5876_v61 = vmul.f32 %v5748_v42, %v15994_v47  ;;  %v11078_v37 = vadd.f32 %v826_v21, %v7664_v59  ;;  %v2007_v17 = vadd.f32 %v15996_v27, %v15995_v46  ;;  %vm2009_vm9 = vweird.f32 %v15996_v27  ;;  %v15999_v47 = vld [vmem:[#allocation238_spill] sm:$0xff] }
 0x395   : > { %15989 = vst [vmem:[#allocation201_spill] sm:$0xff] %v11050_v32  ;;  %7119 = vrcp.f32 %v11050_v32  ;;  %v3829_v39 = vadd.f32 1.4214138, %v3701_v52  ;;  %vm1998_vm10 = vcmp.eq.f32.partialorder %v1997_v12, 8.507059e+37  ;;  %vm2010_vm11 = vmor %vm2008_vm5, %vm2009_vm9  ;;  %v2012_v31 = vand.u32 2147483647, %v15978_v24 }
 0x396   : > { %15990 = vst [vmem:[#allocation226_spill] sm:$0xff] %v11057_v2  ;;  %v11087_v60 = vpop.eup %7117  ;;  %6417 = vmatmul.f32.gmra.mxu3 %v5876_v61  ;;  %v11090_v42 = vand.u32 2147483647, %v11057_v2  ;;  %v11093_v21 = vsel %vm1998_vm10, %v15998_v19, %v1996_v35  ;;  %v2011_v48 = vsel %vm2010_vm11, %v15996_v27, %v2007_v17  ;;  %v16000_v46 = vld [vmem:[#allocation218_spill] sm:$0xff]  ;;  %v4786_v24 = vmul.f32 %v4658_v34, %v11008_v6  ;;  %v16002_v2 = vld [vmem:[#allocation219_spill] sm:$0xff] }
 0x397   : > { %15993 = vst [vmem:[#allocation207_spill] sm:$0xff] %v11074_v58  ;;  %v2022_v52 = vadd.f32 %v16000_v46, %v15999_v47  ;;  %v3957_v12 = vmul.f32 %v3829_v39, %v11019_v38  ;;  %v3446_v58 = vmul.f32 1.0614054, %v11093_v21  ;;  %vm2013_vm12 = vcmp.eq.f32.partialorder %v2012_v31, 8.507059e+37 }
 0x398   : > { %15997 = vst [vmem:[#allocation181_spill] sm:$0xff] %v11087_v60  ;;  %vm2024_vm13 = vweird.f32 %v16000_v46  ;;  %v11103_v61 = vmul.f32 0.70710677, %v11078_v37  ;;  %v11106_v35 = vsel %vm2013_vm12, %v16002_v2, %v2011_v48  ;;  %v2027_v17 = vand.u32 2147483647, %v15981_v30 }
 0x399   : > { %vm2025_vm14 = vmor %vm2023_vm6, %vm2024_vm13  ;;  %v4085_v27 = vadd.f32 -0.28449672, %v3957_v12  ;;  %v3574_v39 = vadd.f32 -1.4531521, %v3446_v58  ;;  %v3447_v19 = vmul.f32 1.0614054, %v11106_v35 }
 0x39a   : > { %16001 = vst [vmem:[#allocation229_spill] sm:$0xff] %v11103_v61  ;;  %v2026_v31 = vsel %vm2025_vm14, %v16000_v46, %v2022_v52  ;;  %v5005_v47 = vmul.f32 1.442695, %v4785_v7  ;;  %v11114_v6 = vmul.f32 0.5, %v10950_v20  ;;  %v1331_v34 = vmul.f32 0.3275911, %v11090_v42  ;;  %v490_v20 = vpop.f32.mrf.mxu0 }
 0x39b   : > { %vm2028_vm15 = vcmp.eq.f32.partialorder %v2027_v17, 8.507059e+37  ;;  %v11117_v2 = vpop.eup %7119  ;;  %v4213_v48 = vmul.f32 %v4085_v27, %v11019_v38  ;;  %v3702_v60 = vmul.f32 %v3574_v39, %v11093_v21  ;;  %v3575_v30 = vadd.f32 -1.4531521, %v3447_v19  ;;  %v16005_v12 = vld [vmem:[#allocation220_spill] sm:$0xff]  ;;  %v16007_v27 = vld [vmem:[#allocation153_spill] sm:$0xff] }
 0x39c   : > { %16003 = vst [vmem:[#allocation210_spill] sm:$0xff] %v11114_v6  ;;  %v11122_v58 = vsel %vm2028_vm15, %v16005_v12, %v2026_v31  ;;  %v2875_v28 = vsub.f32 1.0, %v2874_v23  ;;  %v11124_v9 = vor.u32 1.1754944e-38, %v2884_v55  ;;  %v1204_v7 = vand.u32 2147483647, %v11103_v61 }
 0x39d   : > { %16004 = vst [vmem:[#allocation215_spill] sm:$0xff] %v11117_v2  ;;  %v3448_v46 = vmul.f32 1.0614054, %v11122_v58  ;;  %v5007_v52 = vmul.f32 1.442695, %v4786_v24  ;;  %v3703_v25 = vmul.f32 %v3575_v30, %v11106_v35  ;;  %vm5365_vm0 = vcmp.lt.f32.partialorder %v16007_v27, 0.0 }
 0x39e   : > { %16006 = vst [vmem:[#allocation238_spill] sm:$0xff] %v11124_v9  ;;  %v4341_v17 = vadd.f32 0.2548296, %v4213_v48  ;;  %v3830_v6 = vadd.f32 1.4214138, %v3702_v60  ;;  %7121 = vpow2.f32 %v5005_v47  ;;  %v2899_v39 = vand.u32 2147483648, %v11050_v32 }
 0x39f   : > { %v11131_v19 = vadd.f32 1.0, %v1331_v34  ;;  %v3576_v23 = vadd.f32 -1.4531521, %v3448_v46  ;;  %v491_v55 = vadd.f32 %v490_v20, %v7652_v51  ;;  %v3831_v61 = vadd.f32 1.4214138, %v3703_v25  ;;  %v603_v34 = vpop.f32.mrf.mxu1  ;;  %v16010_v30 = vld [vmem:[#allocation214_spill] sm:$0xff] }
 0x3a0   : > { %v4469_v31 = vmul.f32 %v4341_v17, %v11019_v38  ;;  %v3958_v12 = vmul.f32 %v3830_v6, %v11093_v21  ;;  %v11137_v24 = vmul.f32 %v11039_v0, %v2875_v28  ;;  %v2889_v60 = vmul.f32 %v11117_v2, %v11050_v32 }
 0x3a1   : > { %16008 = vst [vmem:[#allocation218_spill] sm:$0xff] %v11131_v19  ;;  %v1332_v48 = vmul.f32 0.3275911, %v1204_v7  ;;  %v3704_v47 = vmul.f32 %v3576_v23, %v11122_v58  ;;  %7123 = vpow2.f32 %v5007_v52  ;;  %v3959_v20 = vmul.f32 %v3831_v61, %v11106_v35 }
 0x3a2   : > { %16009 = vst [vmem:[#allocation219_spill] sm:$0xff] %v11137_v24  ;;  %v5109_v46 = vmul.f32 %v16010_v30, %v4469_v31  ;;  %v4086_v9 = vadd.f32 -0.28449672, %v3958_v12  ;;  %v11144_v38 = vor.u32 1.1754944e-38, %v2899_v39  ;;  %7125 = vrcp.f32 %v11131_v19  ;;  %v16015_v24 = vld [vmem:[#allocation171_spill] sm:$0xff] }
 0x3a3   : > { %v4659_v25 = vsub.f32 0.0, %v11090_v42  ;;  %v3832_v28 = vadd.f32 1.4214138, %v3704_v47  ;;  %v11148_v6 = vmul.f32 0.70710677, %v491_v55  ;;  %v2890_v0 = vsub.f32 1.0, %v2889_v60 }
 0x3a4   : > { %16011 = vst [vmem:[#allocation220_spill] sm:$0xff] %v11144_v38  ;;  %v5237_v17 = vsub.f32 1.0, %v5109_v46  ;;  %v4214_v32 = vmul.f32 %v4086_v9, %v11093_v21  ;;  %v4087_v23 = vadd.f32 -0.28449672, %v3959_v20  ;;  %v11151_v52 = vpop.eup %7121  ;;  %v11153_v31 = vadd.f32 1.0, %v1332_v48 }
 0x3a5   : > { %16012 = vst [vmem:[#allocation153_spill] sm:$0xff] %v11148_v6  ;;  %v11156_v61 = vadd.f32 %v603_v34, %v7654_v53  ;;  %v3960_v39 = vmul.f32 %v3832_v28, %v11122_v58  ;;  %v4660_v12 = vsub.f32 0.0, %v1204_v7  ;;  %vm5366_vm1 = vcmp.lt.f32.partialorder %v16015_v24, 0.0 }
 0x3a6   : > { %16013 = vst [vmem:[#allocation214_spill] sm:$0xff] %v11151_v52  ;;  %v5493_v30 = vsub.f32 0.0, %v5237_v17  ;;  %v4342_v38 = vadd.f32 0.2548296, %v4214_v32  ;;  %v4215_v47 = vmul.f32 %v4087_v23, %v11106_v35  ;;  %v11162_v9 = vmul.f32 0.5, %v11029_v63  ;;  %v16020_v63 = vld [vmem:[#allocation174_spill] sm:$0xff] }
 0x3a7   : > { %16014 = vst [vmem:[#allocation408_spill] sm:$0xff] %v11153_v31  ;;  %v4787_v46 = vmul.f32 %v4659_v25, %v11090_v42  ;;  %v11166_v60 = vmul.f32 0.5, %v11078_v37  ;;  %v4088_v48 = vadd.f32 -0.28449672, %v3960_v39  ;;  %v11168_v34 = vpop.eup %7123  ;;  %v1205_v20 = vand.u32 2147483647, %v11148_v6 }
 0x3a8   : > { %16016 = vst [vmem:[#allocation171_spill] sm:$0xff] %v11162_v9  ;;  %v5621_v32 = vsel %vm5365_vm0, %v5493_v30, %v5237_v17  ;;  %v4470_v28 = vmul.f32 %v4342_v38, %v11093_v21  ;;  %v4343_v23 = vadd.f32 0.2548296, %v4215_v47  ;;  %v11174_v52 = vpop.eup %7125  ;;  %vm5367_vm2 = vcmp.lt.f32.partialorder %v16020_v63, 0.0  ;;  %v16023_v17 = vld [vmem:[#allocation222_spill] sm:$0xff]  ;;  %v16040_v63 = vld [vmem:[#allocation217_spill] sm:$0xff] }
 0x3a9   : > { %16017 = vst [vmem:[#allocation409_spill] sm:$0xff] %v11166_v60  ;;  %7127 = vrcp.f32 %v11153_v31  ;;  %v11179_v37 = vmul.f32 0.70710677, %v11156_v61  ;;  %v5749_v42 = vadd.f32 1.0, %v5621_v32  ;;  %v4216_v25 = vmul.f32 %v4088_v48, %v11122_v58  ;;  %v16024_v60 = vld [vmem:[#allocation183_spill] sm:$0xff] }
 0x3aa   : > { %16018 = vst [vmem:[#allocation410_spill] sm:$0xff] %v11168_v34  ;;  %v11183_v39 = vmul.f32 %v11117_v2, %v2890_v0  ;;  %v4788_v27 = vmul.f32 %v4660_v12, %v1204_v7  ;;  %v5110_v30 = vmul.f32 %v16023_v17, %v4470_v28  ;;  %v4471_v21 = vmul.f32 %v4343_v23, %v11106_v35  ;;  %v16025_v34 = vld [vmem:[#allocation179_spill] sm:$0xff]  ;;  %v16026_v0 = vld [vmem:[#allocation228_spill] sm:$0xff]  ;;  %v716_v7 = vpop.f32.mrf.mxu2 }
 0x3ab   : > { %16019 = vst [vmem:[#allocation411_spill] sm:$0xff] %v11174_v52  ;;  %v2914_v38 = vand.u32 2147483648, %v11131_v19  ;;  %v5009_v47 = vmul.f32 1.442695, %v4787_v46  ;;  %v5877_v6 = vmul.f32 %v5749_v42, %v16024_v60  ;;  %v4344_v9 = vadd.f32 0.2548296, %v4216_v25 }
 0x3ac   : > { %16021 = vst [vmem:[#allocation174_spill] sm:$0xff] %v11179_v37  ;;  %vm5368_vm3 = vcmp.lt.f32.partialorder %v16025_v34, 0.0  ;;  %v2904_v32 = vmul.f32 %v11174_v52, %v11131_v19  ;;  %v1333_v48 = vmul.f32 0.3275911, %v1205_v20  ;;  %v5238_v44 = vsub.f32 1.0, %v5110_v30 }
 0x3ad   : > { %16022 = vst [vmem:[#allocation412_spill] sm:$0xff] %v11183_v39  ;;  %v5111_v2 = vmul.f32 %v16026_v0, %v4471_v21  ;;  %v2929_v12 = vand.u32 2147483648, %v11153_v31  ;;  %v11194_v28 = vmul.f32 0.5, %v491_v55  ;;  %v1206_v35 = vand.u32 2147483647, %v11179_v37  ;;  %6081 = vmatmul.f32.gmra.mxu0 %v5877_v6  ;;  %v16029_v39 = vld [vmem:[#allocation211_spill] sm:$0xff] }
 0x3ae   : > { %v4472_v46 = vmul.f32 %v4344_v9, %v11122_v58  ;;  %v5011_v60 = vmul.f32 1.442695, %v4788_v27  ;;  %v4661_v23 = vsub.f32 0.0, %v1205_v20  ;;  %v5494_v42 = vsub.f32 0.0, %v5238_v44  ;;  %v16031_v21 = vld [vmem:[#allocation236_spill] sm:$0xff] }
 0x3af   : > { %16027 = vst [vmem:[#allocation222_spill] sm:$0xff] %v11194_v28  ;;  %v5239_v25 = vsub.f32 1.0, %v5111_v2  ;;  %v11198_v17 = vpop.eup %7127  ;;  %vm2038_vm4 = vweird.f32 %v16029_v39  ;;  %v11201_v30 = vor.u32 1.1754944e-38, %v2914_v38  ;;  %7129 = vpow2.f32 %v5009_v47  ;;  %v16032_v28 = vld [vmem:[#allocation216_spill] sm:$0xff] }
 0x3b0   : > { %16028 = vst [vmem:[#allocation183_spill] sm:$0xff] %v11198_v17  ;;  %v5112_v0 = vmul.f32 %v16031_v21, %v4472_v46  ;;  %v11205_v55 = vadd.f32 %v716_v7, %v7662_v57  ;;  %vm2053_vm5 = vweird.f32 %v16032_v28  ;;  %v2905_v6 = vsub.f32 1.0, %v2904_v32  ;;  %v16035_v32 = vld [vmem:[#allocation185_spill] sm:$0xff] }
 0x3b1   : > { %16030 = vst [vmem:[#allocation179_spill] sm:$0xff] %v11201_v30  ;;  %v11208_v58 = vadd.f32 1.0, %v1333_v48  ;;  %v5622_v2 = vsel %vm5366_vm1, %v5494_v42, %v5238_v44  ;;  %v5495_v9 = vsub.f32 0.0, %v5239_v25  ;;  %v11212_v27 = vor.u32 1.1754944e-38, %v2929_v12 }
 0x3b2   : > { %v1334_v37 = vmul.f32 0.3275911, %v1206_v35  ;;  %v5750_v38 = vadd.f32 1.0, %v5622_v2  ;;  %v5240_v30 = vsub.f32 1.0, %v5112_v0  ;;  %v2919_v47 = vmul.f32 %v11198_v17, %v11153_v31  ;;  %v16043_v2 = vld [vmem:[#allocation225_spill] sm:$0xff] }
 0x3b3   : > { %16033 = vst [vmem:[#allocation228_spill] sm:$0xff] %v11208_v58  ;;  %7131 = vpow2.f32 %v5011_v60  ;;  %v4789_v7 = vmul.f32 %v4661_v23, %v1205_v20  ;;  %v5623_v46 = vsel %vm5367_vm2, %v5495_v9, %v5239_v25  ;;  %v11220_v44 = vmul.f32 0.70710677, %v11205_v55  ;;  %v829_v20 = vpop.f32.mrf.mxu3  ;;  %v16042_v25 = vld [vmem:[#allocation200_spill] sm:$0xff] }
 0x3b4   : > { %16034 = vst [vmem:[#allocation211_spill] sm:$0xff] %v11212_v27  ;;  %v5878_v48 = vmul.f32 %v5750_v38, %v16035_v32  ;;  %v5751_v21 = vadd.f32 1.0, %v5623_v46  ;;  %v5496_v19 = vsub.f32 0.0, %v5240_v30  ;;  %v11223_v24 = vmul.f32 %v11174_v52, %v2905_v6 }
 0x3b5   : > { %16036 = vst [vmem:[#allocation236_spill] sm:$0xff] %v11220_v44  ;;  %7133 = vrcp.f32 %v11208_v58  ;;  %v11227_v12 = vmul.f32 0.5, %v11156_v61  ;;  %v4662_v60 = vsub.f32 0.0, %v1206_v35  ;;  %v11229_v23 = vpop.eup %7129  ;;  %vm2068_vm6 = vweird.f32 %v16040_v63 }
 0x3b6   : > { %16037 = vst [vmem:[#allocation216_spill] sm:$0xff] %v11223_v24  ;;  %v11232_v42 = vadd.f32 1.0, %v1334_v37  ;;  %6194 = vmatmul.f32.gmra.mxu1 %v5878_v48  ;;  %v5879_v0 = vmul.f32 %v5751_v21, %v16042_v25  ;;  %v5624_v6 = vsel %vm5368_vm3, %v5496_v19, %v5240_v30  ;;  %v2037_v9 = vadd.f32 %v16043_v2, %v8920_v5  ;;  %v16046_v5 = vld [vmem:[#allocation203_spill] sm:$0xff] }
 0x3b7   : > { %16038 = vst [vmem:[#allocation185_spill] sm:$0xff] %v11227_v12  ;;  %v2920_v38 = vsub.f32 1.0, %v2919_v47  ;;  %v2944_v61 = vand.u32 2147483648, %v11208_v58  ;;  %v5013_v46 = vmul.f32 1.442695, %v4789_v7  ;;  %v5752_v32 = vadd.f32 1.0, %v5624_v6 }
 0x3b8   : > { %16039 = vst [vmem:[#allocation413_spill] sm:$0xff] %v11229_v23  ;;  %v16044_v12 = vld [vmem:[#allocation232_spill] sm:$0xff]  ;;  %6307 = vmatmul.f32.gmra.mxu2 %v5879_v0  ;;  %v11242_v37 = vand.u32 2147483647, %v11220_v44  ;;  %v11245_v48 = vadd.f32 %v829_v20, %v7664_v59  ;;  %vm2039_vm8 = vweird.f32 %v16043_v2  ;;  %v2042_v19 = vand.u32 2147483647, %v16029_v39 }
 0x3b9   : > { %16041 = vst [vmem:[#allocation217_spill] sm:$0xff] %v11232_v42  ;;  %vm2083_vm7 = vweird.f32 %v16044_v12  ;;  %v11249_v34 = vpop.eup %7131  ;;  %v5880_v30 = vmul.f32 %v5752_v32, %v16046_v5  ;;  %vm2040_vm9 = vmor %vm2038_vm4, %vm2039_vm8  ;;  %v16047_v47 = vld [vmem:[#allocation250_spill] sm:$0xff]  ;;  %v2057_v25 = vand.u32 2147483647, %v16032_v28  ;;  %7135 = vrcp.f32 %v11232_v42  ;;  %v16052_v5 = vld [vmem:[#allocation231_spill] sm:$0xff]  ;;  %v493_v28 = vpop.f32.mrf.mxu0 }
 0x3ba   : > { %16045 = vst [vmem:[#allocation200_spill] sm:$0xff] %v11249_v34  ;;  %v16048_v7 = vld [vmem:[#allocation230_spill] sm:$0xff]  ;;  %v4790_v20 = vmul.f32 %v4662_v60, %v1206_v35  ;;  %v2041_v0 = vsel %vm2040_vm9, %v16043_v2, %v2037_v9  ;;  %vm2043_vm11 = vcmp.eq.f32.partialorder %v2042_v19, 8.507059e+37  ;;  %v11265_v39 = vmul.f32 %v11198_v17, %v2920_v38  ;;  %v16054_v38 = vld [vmem:[#allocation239_spill] sm:$0xff] }
 0x3bb   : > { %v2052_v21 = vadd.f32 %v16048_v7, %v16047_v47  ;;  %vm2054_vm10 = vweird.f32 %v16048_v7  ;;  %v11262_v6 = vpop.eup %7133  ;;  %v11267_v32 = vor.u32 1.1754944e-38, %v2944_v61  ;;  %6420 = vmatmul.f32.gmra.mxu3 %v5880_v30  ;;  %v11270_v47 = vsel %vm2043_vm11, %v16052_v5, %v2041_v0  ;;  %v16055_v19 = vld [vmem:[#allocation251_spill] sm:$0xff]  ;;  %v16056_v30 = vld [vmem:[#allocation233_spill] sm:$0xff] }
 0x3bc   : > { %vm2055_vm12 = vmor %vm2053_vm5, %vm2054_vm10  ;;  %16049 = vst [vmem:[#allocation225_spill] sm:$0xff] %v11262_v6  ;;  %7137 = vpow2.f32 %v5013_v46  ;;  %v2959_v35 = vand.u32 2147483648, %v11232_v42  ;;  %v1335_v60 = vmul.f32 0.3275911, %v11242_v37  ;;  %vm2058_vm13 = vcmp.eq.f32.partialorder %v2057_v25, 8.507059e+37 }
 0x3bd   : > { %16050 = vst [vmem:[#allocation232_spill] sm:$0xff] %v11265_v39  ;;  %v2056_v44 = vsel %vm2055_vm12, %v16048_v7, %v2052_v21  ;;  %v11276_v2 = vmul.f32 0.70710677, %v11245_v48  ;;  %v3449_v9 = vmul.f32 1.0614054, %v11270_v47  ;;  %v2067_v0 = vadd.f32 %v16056_v30, %v16055_v19  ;;  %v16059_v19 = vld [vmem:[#allocation248_spill] sm:$0xff] }
 0x3be   : > { %16051 = vst [vmem:[#allocation203_spill] sm:$0xff] %v11267_v32  ;;  %v11280_v61 = vsel %vm2058_vm13, %v16054_v38, %v2056_v44  ;;  %v2934_v46 = vmul.f32 %v11262_v6, %v11208_v58  ;;  %v5015_v7 = vmul.f32 1.442695, %v4790_v20  ;;  %vm2069_vm14 = vweird.f32 %v16056_v30 }
 0x3bf   : > { %16053 = vst [vmem:[#allocation250_spill] sm:$0xff] %v11276_v2  ;;  %v3450_v21 = vmul.f32 1.0614054, %v11280_v61  ;;  %v11289_v25 = vadd.f32 %v493_v28, %v7652_v51  ;;  %v3577_v5 = vadd.f32 -1.4531521, %v3449_v9  ;;  %vm11293_vm15 = vmor %vm2068_vm6, %vm2069_vm14  ;;  %v2082_v34 = vadd.f32 %v16059_v19, %v9007_v33  ;;  %v11300_v20 = vpop.eup %7135 }
 0x3c0   : > { %v2072_v38 = vand.u32 2147483647, %v16040_v63  ;;  %16060 = vst [vmem:[#allocation230_spill] sm:$0xff] %v11300_v20  ;;  %v2071_v28 = vsel %vm11293_vm15, %v16056_v30, %v2067_v0  ;;  %vm2084_vm0 = vweird.f32 %v16059_v19  ;;  %v2087_v9 = vand.u32 2147483647, %v16044_v12  ;;  %v16063_v30 = vld [vmem:[#allocation241_spill] sm:$0xff] }
 0x3c1   : > { %v3578_v23 = vadd.f32 -1.4531521, %v3450_v21  ;;  %v11307_v32 = vadd.f32 1.0, %v1335_v60  ;;  %v11310_v27 = vand.u32 2147483647, %v11276_v2  ;;  %v3705_v63 = vmul.f32 %v3577_v5, %v11270_v47  ;;  %vm2085_vm2 = vmor %vm2083_vm7, %vm2084_vm0 }
 0x3c2   : > { %vm2073_vm1 = vcmp.eq.f32.partialorder %v2072_v38, 8.507059e+37  ;;  %v11315_v33 = vpop.eup %7137  ;;  %v2086_v44 = vsel %vm2085_vm2, %v16059_v19, %v2082_v34  ;;  %vm2088_vm3 = vcmp.eq.f32.partialorder %v2087_v9, 8.507059e+37  ;;  %v2949_v60 = vmul.f32 %v11300_v20, %v11232_v42  ;;  %v16064_v38 = vld [vmem:[#allocation256_spill] sm:$0xff]  ;;  %v606_v19 = vpop.f32.mrf.mxu1 }
 0x3c3   : > { %16061 = vst [vmem:[#allocation231_spill] sm:$0xff] %v11307_v32  ;;  %v3706_v21 = vmul.f32 %v3578_v23, %v11280_v61  ;;  %v11319_v0 = vsel %vm2073_vm1, %v16063_v30, %v2071_v28  ;;  %v3833_v2 = vadd.f32 1.4214138, %v3705_v63  ;;  %v11326_v58 = vsel %vm2088_vm3, %v16064_v38, %v2086_v44 }
 0x3c4   : > { %16062 = vst [vmem:[#allocation239_spill] sm:$0xff] %v11315_v33  ;;  %v3451_v5 = vmul.f32 1.0614054, %v11319_v0  ;;  %v2935_v12 = vsub.f32 1.0, %v2934_v46  ;;  %v11328_v17 = vor.u32 1.1754944e-38, %v2959_v35  ;;  %v4663_v28 = vsub.f32 0.0, %v11242_v37 }
 0x3c5   : > { %v3834_v33 = vadd.f32 1.4214138, %v3706_v21  ;;  %v3452_v23 = vmul.f32 1.0614054, %v11326_v58  ;;  %v11333_v34 = vmul.f32 0.70710677, %v11289_v25  ;;  %v3961_v9 = vmul.f32 %v3833_v2, %v11270_v47 }
 0x3c6   : > { %16065 = vst [vmem:[#allocation251_spill] sm:$0xff] %v11328_v17  ;;  %v3579_v63 = vadd.f32 -1.4531521, %v3451_v5  ;;  %7139 = vrcp.f32 %v11307_v32  ;;  %v1336_v30 = vmul.f32 0.3275911, %v11310_v27  ;;  %v2950_v44 = vsub.f32 1.0, %v2949_v60 }
 0x3c7   : > { %16066 = vst [vmem:[#allocation233_spill] sm:$0xff] %v11333_v34  ;;  %v3962_v46 = vmul.f32 %v3834_v33, %v11280_v61  ;;  %v3580_v35 = vadd.f32 -1.4531521, %v3452_v23  ;;  %7141 = vpow2.f32 %v5015_v7  ;;  %v4089_v21 = vadd.f32 -0.28449672, %v3961_v9 }
 0x3c8   : > { %v3707_v38 = vmul.f32 %v3579_v63, %v11319_v0  ;;  %v11341_v17 = vmul.f32 %v11262_v6, %v2935_v12  ;;  %v11344_v42 = vadd.f32 %v606_v19, %v7654_v53  ;;  %v4791_v39 = vmul.f32 %v4663_v28, %v11242_v37 }
 0x3c9   : > { %v4090_v2 = vadd.f32 -0.28449672, %v3962_v46  ;;  %v3708_v5 = vmul.f32 %v3580_v35, %v11326_v58  ;;  %v11349_v52 = vand.u32 2147483647, %v11333_v34  ;;  %v4217_v33 = vmul.f32 %v4089_v21, %v11270_v47  ;;  %v16072_v35 = vld [vmem:[#allocation191_spill] sm:$0xff] }
 0x3ca   : > { %16067 = vst [vmem:[#allocation248_spill] sm:$0xff] %v11341_v17  ;;  %v3835_v7 = vadd.f32 1.4214138, %v3707_v38  ;;  %v11353_v60 = vmul.f32 0.5, %v11205_v55  ;;  %v11355_v23 = vadd.f32 1.0, %v1336_v30  ;;  %v11359_v9 = vmul.f32 %v11300_v20, %v2950_v44  ;;  %v16075_v44 = vld [vmem:[#allocation196_spill] sm:$0xff] }
 0x3cb   : > { %v4218_v12 = vmul.f32 %v4090_v2, %v11280_v61  ;;  %v3836_v19 = vadd.f32 1.4214138, %v3708_v5  ;;  %v4664_v63 = vsub.f32 0.0, %v11310_v27  ;;  %v4345_v37 = vadd.f32 0.2548296, %v4217_v33 }
 0x3cc   : > { %16068 = vst [vmem:[#allocation241_spill] sm:$0xff] %v11353_v60  ;;  %v3963_v28 = vmul.f32 %v3835_v7, %v11319_v0  ;;  %v11363_v46 = vpop.eup %7139  ;;  %vm5369_vm4 = vcmp.lt.f32.partialorder %v16072_v35, 0.0  ;;  %v2974_v55 = vand.u32 2147483648, %v11307_v32  ;;  %v11368_v30 = vmul.f32 0.70710677, %v11344_v42 }
 0x3cd   : > { %16069 = vst [vmem:[#allocation256_spill] sm:$0xff] %v11355_v23  ;;  %v4346_v21 = vadd.f32 0.2548296, %v4218_v12  ;;  %v3964_v38 = vmul.f32 %v3836_v19, %v11326_v58  ;;  %v11371_v2 = vpop.eup %7141  ;;  %vm5370_vm5 = vcmp.lt.f32.partialorder %v16075_v44, 0.0  ;;  %v5017_v5 = vmul.f32 1.442695, %v4791_v39  ;;  %v832_v44 = vpop.f32.mrf.mxu3 }
 0x3ce   : > { %16070 = vst [vmem:[#allocation414_spill] sm:$0xff] %v11359_v9  ;;  %v1337_v33 = vmul.f32 0.3275911, %v11349_v52  ;;  %v4473_v7 = vmul.f32 %v4345_v37, %v11270_v47  ;;  %v4091_v34 = vadd.f32 -0.28449672, %v3963_v28  ;;  %v11377_v60 = vmul.f32 0.5, %v11245_v48 }
 0x3cf   : > { %16071 = vst [vmem:[#allocation415_spill] sm:$0xff] %v11363_v46  ;;  %7143 = vrcp.f32 %v11355_v23  ;;  %v4474_v20 = vmul.f32 %v4346_v21, %v11280_v61  ;;  %v4092_v12 = vadd.f32 -0.28449672, %v3964_v38  ;;  %v2964_v19 = vmul.f32 %v11363_v46, %v11307_v32  ;;  %v16077_v9 = vld [vmem:[#allocation240_spill] sm:$0xff]  ;;  %v16079_v48 = vld [vmem:[#allocation246_spill] sm:$0xff] }
 0x3d0   : > { %16073 = vst [vmem:[#allocation191_spill] sm:$0xff] %v11368_v30  ;;  %v5113_v39 = vmul.f32 %v16077_v9, %v4473_v7  ;;  %v4219_v6 = vmul.f32 %v4091_v34, %v11319_v0  ;;  %v11386_v17 = vor.u32 1.1754944e-38, %v2974_v55  ;;  %v1210_v47 = vand.u32 2147483647, %v11368_v30  ;;  %v719_v55 = vpop.f32.mrf.mxu2  ;;  %v16083_v7 = vld [vmem:[#allocation212_spill] sm:$0xff] }
 0x3d1   : > { %16074 = vst [vmem:[#allocation416_spill] sm:$0xff] %v11371_v2  ;;  %v4792_v2 = vmul.f32 %v4664_v63, %v11310_v27  ;;  %v5114_v37 = vmul.f32 %v16079_v48, %v4474_v20  ;;  %v4220_v28 = vmul.f32 %v4092_v12, %v11326_v58  ;;  %7145 = vpow2.f32 %v5017_v5  ;;  %v16088_v32 = vld [vmem:[#allocation264_spill] sm:$0xff] }
 0x3d2   : > { %16076 = vst [vmem:[#allocation196_spill] sm:$0xff] %v11377_v60  ;;  %v11391_v61 = vadd.f32 1.0, %v1337_v33  ;;  %v5241_v21 = vsub.f32 1.0, %v5113_v39  ;;  %v4347_v38 = vadd.f32 0.2548296, %v4219_v6  ;;  %v16081_v60 = vld [vmem:[#allocation197_spill] sm:$0xff] }
 0x3d3   : > { %16078 = vst [vmem:[#allocation240_spill] sm:$0xff] %v11386_v17  ;;  %vm5371_vm6 = vcmp.lt.f32.partialorder %v16081_v60, 0.0  ;;  %v2989_v27 = vand.u32 2147483648, %v11355_v23  ;;  %v11396_v9 = vmul.f32 0.5, %v11289_v25  ;;  %v5242_v34 = vsub.f32 1.0, %v5114_v37  ;;  %v16085_v6 = vld [vmem:[#allocation234_spill] sm:$0xff] }
 0x3d4   : > { %16080 = vst [vmem:[#allocation246_spill] sm:$0xff] %v11391_v61  ;;  %v4348_v63 = vadd.f32 0.2548296, %v4220_v28  ;;  %vm5372_vm7 = vcmp.lt.f32.partialorder %v16083_v7, 0.0  ;;  %v2965_v20 = vsub.f32 1.0, %v2964_v19  ;;  %v5497_v12 = vsub.f32 0.0, %v5241_v21 }
 0x3d5   : > { %16082 = vst [vmem:[#allocation197_spill] sm:$0xff] %v11396_v9  ;;  %v5019_v48 = vmul.f32 1.442695, %v4792_v2  ;;  %v4475_v5 = vmul.f32 %v4347_v38, %v11319_v0  ;;  %v11400_v33 = vpop.eup %7143  ;;  %vm2098_vm8 = vweird.f32 %v16085_v6  ;;  %v4665_v39 = vsub.f32 0.0, %v11349_v52  ;;  %v16086_v19 = vld [vmem:[#allocation252_spill] sm:$0xff] }
 0x3d6   : > { %16084 = vst [vmem:[#allocation212_spill] sm:$0xff] %v11400_v33  ;;  %v1338_v30 = vmul.f32 0.3275911, %v1210_v47  ;;  %v5498_v17 = vsub.f32 0.0, %v5242_v34  ;;  %v4476_v25 = vmul.f32 %v4348_v63, %v11326_v58  ;;  %7147 = vrcp.f32 %v11391_v61 }
 0x3d7   : > { %v5625_v37 = vsel %vm5369_vm4, %v5497_v12, %v5241_v21  ;;  %v5115_v2 = vmul.f32 %v16086_v19, %v4475_v5  ;;  %v11410_v28 = vadd.f32 %v719_v55, %v7662_v57  ;;  %v11412_v0 = vor.u32 1.1754944e-38, %v2989_v27  ;;  %v11417_v31 = vpop.eup %7145  ;;  %v16090_v12 = vld [vmem:[#allocation242_spill] sm:$0xff]  ;;  %v16092_v27 = vld [vmem:[#allocation204_spill] sm:$0xff] }
 0x3d8   : > { %v5753_v38 = vadd.f32 1.0, %v5625_v37  ;;  %v5626_v9 = vsel %vm5370_vm5, %v5498_v17, %v5242_v34  ;;  %v5116_v24 = vmul.f32 %v16088_v32, %v4476_v25  ;;  %16089 = vst [vmem:[#allocation252_spill] sm:$0xff] %v11417_v31  ;;  %v2979_v58 = vmul.f32 %v11400_v33, %v11355_v23  ;;  %v16093_v32 = vld [vmem:[#allocation223_spill] sm:$0xff] }
 0x3d9   : > { %16087 = vst [vmem:[#allocation234_spill] sm:$0xff] %v11412_v0  ;;  %v4666_v35 = vsub.f32 0.0, %v1210_v47  ;;  %v5754_v21 = vadd.f32 1.0, %v5626_v9  ;;  %v5243_v63 = vsub.f32 1.0, %v5115_v2  ;;  %vm2113_vm9 = vweird.f32 %v16090_v12 }
 0x3da   : > { %7149 = vpow2.f32 %v5019_v48  ;;  %v11422_v55 = vadd.f32 1.0, %v1338_v30  ;;  %v5881_v5 = vmul.f32 %v5753_v38, %v16092_v27  ;;  %v5244_v37 = vsub.f32 1.0, %v5116_v24  ;;  %v16096_v48 = vld [vmem:[#allocation269_spill] sm:$0xff] }
 0x3db   : > { %v4793_v17 = vmul.f32 %v4665_v39, %v11349_v52  ;;  %v5882_v34 = vmul.f32 %v5754_v21, %v16093_v32  ;;  %v5499_v25 = vsub.f32 0.0, %v5243_v63  ;;  %v11428_v19 = vmul.f32 0.70710677, %v11410_v28  ;;  %v16097_v30 = vld [vmem:[#allocation249_spill] sm:$0xff] }
 0x3dc   : > { %16091 = vst [vmem:[#allocation264_spill] sm:$0xff] %v11422_v55  ;;  %v11431_v9 = vmul.f32 %v11363_v46, %v2965_v20  ;;  %6084 = vmatmul.f32.gmra.mxu0 %v5881_v5  ;;  %v5500_v2 = vsub.f32 0.0, %v5244_v37  ;;  %v2097_v31 = vadd.f32 %v16097_v30, %v16096_v48  ;;  %vm2099_vm10 = vweird.f32 %v16097_v30  ;;  %v11436_v24 = vpop.eup %7147  ;;  %v16099_v20 = vld [vmem:[#allocation253_spill] sm:$0xff]  ;;  %v16105_v48 = vld [vmem:[#allocation227_spill] sm:$0xff]  ;;  %v16147_v46 = vld [vmem:[#allocation268_spill] sm:$0xff] }
 0x3dd   : > { %16094 = vst [vmem:[#allocation242_spill] sm:$0xff] %v11428_v19  ;;  %v2980_v38 = vsub.f32 1.0, %v2979_v58  ;;  %v4794_v52 = vmul.f32 %v4666_v35, %v1210_v47  ;;  %6197 = vmatmul.f32.gmra.mxu1 %v5882_v34  ;;  %v5627_v39 = vsel %vm5371_vm6, %v5499_v25, %v5243_v63  ;;  %v11441_v21 = vadd.f32 %v832_v44, %v7664_v59  ;;  %vm11456_vm12 = vmor %vm2098_vm8, %vm2099_vm10  ;;  %v496_v63 = vpop.f32.mrf.mxu0 }
 0x3de   : > { %16095 = vst [vmem:[#allocation204_spill] sm:$0xff] %v11431_v9  ;;  %vm2128_vm11 = vweird.f32 %v16099_v20  ;;  %7151 = vrcp.f32 %v11422_v55  ;;  %v5755_v27 = vadd.f32 1.0, %v5627_v39  ;;  %v5628_v5 = vsel %vm5372_vm7, %v5500_v2, %v5244_v37 }
 0x3df   : > { %16098 = vst [vmem:[#allocation223_spill] sm:$0xff] %v11436_v24  ;;  %v2102_v32 = vand.u32 2147483647, %v16085_v6  ;;  %v3004_v58 = vand.u32 2147483648, %v11391_v61  ;;  %v5021_v47 = vmul.f32 1.442695, %v4793_v17  ;;  %v2994_v7 = vmul.f32 %v11436_v24, %v11391_v61 }
 0x3e0   : > { %v5756_v35 = vadd.f32 1.0, %v5628_v5  ;;  %v11450_v60 = vand.u32 2147483647, %v11428_v19  ;;  %v11460_v44 = vpop.eup %7149  ;;  %v11465_v37 = vmul.f32 0.5, %v11344_v42  ;;  %v16104_v17 = vld [vmem:[#allocation224_spill] sm:$0xff]  ;;  %v2101_v25 = vsel %vm11456_vm12, %v16097_v30, %v2097_v31  ;;  %v16107_v19 = vld [vmem:[#allocation257_spill] sm:$0xff] }
 0x3e1   : > { %16102 = vst [vmem:[#allocation269_spill] sm:$0xff] %v11460_v44  ;;  %v5883_v34 = vmul.f32 %v5755_v27, %v16104_v17  ;;  %v3019_v6 = vand.u32 2147483648, %v11422_v55  ;;  %v5023_v2 = vmul.f32 1.442695, %v4794_v52  ;;  %v11474_v5 = vmul.f32 0.70710677, %v11441_v21 }
 0x3e2   : > { %16103 = vst [vmem:[#allocation249_spill] sm:$0xff] %v11465_v37  ;;  %v5884_v39 = vmul.f32 %v5756_v35, %v16105_v48  ;;  %vm2143_vm13 = vweird.f32 %v16107_v19  ;;  %v11478_v44 = vmul.f32 %v11400_v33, %v2980_v38  ;;  %vm2103_vm14 = vcmp.eq.f32.partialorder %v2102_v32, 8.507059e+37  ;;  %v16109_v42 = vld [vmem:[#allocation277_spill] sm:$0xff]  ;;  %v16110_v27 = vld [vmem:[#allocation258_spill] sm:$0xff]  ;;  %v16112_v52 = vld [vmem:[#allocation259_spill] sm:$0xff] }
 0x3e3   : > { %16106 = vst [vmem:[#allocation253_spill] sm:$0xff] %v11474_v5  ;;  %6310 = vmatmul.f32.gmra.mxu2 %v5883_v34  ;;  %v2112_v17 = vadd.f32 %v16110_v27, %v16109_v42  ;;  %vm2114_vm15 = vweird.f32 %v16110_v27  ;;  %v11483_v31 = vor.u32 1.1754944e-38, %v3004_v58  ;;  %7153 = vpow2.f32 %v5021_v47  ;;  %v16116_v48 = vld [vmem:[#allocation288_spill] sm:$0xff] }
 0x3e4   : > { %16108 = vst [vmem:[#allocation224_spill] sm:$0xff] %v11478_v44  ;;  %6423 = vmatmul.f32.gmra.mxu3 %v5884_v39  ;;  %v1339_v30 = vmul.f32 0.3275911, %v11450_v60  ;;  %v11487_v35 = vsel %vm2103_vm14, %v16112_v52, %v2101_v25  ;;  %vm11491_vm0 = vmor %vm2113_vm9, %vm2114_vm15  ;;  %v11495_v32 = vpop.eup %7151  ;;  %v2117_v47 = vand.u32 2147483647, %v16090_v12  ;;  %v16117_v25 = vld [vmem:[#allocation270_spill] sm:$0xff]  ;;  %7155 = vpow2.f32 %v5023_v2 }
 0x3e5   : > { %16111 = vst [vmem:[#allocation227_spill] sm:$0xff] %v11483_v31  ;;  %v3453_v34 = vmul.f32 1.0614054, %v11487_v35  ;;  %v2116_v58 = vsel %vm11491_vm0, %v16110_v27, %v2112_v17  ;;  %v2127_v39 = vadd.f32 %v16117_v25, %v16116_v48  ;;  %v2995_v42 = vsub.f32 1.0, %v2994_v7  ;;  %v16120_v38 = vld [vmem:[#allocation260_spill] sm:$0xff] }
 0x3e6   : > { %16115 = vst [vmem:[#allocation257_spill] sm:$0xff] %v11495_v32  ;;  %v11504_v52 = vor.u32 1.1754944e-38, %v3019_v6  ;;  %v1212_v37 = vand.u32 2147483647, %v11474_v5  ;;  %vm2118_vm1 = vcmp.eq.f32.partialorder %v2117_v47, 8.507059e+37  ;;  %vm2129_vm2 = vweird.f32 %v16117_v25  ;;  %v609_v6 = vpop.f32.mrf.mxu1  ;;  %v16122_v5 = vld [vmem:[#allocation271_spill] sm:$0xff] }
 0x3e7   : > { %v3581_v31 = vadd.f32 -1.4531521, %v3453_v34  ;;  %v2132_v0 = vand.u32 2147483647, %v16099_v20  ;;  %v3009_v27 = vmul.f32 %v11495_v32, %v11422_v55  ;;  %v11511_v17 = vadd.f32 1.0, %v1339_v30  ;;  %vm2130_vm3 = vmor %vm2128_vm11, %vm2129_vm2 }
 0x3e8   : > { %16118 = vst [vmem:[#allocation277_spill] sm:$0xff] %v11504_v52  ;;  %v497_v12 = vadd.f32 %v496_v63, %v7652_v51  ;;  %v11515_v7 = vsel %vm2118_vm1, %v16120_v38, %v2116_v58  ;;  %v2131_v47 = vsel %vm2130_vm3, %v16117_v25, %v2127_v39  ;;  %v1340_v30 = vmul.f32 0.3275911, %v1212_v37  ;;  %v16123_v63 = vld [vmem:[#allocation291_spill] sm:$0xff]  ;;  %v16124_v58 = vld [vmem:[#allocation272_spill] sm:$0xff] }
 0x3e9   : > { %16119 = vst [vmem:[#allocation258_spill] sm:$0xff] %v11511_v17  ;;  %v3709_v2 = vmul.f32 %v3581_v31, %v11487_v35  ;;  %v3454_v34 = vmul.f32 1.0614054, %v11515_v7  ;;  %vm2133_vm4 = vcmp.eq.f32.partialorder %v2132_v0, 8.507059e+37  ;;  %v11522_v48 = vpop.eup %7153  ;;  %v2142_v38 = vadd.f32 %v16124_v58, %v16123_v63 }
 0x3ea   : > { %16121 = vst [vmem:[#allocation259_spill] sm:$0xff] %v11522_v48  ;;  %v11525_v52 = vsel %vm2133_vm4, %v16122_v5, %v2131_v47  ;;  %vm2144_vm5 = vweird.f32 %v16124_v58  ;;  %v11531_v20 = vmul.f32 %v11436_v24, %v2995_v42  ;;  %v11534_v25 = vpop.eup %7155  ;;  %v3010_v0 = vsub.f32 1.0, %v3009_v27 }
 0x3eb   : > { %v3837_v31 = vadd.f32 1.4214138, %v3709_v2  ;;  %v3582_v55 = vadd.f32 -1.4531521, %v3454_v34  ;;  %v3455_v61 = vmul.f32 1.0614054, %v11525_v52  ;;  %v11538_v5 = vadd.f32 %v609_v6, %v7654_v53  ;;  %vm11542_vm6 = vmor %vm2143_vm13, %vm2144_vm5 }
 0x3ec   : > { %16125 = vst [vmem:[#allocation288_spill] sm:$0xff] %v11531_v20  ;;  %v4667_v39 = vsub.f32 0.0, %v11450_v60  ;;  %v2147_v42 = vand.u32 2147483647, %v16107_v19  ;;  %v2146_v27 = vsel %vm11542_vm6, %v16124_v58, %v2142_v38  ;;  %7157 = vrcp.f32 %v11511_v17  ;;  %v16134_v58 = vld [vmem:[#allocation280_spill] sm:$0xff] }
 0x3ed   : > { %16126 = vst [vmem:[#allocation270_spill] sm:$0xff] %v11534_v25  ;;  %v3965_v2 = vmul.f32 %v3837_v31, %v11487_v35  ;;  %v3710_v34 = vmul.f32 %v3582_v55, %v11515_v7  ;;  %v3583_v63 = vadd.f32 -1.4531521, %v3455_v61  ;;  %v11553_v6 = vadd.f32 1.0, %v1340_v30 }
 0x3ee   : > { %v4668_v25 = vsub.f32 0.0, %v1212_v37  ;;  %v11555_v48 = vmul.f32 0.70710677, %v497_v12  ;;  %vm2148_vm7 = vcmp.eq.f32.partialorder %v2147_v42, 8.507059e+37  ;;  %v11559_v31 = vmul.f32 %v11495_v32, %v3010_v0 }
 0x3ef   : > { %16129 = vst [vmem:[#allocation260_spill] sm:$0xff] %v11553_v6  ;;  %v4093_v24 = vadd.f32 -0.28449672, %v3965_v2  ;;  %v3838_v20 = vadd.f32 1.4214138, %v3710_v34  ;;  %v3711_v19 = vmul.f32 %v3583_v63, %v11525_v52  ;;  %v11562_v61 = vmul.f32 0.5, %v11410_v28 }
 0x3f0   : > { %16130 = vst [vmem:[#allocation271_spill] sm:$0xff] %v11555_v48  ;;  %v11565_v55 = vmul.f32 0.70710677, %v11538_v5  ;;  %v11568_v30 = vsel %vm2148_vm7, %v16134_v58, %v2146_v27  ;;  %v4795_v38 = vmul.f32 %v4667_v39, %v11450_v60  ;;  %v11574_v42 = vmul.f32 0.5, %v11441_v21 }
 0x3f1   : > { %16131 = vst [vmem:[#allocation291_spill] sm:$0xff] %v11559_v31  ;;  %v4221_v47 = vmul.f32 %v4093_v24, %v11487_v35  ;;  %v3966_v2 = vmul.f32 %v3838_v20, %v11515_v7  ;;  %v3839_v34 = vadd.f32 1.4214138, %v3711_v19  ;;  %v4796_v0 = vmul.f32 %v4668_v25, %v1212_v37  ;;  %v16137_v24 = vld [vmem:[#allocation213_spill] sm:$0xff] }
 0x3f2   : > { %16132 = vst [vmem:[#allocation272_spill] sm:$0xff] %v11562_v61  ;;  %v1213_v28 = vand.u32 2147483647, %v11555_v48  ;;  %v3456_v63 = vmul.f32 1.0614054, %v11568_v30  ;;  %7159 = vrcp.f32 %v11553_v6  ;;  %v11580_v60 = vpop.eup %7157  ;;  %vm5373_vm8 = vcmp.lt.f32.partialorder %v16137_v24, 0.0 }
 0x3f3   : > { %16133 = vst [vmem:[#allocation417_spill] sm:$0xff] %v11565_v55  ;;  %v4349_v61 = vadd.f32 0.2548296, %v4221_v47  ;;  %v4094_v27 = vadd.f32 -0.28449672, %v3966_v2  ;;  %v3967_v58 = vmul.f32 %v3839_v34, %v11525_v52  ;;  %v3034_v20 = vand.u32 2147483648, %v11511_v17 }
 0x3f4   : > { %16135 = vst [vmem:[#allocation280_spill] sm:$0xff] %v11574_v42  ;;  %v11584_v39 = vmul.f32 0.5, %v497_v12  ;;  %v11587_v21 = vand.u32 2147483647, %v11565_v55  ;;  %v3584_v37 = vadd.f32 -1.4531521, %v3456_v63  ;;  %v11595_v12 = vmul.f32 %v11580_v60, %v11511_v17 }
 0x3f5   : > { %16136 = vst [vmem:[#allocation418_spill] sm:$0xff] %v11580_v60  ;;  %v5025_v25 = vmul.f32 1.442695, %v4795_v38  ;;  %v4477_v19 = vmul.f32 %v4349_v61, %v11487_v35  ;;  %v4222_v47 = vmul.f32 %v4094_v27, %v11515_v7  ;;  %v4095_v2 = vadd.f32 -0.28449672, %v3967_v58  ;;  %v16140_v63 = vld [vmem:[#allocation221_spill] sm:$0xff] }
 0x3f6   : > { %16138 = vst [vmem:[#allocation213_spill] sm:$0xff] %v11584_v39  ;;  %v3049_v34 = vand.u32 2147483648, %v11553_v6  ;;  %v5027_v42 = vmul.f32 1.442695, %v4796_v0  ;;  %v1341_v48 = vmul.f32 0.3275911, %v1213_v28  ;;  %v3712_v32 = vmul.f32 %v3584_v37, %v11568_v30 }
 0x3f7   : > { %v16139_v39 = vld [vmem:[#allocation266_spill] sm:$0xff]  ;;  %v4350_v31 = vadd.f32 0.2548296, %v4222_v47  ;;  %v4223_v38 = vmul.f32 %v4095_v2, %v11525_v52  ;;  %vm5374_vm9 = vcmp.lt.f32.partialorder %v16140_v63, 0.0  ;;  %v11600_v35 = vor.u32 1.1754944e-38, %v3034_v20 }
 0x3f8   : > { %v5117_v55 = vmul.f32 %v16139_v39, %v4477_v19  ;;  %v4669_v61 = vsub.f32 0.0, %v1213_v28  ;;  %v1342_v27 = vmul.f32 0.3275911, %v11587_v21  ;;  %v3840_v0 = vadd.f32 1.4214138, %v3712_v32  ;;  %v11603_v58 = vpop.eup %7159  ;;  %v16143_v37 = vld [vmem:[#allocation262_spill] sm:$0xff] }
 0x3f9   : > { %16141 = vst [vmem:[#allocation266_spill] sm:$0xff] %v11600_v35  ;;  %vm2158_vm10 = vweird.f32 %v16143_v37  ;;  %7161 = vpow2.f32 %v5025_v25  ;;  %v4478_v33 = vmul.f32 %v4350_v31, %v11515_v7  ;;  %v4351_v39 = vadd.f32 0.2548296, %v4223_v38  ;;  %v16144_v19 = vld [vmem:[#allocation235_spill] sm:$0xff]  ;;  %v722_v35 = vpop.f32.mrf.mxu2  ;;  %v835_v25 = vpop.f32.mrf.mxu3  ;;  %v16151_v24 = vld [vmem:[#allocation298_spill] sm:$0xff] }
 0x3fa   : > { %16142 = vst [vmem:[#allocation221_spill] sm:$0xff] %v11603_v58  ;;  %v5245_v17 = vsub.f32 1.0, %v5117_v55  ;;  %vm5375_vm11 = vcmp.lt.f32.partialorder %v16144_v19, 0.0  ;;  %v11608_v47 = vor.u32 1.1754944e-38, %v3049_v34  ;;  %7163 = vpow2.f32 %v5027_v42 }
 0x3fb   : > { %v11610_v20 = vadd.f32 1.0, %v1341_v48  ;;  %v3968_v2 = vmul.f32 %v3840_v0, %v11568_v30  ;;  %v3025_v32 = vsub.f32 1.0, %v11595_v12  ;;  %v5118_v9 = vmul.f32 %v16147_v46, %v4478_v33  ;;  %v16149_v0 = vld [vmem:[#allocation282_spill] sm:$0xff] }
 0x3fc   : > { %16145 = vst [vmem:[#allocation262_spill] sm:$0xff] %v11608_v47  ;;  %v5501_v44 = vsub.f32 0.0, %v5245_v17  ;;  %v4479_v55 = vmul.f32 %v4351_v39, %v11525_v52  ;;  %v3039_v7 = vmul.f32 %v11603_v58, %v11553_v6  ;;  %v4797_v31 = vmul.f32 %v4669_v61, %v1213_v28  ;;  %v16154_v39 = vld [vmem:[#allocation244_spill] sm:$0xff] }
 0x3fd   : > { %16146 = vst [vmem:[#allocation235_spill] sm:$0xff] %v11610_v20  ;;  %v11618_v34 = vadd.f32 1.0, %v1342_v27  ;;  %v4096_v42 = vadd.f32 -0.28449672, %v3968_v2  ;;  %v5246_v38 = vsub.f32 1.0, %v5118_v9  ;;  %v11624_v12 = vadd.f32 %v722_v35, %v7662_v57 }
 0x3fe   : > { %v5629_v48 = vsel %vm5373_vm8, %v5501_v44, %v5245_v17  ;;  %v5119_v47 = vmul.f32 %v16149_v0, %v4479_v55  ;;  %7165 = vrcp.f32 %v11610_v20  ;;  %v11629_v52 = vadd.f32 %v835_v25, %v7664_v59  ;;  %v16152_v44 = vld [vmem:[#allocation279_spill] sm:$0xff]  ;;  %v16155_v25 = vld [vmem:[#allocation237_spill] sm:$0xff] }
 0x3ff   : > { %16148 = vst [vmem:[#allocation268_spill] sm:$0xff] %v11618_v34  ;;  %v5757_v46 = vadd.f32 1.0, %v5629_v48  ;;  %v4224_v33 = vmul.f32 %v4096_v42, %v11568_v30  ;;  %v11631_v28 = vpop.eup %7161  ;;  %v5502_v61 = vsub.f32 0.0, %v5246_v38  ;;  %v2157_v9 = vadd.f32 %v16152_v44, %v16151_v24  ;;  %v16156_v42 = vld [vmem:[#allocation273_spill] sm:$0xff] }
 0x400   : > { %16150 = vst [vmem:[#allocation282_spill] sm:$0xff] %v11631_v28  ;;  %v5247_v27 = vsub.f32 1.0, %v5119_v47  ;;  %vm2159_vm12 = vweird.f32 %v16152_v44  ;;  %v11636_v17 = vpop.eup %7163  ;;  %7167 = vrcp.f32 %v11618_v34  ;;  %v4670_v35 = vsub.f32 0.0, %v11587_v21 }
 0x401   : > { %16153 = vst [vmem:[#allocation298_spill] sm:$0xff] %v11636_v17  ;;  %v5885_v2 = vmul.f32 %v5757_v46, %v16154_v39  ;;  %v4352_v55 = vadd.f32 0.2548296, %v4224_v33  ;;  %vm5376_vm13 = vcmp.lt.f32.partialorder %v16155_v25, 0.0  ;;  %vm2173_vm14 = vweird.f32 %v16156_v42  ;;  %vm11657_vm15 = vmor %vm2158_vm10, %vm2159_vm12  ;;  %v16175_v25 = vld [vmem:[#allocation299_spill] sm:$0xff] }
 0x402   : > { %v5630_v47 = vsel %vm5374_vm9, %v5502_v61, %v5246_v38  ;;  %v5503_v48 = vsub.f32 0.0, %v5247_v27  ;;  %v11646_v0 = vmul.f32 0.70710677, %v11624_v12  ;;  %v2162_v24 = vand.u32 2147483647, %v16143_v37 }
 0x403   : > { %v3040_v17 = vsub.f32 1.0, %v3039_v7  ;;  %6087 = vmatmul.f32.gmra.mxu0 %v5885_v2  ;;  %v5758_v28 = vadd.f32 1.0, %v5630_v47  ;;  %v4480_v6 = vmul.f32 %v4352_v55, %v11568_v30  ;;  %v11651_v46 = vmul.f32 0.70710677, %v11629_v52  ;;  %v16161_v2 = vld [vmem:[#allocation245_spill] sm:$0xff]  ;;  %v16162_v47 = vld [vmem:[#allocation287_spill] sm:$0xff] }
 0x404   : > { %16157 = vst [vmem:[#allocation279_spill] sm:$0xff] %v11646_v0  ;;  %v3064_v38 = vand.u32 2147483648, %v11610_v20  ;;  %v5029_v33 = vmul.f32 1.442695, %v4797_v31  ;;  %v5631_v7 = vsel %vm5375_vm11, %v5503_v48, %v5247_v27  ;;  %v2161_v30 = vsel %vm11657_vm15, %v16152_v44, %v2157_v9  ;;  %v11667_v61 = vpop.eup %7165  ;;  %v499_v44 = vpop.f32.mrf.mxu0  ;;  %v16168_v48 = vld [vmem:[#allocation281_spill] sm:$0xff] }
 0x405   : > { %16158 = vst [vmem:[#allocation244_spill] sm:$0xff] %v11651_v46  ;;  %v4798_v39 = vmul.f32 %v4670_v35, %v11587_v21  ;;  %v5886_v37 = vmul.f32 %v5758_v28, %v16161_v2  ;;  %v5759_v55 = vadd.f32 1.0, %v5631_v7  ;;  %v5120_v23 = vmul.f32 %v16162_v47, %v4480_v6  ;;  %v16167_v21 = vld [vmem:[#allocation247_spill] sm:$0xff]  ;;  %v16171_v7 = vld [vmem:[#allocation309_spill] sm:$0xff] }
 0x406   : > { %vm2188_vm0 = vweird.f32 %v16163_v14  ;;  %v11674_v31 = vmul.f32 %v11580_v60, %v3025_v32  ;;  %v11677_v19 = vmul.f32 0.5, %v11538_v5  ;;  %v1215_v27 = vand.u32 2147483647, %v11646_v0  ;;  %v11680_v9 = vpop.eup %7167 }
 0x407   : > { %vm2163_vm1 = vcmp.eq.f32.partialorder %v2162_v24, 8.507059e+37  ;;  %16166 = vst [vmem:[#allocation245_spill] sm:$0xff] %v11680_v9  ;;  %6200 = vmatmul.f32.gmra.mxu1 %v5886_v37  ;;  %v5887_v28 = vmul.f32 %v5759_v55, %v16167_v21  ;;  %v5248_v35 = vsub.f32 1.0, %v5120_v23  ;;  %v11684_v6 = vand.u32 2147483647, %v11651_v46  ;;  %v16172_v24 = vld [vmem:[#allocation289_spill] sm:$0xff] }
 0x408   : > { %16164 = vst [vmem:[#allocation237_spill] sm:$0xff] %v11674_v31  ;;  %v11687_v63 = vsel %vm2163_vm1, %v16168_v48, %v2161_v30  ;;  %v11690_v32 = vmul.f32 %v11603_v58, %v3040_v17  ;;  %v11692_v5 = vor.u32 1.1754944e-38, %v3064_v38  ;;  %7169 = vpow2.f32 %v5029_v33  ;;  %v612_v17 = vpop.f32.mrf.mxu1  ;;  %v16173_v48 = vld [vmem:[#allocation283_spill] sm:$0xff]  ;;  %v16179_v58 = vld [vmem:[#allocation261_spill] sm:$0xff] }
 0x409   : > { %16165 = vst [vmem:[#allocation273_spill] sm:$0xff] %v11677_v19  ;;  %v2172_v2 = vadd.f32 %v16172_v24, %v16171_v7  ;;  %v3079_v37 = vand.u32 2147483648, %v11618_v34  ;;  %v11697_v47 = vmul.f32 1.442695, %v4798_v39  ;;  %6313 = vmatmul.f32.gmra.mxu2 %v5887_v28  ;;  %v5504_v23 = vsub.f32 0.0, %v5248_v35 }
 0x40a   : > { %16169 = vst [vmem:[#allocation287_spill] sm:$0xff] %v11690_v32  ;;  %v11700_v55 = vadd.f32 %v499_v44, %v7652_v51  ;;  %v3054_v30 = vmul.f32 %v11667_v61, %v11610_v20  ;;  %v3457_v38 = vmul.f32 1.0614054, %v11687_v63  ;;  %vm2174_vm2 = vweird.f32 %v16172_v24 }
 0x40b   : > { %16170 = vst [vmem:[#allocation275_spill] sm:$0xff] %v11692_v5  ;;  %v2177_v33 = vand.u32 2147483647, %v16156_v42  ;;  %v11709_v21 = vmul.f32 %v11680_v9, %v11618_v34  ;;  %v5632_v39 = vsel %vm5376_vm13, %v5504_v23, %v5248_v35  ;;  %v1343_v28 = vmul.f32 0.3275911, %v1215_v27  ;;  %vm2175_vm3 = vmor %vm2173_vm14, %vm2174_vm2  ;;  %v16176_v23 = vld [vmem:[#allocation310_spill] sm:$0xff] }
 0x40c   : > { %v1344_v44 = vmul.f32 0.3275911, %v11684_v6  ;;  %vm2203_vm4 = vweird.f32 %v16173_v48  ;;  %v5760_v7 = vadd.f32 1.0, %v5632_v39  ;;  %v3585_v46 = vadd.f32 -1.4531521, %v3457_v38  ;;  %v16177_v34 = vld [vmem:[#allocation290_spill] sm:$0xff] }
 0x40d   : > { %v2176_v19 = vsel %vm2175_vm3, %v16172_v24, %v2172_v2  ;;  %vm2178_vm5 = vcmp.eq.f32.partialorder %v2177_v33, 8.507059e+37  ;;  %v11719_v0 = vmul.f32 0.70710677, %v11700_v55  ;;  %v11722_v5 = vadd.f32 %v612_v17, %v7654_v53 }
 0x40e   : > { %v11725_v35 = vsel %vm2178_vm5, %v16175_v25, %v2176_v19  ;;  %v2187_v42 = vadd.f32 %v16177_v34, %v16176_v23  ;;  %v11729_v20 = vpop.eup %7169  ;;  %v5888_v39 = vmul.f32 %v5760_v7, %v16179_v58  ;;  %v3713_v38 = vmul.f32 %v3585_v46, %v11687_v63 }
 0x40f   : > { %16174 = vst [vmem:[#allocation247_spill] sm:$0xff] %v11719_v0  ;;  %v3458_v24 = vmul.f32 1.0614054, %v11725_v35  ;;  %vm2189_vm6 = vweird.f32 %v16177_v34  ;;  %v3055_v2 = vsub.f32 1.0, %v3054_v30  ;;  %v11735_v33 = vor.u32 1.1754944e-38, %v3079_v37 }
 0x410   : > { %16178 = vst [vmem:[#allocation281_spill] sm:$0xff] %v11729_v20  ;;  %v4671_v17 = vsub.f32 0.0, %v1215_v27  ;;  %vm11739_vm7 = vmor %vm2188_vm0, %vm2189_vm6  ;;  %v2192_v25 = vand.u32 2147483647, %v16163_v14  ;;  %6426 = vmatmul.f32.gmra.mxu3 %v5888_v39  ;;  %v11744_v58 = vadd.f32 1.0, %v1343_v28  ;;  %v3070_v37 = vsub.f32 1.0, %v11709_v21 }
 0x411   : > { %16180 = vst [vmem:[#allocation309_spill] sm:$0xff] %v11735_v33  ;;  %v3841_v46 = vadd.f32 1.4214138, %v3713_v38  ;;  %v3586_v7 = vadd.f32 -1.4531521, %v3458_v24  ;;  %v2191_v30 = vsel %vm11739_vm7, %v16177_v34, %v2187_v42  ;;  %v11750_v23 = vadd.f32 1.0, %v1344_v44 }
 0x412   : > { %16183 = vst [vmem:[#allocation289_spill] sm:$0xff] %v11744_v58  ;;  %v11753_v20 = vand.u32 2147483647, %v11719_v0  ;;  %v11756_v33 = vmul.f32 0.70710677, %v11722_v5  ;;  %vm2193_vm8 = vcmp.eq.f32.partialorder %v2192_v25, 8.507059e+37  ;;  %v4799_v19 = vmul.f32 %v4671_v17, %v1215_v27 }
 0x413   : > { %16184 = vst [vmem:[#allocation283_spill] sm:$0xff] %v11750_v23  ;;  %v3969_v14 = vmul.f32 %v3841_v46, %v11687_v63  ;;  %v3714_v28 = vmul.f32 %v3586_v7, %v11725_v35  ;;  %v16186_v39 = vld [vmem:[#allocation320_spill] sm:$0xff]  ;;  %v4672_v34 = vsub.f32 0.0, %v11684_v6  ;;  %v16188_v21 = vld [vmem:[#allocation301_spill] sm:$0xff]  ;;  %7171 = vrcp.f32 %v11744_v58 }
 0x414   : > { %16185 = vst [vmem:[#allocation299_spill] sm:$0xff] %v11756_v33  ;;  %v16187_v38 = vld [vmem:[#allocation300_spill] sm:$0xff]  ;;  %v11764_v44 = vsel %vm2193_vm8, %v16188_v21, %v2191_v30  ;;  %7173 = vrcp.f32 %v11750_v23  ;;  %v1345_v25 = vmul.f32 0.3275911, %v11753_v20  ;;  %v11772_v7 = vand.u32 2147483647, %v11756_v33 }
 0x415   : > { %v2202_v24 = vadd.f32 %v16187_v38, %v16186_v39  ;;  %vm2204_vm9 = vweird.f32 %v16187_v38  ;;  %v4097_v42 = vadd.f32 -0.28449672, %v3969_v14  ;;  %v3842_v0 = vadd.f32 1.4214138, %v3714_v28 }
 0x416   : > { %v3459_v46 = vmul.f32 1.0614054, %v11764_v44  ;;  %vm11776_vm10 = vmor %vm2203_vm4, %vm2204_vm9  ;;  %v2207_v17 = vand.u32 2147483647, %v16173_v48  ;;  %v11787_v21 = vmul.f32 %v11667_v61, %v3055_v2  ;;  %7175 = vpow2.f32 %v11697_v47  ;;  %v16194_v2 = vld [vmem:[#allocation303_spill] sm:$0xff] }
 0x417   : > { %v4225_v30 = vmul.f32 %v4097_v42, %v11687_v63  ;;  %v3970_v14 = vmul.f32 %v3842_v0, %v11725_v35  ;;  %v2206_v39 = vsel %vm11776_vm10, %v16187_v38, %v2202_v24  ;;  %v3094_v33 = vand.u32 2147483648, %v11744_v58  ;;  %v16191_v42 = vld [vmem:[#allocation243_spill] sm:$0xff] }
 0x418   : > { %v3587_v28 = vadd.f32 -1.4531521, %v3459_v46  ;;  %v5033_v32 = vmul.f32 1.442695, %v4799_v19  ;;  %vm2208_vm11 = vcmp.eq.f32.partialorder %v2207_v17, 8.507059e+37  ;;  %vm5377_vm12 = vcmp.lt.f32.partialorder %v16191_v42, 0.0 }
 0x419   : > { %v4353_v60 = vadd.f32 0.2548296, %v4225_v30  ;;  %v4098_v31 = vadd.f32 -0.28449672, %v3970_v14  ;;  %v11794_v0 = vmul.f32 %v11680_v9, %v3070_v37  ;;  %v4800_v38 = vmul.f32 %v4672_v34, %v11684_v6  ;;  %v11802_v47 = vpop.eup %7171 }
 0x41a   : > { %v3715_v48 = vmul.f32 %v3587_v28, %v11764_v44  ;;  %v11797_v24 = vadd.f32 1.0, %v1345_v25  ;;  %v11800_v46 = vsel %vm2208_vm11, %v16194_v2, %v2206_v39  ;;  %v1346_v19 = vmul.f32 0.3275911, %v11772_v7  ;;  %v11807_v14 = vpop.eup %7173  ;;  %v16199_v28 = vld [vmem:[#allocation292_spill] sm:$0xff] }
 0x41b   : > { %16192 = vst [vmem:[#allocation310_spill] sm:$0xff] %v11794_v0  ;;  %v4481_v27 = vmul.f32 %v4353_v60, %v11687_v63  ;;  %v4226_v17 = vmul.f32 %v4098_v31, %v11725_v35  ;;  %v11810_v37 = vmul.f32 0.5, %v11624_v12  ;;  %v11812_v6 = vor.u32 1.1754944e-38, %v3094_v33  ;;  %v16201_v63 = vld [vmem:[#allocation254_spill] sm:$0xff] }
 0x41c   : > { %16193 = vst [vmem:[#allocation290_spill] sm:$0xff] %v11797_v24  ;;  %v3843_v30 = vadd.f32 1.4214138, %v3715_v48  ;;  %v11815_v34 = vmul.f32 0.5, %v11629_v52  ;;  %v3460_v25 = vmul.f32 1.0614054, %v11800_v46  ;;  %7177 = vpow2.f32 %v5033_v32  ;;  %v11820_v31 = vpop.eup %7175  ;;  %v725_v52 = vpop.f32.mrf.mxu2 }
 0x41d   : > { %16195 = vst [vmem:[#allocation261_spill] sm:$0xff] %v11807_v14  ;;  %v5121_v39 = vmul.f32 %v16199_v28, %v4481_v27  ;;  %v4354_v2 = vadd.f32 0.2548296, %v4226_v17  ;;  %vm5378_vm13 = vcmp.lt.f32.partialorder %v16201_v63, 0.0  ;;  %v3109_v12 = vand.u32 2147483648, %v11750_v23 }
 0x41e   : > { %16196 = vst [vmem:[#allocation320_spill] sm:$0xff] %v11810_v37  ;;  %v3971_v60 = vmul.f32 %v3843_v30, %v11764_v44  ;;  %v5035_v48 = vmul.f32 1.442695, %v4800_v38  ;;  %7179 = vrcp.f32 %v11797_v24  ;;  %v3588_v33 = vadd.f32 -1.4531521, %v3460_v25 }
 0x41f   : > { %16197 = vst [vmem:[#allocation300_spill] sm:$0xff] %v11812_v6  ;;  %v5249_v37 = vsub.f32 1.0, %v5121_v39  ;;  %v4482_v32 = vmul.f32 %v4354_v2, %v11725_v35  ;;  %v3084_v17 = vmul.f32 %v11802_v47, %v11744_v58  ;;  %v3099_v30 = vmul.f32 %v11807_v14, %v11750_v23  ;;  %v16204_v6 = vld [vmem:[#allocation302_spill] sm:$0xff] }
 0x420   : > { %16198 = vst [vmem:[#allocation301_spill] sm:$0xff] %v11815_v34  ;;  %v11825_v34 = vadd.f32 1.0, %v1346_v19  ;;  %v4099_v27 = vadd.f32 -0.28449672, %v3971_v60  ;;  %v4673_v28 = vsub.f32 0.0, %v11753_v20  ;;  %v3716_v38 = vmul.f32 %v3588_v33, %v11800_v46 }
 0x421   : > { %16200 = vst [vmem:[#allocation243_spill] sm:$0xff] %v11820_v31  ;;  %v16203_v31 = vld [vmem:[#allocation293_spill] sm:$0xff]  ;;  %v5505_v25 = vsub.f32 0.0, %v5249_v37  ;;  %v5122_v19 = vmul.f32 %v16204_v6, %v4482_v32  ;;  %v11838_v35 = vadd.f32 %v725_v52, %v7662_v57  ;;  %v11840_v2 = vor.u32 1.1754944e-38, %v3109_v12  ;;  %v16209_v52 = vld [vmem:[#allocation255_spill] sm:$0xff] }
 0x422   : > { %16202 = vst [vmem:[#allocation303_spill] sm:$0xff] %v11825_v34  ;;  %vm2218_vm14 = vweird.f32 %v16203_v31  ;;  %v4227_v39 = vmul.f32 %v4099_v27, %v11764_v44  ;;  %7181 = vpow2.f32 %v5035_v48  ;;  %v11843_v60 = vmul.f32 0.5, %v11700_v55  ;;  %v11845_v9 = vpop.eup %7177  ;;  %v838_v27 = vpop.f32.mrf.mxu3 }
 0x423   : > { %16205 = vst [vmem:[#allocation292_spill] sm:$0xff] %v11840_v2  ;;  %v3844_v23 = vadd.f32 1.4214138, %v3716_v38  ;;  %7183 = vrcp.f32 %v11825_v34  ;;  %v5633_v33 = vsel %vm5377_vm12, %v5505_v25, %v5249_v37  ;;  %v5250_v6 = vsub.f32 1.0, %v5122_v19  ;;  %v16211_v25 = vld [vmem:[#allocation265_spill] sm:$0xff] }
 0x424   : > { %16206 = vst [vmem:[#allocation254_spill] sm:$0xff] %v11843_v60  ;;  %v4355_v32 = vadd.f32 0.2548296, %v4227_v39  ;;  %v11850_v0 = vpop.eup %7179  ;;  %vm5379_vm15 = vcmp.lt.f32.partialorder %v16209_v52, 0.0  ;;  %v3085_v12 = vsub.f32 1.0, %v3084_v17  ;;  %v3100_v48 = vsub.f32 1.0, %v3099_v30 }
 0x425   : > { %16207 = vst [vmem:[#allocation293_spill] sm:$0xff] %v11845_v9  ;;  %v5761_v2 = vadd.f32 1.0, %v5633_v33  ;;  %v3972_v55 = vmul.f32 %v3844_v23, %v11800_v46  ;;  %v4801_v38 = vmul.f32 %v4673_v28, %v11753_v20  ;;  %v5506_v60 = vsub.f32 0.0, %v5250_v6  ;;  %v16212_v23 = vld [vmem:[#allocation305_spill] sm:$0xff] }
 0x426   : > { %16208 = vst [vmem:[#allocation302_spill] sm:$0xff] %v11850_v0  ;;  %v4483_v9 = vmul.f32 %v4355_v32, %v11764_v44  ;;  %v11857_v42 = vmul.f32 0.70710677, %v11838_v35  ;;  %v4674_v37 = vsub.f32 0.0, %v11772_v7  ;;  %v11862_v58 = vadd.f32 %v838_v27, %v7664_v59 }
 0x427   : > { %v5889_v19 = vmul.f32 %v5761_v2, %v16211_v25  ;;  %v4100_v39 = vadd.f32 -0.28449672, %v3972_v55  ;;  %v5634_v17 = vsel %vm5378_vm13, %v5506_v60, %v5250_v6  ;;  %v2217_v20 = vadd.f32 %v9187_v11, %v9277_v3 }
 0x428   : > { %16210 = vst [vmem:[#allocation255_spill] sm:$0xff] %v11857_v42  ;;  %v5123_v30 = vmul.f32 %v16212_v23, %v4483_v9  ;;  %vm2219_vm0 = vweird.f32 %v9187_v11  ;;  %v11870_v44 = vpop.eup %7181  ;;  %v11873_v28 = vmul.f32 %v11802_v47, %v3085_v12  ;;  %v3114_v2 = vmul.f32 %v11850_v0, %v11797_v24  ;;  %v16216_v12 = vld [vmem:[#allocation267_spill] sm:$0xff] }
 0x429   : > { %16213 = vst [vmem:[#allocation265_spill] sm:$0xff] %v11870_v44  ;;  %6090 = vmatmul.f32.gmra.mxu0 %v5889_v19  ;;  %v5762_v33 = vadd.f32 1.0, %v5634_v17  ;;  %v4228_v63 = vmul.f32 %v4100_v39, %v11800_v46  ;;  %v11878_v60 = vpop.eup %7183  ;;  %v3124_v9 = vand.u32 2147483648, %v11797_v24  ;;  %v1219_v3 = vand.u32 2147483647, %v11857_v42  ;;  %vm11894_vm1 = vmor %vm2218_vm14, %vm2219_vm0  ;;  %v16220_v17 = vld [vmem:[#allocation263_spill] sm:$0xff]  ;;  %v615_v39 = vpop.f32.mrf.mxu1 }
 0x42a   : > { %16214 = vst [vmem:[#allocation305_spill] sm:$0xff] %v11878_v60  ;;  %v5251_v6 = vsub.f32 1.0, %v5123_v30  ;;  %v2222_v32 = vand.u32 2147483647, %v16203_v31  ;;  %v11884_v27 = vmul.f32 %v11807_v14, %v3100_v48  ;;  %v11888_v19 = vmul.f32 0.70710677, %v11862_v58 }
 0x42b   : > { %v5890_v55 = vmul.f32 %v5762_v33, %v16216_v12  ;;  %v4356_v25 = vadd.f32 0.2548296, %v4228_v63  ;;  %vm5380_vm2 = vcmp.lt.f32.partialorder %v16220_v17, 0.0  ;;  %v5037_v23 = vmul.f32 1.442695, %v4801_v38  ;;  %v16221_v63 = vld [vmem:[#allocation295_spill] sm:$0xff]  ;;  %v502_v38 = vpop.f32.mrf.mxu0 }
 0x42c   : > { %16215 = vst [vmem:[#allocation419_spill] sm:$0xff] %v11884_v27  ;;  %v4802_v48 = vmul.f32 %v4674_v37, %v11772_v7  ;;  %v5507_v30 = vsub.f32 0.0, %v5251_v6  ;;  %v2221_v33 = vsel %vm11894_vm1, %v9187_v11, %v2217_v20  ;;  %vm2233_vm3 = vweird.f32 %v16221_v63  ;;  %v16224_v20 = vld [vmem:[#allocation307_spill] sm:$0xff] }
 0x42d   : > { %16217 = vst [vmem:[#allocation267_spill] sm:$0xff] %v11888_v19  ;;  %v3115_v12 = vsub.f32 1.0, %v3114_v2  ;;  %v11905_v42 = vmul.f32 0.5, %v11722_v5  ;;  %v3129_v31 = vmul.f32 %v11878_v60, %v11825_v34  ;;  %6203 = vmatmul.f32.gmra.mxu1 %v5890_v55  ;;  %v4484_v44 = vmul.f32 %v4356_v25, %v11800_v46  ;;  %v16226_v55 = vld [vmem:[#allocation297_spill] sm:$0xff] }
 0x42e   : > { %v11910_v14 = vor.u32 1.1754944e-38, %v3124_v9  ;;  %v5635_v7 = vsel %vm5379_vm15, %v5507_v30, %v5251_v6  ;;  %v1347_v37 = vmul.f32 0.3275911, %v1219_v3  ;;  %vm2223_vm4 = vcmp.eq.f32.partialorder %v2222_v32, 8.507059e+37  ;;  %v16228_v32 = vld [vmem:[#allocation284_spill] sm:$0xff] }
 0x42f   : > { %16222 = vst [vmem:[#allocation263_spill] sm:$0xff] %v11905_v42  ;;  %v5763_v11 = vadd.f32 1.0, %v5635_v7  ;;  %v5124_v2 = vmul.f32 %v16224_v20, %v4484_v44  ;;  %v11916_v5 = vand.u32 2147483647, %v11888_v19  ;;  %v16225_v42 = vld [vmem:[#allocation313_spill] sm:$0xff]  ;;  %vm2248_vm5 = vweird.f32 %v16226_v55  ;;  %v16230_v20 = vld [vmem:[#allocation316_spill] sm:$0xff] }
 0x430   : > { %16223 = vst [vmem:[#allocation295_spill] sm:$0xff] %v11910_v14  ;;  %v11919_v27 = vsel %vm2223_vm4, %v16225_v42, %v2221_v33  ;;  %7185 = vpow2.f32 %v5037_v23  ;;  %v3139_v46 = vand.u32 2147483648, %v11825_v34  ;;  %v5039_v9 = vmul.f32 1.442695, %v4802_v48  ;;  %v16232_v19 = vld [vmem:[#allocation312_spill] sm:$0xff] }
 0x431   : > { %v11924_v52 = vadd.f32 %v502_v38, %v7652_v51  ;;  %v11927_v6 = vmul.f32 %v11850_v0, %v3115_v12  ;;  %v3130_v44 = vsub.f32 1.0, %v3129_v31  ;;  %v5891_v25 = vmul.f32 %v5763_v11, %v16228_v32  ;;  %v16231_v12 = vld [vmem:[#allocation333_spill] sm:$0xff] }
 0x432   : > { %v5252_v30 = vsub.f32 1.0, %v5124_v2  ;;  %v11930_v7 = vadd.f32 1.0, %v1347_v37  ;;  %v4675_v42 = vsub.f32 0.0, %v1219_v3  ;;  %v11933_v33 = vadd.f32 %v615_v39, %v7654_v53 }
 0x433   : > { %16227 = vst [vmem:[#allocation307_spill] sm:$0xff] %v11927_v6  ;;  %v3461_v23 = vmul.f32 1.0614054, %v11919_v27  ;;  %vm2263_vm6 = vweird.f32 %v16230_v20  ;;  %6316 = vmatmul.f32.gmra.mxu2 %v5891_v25  ;;  %v1348_v38 = vmul.f32 0.3275911, %v11916_v5  ;;  %v2232_v31 = vadd.f32 %v16232_v19, %v16231_v12 }
 0x434   : > { %16229 = vst [vmem:[#allocation313_spill] sm:$0xff] %v11930_v7  ;;  %v5508_v48 = vsub.f32 0.0, %v5252_v30  ;;  %vm2234_vm7 = vweird.f32 %v16232_v19  ;;  %v11941_v11 = vor.u32 1.1754944e-38, %v3139_v46  ;;  %7187 = vpow2.f32 %v5039_v9 }
 0x435   : > { %v11944_v37 = vmul.f32 0.5, %v11838_v35  ;;  %v11947_v2 = vmul.f32 0.70710677, %v11924_v52  ;;  %v11950_v39 = vmul.f32 %v11878_v60, %v3130_v44  ;;  %v11955_v25 = vmul.f32 0.5, %v11862_v58  ;;  %vm11965_vm8 = vmor %vm2233_vm3, %vm2234_vm7 }
 0x436   : > { %16233 = vst [vmem:[#allocation297_spill] sm:$0xff] %v11941_v11  ;;  %v5636_v32 = vsel %vm5380_vm2, %v5508_v48, %v5252_v30  ;;  %v3589_v12 = vadd.f32 -1.4531521, %v3461_v23  ;;  %v11957_v14 = vpop.eup %7185  ;;  %7189 = vrcp.f32 %v11930_v7  ;;  %v4803_v35 = vmul.f32 %v4675_v42, %v1219_v3  ;;  %v16243_v3 = vld [vmem:[#allocation285_spill] sm:$0xff] }
 0x437   : > { %16234 = vst [vmem:[#allocation284_spill] sm:$0xff] %v11944_v37  ;;  %v5764_v46 = vadd.f32 1.0, %v5636_v32  ;;  %v11961_v9 = vmul.f32 0.70710677, %v11933_v33  ;;  %v11969_v17 = vadd.f32 1.0, %v1348_v38  ;;  %v2236_v30 = vsel %vm11965_vm8, %v16232_v19, %v2232_v31  ;;  %v16244_v32 = vld [vmem:[#allocation334_spill] sm:$0xff] }
 0x438   : > { %16235 = vst [vmem:[#allocation316_spill] sm:$0xff] %v11947_v2  ;;  %v3717_v58 = vmul.f32 %v3589_v12, %v11919_v27  ;;  %v2237_v23 = vand.u32 2147483647, %v16221_v63  ;;  %v11978_v48 = vand.u32 2147483647, %v11947_v2  ;;  %v4676_v38 = vsub.f32 0.0, %v11916_v5 }
 0x439   : > { %16236 = vst [vmem:[#allocation333_spill] sm:$0xff] %v11950_v39  ;;  %v5892_v42 = vmul.f32 %v5764_v46, %v16243_v3  ;;  %v2252_v63 = vand.u32 2147483647, %v16226_v55  ;;  %v11994_v12 = vand.u32 2147483647, %v11961_v9  ;;  %v16249_v46 = vld [vmem:[#allocation321_spill] sm:$0xff]  ;;  %7191 = vrcp.f32 %v11969_v17 }
 0x43a   : > { %16237 = vst [vmem:[#allocation312_spill] sm:$0xff] %v11955_v25  ;;  %v16245_v25 = vld [vmem:[#allocation315_spill] sm:$0xff]  ;;  %vm2238_vm10 = vcmp.eq.f32.partialorder %v2237_v23, 8.507059e+37  ;;  %v11991_v31 = vpop.eup %7187  ;;  %v16250_v23 = vld [vmem:[#allocation345_spill] sm:$0xff]  ;;  %vm2323_vm7 = vweird.f32 %v9297_v40 }
 0x43b   : > { %16238 = vst [vmem:[#allocation420_spill] sm:$0xff] %v11957_v14  ;;  %v2247_v37 = vadd.f32 %v16245_v25, %v16244_v32  ;;  %vm2249_vm9 = vweird.f32 %v16245_v25  ;;  %v3845_v14 = vadd.f32 1.4214138, %v3717_v58  ;;  %6429 = vmatmul.f32.gmra.mxu3 %v5892_v42  ;;  %v11997_v44 = vsel %vm2238_vm10, %v16249_v46, %v2236_v30  ;;  %v16251_v3 = vld [vmem:[#allocation331_spill] sm:$0xff]  ;;  %v16253_v46 = vld [vmem:[#allocation322_spill] sm:$0xff] }
 0x43c   : > { %16239 = vst [vmem:[#allocation421_spill] sm:$0xff] %v11961_v9  ;;  %vm11986_vm11 = vmor %vm2248_vm5, %vm2249_vm9  ;;  %v2262_v32 = vadd.f32 %v16251_v3, %v16250_v23  ;;  %v3462_v55 = vmul.f32 1.0614054, %v11997_v44  ;;  %vm2253_vm12 = vcmp.eq.f32.partialorder %v2252_v63, 8.507059e+37  ;;  %vm2264_vm13 = vweird.f32 %v16251_v3  ;;  %v12007_v42 = vpop.eup %7189  ;;  %v16254_v39 = vld [vmem:[#allocation335_spill] sm:$0xff] }
 0x43d   : > { %16242 = vst [vmem:[#allocation422_spill] sm:$0xff] %v11969_v17  ;;  %v2251_v58 = vsel %vm11986_vm11, %v16245_v25, %v2247_v37  ;;  %v3973_v2 = vmul.f32 %v3845_v14, %v11919_v27  ;;  %v1349_v30 = vmul.f32 0.3275911, %v11978_v48  ;;  %vm2265_vm14 = vmor %vm2263_vm6, %vm2264_vm13  ;;  %v2267_v37 = vand.u32 2147483647, %v16230_v20 }
 0x43e   : > { %16248 = vst [vmem:[#allocation285_spill] sm:$0xff] %v11991_v31  ;;  %v12012_v9 = vsel %vm2253_vm12, %v16253_v46, %v2251_v58  ;;  %v3590_v25 = vadd.f32 -1.4531521, %v3462_v55  ;;  %v2266_v63 = vsel %vm2265_vm14, %v16251_v3, %v2262_v32  ;;  %v3154_v23 = vand.u32 2147483648, %v11930_v7  ;;  %v728_v32 = vpop.f32.mrf.mxu2 }
 0x43f   : > { %16252 = vst [vmem:[#allocation334_spill] sm:$0xff] %v12007_v42  ;;  %v4101_v14 = vadd.f32 -0.28449672, %v3973_v2  ;;  %v3463_v19 = vmul.f32 1.0614054, %v12012_v9  ;;  %vm2268_vm15 = vcmp.eq.f32.partialorder %v2267_v37, 8.507059e+37  ;;  %v4804_v2 = vmul.f32 %v4676_v38, %v11916_v5 }
 0x440   : > { %v5041_v31 = vmul.f32 1.442695, %v4803_v35  ;;  %v1350_v11 = vmul.f32 0.3275911, %v11994_v12  ;;  %v3718_v46 = vmul.f32 %v3590_v25, %v11997_v44  ;;  %v12024_v0 = vsel %vm2268_vm15, %v16254_v39, %v2266_v63  ;;  %v16258_v39 = vld [vmem:[#allocation274_spill] sm:$0xff] }
 0x441   : > { %v4229_v58 = vmul.f32 %v4101_v14, %v11919_v27  ;;  %v3591_v60 = vadd.f32 -1.4531521, %v3463_v19  ;;  %v3169_v20 = vand.u32 2147483648, %v11969_v17  ;;  %v12029_v3 = vmul.f32 0.5, %v11924_v52  ;;  %v12035_v19 = vpop.eup %7191 }
 0x442   : > { %v3464_v35 = vmul.f32 1.0614054, %v12024_v0  ;;  %v12032_v55 = vadd.f32 1.0, %v1349_v30  ;;  %v3846_v14 = vadd.f32 1.4214138, %v3718_v46  ;;  %16257 = vst [vmem:[#allocation345_spill] sm:$0xff] %v12035_v19  ;;  %7193 = vpow2.f32 %v5041_v31 }
 0x443   : > { %16255 = vst [vmem:[#allocation315_spill] sm:$0xff] %v12029_v3  ;;  %v4357_v37 = vadd.f32 0.2548296, %v4229_v58  ;;  %v3719_v25 = vmul.f32 %v3591_v60, %v12012_v9  ;;  %vm5381_vm0 = vcmp.lt.f32.partialorder %v16258_v39, 0.0  ;;  %v12038_v63 = vor.u32 1.1754944e-38, %v3154_v23 }
 0x444   : > { %16256 = vst [vmem:[#allocation321_spill] sm:$0xff] %v12032_v55  ;;  %v12040_v5 = vadd.f32 1.0, %v1350_v11  ;;  %v3592_v52 = vadd.f32 -1.4531521, %v3464_v35  ;;  %v3974_v3 = vmul.f32 %v3846_v14, %v11997_v44  ;;  %v12045_v58 = vadd.f32 %v728_v32, %v7662_v57  ;;  %v16262_v11 = vld [vmem:[#allocation324_spill] sm:$0xff] }
 0x445   : > { %16259 = vst [vmem:[#allocation331_spill] sm:$0xff] %v12038_v63  ;;  %v4485_v38 = vmul.f32 %v4357_v37, %v11919_v27  ;;  %v3847_v30 = vadd.f32 1.4214138, %v3719_v25  ;;  %v3144_v60 = vmul.f32 %v12007_v42, %v11930_v7  ;;  %v12049_v46 = vor.u32 1.1754944e-38, %v3169_v20  ;;  %v841_v20 = vpop.f32.mrf.mxu3 }
 0x446   : > { %16260 = vst [vmem:[#allocation322_spill] sm:$0xff] %v12040_v5  ;;  %v5043_v6 = vmul.f32 1.442695, %v4804_v2  ;;  %v3720_v23 = vmul.f32 %v3592_v52, %v12024_v0  ;;  %7195 = vrcp.f32 %v12032_v55  ;;  %v4102_v35 = vadd.f32 -0.28449672, %v3974_v3 }
 0x447   : > { %16261 = vst [vmem:[#allocation335_spill] sm:$0xff] %v12049_v46  ;;  %v5125_v31 = vmul.f32 %v16262_v11, %v4485_v38  ;;  %v3975_v27 = vmul.f32 %v3847_v30, %v12012_v9  ;;  %v3159_v37 = vmul.f32 %v12035_v19, %v11969_v17  ;;  %v4677_v32 = vsub.f32 0.0, %v11978_v48 }
 0x448   : > { %7197 = vrcp.f32 %v12040_v5  ;;  %v3848_v14 = vadd.f32 1.4214138, %v3720_v23  ;;  %v4230_v2 = vmul.f32 %v4102_v35, %v11997_v44  ;;  %v12061_v46 = vmul.f32 0.70710677, %v12045_v58  ;;  %v12063_v38 = vpop.eup %7193 }
 0x449   : > { %v5253_v25 = vsub.f32 1.0, %v5125_v31  ;;  %v4103_v52 = vadd.f32 -0.28449672, %v3975_v27  ;;  %16264 = vst [vmem:[#allocation324_spill] sm:$0xff] %v12063_v38  ;;  %v3145_v3 = vsub.f32 1.0, %v3144_v60  ;;  %v12066_v30 = vmul.f32 0.5, %v11933_v33 }
 0x44a   : > { %16263 = vst [vmem:[#allocation274_spill] sm:$0xff] %v12061_v46  ;;  %v4678_v11 = vsub.f32 0.0, %v11994_v12  ;;  %v3976_v63 = vmul.f32 %v3848_v14, %v12024_v0  ;;  %v4358_v23 = vadd.f32 0.2548296, %v4230_v2  ;;  %v12072_v35 = vadd.f32 %v841_v20, %v7664_v59  ;;  %v16266_v27 = vld [vmem:[#allocation276_spill] sm:$0xff]  ;;  %v16267_v20 = vld [vmem:[#allocation278_spill] sm:$0xff] }
 0x44b   : > { %16265 = vst [vmem:[#allocation423_spill] sm:$0xff] %v12066_v30  ;;  %v5509_v17 = vsub.f32 0.0, %v5253_v25  ;;  %v4231_v31 = vmul.f32 %v4103_v52, %v12012_v9  ;;  %vm5382_vm1 = vcmp.lt.f32.partialorder %v16266_v27, 0.0  ;;  %v3160_v7 = vsub.f32 1.0, %v3159_v37 }
 0x44c   : > { %7199 = vpow2.f32 %v5043_v6  ;;  %v4805_v60 = vmul.f32 %v4677_v32, %v11978_v48  ;;  %v4104_v38 = vadd.f32 -0.28449672, %v3976_v63  ;;  %v12076_v33 = vpop.eup %7195  ;;  %v4486_v14 = vmul.f32 %v4358_v23, %v11997_v44 }
 0x44d   : > { %v5637_v30 = vsel %vm5381_vm0, %v5509_v17, %v5253_v25  ;;  %v4359_v2 = vadd.f32 0.2548296, %v4231_v31  ;;  %v1223_v52 = vand.u32 2147483647, %v12061_v46  ;;  %vm5383_vm2 = vcmp.lt.f32.partialorder %v16267_v20, 0.0  ;;  %v16269_v17 = vld [vmem:[#allocation326_spill] sm:$0xff] }
 0x44e   : > { %v12082_v34 = vpop.eup %7197  ;;  %v12086_v37 = vmul.f32 %v12007_v42, %v3145_v3  ;;  %v4806_v6 = vmul.f32 %v4678_v11, %v11994_v12  ;;  %v5765_v48 = vadd.f32 1.0, %v5637_v30  ;;  %v4232_v63 = vmul.f32 %v4104_v38, %v12024_v0  ;;  %v16272_v3 = vld [vmem:[#allocation286_spill] sm:$0xff]  ;;  %v16274_v11 = vld [vmem:[#allocation329_spill] sm:$0xff] }
 0x44f   : > { %v3184_v39 = vand.u32 2147483648, %v12032_v55  ;;  %v5126_v32 = vmul.f32 %v16269_v17, %v4486_v14  ;;  %v4487_v44 = vmul.f32 %v4359_v2, %v12012_v9  ;;  %v12094_v25 = vmul.f32 0.70710677, %v12072_v35  ;;  %v16273_v12 = vld [vmem:[#allocation294_spill] sm:$0xff]  ;;  %v505_v9 = vpop.f32.mrf.mxu0 }
 0x450   : > { %16268 = vst [vmem:[#allocation276_spill] sm:$0xff] %v12086_v37  ;;  %v12097_v23 = vmul.f32 %v12035_v19, %v3160_v7  ;;  %v5045_v31 = vmul.f32 1.442695, %v4805_v60  ;;  %v5893_v46 = vmul.f32 %v5765_v48, %v16272_v3  ;;  %v4360_v42 = vadd.f32 0.2548296, %v4232_v63 }
 0x451   : > { %16270 = vst [vmem:[#allocation278_spill] sm:$0xff] %v12094_v25  ;;  %vm5384_vm3 = vcmp.lt.f32.partialorder %v16273_v12, 0.0  ;;  %v3174_v38 = vmul.f32 %v12076_v33, %v12032_v55  ;;  %v5254_v30 = vsub.f32 1.0, %v5126_v32  ;;  %v5127_v14 = vmul.f32 %v16274_v11, %v4487_v44  ;;  %v16276_v44 = vld [vmem:[#allocation318_spill] sm:$0xff] }
 0x452   : > { %16271 = vst [vmem:[#allocation326_spill] sm:$0xff] %v12097_v23  ;;  %v1351_v17 = vmul.f32 0.3275911, %v1223_v52  ;;  %v12104_v2 = vpop.eup %7199  ;;  %v3189_v7 = vmul.f32 %v12082_v34, %v12040_v5  ;;  %v3199_v60 = vand.u32 2147483648, %v12040_v5  ;;  %v5047_v19 = vmul.f32 1.442695, %v4806_v6  ;;  %6093 = vmatmul.f32.gmra.mxu0 %v5893_v46 }
 0x453   : > { %16275 = vst [vmem:[#allocation286_spill] sm:$0xff] %v12104_v2  ;;  %v4488_v48 = vmul.f32 %v4360_v42, %v12024_v0  ;;  %v5510_v63 = vsub.f32 0.0, %v5254_v30  ;;  %v5255_v3 = vsub.f32 1.0, %v5127_v14  ;;  %v4679_v23 = vsub.f32 0.0, %v1223_v52  ;;  %v16278_v2 = vld [vmem:[#allocation343_spill] sm:$0xff] }
 0x454   : > { %v12111_v32 = vand.u32 2147483647, %v12094_v25  ;;  %vm2278_vm4 = vweird.f32 %v16276_v44  ;;  %v12114_v11 = vor.u32 1.1754944e-38, %v3184_v39  ;;  %7201 = vpow2.f32 %v5045_v31  ;;  %v16279_v5 = vld [vmem:[#allocation323_spill] sm:$0xff] }
 0x455   : > { %v5128_v55 = vmul.f32 %v16278_v2, %v4488_v48  ;;  %v506_v37 = vadd.f32 %v505_v9, %v7652_v51  ;;  %vm2293_vm5 = vweird.f32 %v16279_v5  ;;  %v3175_v46 = vsub.f32 1.0, %v3174_v38  ;;  %v16281_v48 = vld [vmem:[#allocation306_spill] sm:$0xff] }
 0x456   : > { %16277 = vst [vmem:[#allocation294_spill] sm:$0xff] %v12114_v11  ;;  %v5638_v0 = vsel %vm5382_vm1, %v5510_v63, %v5254_v30  ;;  %v5511_v42 = vsub.f32 0.0, %v5255_v3  ;;  %v12121_v6 = vadd.f32 1.0, %v1351_v17  ;;  %v3190_v14 = vsub.f32 1.0, %v3189_v7  ;;  %v618_v17 = vpop.f32.mrf.mxu1 }
 0x457   : > { %v12123_v25 = vor.u32 1.1754944e-38, %v3199_v60  ;;  %v5766_v24 = vadd.f32 1.0, %v5638_v0  ;;  %v5256_v39 = vsub.f32 1.0, %v5128_v55  ;;  %7203 = vpow2.f32 %v5047_v19  ;;  %v16284_v55 = vld [vmem:[#allocation347_spill] sm:$0xff]  ;;  %v16285_v19 = vld [vmem:[#allocation332_spill] sm:$0xff] }
 0x458   : > { %v5639_v31 = vsel %vm5383_vm2, %v5511_v42, %v5255_v3  ;;  %v4807_v2 = vmul.f32 %v4679_v23, %v1223_v52  ;;  %v1352_v9 = vmul.f32 0.3275911, %v12111_v32  ;;  %v12129_v30 = vmul.f32 0.70710677, %v506_v37  ;;  %v16287_v23 = vld [vmem:[#allocation308_spill] sm:$0xff] }
 0x459   : > { %16280 = vst [vmem:[#allocation329_spill] sm:$0xff] %v12123_v25  ;;  %v5894_v38 = vmul.f32 %v5766_v24, %v16281_v48  ;;  %v5767_v11 = vadd.f32 1.0, %v5639_v31  ;;  %v5512_v27 = vsub.f32 0.0, %v5256_v39  ;;  %v12132_v7 = vmul.f32 %v12076_v33, %v3175_v46  ;;  %v16316_v25 = vld [vmem:[#allocation348_spill] sm:$0xff] }
 0x45a   : > { %16282 = vst [vmem:[#allocation318_spill] sm:$0xff] %v12129_v30  ;;  %v12135_v60 = vmul.f32 0.5, %v12045_v58  ;;  %7205 = vrcp.f32 %v12121_v6  ;;  %v2277_v52 = vadd.f32 %v16285_v19, %v16284_v55  ;;  %v12140_v20 = vpop.eup %7201  ;;  %vm2308_vm6 = vweird.f32 %v9292_v8 }
 0x45b   : > { %16286 = vst [vmem:[#allocation323_spill] sm:$0xff] %v12140_v20  ;;  %v12144_v24 = vmul.f32 %v12082_v34, %v3190_v14  ;;  %6206 = vmatmul.f32.gmra.mxu1 %v5894_v38  ;;  %v5895_v63 = vmul.f32 %v5767_v11, %v16287_v23  ;;  %v5640_v3 = vsel %vm5384_vm3, %v5512_v27, %v5256_v39  ;;  %v3214_v58 = vand.u32 2147483648, %v12121_v6  ;;  %v16289_v39 = vld [vmem:[#allocation311_spill] sm:$0xff]  ;;  %v16291_v27 = vld [vmem:[#allocation337_spill] sm:$0xff] }
 0x45c   : > { %16283 = vst [vmem:[#allocation343_spill] sm:$0xff] %v12135_v60  ;;  %v5768_v46 = vadd.f32 1.0, %v5640_v3  ;;  %v5049_v0 = vmul.f32 1.442695, %v4807_v2  ;;  %v4680_v42 = vsub.f32 0.0, %v12111_v32  ;;  %v12152_v31 = vadd.f32 %v618_v17, %v7654_v53  ;;  %v16290_v38 = vld [vmem:[#allocation351_spill] sm:$0xff] }
 0x45d   : > { %6319 = vmatmul.f32.gmra.mxu2 %v5895_v63  ;;  %v12155_v14 = vadd.f32 1.0, %v1352_v9  ;;  %v12158_v48 = vand.u32 2147483647, %v12129_v30  ;;  %vm2279_vm8 = vweird.f32 %v16285_v19  ;;  %v2282_v12 = vand.u32 2147483647, %v16276_v44  ;;  %v12162_v11 = vpop.eup %7203 }
 0x45e   : > { %16288 = vst [vmem:[#allocation306_spill] sm:$0xff] %v12162_v11  ;;  %v5896_v2 = vmul.f32 %v5768_v46, %v16289_v39  ;;  %vm2280_vm9 = vmor %vm2278_vm4, %vm2279_vm8  ;;  %v2292_v17 = vadd.f32 %v16291_v27, %v16290_v38  ;;  %vm2294_vm10 = vweird.f32 %v16291_v27  ;;  %v2297_v9 = vand.u32 2147483647, %v16279_v5  ;;  %v16296_v46 = vld [vmem:[#allocation338_spill] sm:$0xff] }
 0x45f   : > { %v12171_v55 = vor.u32 1.1754944e-38, %v3214_v58  ;;  %v12174_v23 = vmul.f32 0.5, %v12072_v35  ;;  %v2281_v63 = vsel %vm2280_vm9, %v16285_v19, %v2277_v52  ;;  %vm2283_vm11 = vcmp.eq.f32.partialorder %v2282_v12, 8.507059e+37  ;;  %vm2295_vm12 = vmor %vm2293_vm5, %vm2294_vm10 }
 0x460   : > { %v12179_v44 = vpop.eup %7205  ;;  %6432 = vmatmul.f32.gmra.mxu3 %v5896_v2  ;;  %7207 = vpow2.f32 %v5049_v0  ;;  %v12182_v3 = vmul.f32 0.70710677, %v12152_v31  ;;  %v12185_v39 = vsel %vm2283_vm11, %v16296_v46, %v2281_v63  ;;  %v2296_v58 = vsel %vm2295_vm12, %v16291_v27, %v2292_v17  ;;  %v16298_v0 = vld [vmem:[#allocation341_spill] sm:$0xff] }
 0x461   : > { %16292 = vst [vmem:[#allocation347_spill] sm:$0xff] %v12171_v55  ;;  %7209 = vrcp.f32 %v12155_v14  ;;  %v4808_v35 = vmul.f32 %v4680_v42, %v12111_v32  ;;  %v12190_v19 = vmul.f32 0.5, %v506_v37  ;;  %vm2298_vm13 = vcmp.eq.f32.partialorder %v2297_v9, 8.507059e+37 }
 0x462   : > { %16293 = vst [vmem:[#allocation332_spill] sm:$0xff] %v12174_v23  ;;  %v1353_v5 = vmul.f32 0.3275911, %v12158_v48  ;;  %v3465_v52 = vmul.f32 1.0614054, %v12185_v39  ;;  %v12195_v12 = vsel %vm2298_vm13, %v16298_v0, %v2296_v58  ;;  %v2307_v2 = vadd.f32 %v9344_v36, %v9414_v4 }
 0x463   : > { %16294 = vst [vmem:[#allocation308_spill] sm:$0xff] %v12179_v44  ;;  %v3204_v38 = vmul.f32 %v12179_v44, %v12121_v6  ;;  %v3229_v27 = vand.u32 2147483648, %v12155_v14  ;;  %v3466_v32 = vmul.f32 1.0614054, %v12195_v12  ;;  %vm2309_vm14 = vweird.f32 %v9344_v36 }
 0x464   : > { %16295 = vst [vmem:[#allocation311_spill] sm:$0xff] %v12182_v3  ;;  %v12205_v37 = vand.u32 2147483647, %v12182_v3  ;;  %v3593_v42 = vadd.f32 -1.4531521, %v3465_v52  ;;  %vm12209_vm15 = vmor %vm2308_vm6, %vm2309_vm14  ;;  %v2322_v9 = vadd.f32 %v9352_v29, %v9424_v22  ;;  %vm2324_vm0 = vweird.f32 %v9352_v29 }
 0x465   : > { %16297 = vst [vmem:[#allocation351_spill] sm:$0xff] %v12190_v19  ;;  %v2312_v4 = vand.u32 2147483647, %v9292_v8  ;;  %v3594_v63 = vadd.f32 -1.4531521, %v3466_v32  ;;  %v2311_v46 = vsel %vm12209_vm15, %v9344_v36, %v2307_v2  ;;  %v12223_v19 = vadd.f32 1.0, %v1353_v5  ;;  %vm2325_vm2 = vmor %vm2323_vm7, %vm2324_vm0  ;;  %v731_v8 = vpop.f32.mrf.mxu2 }
 0x466   : > { %v2327_v58 = vand.u32 2147483647, %v9297_v40  ;;  %v12221_v52 = vpop.eup %7207  ;;  %v5051_v0 = vmul.f32 1.442695, %v4808_v35  ;;  %v3721_v23 = vmul.f32 %v3593_v42, %v12185_v39  ;;  %v16304_v2 = vld [vmem:[#allocation349_spill] sm:$0xff]  ;;  %v2326_v17 = vsel %vm2325_vm2, %v9352_v29, %v2322_v9 }
 0x467   : > { %16301 = vst [vmem:[#allocation337_spill] sm:$0xff] %v12221_v52  ;;  %vm2313_vm1 = vcmp.eq.f32.partialorder %v2312_v4, 8.507059e+37  ;;  %v12228_v22 = vpop.eup %7209  ;;  %v3722_v36 = vmul.f32 %v3594_v63, %v12195_v12  ;;  %v1354_v35 = vmul.f32 0.3275911, %v12205_v37  ;;  %v16305_v4 = vld [vmem:[#allocation352_spill] sm:$0xff]  ;;  %v3205_v40 = vsub.f32 1.0, %v3204_v38 }
 0x468   : > { %16302 = vst [vmem:[#allocation338_spill] sm:$0xff] %v12223_v19  ;;  %v12232_v32 = vsel %vm2313_vm1, %v16304_v2, %v2311_v46  ;;  %vm2328_vm3 = vcmp.eq.f32.partialorder %v2327_v58, 8.507059e+37  ;;  %v3849_v5 = vadd.f32 1.4214138, %v3721_v23  ;;  %v12242_v63 = vadd.f32 %v731_v8, %v7662_v57  ;;  %v844_v23 = vpop.f32.mrf.mxu3 }
 0x469   : > { %16303 = vst [vmem:[#allocation341_spill] sm:$0xff] %v12228_v22  ;;  %v3467_v42 = vmul.f32 1.0614054, %v12232_v32  ;;  %v12238_v60 = vsel %vm2328_vm3, %v16305_v4, %v2326_v17  ;;  %v3850_v3 = vadd.f32 1.4214138, %v3722_v36  ;;  %7211 = vrcp.f32 %v12223_v19 }
 0x46a   : > { %v3468_v30 = vmul.f32 1.0614054, %v12238_v60  ;;  %v4681_v29 = vsub.f32 0.0, %v12158_v48  ;;  %v3977_v9 = vmul.f32 %v3849_v5, %v12185_v39  ;;  %v12247_v58 = vor.u32 1.1754944e-38, %v3229_v27 }
 0x46b   : > { %v3595_v46 = vadd.f32 -1.4531521, %v3467_v42  ;;  %7213 = vpow2.f32 %v5051_v0  ;;  %v3978_v2 = vmul.f32 %v3850_v3, %v12195_v12  ;;  %v3219_v36 = vmul.f32 %v12228_v22, %v12155_v14 }
 0x46c   : > { %16306 = vst [vmem:[#allocation349_spill] sm:$0xff] %v12247_v58  ;;  %v3596_v38 = vadd.f32 -1.4531521, %v3468_v30  ;;  %v12252_v17 = vadd.f32 1.0, %v1354_v35  ;;  %v4105_v8 = vadd.f32 -0.28449672, %v3977_v9  ;;  %v12260_v27 = vadd.f32 %v844_v23, %v7664_v59 }
 0x46d   : > { %v3723_v4 = vmul.f32 %v3595_v46, %v12232_v32  ;;  %v4106_v52 = vadd.f32 -0.28449672, %v3978_v2  ;;  %v12257_v5 = vmul.f32 0.70710677, %v12242_v63  ;;  %v12263_v3 = vmul.f32 %v12179_v44, %v3205_v40 }
 0x46e   : > { %16307 = vst [vmem:[#allocation352_spill] sm:$0xff] %v12252_v17  ;;  %v3724_v11 = vmul.f32 %v3596_v38, %v12238_v60  ;;  %v4809_v30 = vmul.f32 %v4681_v29, %v12158_v48  ;;  %v4233_v0 = vmul.f32 %v4105_v8, %v12185_v39  ;;  %v12268_v42 = vmul.f32 0.5, %v12152_v31  ;;  %v16312_v29 = vld [vmem:[#allocation296_spill] sm:$0xff] }
 0x46f   : > { %16308 = vst [vmem:[#allocation424_spill] sm:$0xff] %v12257_v5  ;;  %v3851_v35 = vadd.f32 1.4214138, %v3723_v4  ;;  %v4682_v9 = vsub.f32 0.0, %v12205_v37  ;;  %v4234_v46 = vmul.f32 %v4106_v52, %v12195_v12  ;;  %v12272_v38 = vpop.eup %7211  ;;  %v3220_v23 = vsub.f32 1.0, %v3219_v36 }
 0x470   : > { %16309 = vst [vmem:[#allocation425_spill] sm:$0xff] %v12263_v3  ;;  %v3852_v2 = vadd.f32 1.4214138, %v3724_v11  ;;  %7215 = vrcp.f32 %v12252_v17  ;;  %v4361_v40 = vadd.f32 0.2548296, %v4233_v0  ;;  %vm5385_vm4 = vcmp.lt.f32.partialorder %v16312_v29, 0.0 }
 0x471   : > { %16310 = vst [vmem:[#allocation426_spill] sm:$0xff] %v12268_v42  ;;  %v3979_v20 = vmul.f32 %v3851_v35, %v12232_v32  ;;  %v12276_v48 = vpop.eup %7213  ;;  %v4362_v8 = vadd.f32 0.2548296, %v4234_v46  ;;  %v1227_v4 = vand.u32 2147483647, %v12257_v5  ;;  %v16314_v11 = vld [vmem:[#allocation304_spill] sm:$0xff]  ;;  %v4810_v46 = vmul.f32 %v4682_v9, %v12205_v37  ;;  %v508_v37 = vpop.f32.mrf.mxu0 }
 0x472   : > { %16311 = vst [vmem:[#allocation427_spill] sm:$0xff] %v12276_v48  ;;  %v3980_v31 = vmul.f32 %v3852_v2, %v12238_v60  ;;  %v12282_v52 = vmul.f32 0.70710677, %v12260_v27  ;;  %vm5386_vm5 = vcmp.lt.f32.partialorder %v16314_v11, 0.0  ;;  %v3244_v36 = vand.u32 2147483648, %v12223_v19  ;;  %v16317_v3 = vld [vmem:[#allocation350_spill] sm:$0xff] }
 0x473   : > { %v5053_v42 = vmul.f32 1.442695, %v4809_v30  ;;  %v4489_v0 = vmul.f32 %v4361_v40, %v12185_v39  ;;  %v4107_v35 = vadd.f32 -0.28449672, %v3979_v20  ;;  %v3234_v48 = vmul.f32 %v12272_v38, %v12223_v19  ;;  %v16326_v29 = vld [vmem:[#allocation340_spill] sm:$0xff] }
 0x474   : > { %16313 = vst [vmem:[#allocation296_spill] sm:$0xff] %v12282_v52  ;;  %v4490_v2 = vmul.f32 %v4362_v8, %v12195_v12  ;;  %v4108_v58 = vadd.f32 -0.28449672, %v3980_v31  ;;  %v12292_v5 = vmul.f32 %v12228_v22, %v3220_v23  ;;  %v3259_v55 = vand.u32 2147483648, %v12252_v17  ;;  %v16319_v31 = vld [vmem:[#allocation314_spill] sm:$0xff] }
 0x475   : > { %v5129_v44 = vmul.f32 %v16316_v25, %v4489_v0  ;;  %v4235_v30 = vmul.f32 %v4107_v35, %v12232_v32  ;;  %v1355_v40 = vmul.f32 0.3275911, %v1227_v4  ;;  %v12300_v19 = vand.u32 2147483647, %v12282_v52 }
 0x476   : > { %16315 = vst [vmem:[#allocation304_spill] sm:$0xff] %v12292_v5  ;;  %v5130_v39 = vmul.f32 %v16317_v3, %v4490_v2  ;;  %v4236_v20 = vmul.f32 %v4108_v58, %v12238_v60  ;;  %v12302_v12 = vpop.eup %7215  ;;  %v12304_v9 = vor.u32 1.1754944e-38, %v3244_v36  ;;  %7217 = vpow2.f32 %v5053_v42  ;;  %v16320_v2 = vld [vmem:[#allocation317_spill] sm:$0xff] }
 0x477   : > { %v5257_v23 = vsub.f32 1.0, %v5129_v44  ;;  %v4363_v8 = vadd.f32 0.2548296, %v4235_v30  ;;  %vm5387_vm6 = vcmp.lt.f32.partialorder %v16319_v31, 0.0  ;;  %v3235_v25 = vsub.f32 1.0, %v3234_v48  ;;  %v16322_v30 = vld [vmem:[#allocation356_spill] sm:$0xff] }
 0x478   : > { %16318 = vst [vmem:[#allocation348_spill] sm:$0xff] %v12304_v9  ;;  %v5055_v0 = vmul.f32 1.442695, %v4810_v46  ;;  %v5258_v35 = vsub.f32 1.0, %v5130_v39  ;;  %v4364_v3 = vadd.f32 0.2548296, %v4236_v20  ;;  %v509_v5 = vadd.f32 %v508_v37, %v7652_v51 }
 0x479   : > { %vm5388_vm7 = vcmp.lt.f32.partialorder %v16320_v2, 0.0  ;;  %v12308_v58 = vor.u32 1.1754944e-38, %v3259_v55  ;;  %v5513_v52 = vsub.f32 0.0, %v5257_v23  ;;  %v4491_v22 = vmul.f32 %v4363_v8, %v12232_v32  ;;  %v16323_v8 = vld [vmem:[#allocation358_spill] sm:$0xff] }
 0x47a   : > { %vm2338_vm8 = vweird.f32 %v9304_v54  ;;  %v5514_v42 = vsub.f32 0.0, %v5258_v35  ;;  %v4492_v44 = vmul.f32 %v4364_v3, %v12238_v60  ;;  %v12314_v36 = vadd.f32 1.0, %v1355_v40 }
 0x47b   : > { %16321 = vst [vmem:[#allocation350_spill] sm:$0xff] %v12308_v58  ;;  %v1356_v48 = vmul.f32 0.3275911, %v12300_v19  ;;  %v3249_v46 = vmul.f32 %v12302_v12, %v12252_v17  ;;  %v5641_v55 = vsel %vm5385_vm4, %v5513_v52, %v5257_v23  ;;  %v5131_v39 = vmul.f32 %v16322_v30, %v4491_v22  ;;  %v16327_v22 = vld [vmem:[#allocation327_spill] sm:$0xff] }
 0x47c   : > { %v4683_v32 = vsub.f32 0.0, %v1227_v4  ;;  %7219 = vpow2.f32 %v5055_v0  ;;  %v5769_v20 = vadd.f32 1.0, %v5641_v55  ;;  %v5642_v37 = vsel %vm5386_vm5, %v5514_v42, %v5258_v35  ;;  %v12325_v40 = vpop.eup %7217  ;;  %v621_v0 = vpop.f32.mrf.mxu1  ;;  %v16328_v42 = vld [vmem:[#allocation328_spill] sm:$0xff] }
 0x47d   : > { %v5132_v60 = vmul.f32 %v16323_v8, %v4492_v44  ;;  %16324 = vst [vmem:[#allocation314_spill] sm:$0xff] %v12325_v40  ;;  %v12328_v3 = vmul.f32 %v12272_v38, %v3235_v25  ;;  %v5770_v58 = vadd.f32 1.0, %v5642_v37  ;;  %v5259_v9 = vsub.f32 1.0, %v5131_v39 }
 0x47e   : > { %v12330_v17 = vmul.f32 0.70710677, %v509_v5  ;;  %vm2353_vm9 = vweird.f32 %v16326_v29  ;;  %v5897_v52 = vmul.f32 %v5769_v20, %v16327_v22  ;;  %7221 = vrcp.f32 %v12314_v36 }
 0x47f   : > { %v5260_v23 = vsub.f32 1.0, %v5132_v60  ;;  %v12335_v11 = vadd.f32 1.0, %v1356_v48  ;;  %v3250_v35 = vsub.f32 1.0, %v3249_v46  ;;  %v5898_v44 = vmul.f32 %v5770_v58, %v16328_v42 }
 0x480   : > { %16325 = vst [vmem:[#allocation317_spill] sm:$0xff] %v12330_v17  ;;  %v5515_v55 = vsub.f32 0.0, %v5259_v9  ;;  %v4811_v25 = vmul.f32 %v4683_v32, %v1227_v4  ;;  %6096 = vmatmul.f32.gmra.mxu0 %v5897_v52  ;;  %v4684_v39 = vsub.f32 0.0, %v12300_v19  ;;  %v2337_v37 = vadd.f32 %v9359_v50, %v9427_v1  ;;  %v16333_v52 = vld [vmem:[#allocation330_spill] sm:$0xff] }
 0x481   : > { %v5516_v30 = vsub.f32 0.0, %v5260_v23  ;;  %vm2339_vm10 = vweird.f32 %v9359_v50  ;;  %6209 = vmatmul.f32.gmra.mxu1 %v5898_v44  ;;  %v12345_v20 = vmul.f32 0.5, %v12242_v63  ;;  %v12348_v58 = vand.u32 2147483647, %v12330_v17  ;;  %v16335_v44 = vld [vmem:[#allocation342_spill] sm:$0xff] }
 0x482   : > { %v5643_v48 = vsel %vm5387_vm6, %v5515_v55, %v5259_v9  ;;  %v12351_v4 = vadd.f32 %v621_v0, %v7654_v53  ;;  %v12353_v46 = vpop.eup %7219  ;;  %vm2368_vm11 = vweird.f32 %v9372_v16  ;;  %7223 = vrcp.f32 %v12335_v11  ;;  %vm12368_vm12 = vmor %vm2338_vm8, %vm2339_vm10 }
 0x483   : > { %16329 = vst [vmem:[#allocation356_spill] sm:$0xff] %v12345_v20  ;;  %v5771_v1 = vadd.f32 1.0, %v5643_v48  ;;  %v5644_v32 = vsel %vm5388_vm7, %v5516_v30, %v5260_v23  ;;  %v2342_v9 = vand.u32 2147483647, %v9304_v54  ;;  %v12361_v63 = vmul.f32 %v12302_v12, %v3250_v35 }
 0x484   : > { %16330 = vst [vmem:[#allocation358_spill] sm:$0xff] %v12353_v46  ;;  %v5772_v31 = vadd.f32 1.0, %v5644_v32  ;;  %v3274_v8 = vand.u32 2147483648, %v12314_v36  ;;  %v5057_v60 = vmul.f32 1.442695, %v4811_v25  ;;  %v12372_v2 = vpop.eup %7221  ;;  %v12376_v0 = vmul.f32 0.5, %v12260_v27 }
 0x485   : > { %v5899_v23 = vmul.f32 %v5771_v1, %v16333_v52  ;;  %v4812_v35 = vmul.f32 %v4684_v39, %v12300_v19  ;;  %v2341_v42 = vsel %vm12368_vm12, %v9359_v50, %v2337_v37  ;;  %v3289_v54 = vand.u32 2147483648, %v12335_v11  ;;  %v16338_v37 = vld [vmem:[#allocation353_spill] sm:$0xff] }
 0x486   : > { %16334 = vst [vmem:[#allocation340_spill] sm:$0xff] %v12376_v0  ;;  %v5900_v55 = vmul.f32 %v5772_v31, %v16335_v44  ;;  %v1357_v25 = vmul.f32 0.3275911, %v12348_v58  ;;  %v12386_v30 = vmul.f32 0.70710677, %v12351_v4  ;;  %vm2383_vm13 = vweird.f32 %v9390_v13 }
 0x487   : > { %6322 = vmatmul.f32.gmra.mxu2 %v5899_v23  ;;  %v12389_v27 = vmul.f32 0.5, %v509_v5  ;;  %vm2343_vm14 = vcmp.eq.f32.partialorder %v2342_v9, 8.507059e+37  ;;  %v2352_v19 = vadd.f32 %v9388_v43, %v9457_v45  ;;  %vm2354_vm15 = vweird.f32 %v9388_v43  ;;  %v16344_v5 = vld [vmem:[#allocation367_spill] sm:$0xff] }
 0x488   : > { %16336 = vst [vmem:[#allocation327_spill] sm:$0xff] %v12386_v30  ;;  %6435 = vmatmul.f32.gmra.mxu3 %v5900_v55  ;;  %v3264_v50 = vmul.f32 %v12372_v2, %v12314_v36  ;;  %v12396_v39 = vor.u32 1.1754944e-38, %v3274_v8  ;;  %7225 = vpow2.f32 %v5057_v60  ;;  %v12399_v48 = vsel %vm2343_vm14, %v16338_v37, %v2341_v42  ;;  %vm12403_vm0 = vmor %vm2353_vm9, %vm2354_vm15  ;;  %v12407_v1 = vpop.eup %7223 }
 0x489   : > { %16337 = vst [vmem:[#allocation328_spill] sm:$0xff] %v12389_v27  ;;  %v3469_v45 = vmul.f32 1.0614054, %v12399_v48  ;;  %v2356_v32 = vsel %vm12403_vm0, %v9388_v43, %v2352_v19  ;;  %v2357_v9 = vand.u32 2147483647, %v16326_v29  ;;  %v2367_v31 = vadd.f32 %v9433_v15, %v9504_v62  ;;  %v16342_v29 = vld [vmem:[#allocation362_spill] sm:$0xff] }
 0x48a   : > { %v12416_v8 = vor.u32 1.1754944e-38, %v3289_v54  ;;  %v5059_v60 = vmul.f32 1.442695, %v4812_v35  ;;  %v12418_v22 = vadd.f32 1.0, %v1357_v25  ;;  %v1230_v52 = vand.u32 2147483647, %v12386_v30 }
 0x48b   : > { %v3597_v23 = vadd.f32 -1.4531521, %v3469_v45  ;;  %vm2358_vm1 = vcmp.eq.f32.partialorder %v2357_v9, 8.507059e+37  ;;  %vm2369_vm2 = vweird.f32 %v9433_v15  ;;  %v2372_v42 = vand.u32 2147483647, %v9372_v16  ;;  %v16349_v30 = vld [vmem:[#allocation364_spill] sm:$0xff] }
 0x48c   : > { %16341 = vst [vmem:[#allocation330_spill] sm:$0xff] %v12416_v8  ;;  %v3265_v44 = vsub.f32 1.0, %v3264_v50  ;;  %v12425_v43 = vmul.f32 %v12407_v1, %v12335_v11  ;;  %v4685_v62 = vsub.f32 0.0, %v12348_v58  ;;  %v12429_v55 = vsel %vm2358_vm1, %v16342_v29, %v2356_v32  ;;  %vm2370_vm3 = vmor %vm2368_vm11, %vm2369_vm2 }
 0x48d   : > { %v3725_v35 = vmul.f32 %v3597_v23, %v12399_v48  ;;  %v3470_v54 = vmul.f32 1.0614054, %v12429_v55  ;;  %v2371_v25 = vsel %vm2370_vm3, %v9433_v15, %v2367_v31  ;;  %vm2373_vm4 = vcmp.eq.f32.partialorder %v2372_v42, 8.507059e+37 }
 0x48e   : > { %v12436_v19 = vpop.eup %7225  ;;  %v1358_v50 = vmul.f32 0.3275911, %v1230_v52  ;;  %v12439_v37 = vsel %vm2373_vm4, %v9435_v41, %v2371_v25  ;;  %v2382_v45 = vadd.f32 %v16344_v5, %v9525_v10  ;;  %vm2384_vm5 = vweird.f32 %v16344_v5 }
 0x48f   : > { %16343 = vst [vmem:[#allocation342_spill] sm:$0xff] %v12436_v19  ;;  %7227 = vrcp.f32 %v12418_v22  ;;  %v3853_v16 = vadd.f32 1.4214138, %v3725_v35  ;;  %v3598_v32 = vadd.f32 -1.4531521, %v3470_v54  ;;  %v12447_v15 = vmul.f32 0.5, %v12351_v4  ;;  %vm12451_vm6 = vmor %vm2383_vm13, %vm2384_vm5 }
 0x490   : > { %v3471_v9 = vmul.f32 1.0614054, %v12439_v37  ;;  %7229 = vpow2.f32 %v5059_v60  ;;  %v4686_v31 = vsub.f32 0.0, %v1230_v52  ;;  %v2387_v10 = vand.u32 2147483647, %v9390_v13  ;;  %v16357_v19 = vld [vmem:[#allocation361_spill] sm:$0xff] }
 0x491   : > { %16345 = vst [vmem:[#allocation353_spill] sm:$0xff] %v12447_v15  ;;  %v3981_v23 = vmul.f32 %v3853_v16, %v12399_v48  ;;  %v3726_v42 = vmul.f32 %v3598_v32, %v12429_v55  ;;  %v2386_v60 = vsel %vm12451_vm6, %v16344_v5, %v2382_v45  ;;  %v12462_v4 = vmul.f32 %v12372_v2, %v3265_v44  ;;  %v734_v32 = vpop.f32.mrf.mxu2 }
 0x492   : > { %v3599_v29 = vadd.f32 -1.4531521, %v3471_v9  ;;  %v3280_v35 = vsub.f32 1.0, %v12425_v43  ;;  %v4813_v54 = vmul.f32 %v4685_v62, %v12348_v58  ;;  %v12466_v25 = vadd.f32 1.0, %v1358_v50  ;;  %v847_v9 = vpop.f32.mrf.mxu3 }
 0x493   : > { %v4109_v15 = vadd.f32 -0.28449672, %v3981_v23  ;;  %v3854_v13 = vadd.f32 1.4214138, %v3726_v42  ;;  %vm2388_vm7 = vcmp.eq.f32.partialorder %v2387_v10, 8.507059e+37  ;;  %v4814_v27 = vmul.f32 %v4686_v31, %v1230_v52 }
 0x494   : > { %16348 = vst [vmem:[#allocation362_spill] sm:$0xff] %v12466_v25  ;;  %v3727_v16 = vmul.f32 %v3599_v29, %v12439_v37  ;;  %v12470_v41 = vsel %vm2388_vm7, %v16349_v30, %v2386_v60  ;;  %v12473_v44 = vadd.f32 %v734_v32, %v7662_v57  ;;  %v12476_v43 = vadd.f32 %v847_v9, %v7664_v59 }
 0x495   : > { %v12478_v58 = vpop.eup %7227  ;;  %v3304_v62 = vand.u32 2147483648, %v12418_v22  ;;  %v4237_v50 = vmul.f32 %v4109_v15, %v12399_v48  ;;  %v3982_v5 = vmul.f32 %v3854_v13, %v12429_v55  ;;  %v5061_v52 = vmul.f32 1.442695, %v4813_v54  ;;  %v16354_v15 = vld [vmem:[#allocation319_spill] sm:$0xff]  ;;  %v16355_v13 = vld [vmem:[#allocation368_spill] sm:$0xff] }
 0x496   : > { %16350 = vst [vmem:[#allocation367_spill] sm:$0xff] %v12478_v58  ;;  %v3855_v45 = vadd.f32 1.4214138, %v3727_v16  ;;  %v12483_v10 = vpop.eup %7229  ;;  %7231 = vrcp.f32 %v12466_v25  ;;  %v3472_v30 = vmul.f32 1.0614054, %v12470_v41  ;;  %vm5389_vm8 = vcmp.lt.f32.partialorder %v16354_v15, 0.0 }
 0x497   : > { %16351 = vst [vmem:[#allocation364_spill] sm:$0xff] %v12483_v10  ;;  %v12488_v31 = vmul.f32 0.70710677, %v12473_v44  ;;  %v4365_v23 = vadd.f32 0.2548296, %v4237_v50  ;;  %vm2398_vm9 = vweird.f32 %v16355_v13  ;;  %v3294_v54 = vmul.f32 %v12478_v58, %v12418_v22 }
 0x498   : > { %v4110_v42 = vadd.f32 -0.28449672, %v3982_v5  ;;  %v3983_v29 = vmul.f32 %v3855_v45, %v12439_v37  ;;  %v12492_v60 = vmul.f32 0.70710677, %v12476_v43  ;;  %v3319_v16 = vand.u32 2147483648, %v12466_v25 }
 0x499   : > { %16352 = vst [vmem:[#allocation428_spill] sm:$0xff] %v12488_v31  ;;  %v5063_v32 = vmul.f32 1.442695, %v4814_v27  ;;  %v3600_v9 = vadd.f32 -1.4531521, %v3472_v30  ;;  %v4493_v0 = vmul.f32 %v4365_v23, %v12399_v48  ;;  %v12503_v17 = vmul.f32 %v12407_v1, %v3280_v35  ;;  %v511_v30 = vpop.f32.mrf.mxu0 }
 0x49a   : > { %16353 = vst [vmem:[#allocation429_spill] sm:$0xff] %v12492_v60  ;;  %v4238_v50 = vmul.f32 %v4110_v42, %v12429_v55  ;;  %v4111_v5 = vadd.f32 -0.28449672, %v3983_v29  ;;  %v1231_v45 = vand.u32 2147483647, %v12488_v31  ;;  %v12505_v20 = vor.u32 1.1754944e-38, %v3304_v62 }
 0x49b   : > { %7233 = vpow2.f32 %v5061_v52  ;;  %v3728_v10 = vmul.f32 %v3600_v9, %v12470_v41  ;;  %v5133_v46 = vmul.f32 %v16357_v19, %v4493_v0  ;;  %v12511_v48 = vand.u32 2147483647, %v12492_v60  ;;  %v16358_v42 = vld [vmem:[#allocation325_spill] sm:$0xff] }
 0x49c   : > { %16356 = vst [vmem:[#allocation319_spill] sm:$0xff] %v12505_v20  ;;  %v4366_v40 = vadd.f32 0.2548296, %v4238_v50  ;;  %v4239_v27 = vmul.f32 %v4111_v5, %v12439_v37  ;;  %v12513_v23 = vpop.eup %7231  ;;  %vm5390_vm10 = vcmp.lt.f32.partialorder %v16358_v42, 0.0  ;;  %v3295_v35 = vsub.f32 1.0, %v3294_v54  ;;  %v16360_v50 = vld [vmem:[#allocation336_spill] sm:$0xff] }
 0x49d   : > { %v12516_v29 = vor.u32 1.1754944e-38, %v3319_v16  ;;  %7235 = vpow2.f32 %v5063_v32  ;;  %v3856_v62 = vadd.f32 1.4214138, %v3728_v10  ;;  %v5261_v52 = vsub.f32 1.0, %v5133_v46  ;;  %v16362_v31 = vld [vmem:[#allocation389_spill] sm:$0xff]  ;;  %v16364_v16 = vld [vmem:[#allocation370_spill] sm:$0xff] }
 0x49e   : > { %v4494_v9 = vmul.f32 %v4366_v40, %v12429_v55  ;;  %v4367_v0 = vadd.f32 0.2548296, %v4239_v27  ;;  %v1359_v19 = vmul.f32 0.3275911, %v1231_v45  ;;  %vm5391_vm11 = vcmp.lt.f32.partialorder %v16360_v50, 0.0  ;;  %v16363_v20 = vld [vmem:[#allocation377_spill] sm:$0xff] }
 0x49f   : > { %16359 = vst [vmem:[#allocation368_spill] sm:$0xff] %v12516_v29  ;;  %v3984_v5 = vmul.f32 %v3856_v62, %v12470_v41  ;;  %v12522_v60 = vadd.f32 %v511_v30, %v7652_v51  ;;  %v2397_v8 = vadd.f32 %v16363_v20, %v16362_v31  ;;  %vm2399_vm12 = vweird.f32 %v16363_v20  ;;  %v16367_v29 = vld [vmem:[#allocation371_spill] sm:$0xff] }
 0x4a0   : > { %v5517_v54 = vsub.f32 0.0, %v5261_v52  ;;  %v5134_v10 = vmul.f32 %v16364_v16, %v4494_v9  ;;  %v4495_v46 = vmul.f32 %v4367_v0, %v12439_v37  ;;  %v1360_v40 = vmul.f32 0.3275911, %v12511_v48  ;;  %vm12544_vm13 = vmor %vm2398_vm9, %vm2399_vm12 }
 0x4a1   : > { %16361 = vst [vmem:[#allocation361_spill] sm:$0xff] %v12522_v60  ;;  %v12530_v55 = vpop.eup %7233  ;;  %v12533_v32 = vmul.f32 %v12478_v58, %v3295_v35  ;;  %v3309_v51 = vmul.f32 %v12513_v23, %v12466_v25  ;;  %v4112_v27 = vadd.f32 -0.28449672, %v3984_v5  ;;  %v4687_v30 = vsub.f32 0.0, %v1231_v45  ;;  %v16380_v25 = vld [vmem:[#allocation374_spill] sm:$0xff] }
 0x4a2   : > { %16365 = vst [vmem:[#allocation325_spill] sm:$0xff] %v12530_v55  ;;  %v5645_v31 = vsel %vm5389_vm8, %v5517_v54, %v5261_v52  ;;  %v5262_v62 = vsub.f32 1.0, %v5134_v10  ;;  %v5135_v9 = vmul.f32 %v16367_v29, %v4495_v46  ;;  %v12540_v16 = vadd.f32 1.0, %v1359_v19  ;;  %v16373_v46 = vld [vmem:[#allocation344_spill] sm:$0xff] }
 0x4a3   : > { %16366 = vst [vmem:[#allocation336_spill] sm:$0xff] %v12533_v32  ;;  %v12548_v35 = vpop.eup %7235  ;;  %v5773_v0 = vadd.f32 1.0, %v5645_v31  ;;  %v4240_v5 = vmul.f32 %v4112_v27, %v12470_v41  ;;  %v2401_v15 = vsel %vm12544_vm13, %v16363_v20, %v2397_v8  ;;  %v2402_v52 = vand.u32 2147483647, %v16355_v13  ;;  %v16374_v27 = vld [vmem:[#allocation339_spill] sm:$0xff]  ;;  %v16375_v32 = vld [vmem:[#allocation373_spill] sm:$0xff] }
 0x4a4   : > { %16370 = vst [vmem:[#allocation389_spill] sm:$0xff] %v12548_v35  ;;  %v5518_v29 = vsub.f32 0.0, %v5262_v62  ;;  %v5263_v19 = vsub.f32 1.0, %v5135_v9  ;;  %v12555_v54 = vadd.f32 1.0, %v1360_v40  ;;  %v12558_v10 = vmul.f32 0.70710677, %v12522_v60 }
 0x4a5   : > { %v5901_v55 = vmul.f32 %v5773_v0, %v16373_v46  ;;  %v4368_v58 = vadd.f32 0.2548296, %v4240_v5  ;;  %v4815_v35 = vmul.f32 %v4687_v30, %v1231_v45  ;;  %v4688_v31 = vsub.f32 0.0, %v12511_v48  ;;  %v624_v45 = vpop.f32.mrf.mxu1  ;;  %v16376_v30 = vld [vmem:[#allocation15_spill] sm:$0xff]  ;;  %v16377_v0 = vld [vmem:[#allocation382_spill] sm:$0xff] }
 0x4a6   : > { %16371 = vst [vmem:[#allocation377_spill] sm:$0xff] %v12555_v54  ;;  %vm5392_vm14 = vcmp.lt.f32.partialorder %v16374_v27, 0.0  ;;  %vm2413_vm15 = vweird.f32 %v16375_v32  ;;  %v5646_v20 = vsel %vm5390_vm10, %v5518_v29, %v5262_v62  ;;  %v5519_v8 = vsub.f32 0.0, %v5263_v19  ;;  %v16378_v29 = vld [vmem:[#allocation346_spill] sm:$0xff] }
 0x4a7   : > { %16372 = vst [vmem:[#allocation370_spill] sm:$0xff] %v12558_v10  ;;  %7237 = vrcp.f32 %v12540_v16  ;;  %v1233_v13 = vand.u32 2147483647, %v12558_v10  ;;  %v3310_v40 = vsub.f32 1.0, %v3309_v51  ;;  %6099 = vmatmul.f32.gmra.mxu0 %v5901_v55  ;;  %v5774_v9 = vadd.f32 1.0, %v5646_v20  ;;  %v16379_v51 = vld [vmem:[#allocation372_spill] sm:$0xff] }
 0x4a8   : > { %v4496_v37 = vmul.f32 %v4368_v58, %v12470_v41  ;;  %v2412_v5 = vadd.f32 %v16377_v0, %v16376_v30  ;;  %v5647_v46 = vsel %vm5391_vm11, %v5519_v8, %v5263_v19  ;;  %v3334_v42 = vand.u32 2147483648, %v12540_v16  ;;  %v16383_v8 = vld [vmem:[#allocation355_spill] sm:$0xff] }
 0x4a9   : > { %7239 = vrcp.f32 %v12555_v54  ;;  %v1361_v62 = vmul.f32 0.3275911, %v1233_v13  ;;  %v5902_v60 = vmul.f32 %v5774_v9, %v16378_v29  ;;  %v5775_v10 = vadd.f32 1.0, %v5647_v46  ;;  %v16384_v46 = vld [vmem:[#allocation375_spill] sm:$0xff] }
 0x4aa   : > { %v5136_v55 = vmul.f32 %v16379_v51, %v4496_v37  ;;  %v5065_v20 = vmul.f32 1.442695, %v4815_v35  ;;  %vm2428_vm0 = vweird.f32 %v16380_v25  ;;  %v4816_v41 = vmul.f32 %v4688_v31, %v12511_v48  ;;  %v16391_v51 = vld [vmem:[#allocation24_spill] sm:$0xff] }
 0x4ab   : > { %v12579_v58 = vadd.f32 1.0, %v1361_v62  ;;  %v12582_v50 = vadd.f32 %v624_v45, %v7654_v53  ;;  %vm2403_vm1 = vcmp.eq.f32.partialorder %v2402_v52, 8.507059e+37  ;;  %v12585_v19 = vmul.f32 %v12513_v23, %v3310_v40  ;;  %6212 = vmatmul.f32.gmra.mxu1 %v5902_v60 }
 0x4ac   : > { %v5903_v9 = vmul.f32 %v5775_v10, %v16383_v8  ;;  %v5264_v30 = vsub.f32 1.0, %v5136_v55  ;;  %v12589_v37 = vsel %vm2403_vm1, %v16384_v46, %v2401_v15  ;;  %v12594_v48 = vmul.f32 0.5, %v12473_v44  ;;  %v16393_v46 = vld [vmem:[#allocation27_spill] sm:$0xff] }
 0x4ad   : > { %16381 = vst [vmem:[#allocation371_spill] sm:$0xff] %v12579_v58  ;;  %v12591_v35 = vpop.eup %7237  ;;  %v12596_v31 = vor.u32 1.1754944e-38, %v3334_v42  ;;  %v12599_v53 = vmul.f32 0.5, %v12476_v43  ;;  %7241 = vrcp.f32 %v12579_v58  ;;  %v3349_v52 = vand.u32 2147483648, %v12555_v54 }
 0x4ae   : > { %16382 = vst [vmem:[#allocation344_spill] sm:$0xff] %v12582_v50  ;;  %6325 = vmatmul.f32.gmra.mxu2 %v5903_v9  ;;  %v5520_v60 = vsub.f32 0.0, %v5264_v30  ;;  %7243 = vpow2.f32 %v5065_v20  ;;  %v12604_v15 = vmul.f32 0.70710677, %v12582_v50  ;;  %v5067_v40 = vmul.f32 1.442695, %v4816_v41 }
 0x4af   : > { %16385 = vst [vmem:[#allocation339_spill] sm:$0xff] %v12591_v35  ;;  %v12606_v10 = vpop.eup %7239  ;;  %v3473_v44 = vmul.f32 1.0614054, %v12589_v37  ;;  %vm2414_vm2 = vweird.f32 %v16377_v0  ;;  %v2417_v43 = vand.u32 2147483647, %v16375_v32  ;;  %v3324_v42 = vmul.f32 %v12591_v35, %v12540_v16  ;;  %v16392_v9 = vld [vmem:[#allocation376_spill] sm:$0xff] }
 0x4b0   : > { %16386 = vst [vmem:[#allocation373_spill] sm:$0xff] %v12594_v48  ;;  %v5648_v45 = vsel %vm5392_vm14, %v5520_v60, %v5264_v30  ;;  %v4689_v62 = vsub.f32 0.0, %v1233_v13  ;;  %v1234_v29 = vand.u32 2147483647, %v12604_v15  ;;  %vm2415_vm3 = vmor %vm2413_vm15, %vm2414_vm2  ;;  %vm2443_vm4 = vweird.f32 %v16391_v51  ;;  %v16394_v60 = vld [vmem:[#allocation384_spill] sm:$0xff]  ;;  %v16396_v32 = vld [vmem:[#allocation359_spill] sm:$0xff] }
 0x4b1   : > { %16387 = vst [vmem:[#allocation15_spill] sm:$0xff] %v12596_v31  ;;  %v5776_v55 = vadd.f32 1.0, %v5648_v45  ;;  %v3601_v20 = vadd.f32 -1.4531521, %v3473_v44  ;;  %v2416_v41 = vsel %vm2415_vm3, %v16377_v0, %v2412_v5  ;;  %vm2418_vm5 = vcmp.eq.f32.partialorder %v2417_v43, 8.507059e+37 }
 0x4b2   : > { %16388 = vst [vmem:[#allocation382_spill] sm:$0xff] %v12599_v53  ;;  %v3339_v27 = vmul.f32 %v12606_v10, %v12555_v54  ;;  %v1362_v8 = vmul.f32 0.3275911, %v1234_v29  ;;  %v12623_v30 = vsel %vm2418_vm5, %v16392_v9, %v2416_v41  ;;  %v2427_v50 = vadd.f32 %v16394_v60, %v16393_v46 }
 0x4b3   : > { %16389 = vst [vmem:[#allocation346_spill] sm:$0xff] %v12604_v15  ;;  %v12627_v15 = vpop.eup %7241  ;;  %v5904_v53 = vmul.f32 %v5776_v55, %v16396_v32  ;;  %v3729_v45 = vmul.f32 %v3601_v20, %v12589_v37  ;;  %v3474_v44 = vmul.f32 1.0614054, %v12623_v30  ;;  %vm2429_vm6 = vweird.f32 %v16394_v60 }
 0x4b4   : > { %16390 = vst [vmem:[#allocation372_spill] sm:$0xff] %v12606_v10  ;;  %v12633_v0 = vpop.eup %7243  ;;  %v12635_v5 = vor.u32 1.1754944e-38, %v3349_v52  ;;  %7245 = vpow2.f32 %v5067_v40  ;;  %v4817_v43 = vmul.f32 %v4689_v62, %v1233_v13  ;;  %vm12639_vm7 = vmor %vm2428_vm0, %vm2429_vm6  ;;  %v2432_v55 = vand.u32 2147483647, %v16380_v25  ;;  %v16402_v25 = vld [vmem:[#allocation47_spill] sm:$0xff] }
 0x4b5   : > { %16395 = vst [vmem:[#allocation374_spill] sm:$0xff] %v12627_v15  ;;  %6438 = vmatmul.f32.gmra.mxu3 %v5904_v53  ;;  %v12644_v20 = vadd.f32 1.0, %v1362_v8  ;;  %v3857_v9 = vadd.f32 1.4214138, %v3729_v45  ;;  %v3602_v46 = vadd.f32 -1.4531521, %v3474_v44  ;;  %v2431_v52 = vsel %vm12639_vm7, %v16394_v60, %v2427_v50 }
 0x4b6   : > { %16397 = vst [vmem:[#allocation355_spill] sm:$0xff] %v12633_v0  ;;  %v3325_v32 = vsub.f32 1.0, %v3324_v42  ;;  %v3340_v40 = vsub.f32 1.0, %v3339_v27  ;;  %v3354_v13 = vmul.f32 %v12627_v15, %v12579_v58  ;;  %v4690_v62 = vsub.f32 0.0, %v1234_v29  ;;  %v16403_v53 = vld [vmem:[#allocation44_spill] sm:$0xff] }
 0x4b7   : > { %16398 = vst [vmem:[#allocation375_spill] sm:$0xff] %v12635_v5  ;;  %v3985_v48 = vmul.f32 %v3857_v9, %v12589_v37  ;;  %v3730_v0 = vmul.f32 %v3602_v46, %v12623_v30  ;;  %vm2433_vm8 = vcmp.eq.f32.partialorder %v2432_v55, 8.507059e+37  ;;  %v2442_v8 = vadd.f32 %v16403_v53, %v16402_v25  ;;  %v16404_v5 = vld [vmem:[#allocation380_spill] sm:$0xff] }
 0x4b8   : > { %16401 = vst [vmem:[#allocation24_spill] sm:$0xff] %v12644_v20  ;;  %v3364_v45 = vand.u32 2147483648, %v12579_v58  ;;  %v5069_v44 = vmul.f32 1.442695, %v4817_v43  ;;  %v12657_v41 = vsel %vm2433_vm8, %v16404_v5, %v2431_v52  ;;  %vm2444_vm9 = vweird.f32 %v16403_v53  ;;  %v16406_v55 = vld [vmem:[#allocation16_spill] sm:$0xff]  ;;  %v16433_v58 = vld [vmem:[#allocation37_spill] sm:$0xff] }
 0x4b9   : > { %7247 = vrcp.f32 %v12644_v20  ;;  %v4113_v50 = vadd.f32 -0.28449672, %v3985_v48  ;;  %v3858_v42 = vadd.f32 1.4214138, %v3730_v0  ;;  %v3475_v27 = vmul.f32 1.0614054, %v12657_v41  ;;  %vm12670_vm11 = vmor %vm2443_vm4, %vm2444_vm9 }
 0x4ba   : > { %v12662_v60 = vpop.eup %7245  ;;  %vm2458_vm10 = vweird.f32 %v16406_v55  ;;  %v12666_v9 = vmul.f32 %v12591_v35, %v3325_v32  ;;  %v3355_v46 = vsub.f32 1.0, %v3354_v13  ;;  %v4818_v43 = vmul.f32 %v4690_v62, %v1234_v29 }
 0x4bb   : > { %16405 = vst [vmem:[#allocation376_spill] sm:$0xff] %v12662_v60  ;;  %v2447_v48 = vand.u32 2147483647, %v16391_v51  ;;  %v4241_v0 = vmul.f32 %v4113_v50, %v12589_v37  ;;  %v3986_v52 = vmul.f32 %v3858_v42, %v12623_v30  ;;  %v3603_v25 = vadd.f32 -1.4531521, %v3475_v27  ;;  %v737_v50 = vpop.f32.mrf.mxu2  ;;  %v850_v42 = vpop.f32.mrf.mxu3  ;;  %v16412_v27 = vld [vmem:[#allocation354_spill] sm:$0xff] }
 0x4bc   : > { %16407 = vst [vmem:[#allocation27_spill] sm:$0xff] %v12666_v9  ;;  %v2446_v32 = vsel %vm12670_vm11, %v16403_v53, %v2442_v8  ;;  %v12681_v13 = vmul.f32 %v12606_v10, %v3340_v40  ;;  %v12683_v29 = vor.u32 1.1754944e-38, %v3364_v45  ;;  %7249 = vpow2.f32 %v5069_v44  ;;  %v16415_v40 = vld [vmem:[#allocation17_spill] sm:$0xff] }
 0x4bd   : > { %v3379_v62 = vand.u32 2147483648, %v12644_v20  ;;  %v4369_v60 = vadd.f32 0.2548296, %v4241_v0  ;;  %v4114_v31 = vadd.f32 -0.28449672, %v3986_v52  ;;  %v3731_v51 = vmul.f32 %v3603_v25, %v12657_v41 }
 0x4be   : > { %16410 = vst [vmem:[#allocation384_spill] sm:$0xff] %v12681_v13  ;;  %vm2448_vm12 = vcmp.eq.f32.partialorder %v2447_v48, 8.507059e+37  ;;  %vm5393_vm13 = vcmp.lt.f32.partialorder %v16412_v27, 0.0  ;;  %v12689_v5 = vmul.f32 %v12627_v15, %v3355_v46  ;;  %v12691_v53 = vmul.f32 1.442695, %v4818_v43  ;;  %v16432_v13 = vld [vmem:[#allocation39_spill] sm:$0xff] }
 0x4bf   : > { %16411 = vst [vmem:[#allocation359_spill] sm:$0xff] %v12683_v29  ;;  %v12694_v8 = vsel %vm2448_vm12, %v16415_v40, %v2446_v32  ;;  %v12697_v45 = vadd.f32 %v737_v50, %v7662_v57  ;;  %v12699_v44 = vpop.eup %7247  ;;  %v4497_v0 = vmul.f32 %v4369_v60, %v12589_v37  ;;  %v4242_v48 = vmul.f32 %v4114_v31, %v12623_v30  ;;  %v16420_v32 = vld [vmem:[#allocation20_spill] sm:$0xff]  ;;  %v16421_v40 = vld [vmem:[#allocation21_spill] sm:$0xff]  ;;  %v16423_v37 = vld [vmem:[#allocation378_spill] sm:$0xff] }
 0x4c0   : > { %16413 = vst [vmem:[#allocation47_spill] sm:$0xff] %v12689_v5  ;;  %v3859_v52 = vadd.f32 1.4214138, %v3731_v51  ;;  %v12704_v25 = vadd.f32 %v850_v42, %v7664_v59  ;;  %v3476_v46 = vmul.f32 1.0614054, %v12694_v8  ;;  %vm2459_vm14 = vweird.f32 %v16421_v40  ;;  %v16425_v50 = vld [vmem:[#allocation357_spill] sm:$0xff] }
 0x4c1   : > { %16414 = vst [vmem:[#allocation44_spill] sm:$0xff] %v12691_v53  ;;  %v12708_v43 = vmul.f32 0.70710677, %v12697_v45  ;;  %v12712_v53 = vadd.f32 %v16421_v40, %v16420_v32  ;;  %v12715_v57 = vor.u32 1.1754944e-38, %v3379_v62  ;;  %v5137_v60 = vmul.f32 %v16423_v37, %v4497_v0  ;;  %vm12734_vm0 = vmor %vm2458_vm10, %vm2459_vm14 }
 0x4c2   : > { %16416 = vst [vmem:[#allocation380_spill] sm:$0xff] %v12697_v45  ;;  %v4370_v31 = vadd.f32 0.2548296, %v4242_v48  ;;  %v3987_v51 = vmul.f32 %v3859_v52, %v12657_v41  ;;  %v12719_v59 = vpop.eup %7249  ;;  %vm5394_vm15 = vcmp.lt.f32.partialorder %v16425_v50, 0.0  ;;  %v3369_v42 = vmul.f32 %v12699_v44, %v12644_v20 }
 0x4c3   : > { %16417 = vst [vmem:[#allocation16_spill] sm:$0xff] %v12699_v44  ;;  %v3604_v45 = vadd.f32 -1.4531521, %v3476_v46  ;;  %v1235_v32 = vand.u32 2147483647, %v12708_v43  ;;  %v5265_v15 = vsub.f32 1.0, %v5137_v60  ;;  %v2461_v60 = vsel %vm12734_vm0, %v16421_v40, %v12712_v53 }
 0x4c4   : > { %16418 = vst [vmem:[#allocation354_spill] sm:$0xff] %v12704_v25  ;;  %v2462_v29 = vand.u32 2147483647, %v16406_v55  ;;  %v4498_v62 = vmul.f32 %v4370_v31, %v12623_v30  ;;  %v12728_v0 = vmul.f32 0.70710677, %v12704_v25  ;;  %v16429_v31 = vld [vmem:[#allocation31_spill] sm:$0xff]  ;;  %v12758_v35 = vadd.f32 %v16433_v58, %v16432_v13 }
 0x4c5   : > { %16419 = vst [vmem:[#allocation17_spill] sm:$0xff] %v12708_v43  ;;  %v3732_v52 = vmul.f32 %v3604_v45, %v12694_v8  ;;  %v1363_v46 = vmul.f32 0.3275911, %v1235_v32  ;;  %v4691_v37 = vsub.f32 0.0, %v1235_v32  ;;  %v12742_v30 = vld [vmem:[%s14512_s4] ss:$0 sm:$0xff]  ;;  %vm2473_vm1 = vweird.f32 %v16429_v31 }
 0x4c6   : > { %16422 = vst [vmem:[#allocation20_spill] sm:$0xff] %v12715_v57  ;;  %v4115_v57 = vadd.f32 -0.28449672, %v3987_v51  ;;  %v5521_v55 = vsub.f32 0.0, %v5265_v15  ;;  %v16430_v51 = vld [vmem:[#allocation387_spill] sm:$0xff]  ;;  %v3370_v20 = vsub.f32 1.0, %v3369_v42  ;;  %vm2474_vm4 = vweird.f32 %v16433_v58 }
 0x4c7   : > { %16424 = vst [vmem:[#allocation21_spill] sm:$0xff] %v12719_v59  ;;  %v5138_v25 = vmul.f32 %v16430_v51, %v4498_v62  ;;  %v12752_v45 = vand.u32 2147483647, %v12728_v0  ;;  %v6058_v59 = vpop.f32.mrf.mxu0  ;;  %v3860_v5 = vadd.f32 1.4214138, %v3732_v52  ;;  %v12754_v10 = vadd.f32 1.0, %v1363_v46  ;;  %vm12800_vm7 = vmor %vm2473_vm1, %vm2474_vm4 }
 0x4c8   : > { %16426 = vst [vmem:[#allocation378_spill] sm:$0xff] %v12728_v0  ;;  %v4243_v43 = vmul.f32 %v4115_v57, %v12657_v41  ;;  %v5649_v53 = vsel %vm5393_vm13, %v5521_v55, %v5265_v15  ;;  %v16434_v57 = vld [vmem:[#allocation363_spill] sm:$0xff]  ;;  %v6059_v42 = vadd.f32 %v12742_v30, %v6058_v59  ;;  %v16435_v52 = vld [vmem:[#allocation46_spill] sm:$0xff]  ;;  %v4819_v27 = vmul.f32 %v4691_v37, %v1235_v32  ;;  %v16436_v15 = vld [vmem:[#allocation360_spill] sm:$0xff] }
 0x4c9   : > { %16431 = vst [vmem:[#allocation357_spill] sm:$0xff] %v12752_v45  ;;  %v5266_v40 = vsub.f32 1.0, %v5138_v25  ;;  %v1364_v62 = vmul.f32 0.3275911, %v12752_v45  ;;  %vm5395_vm2 = vcmp.lt.f32.partialorder %v16434_v57, 0.0  ;;  %v5777_v51 = vadd.f32 1.0, %v5649_v53 }
 0x4ca   : > { %v4371_v48 = vadd.f32 0.2548296, %v4243_v43  ;;  %v3988_v0 = vmul.f32 %v3860_v5, %v12694_v8  ;;  %7251 = vrcp.f32 %v12754_v10  ;;  %vm2488_vm3 = vweird.f32 %v16435_v52  ;;  %v16439_v53 = vld [vmem:[#allocation388_spill] sm:$0xff] }
 0x4cb   : > { %v5522_v13 = vsub.f32 0.0, %v5266_v40  ;;  %v5905_v25 = vmul.f32 %v5777_v51, %v16436_v15  ;;  %v12771_v55 = vadd.f32 1.0, %v1364_v62  ;;  %vm2463_vm5 = vcmp.eq.f32.partialorder %v2462_v29, 8.507059e+37  ;;  %v16440_v29 = vld [vmem:[#allocation70_spill] sm:$0xff] }
 0x4cc   : > { %v4499_v46 = vmul.f32 %v4371_v48, %v12657_v41  ;;  %v4116_v43 = vadd.f32 -0.28449672, %v3988_v0  ;;  %v12774_v5 = vmul.f32 %v12699_v44, %v3370_v20  ;;  %v3394_v54 = vand.u32 2147483648, %v12754_v10  ;;  %v6171_v41 = vpop.f32.mrf.mxu1  ;;  %v16497_v44 = vld [vmem:[#allocation33_spill] sm:$0xff] }
 0x4cd   : > { %16437 = vst [vmem:[#allocation31_spill] sm:$0xff] %v12771_v55  ;;  %v5650_v59 = vsel %vm5394_vm15, %v5522_v13, %v5266_v40  ;;  %6102 = vmatmul.f32.gmra.mxu0 %v5905_v25  ;;  %7253 = vrcp.f32 %v12771_v55  ;;  %v12782_v0 = vadd.f32 %v6171_v41, %v6059_v42  ;;  %vm2503_vm6 = vweird.f32 %v16440_v29  ;;  %v16442_v40 = vld [vmem:[#allocation49_spill] sm:$0xff] }
 0x4ce   : > { %16438 = vst [vmem:[#allocation387_spill] sm:$0xff] %v12774_v5  ;;  %v5139_v9 = vmul.f32 %v16439_v53, %v4499_v46  ;;  %v5778_v32 = vadd.f32 1.0, %v5650_v59  ;;  %v4244_v37 = vmul.f32 %v4116_v43, %v12694_v8  ;;  %v12785_v48 = vmul.f32 1.442695, %v4819_v27  ;;  %v16444_v13 = vld [vmem:[#allocation365_spill] sm:$0xff]  ;;  %v16447_v27 = vld [vmem:[#allocation379_spill] sm:$0xff] }
 0x4cf   : > { %v3409_v50 = vand.u32 2147483648, %v12771_v55  ;;  %v12789_v62 = vsel %vm2463_vm5, %v16442_v40, %v2461_v60  ;;  %vm5396_vm8 = vcmp.lt.f32.partialorder %v16447_v27, 0.0  ;;  %v12807_v59 = vor.u32 1.1754944e-38, %v3394_v54  ;;  %v16449_v40 = vld [vmem:[#allocation66_spill] sm:$0xff] }
 0x4d0   : > { %v5267_v20 = vsub.f32 1.0, %v5139_v9  ;;  %16441 = vst [vmem:[#allocation39_spill] sm:$0xff] %v12785_v48  ;;  %v12791_v51 = vpop.eup %7251  ;;  %v5906_v46 = vmul.f32 %v5778_v32, %v16444_v13  ;;  %v4372_v15 = vadd.f32 0.2548296, %v4244_v37  ;;  %v3477_v42 = vmul.f32 1.0614054, %v12789_v62 }
 0x4d1   : > { %16443 = vst [vmem:[#allocation37_spill] sm:$0xff] %v12791_v51  ;;  %v3384_v43 = vmul.f32 %v12791_v51, %v12754_v10  ;;  %v2476_v53 = vsel %vm12800_vm7, %v16433_v58, %v12758_v35  ;;  %v2477_v37 = vand.u32 2147483647, %v16429_v31  ;;  %v16450_v13 = vld [vmem:[#allocation45_spill] sm:$0xff]  ;;  %v12819_v54 = vor.u32 1.1754944e-38, %v3409_v50  ;;  %v16453_v35 = vld [vmem:[#allocation32_spill] sm:$0xff] }
 0x4d2   : > { %v5523_v60 = vsub.f32 0.0, %v5267_v20  ;;  %16448 = vst [vmem:[#allocation363_spill] sm:$0xff] %v12807_v59  ;;  %6215 = vmatmul.f32.gmra.mxu1 %v5906_v46  ;;  %v4500_v41 = vmul.f32 %v4372_v15, %v12694_v8  ;;  %v3605_v32 = vadd.f32 -1.4531521, %v3477_v42  ;;  %v2487_v25 = vadd.f32 %v16450_v13, %v16449_v40  ;;  %v16457_v50 = vld [vmem:[#allocation18_spill] sm:$0xff]  ;;  %v16458_v42 = vld [vmem:[#allocation48_spill] sm:$0xff] }
 0x4d3   : > { %v3385_v45 = vsub.f32 1.0, %v3384_v43  ;;  %16451 = vst [vmem:[#allocation46_spill] sm:$0xff] %v12819_v54  ;;  %vm2489_vm9 = vweird.f32 %v16450_v13  ;;  %v12822_v59 = vpop.eup %7253  ;;  %vm2478_vm10 = vcmp.eq.f32.partialorder %v2477_v37, 8.507059e+37  ;;  %vm2518_vm12 = vweird.f32 %v16458_v42  ;;  %v16459_v9 = vld [vmem:[#allocation366_spill] sm:$0xff]  ;;  %v16460_v40 = vld [vmem:[#allocation57_spill] sm:$0xff] }
 0x4d4   : > { %v5651_v48 = vsel %vm5395_vm2, %v5523_v60, %v5267_v20  ;;  %16452 = vst [vmem:[#allocation360_spill] sm:$0xff] %v12822_v59  ;;  %v5140_v46 = vmul.f32 %v16453_v35, %v4500_v41  ;;  %v3733_v8 = vmul.f32 %v3605_v32, %v12789_v62  ;;  %vm12828_vm11 = vmor %vm2488_vm3, %vm2489_vm9  ;;  %v3399_v20 = vmul.f32 %v12822_v59, %v12771_v55  ;;  %v16461_v35 = vld [vmem:[#allocation23_spill] sm:$0xff] }
 0x4d5   : > { %v5779_v58 = vadd.f32 1.0, %v5651_v48  ;;  %v12833_v57 = vmul.f32 %v12791_v51, %v3385_v45  ;;  %v12838_v15 = vsel %vm2478_vm10, %v16457_v50, %v2476_v53  ;;  %v2491_v48 = vsel %vm12828_vm11, %v16450_v13, %v2487_v25  ;;  %v16462_v53 = vld [vmem:[#allocation71_spill] sm:$0xff]  ;;  %v16467_v50 = vld [vmem:[#allocation60_spill] sm:$0xff] }
 0x4d6   : > { %v5268_v43 = vsub.f32 1.0, %v5140_v46  ;;  %v3861_v41 = vadd.f32 1.4214138, %v3733_v8  ;;  %v3478_v32 = vmul.f32 1.0614054, %v12838_v15  ;;  %v3400_v45 = vsub.f32 1.0, %v3399_v20 }
 0x4d7   : > { %16456 = vst [vmem:[#allocation388_spill] sm:$0xff] %v12833_v57  ;;  %v5907_v60 = vmul.f32 %v5779_v58, %v16459_v9  ;;  %v2492_v37 = vand.u32 2147483647, %v16435_v52  ;;  %v2502_v54 = vadd.f32 %v16461_v35, %v16460_v40  ;;  %vm2504_vm13 = vweird.f32 %v16461_v35  ;;  %v16466_v20 = vld [vmem:[#allocation38_spill] sm:$0xff]  ;;  %v16468_v40 = vld [vmem:[#allocation19_spill] sm:$0xff] }
 0x4d8   : > { %vm2533_vm14 = vweird.f32 %v16462_v53  ;;  %v5524_v25 = vsub.f32 0.0, %v5268_v43  ;;  %v3989_v13 = vmul.f32 %v3861_v41, %v12789_v62  ;;  %v3606_v31 = vadd.f32 -1.4531521, %v3478_v32  ;;  %vm12854_vm15 = vmor %vm2503_vm6, %vm2504_vm13 }
 0x4d9   : > { %6328 = vmatmul.f32.gmra.mxu2 %v5907_v60  ;;  %v2507_v52 = vand.u32 2147483647, %v16440_v29  ;;  %v12860_v46 = vmul.f32 %v12822_v59, %v3400_v45  ;;  %vm2493_vm0 = vcmp.eq.f32.partialorder %v2492_v37, 8.507059e+37  ;;  %v2506_v8 = vsel %vm12854_vm15, %v16461_v35, %v2502_v54  ;;  %v6284_v29 = vpop.f32.mrf.mxu2  ;;  %v6061_v54 = vpop.f32.mrf.mxu0  ;;  %v16469_v59 = vld [vmem:[#allocation56_spill] sm:$0xff] }
 0x4da   : > { %v2517_v9 = vadd.f32 %v16467_v50, %v16466_v20  ;;  %v5652_v60 = vsel %vm5396_vm8, %v5524_v25, %v5268_v43  ;;  %v4117_v41 = vadd.f32 -0.28449672, %v3989_v13  ;;  %v3734_v32 = vmul.f32 %v3606_v31, %v12838_v15  ;;  %v6397_v43 = vpop.f32.mrf.mxu3 }
 0x4db   : > { %16465 = vst [vmem:[#allocation70_spill] sm:$0xff] %v12860_v46  ;;  %v12871_v55 = vsel %vm2493_vm0, %v16468_v40, %v2491_v48  ;;  %v5780_v45 = vadd.f32 1.0, %v5652_v60  ;;  %vm2508_vm1 = vcmp.eq.f32.partialorder %v2507_v52, 8.507059e+37  ;;  %v6285_v58 = vadd.f32 %v6284_v29, %v12782_v0  ;;  %v16470_v48 = vld [vmem:[#allocation369_spill] sm:$0xff]  ;;  %v6174_v52 = vpop.f32.mrf.mxu1 }
 0x4dc   : > { %v3479_v37 = vmul.f32 1.0614054, %v12871_v55  ;;  %v4245_v35 = vmul.f32 %v4117_v41, %v12789_v62  ;;  %v3862_v20 = vadd.f32 1.4214138, %v3734_v32  ;;  %v12877_v27 = vsel %vm2508_vm1, %v16469_v59, %v2506_v8  ;;  %v16471_v46 = vld [vmem:[#allocation61_spill] sm:$0xff] }
 0x4dd   : > { %v6062_v25 = vadd.f32 %v12742_v30, %v6061_v54  ;;  %v5908_v13 = vmul.f32 %v5780_v45, %v16470_v48  ;;  %v3480_v60 = vmul.f32 1.0614054, %v12877_v27  ;;  %v6398_v40 = vadd.f32 %v6397_v43, %v6285_v58  ;;  %v16472_v59 = vld [vmem:[#allocation381_spill] sm:$0xff]  ;;  %v16474_v58 = vld [vmem:[#allocation92_spill] sm:$0xff] }
 0x4de   : > { %v3607_v31 = vadd.f32 -1.4531521, %v3479_v37  ;;  %vm2548_vm2 = vweird.f32 %v16471_v46  ;;  %v4373_v0 = vadd.f32 0.2548296, %v4245_v35  ;;  %v3990_v41 = vmul.f32 %v3862_v20, %v12838_v15  ;;  %v16473_v37 = vld [vmem:[#allocation28_spill] sm:$0xff] }
 0x4df   : > { %v12884_v32 = vadd.f32 %v6174_v52, %v6062_v25  ;;  %vm2519_vm3 = vweird.f32 %v16467_v50  ;;  %vm5397_vm4 = vcmp.lt.f32.partialorder %v16472_v59, 0.0  ;;  %6441 = vmatmul.f32.gmra.mxu3 %v5908_v13  ;;  %v3608_v29 = vadd.f32 -1.4531521, %v3480_v60  ;;  %6493 = vst [vmem:[%s12891_s28] sm:$0xff] %v6398_v40  ;;  %v16476_v40 = vld [vmem:[#allocation30_spill] sm:$0xff]  ;;  %v16485_v59 = vld [vmem:[#allocation59_spill] sm:$0xff] }
 0x4e0   : > { %v3735_v8 = vmul.f32 %v3607_v31, %v12871_v55  ;;  %vm2520_vm5 = vmor %vm2518_vm12, %vm2519_vm3  ;;  %v2522_v45 = vand.u32 2147483647, %v16458_v42  ;;  %v2532_v54 = vadd.f32 %v16474_v58, %v16473_v37  ;;  %v4501_v35 = vmul.f32 %v4373_v0, %v12789_v62  ;;  %v16475_v42 = vld [vmem:[#allocation54_spill] sm:$0xff]  ;;  %v16479_v37 = vld [vmem:[#allocation40_spill] sm:$0xff] }
 0x4e1   : > { %v4118_v20 = vadd.f32 -0.28449672, %v3990_v41  ;;  %v2521_v43 = vsel %vm2520_vm5, %v16467_v50, %v2517_v9  ;;  %vm2534_vm6 = vweird.f32 %v16474_v58  ;;  %v3736_v48 = vmul.f32 %v3608_v29, %v12877_v27  ;;  %v16477_v41 = vld [vmem:[#allocation41_spill] sm:$0xff] }
 0x4e2   : > { %v3863_v25 = vadd.f32 1.4214138, %v3735_v8  ;;  %vm2523_vm7 = vcmp.eq.f32.partialorder %v2522_v45, 8.507059e+37  ;;  %vm2535_vm8 = vmor %vm2533_vm14, %vm2534_vm6  ;;  %v2537_v13 = vand.u32 2147483647, %v16462_v53  ;;  %v5141_v31 = vmul.f32 %v16475_v42, %v4501_v35  ;;  %v16478_v53 = vld [vmem:[#allocation55_spill] sm:$0xff] }
 0x4e3   : > { %v4246_v60 = vmul.f32 %v4118_v20, %v12838_v15  ;;  %v12909_v62 = vsel %vm2523_vm7, %v16476_v40, %v2521_v43  ;;  %v2536_v50 = vsel %vm2535_vm8, %v16474_v58, %v2532_v54  ;;  %v3864_v52 = vadd.f32 1.4214138, %v3736_v48  ;;  %v16480_v35 = vld [vmem:[#allocation77_spill] sm:$0xff]  ;;  %v16481_v43 = vld [vmem:[#allocation386_spill] sm:$0xff] }
 0x4e4   : > { %v3991_v9 = vmul.f32 %v3863_v25, %v12871_v55  ;;  %v3481_v0 = vmul.f32 1.0614054, %v12909_v62  ;;  %vm2538_vm9 = vcmp.eq.f32.partialorder %v2537_v13, 8.507059e+37  ;;  %vm2563_vm10 = vweird.f32 %v16477_v41 }
 0x4e5   : > { %v5269_v8 = vsub.f32 1.0, %v5141_v31  ;;  %v4374_v29 = vadd.f32 0.2548296, %v4246_v60  ;;  %v12916_v45 = vsel %vm2538_vm9, %v16478_v53, %v2536_v50  ;;  %v2547_v20 = vadd.f32 %v16480_v35, %v16479_v37 }
 0x4e6   : > { %vm5398_vm11 = vcmp.lt.f32.partialorder %v16481_v43, 0.0  ;;  %v4119_v42 = vadd.f32 -0.28449672, %v3991_v9  ;;  %v3992_v58 = vmul.f32 %v3864_v52, %v12877_v27  ;;  %v3609_v54 = vadd.f32 -1.4531521, %v3481_v0  ;;  %v16482_v52 = vld [vmem:[#allocation50_spill] sm:$0xff]  ;;  %v6287_v43 = vpop.f32.mrf.mxu2 }
 0x4e7   : > { %v3482_v25 = vmul.f32 1.0614054, %v12916_v45  ;;  %v5525_v48 = vsub.f32 0.0, %v5269_v8  ;;  %v4502_v13 = vmul.f32 %v4374_v29, %v12838_v15  ;;  %vm2549_vm12 = vweird.f32 %v16480_v35 }
 0x4e8   : > { %v2552_v31 = vand.u32 2147483647, %v16471_v46  ;;  %v4247_v60 = vmul.f32 %v4119_v42, %v12871_v55  ;;  %v4120_v40 = vadd.f32 -0.28449672, %v3992_v58  ;;  %v3737_v50 = vmul.f32 %v3609_v54, %v12909_v62  ;;  %vm2550_vm13 = vmor %vm2548_vm2, %vm2549_vm12  ;;  %v16483_v58 = vld [vmem:[#allocation29_spill] sm:$0xff]  ;;  %v16484_v46 = vld [vmem:[#allocation80_spill] sm:$0xff] }
 0x4e9   : > { %v3610_v53 = vadd.f32 -1.4531521, %v3482_v25  ;;  %v5653_v9 = vsel %vm5397_vm4, %v5525_v48, %v5269_v8  ;;  %v5142_v0 = vmul.f32 %v16482_v52, %v4502_v13  ;;  %v2551_v15 = vsel %vm2550_vm13, %v16480_v35, %v2547_v20  ;;  %v16486_v8 = vld [vmem:[#allocation85_spill] sm:$0xff]  ;;  %v16487_v13 = vld [vmem:[#allocation383_spill] sm:$0xff] }
 0x4ea   : > { %vm2553_vm14 = vcmp.eq.f32.partialorder %v2552_v31, 8.507059e+37  ;;  %v5781_v29 = vadd.f32 1.0, %v5653_v9  ;;  %v4375_v37 = vadd.f32 0.2548296, %v4247_v60  ;;  %v4248_v51 = vmul.f32 %v4120_v40, %v12877_v27  ;;  %v16488_v60 = vld [vmem:[#allocation34_spill] sm:$0xff] }
 0x4eb   : > { %v3865_v42 = vadd.f32 1.4214138, %v3737_v50  ;;  %vm5399_vm15 = vcmp.lt.f32.partialorder %v16483_v58, 0.0  ;;  %v5270_v54 = vsub.f32 1.0, %v5142_v0  ;;  %v3738_v25 = vmul.f32 %v3610_v53, %v12916_v45  ;;  %v16489_v53 = vld [vmem:[#allocation63_spill] sm:$0xff] }
 0x4ec   : > { %v12938_v57 = vsel %vm2553_vm14, %v16484_v46, %v2551_v15  ;;  %v2562_v48 = vadd.f32 %v16486_v8, %v16485_v59  ;;  %v5909_v52 = vmul.f32 %v5781_v29, %v16487_v13  ;;  %v4503_v35 = vmul.f32 %v4375_v37, %v12871_v55 }
 0x4ed   : > { %v4376_v20 = vadd.f32 0.2548296, %v4248_v51  ;;  %v3993_v31 = vmul.f32 %v3865_v42, %v12909_v62  ;;  %vm5400_vm0 = vcmp.lt.f32.partialorder %v16488_v60, 0.0  ;;  %v5526_v40 = vsub.f32 0.0, %v5270_v54 }
 0x4ee   : > { %v3866_v50 = vadd.f32 1.4214138, %v3738_v25  ;;  %v3483_v9 = vmul.f32 1.0614054, %v12938_v57  ;;  %vm2564_vm1 = vweird.f32 %v16486_v8  ;;  %6105 = vmatmul.f32.gmra.mxu0 %v5909_v52  ;;  %v5143_v0 = vmul.f32 %v16489_v53, %v4503_v35  ;;  %v16493_v52 = vld [vmem:[#allocation52_spill] sm:$0xff] }
 0x4ef   : > { %v4504_v15 = vmul.f32 %v4376_v20, %v12877_v27  ;;  %v4121_v46 = vadd.f32 -0.28449672, %v3993_v31  ;;  %vm12952_vm2 = vmor %vm2563_vm10, %vm2564_vm1  ;;  %v2567_v51 = vand.u32 2147483647, %v16477_v41  ;;  %v5654_v29 = vsel %vm5398_vm11, %v5526_v40, %v5270_v54  ;;  %v16492_v27 = vld [vmem:[#allocation36_spill] sm:$0xff]  ;;  %v16494_v54 = vld [vmem:[#allocation94_spill] sm:$0xff] }
 0x4f0   : > { %v3994_v37 = vmul.f32 %v3866_v50, %v12916_v45  ;;  %v3611_v42 = vadd.f32 -1.4531521, %v3483_v9  ;;  %v2566_v25 = vsel %vm12952_vm2, %v16486_v8, %v2562_v48  ;;  %vm2578_vm3 = vweird.f32 %v16492_v27  ;;  %v16495_v40 = vld [vmem:[#allocation42_spill] sm:$0xff]  ;;  %v16496_v9 = vld [vmem:[#allocation385_spill] sm:$0xff] }
 0x4f1   : > { %v5782_v59 = vadd.f32 1.0, %v5654_v29  ;;  %v5271_v13 = vsub.f32 1.0, %v5143_v0  ;;  %v5144_v35 = vmul.f32 %v16493_v52, %v4504_v15  ;;  %v4249_v20 = vmul.f32 %v4121_v46, %v12909_v62  ;;  %v16498_v29 = vld [vmem:[#allocation392_spill] sm:$0xff] }
 0x4f2   : > { %v4122_v31 = vadd.f32 -0.28449672, %v3994_v37  ;;  %v3739_v41 = vmul.f32 %v3611_v42, %v12938_v57  ;;  %vm2568_vm4 = vcmp.eq.f32.partialorder %v2567_v51, 8.507059e+37  ;;  %v2577_v50 = vadd.f32 %v16495_v40, %v16494_v54  ;;  %v6064_v51 = vpop.f32.mrf.mxu0  ;;  %v16499_v42 = vld [vmem:[#allocation391_spill] sm:$0xff] }
 0x4f3   : > { %v5910_v53 = vmul.f32 %v5782_v59, %v16496_v9  ;;  %v5527_v55 = vsub.f32 0.0, %v5271_v13  ;;  %v5272_v8 = vsub.f32 1.0, %v5144_v35  ;;  %v4377_v48 = vadd.f32 0.2548296, %v4249_v20 }
 0x4f4   : > { %vm5401_vm5 = vcmp.lt.f32.partialorder %v16497_v44, 0.0  ;;  %v4250_v0 = vmul.f32 %v4122_v31, %v12916_v45  ;;  %v3867_v15 = vadd.f32 1.4214138, %v3739_v41  ;;  %v12973_v46 = vsel %vm2568_vm4, %v16498_v29, %v2566_v25  ;;  %v6400_v31 = vpop.f32.mrf.mxu3 }
 0x4f5   : > { %v6288_v37 = vadd.f32 %v6287_v43, %v12884_v32  ;;  %vm2593_vm6 = vweird.f32 %v16499_v42  ;;  %6218 = vmatmul.f32.gmra.mxu1 %v5910_v53  ;;  %v5655_v59 = vsel %vm5399_vm15, %v5527_v55, %v5271_v13  ;;  %v5528_v52 = vsub.f32 0.0, %v5272_v8  ;;  %v16500_v32 = vld [vmem:[#allocation51_spill] sm:$0xff]  ;;  %v16501_v53 = vld [vmem:[#allocation69_spill] sm:$0xff] }
 0x4f6   : > { %v4505_v35 = vmul.f32 %v4377_v48, %v12909_v62  ;;  %v3484_v20 = vmul.f32 1.0614054, %v12973_v46  ;;  %v5783_v41 = vadd.f32 1.0, %v5655_v59  ;;  %v4378_v54 = vadd.f32 0.2548296, %v4250_v0  ;;  %v16502_v62 = vld [vmem:[#allocation390_spill] sm:$0xff]  ;;  %v6177_v0 = vpop.f32.mrf.mxu1 }
 0x4f7   : > { %v3995_v25 = vmul.f32 %v3867_v15, %v12938_v57  ;;  %v6401_v9 = vadd.f32 %v6400_v31, %v6288_v37  ;;  %vm5402_vm7 = vcmp.lt.f32.partialorder %v16500_v32, 0.0  ;;  %v5656_v43 = vsel %vm5400_vm0, %v5528_v52, %v5272_v8  ;;  %v16503_v15 = vld [vmem:[#allocation91_spill] sm:$0xff] }
 0x4f8   : > { %v5145_v58 = vmul.f32 %v16501_v53, %v4505_v35  ;;  %v3612_v13 = vadd.f32 -1.4531521, %v3484_v20  ;;  %v6065_v55 = vadd.f32 %v12742_v30, %v6064_v51  ;;  %v5911_v48 = vmul.f32 %v5783_v41, %v16502_v62  ;;  %v16504_v8 = vld [vmem:[#allocation35_spill] sm:$0xff]  ;;  %v16509_v53 = vld [vmem:[#allocation88_spill] sm:$0xff]  ;;  %v16511_v62 = vld [vmem:[#allocation90_spill] sm:$0xff] }
 0x4f9   : > { %v5784_v29 = vadd.f32 1.0, %v5656_v43  ;;  %v4506_v5 = vmul.f32 %v4378_v54, %v12916_v45  ;;  %v4123_v59 = vadd.f32 -0.28449672, %v3995_v25  ;;  %6494 = vst [vmem:[%s12891_s28 + $0x8] sm:$0xff] %v6401_v9  ;;  %vm2608_vm8 = vweird.f32 %v16503_v15  ;;  %v16505_v52 = vld [vmem:[#allocation75_spill] sm:$0xff]  ;;  %v16508_v43 = vld [vmem:[#allocation64_spill] sm:$0xff] }
 0x4fa   : > { %v5273_v37 = vsub.f32 1.0, %v5145_v58  ;;  %v3740_v31 = vmul.f32 %v3612_v13, %v12973_v46  ;;  %v12992_v60 = vadd.f32 %v6177_v0, %v6065_v55  ;;  %vm2579_vm9 = vweird.f32 %v16495_v40  ;;  %6331 = vmatmul.f32.gmra.mxu2 %v5911_v48  ;;  %v16510_v55 = vld [vmem:[#allocation26_spill] sm:$0xff] }
 0x4fb   : > { %v5912_v51 = vmul.f32 %v5784_v29, %v16504_v8  ;;  %v5146_v35 = vmul.f32 %v16505_v52, %v4506_v5  ;;  %v4251_v20 = vmul.f32 %v4123_v59, %v12938_v57  ;;  %vm13000_vm10 = vmor %vm2578_vm3, %vm2579_vm9  ;;  %v2582_v41 = vand.u32 2147483647, %v16492_v27  ;;  %v16512_v29 = vld [vmem:[#allocation43_spill] sm:$0xff]  ;;  %v16514_v52 = vld [vmem:[#allocation118_spill] sm:$0xff] }
 0x4fc   : > { %v5529_v54 = vsub.f32 0.0, %v5273_v37  ;;  %v3868_v25 = vadd.f32 1.4214138, %v3740_v31  ;;  %v2581_v9 = vsel %vm13000_vm10, %v16495_v40, %v2577_v50  ;;  %v2592_v58 = vadd.f32 %v16509_v53, %v16508_v43 }
 0x4fd   : > { %6444 = vmatmul.f32.gmra.mxu3 %v5912_v51  ;;  %v5274_v5 = vsub.f32 1.0, %v5146_v35  ;;  %v4379_v13 = vadd.f32 0.2548296, %v4251_v20  ;;  %vm2583_vm11 = vcmp.eq.f32.partialorder %v2582_v41, 8.507059e+37  ;;  %vm2594_vm12 = vweird.f32 %v16509_v53  ;;  %v16515_v20 = vld [vmem:[#allocation22_spill] sm:$0xff] }
 0x4fe   : > { %vm5403_vm13 = vcmp.lt.f32.partialorder %v16510_v55, 0.0  ;;  %vm2623_vm14 = vweird.f32 %v16511_v62  ;;  %v5657_v27 = vsel %vm5401_vm5, %v5529_v54, %v5273_v37  ;;  %v3996_v48 = vmul.f32 %v3868_v25, %v12973_v46  ;;  %vm2595_vm15 = vmor %vm2593_vm6, %vm2594_vm12  ;;  %v16513_v37 = vld [vmem:[#allocation58_spill] sm:$0xff] }
 0x4ff   : > { %v13017_v40 = vsel %vm2583_vm11, %v16512_v29, %v2581_v9  ;;  %v2597_v50 = vand.u32 2147483647, %v16499_v42  ;;  %v5785_v59 = vadd.f32 1.0, %v5657_v27  ;;  %v5530_v0 = vsub.f32 0.0, %v5274_v5  ;;  %v16516_v54 = vld [vmem:[#allocation74_spill] sm:$0xff]  ;;  %v16517_v42 = vld [vmem:[#allocation83_spill] sm:$0xff] }
 0x500   : > { %v4507_v31 = vmul.f32 %v4379_v13, %v12938_v57  ;;  %v3485_v8 = vmul.f32 1.0614054, %v13017_v40  ;;  %v4124_v51 = vadd.f32 -0.28449672, %v3996_v48  ;;  %v2596_v44 = vsel %vm2595_vm15, %v16509_v53, %v2592_v58 }
 0x501   : > { %vm2598_vm0 = vcmp.eq.f32.partialorder %v2597_v50, 8.507059e+37  ;;  %v2607_v35 = vadd.f32 %v16514_v52, %v16513_v37  ;;  %v5913_v45 = vmul.f32 %v5785_v59, %v16515_v20  ;;  %v5658_v41 = vsel %vm5402_vm7, %v5530_v0, %v5274_v5  ;;  %v16518_v5 = vld [vmem:[#allocation67_spill] sm:$0xff]  ;;  %v16519_v59 = vld [vmem:[#allocation62_spill] sm:$0xff]  ;;  %v16522_v20 = vld [vmem:[#allocation101_spill] sm:$0xff] }
 0x502   : > { %v5147_v25 = vmul.f32 %v16516_v54, %v4507_v31  ;;  %v3613_v57 = vadd.f32 -1.4531521, %v3485_v8  ;;  %v5786_v9 = vadd.f32 1.0, %v5658_v41  ;;  %v4252_v43 = vmul.f32 %v4124_v51, %v12973_v46  ;;  %v16520_v0 = vld [vmem:[#allocation126_spill] sm:$0xff]  ;;  %v16521_v8 = vld [vmem:[#allocation25_spill] sm:$0xff] }
 0x503   : > { %v13033_v13 = vsel %vm2598_vm0, %v16517_v42, %v2596_v44  ;;  %vm2609_vm1 = vweird.f32 %v16514_v52  ;;  %6108 = vmatmul.f32.gmra.mxu0 %v5913_v45  ;;  %v2612_v32 = vand.u32 2147483647, %v16503_v15  ;;  %v2622_v31 = vadd.f32 %v16520_v0, %v16519_v59  ;;  %v16523_v15 = vld [vmem:[#allocation107_spill] sm:$0xff] }
 0x504   : > { %v5275_v53 = vsub.f32 1.0, %v5147_v25  ;;  %v3741_v58 = vmul.f32 %v3613_v57, %v13017_v40  ;;  %v3486_v27 = vmul.f32 1.0614054, %v13033_v13  ;;  %vm2610_vm2 = vmor %vm2608_vm8, %vm2609_vm1  ;;  %v5914_v48 = vmul.f32 %v5786_v9, %v16518_v5  ;;  %v16525_v5 = vld [vmem:[#allocation398_spill] sm:$0xff] }
 0x505   : > { %v4380_v29 = vadd.f32 0.2548296, %v4252_v43  ;;  %v2611_v50 = vsel %vm2610_vm2, %v16514_v52, %v2607_v35  ;;  %vm5404_vm3 = vcmp.lt.f32.partialorder %v16521_v8, 0.0  ;;  %vm2613_vm4 = vcmp.eq.f32.partialorder %v2612_v32, 8.507059e+37  ;;  %v16524_v43 = vld [vmem:[#allocation394_spill] sm:$0xff] }
 0x506   : > { %v5531_v51 = vsub.f32 0.0, %v5275_v53  ;;  %v3869_v44 = vadd.f32 1.4214138, %v3741_v58  ;;  %v3614_v37 = vadd.f32 -1.4531521, %v3486_v27  ;;  %vm2638_vm5 = vweird.f32 %v16522_v20  ;;  %6221 = vmatmul.f32.gmra.mxu1 %v5914_v48  ;;  %v6067_v27 = vpop.f32.mrf.mxu0 }
 0x507   : > { %v4508_v45 = vmul.f32 %v4380_v29, %v12973_v46  ;;  %v13049_v41 = vsel %vm2613_vm4, %v16523_v15, %v2611_v50  ;;  %vm2624_vm6 = vweird.f32 %v16520_v0  ;;  %v2627_v52 = vand.u32 2147483647, %v16511_v62  ;;  %v6290_v46 = vpop.f32.mrf.mxu2  ;;  %v16526_v29 = vld [vmem:[#allocation116_spill] sm:$0xff] }
 0x508   : > { %v5659_v35 = vsel %vm5403_vm13, %v5531_v51, %v5275_v53  ;;  %v3997_v54 = vmul.f32 %v3869_v44, %v13017_v40  ;;  %v3742_v25 = vmul.f32 %v3614_v37, %v13033_v13  ;;  %v3487_v57 = vmul.f32 1.0614054, %v13049_v41  ;;  %vm2625_vm7 = vmor %vm2623_vm14, %vm2624_vm6  ;;  %v16527_v50 = vld [vmem:[#allocation72_spill] sm:$0xff] }
 0x509   : > { %v5787_v9 = vadd.f32 1.0, %v5659_v35  ;;  %v5148_v42 = vmul.f32 %v16524_v43, %v4508_v45  ;;  %v2626_v58 = vsel %vm2625_vm7, %v16520_v0, %v2622_v31  ;;  %vm2628_vm8 = vcmp.eq.f32.partialorder %v2627_v52, 8.507059e+37  ;;  %v6403_v45 = vpop.f32.mrf.mxu3 }
 0x50a   : > { %v4125_v32 = vadd.f32 -0.28449672, %v3997_v54  ;;  %v3870_v55 = vadd.f32 1.4214138, %v3742_v25  ;;  %v3615_v53 = vadd.f32 -1.4531521, %v3487_v57  ;;  %v13063_v48 = vsel %vm2628_vm8, %v16525_v5, %v2626_v58  ;;  %v6180_v25 = vpop.f32.mrf.mxu1 }
 0x50b   : > { %vm2653_vm9 = vweird.f32 %v16526_v29  ;;  %v5915_v59 = vmul.f32 %v5787_v9, %v16527_v50  ;;  %v5276_v62 = vsub.f32 1.0, %v5148_v42  ;;  %v3488_v51 = vmul.f32 1.0614054, %v13063_v48  ;;  %v16528_v57 = vld [vmem:[#allocation99_spill] sm:$0xff]  ;;  %v16529_v9 = vld [vmem:[#allocation397_spill] sm:$0xff] }
 0x50c   : > { %v6291_v44 = vadd.f32 %v6290_v46, %v12992_v60  ;;  %v4253_v37 = vmul.f32 %v4125_v32, %v13017_v40  ;;  %v3998_v0 = vmul.f32 %v3870_v55, %v13033_v13  ;;  %v3743_v31 = vmul.f32 %v3615_v53, %v13049_v41  ;;  %v16530_v32 = vld [vmem:[#allocation93_spill] sm:$0xff]  ;;  %v16531_v55 = vld [vmem:[#allocation120_spill] sm:$0xff] }
 0x50d   : > { %v6068_v15 = vadd.f32 %v12742_v30, %v6067_v27  ;;  %6334 = vmatmul.f32.gmra.mxu2 %v5915_v59  ;;  %v5532_v52 = vsub.f32 0.0, %v5276_v62  ;;  %v3616_v35 = vadd.f32 -1.4531521, %v3488_v51  ;;  %v2637_v43 = vadd.f32 %v16529_v9, %v16528_v57 }
 0x50e   : > { %v6404_v54 = vadd.f32 %v6403_v45, %v6291_v44  ;;  %v4381_v42 = vadd.f32 0.2548296, %v4253_v37  ;;  %v4126_v60 = vadd.f32 -0.28449672, %v3998_v0  ;;  %v3871_v46 = vadd.f32 1.4214138, %v3743_v31 }
 0x50f   : > { %v13075_v58 = vadd.f32 %v6180_v25, %v6068_v15  ;;  %vm5405_vm10 = vcmp.lt.f32.partialorder %v16530_v32, 0.0  ;;  %vm2668_vm11 = vweird.f32 %v16531_v55  ;;  %v5660_v27 = vsel %vm5404_vm3, %v5532_v52, %v5276_v62  ;;  %v16532_v62 = vld [vmem:[#allocation82_spill] sm:$0xff]  ;;  %v16533_v0 = vld [vmem:[#allocation399_spill] sm:$0xff]  ;;  %v16535_v52 = vld [vmem:[#allocation96_spill] sm:$0xff] }
 0x510   : > { %v3744_v53 = vmul.f32 %v3616_v35, %v13063_v48  ;;  %6495 = vst [vmem:[%s12891_s28 + $0x10] sm:$0xff] %v6404_v54  ;;  %vm2639_vm12 = vweird.f32 %v16529_v9  ;;  %v2642_v5 = vand.u32 2147483647, %v16522_v20  ;;  %v5788_v50 = vadd.f32 1.0, %v5660_v27  ;;  %v16534_v45 = vld [vmem:[#allocation98_spill] sm:$0xff]  ;;  %v16536_v25 = vld [vmem:[#allocation73_spill] sm:$0xff] }
 0x511   : > { %v4509_v59 = vmul.f32 %v4381_v42, %v13017_v40  ;;  %v4254_v51 = vmul.f32 %v4126_v60, %v13033_v13  ;;  %v3999_v44 = vmul.f32 %v3871_v46, %v13049_v41  ;;  %vm2640_vm13 = vmor %vm2638_vm5, %vm2639_vm12  ;;  %v2652_v31 = vadd.f32 %v16533_v0, %v16532_v62  ;;  %v16537_v42 = vld [vmem:[#allocation68_spill] sm:$0xff] }
 0x512   : > { %v3872_v37 = vadd.f32 1.4214138, %v3744_v53  ;;  %v2641_v8 = vsel %vm2640_vm13, %v16529_v9, %v2637_v43  ;;  %vm2643_vm14 = vcmp.eq.f32.partialorder %v2642_v5, 8.507059e+37  ;;  %v5916_v15 = vmul.f32 %v5788_v50, %v16534_v45  ;;  %v16538_v50 = vld [vmem:[#allocation133_spill] sm:$0xff] }
 0x513   : > { %v5149_v35 = vmul.f32 %v16535_v52, %v4509_v59  ;;  %v4382_v54 = vadd.f32 0.2548296, %v4254_v51  ;;  %v4127_v40 = vadd.f32 -0.28449672, %v3999_v44  ;;  %vm5406_vm15 = vcmp.lt.f32.partialorder %v16536_v25, 0.0  ;;  %v16539_v59 = vld [vmem:[#allocation112_spill] sm:$0xff] }
 0x514   : > { %v4000_v57 = vmul.f32 %v3872_v37, %v13063_v48  ;;  %v13098_v20 = vsel %vm2643_vm14, %v16537_v42, %v2641_v8  ;;  %vm2654_vm0 = vweird.f32 %v16533_v0  ;;  %v2657_v9 = vand.u32 2147483647, %v16526_v29  ;;  %6447 = vmatmul.f32.gmra.mxu3 %v5916_v15  ;;  %v16540_v44 = vld [vmem:[#allocation114_spill] sm:$0xff]  ;;  %v16541_v8 = vld [vmem:[#allocation65_spill] sm:$0xff]  ;;  %v16542_v15 = vld [vmem:[#allocation395_spill] sm:$0xff] }
 0x515   : > { %v5277_v43 = vsub.f32 1.0, %v5149_v35  ;;  %v4510_v60 = vmul.f32 %v4382_v54, %v13033_v13  ;;  %v4255_v46 = vmul.f32 %v4127_v40, %v13049_v41  ;;  %v3489_v27 = vmul.f32 1.0614054, %v13098_v20  ;;  %vm2655_vm1 = vmor %vm2653_vm9, %vm2654_vm0  ;;  %v16543_v29 = vld [vmem:[#allocation123_spill] sm:$0xff] }
 0x516   : > { %v4128_v53 = vadd.f32 -0.28449672, %v4000_v57  ;;  %v2656_v5 = vsel %vm2655_vm1, %v16533_v0, %v2652_v31  ;;  %vm2658_vm2 = vcmp.eq.f32.partialorder %v2657_v9, 8.507059e+37  ;;  %v2667_v51 = vadd.f32 %v16539_v59, %v16538_v50  ;;  %v16546_v50 = vld [vmem:[#allocation393_spill] sm:$0xff] }
 0x517   : > { %vm2683_vm3 = vweird.f32 %v16540_v44  ;;  %v5533_v37 = vsub.f32 0.0, %v5277_v43  ;;  %v5150_v62 = vmul.f32 %v16541_v8, %v4510_v60  ;;  %v4383_v13 = vadd.f32 0.2548296, %v4255_v46 }
 0x518   : > { %v3617_v45 = vadd.f32 -1.4531521, %v3489_v27  ;;  %vm5407_vm4 = vcmp.lt.f32.partialorder %v16542_v15, 0.0  ;;  %v4256_v52 = vmul.f32 %v4128_v53, %v13063_v48  ;;  %v13115_v35 = vsel %vm2658_vm2, %v16543_v29, %v2656_v5  ;;  %v16544_v27 = vld [vmem:[#allocation86_spill] sm:$0xff]  ;;  %v16545_v5 = vld [vmem:[#allocation104_spill] sm:$0xff]  ;;  %v16548_v29 = vld [vmem:[#allocation105_spill] sm:$0xff] }
 0x519   : > { %vm2669_vm5 = vweird.f32 %v16539_v59  ;;  %v2672_v0 = vand.u32 2147483647, %v16531_v55  ;;  %v5661_v31 = vsel %vm5405_vm10, %v5533_v37, %v5277_v43  ;;  %v5278_v54 = vsub.f32 1.0, %v5150_v62  ;;  %v16547_v55 = vld [vmem:[#allocation89_spill] sm:$0xff] }
 0x51a   : > { %v4511_v40 = vmul.f32 %v4383_v13, %v13049_v41  ;;  %v3745_v57 = vmul.f32 %v3617_v45, %v13098_v20  ;;  %vm2670_vm6 = vmor %vm2668_vm11, %vm2669_vm5  ;;  %v5789_v42 = vadd.f32 1.0, %v5661_v31  ;;  %v4384_v9 = vadd.f32 0.2548296, %v4256_v52 }
 0x51b   : > { %v3490_v60 = vmul.f32 1.0614054, %v13115_v35  ;;  %v2671_v46 = vsel %vm2670_vm6, %v16539_v59, %v2667_v51  ;;  %vm5408_vm7 = vcmp.lt.f32.partialorder %v16544_v27, 0.0  ;;  %v5534_v53 = vsub.f32 0.0, %v5278_v54  ;;  %v16560_v27 = vld [vmem:[#allocation140_spill] sm:$0xff] }
 0x51c   : > { %v5151_v32 = vmul.f32 %v16545_v5, %v4511_v40  ;;  %v3873_v43 = vadd.f32 1.4214138, %v3745_v57  ;;  %vm2673_vm8 = vcmp.eq.f32.partialorder %v2672_v0, 8.507059e+37  ;;  %v5917_v41 = vmul.f32 %v5789_v42, %v16546_v50  ;;  %v16549_v40 = vld [vmem:[#allocation144_spill] sm:$0xff]  ;;  %v16551_v42 = vld [vmem:[#allocation115_spill] sm:$0xff] }
 0x51d   : > { %v4512_v37 = vmul.f32 %v4384_v9, %v13063_v48  ;;  %v3618_v8 = vadd.f32 -1.4531521, %v3490_v60  ;;  %v13132_v62 = vsel %vm2673_vm8, %v16547_v55, %v2671_v46  ;;  %v5662_v13 = vsel %vm5406_vm15, %v5534_v53, %v5278_v54  ;;  %v16550_v48 = vld [vmem:[#allocation119_spill] sm:$0xff]  ;;  %v16552_v54 = vld [vmem:[#allocation84_spill] sm:$0xff]  ;;  %v6293_v55 = vpop.f32.mrf.mxu2 }
 0x51e   : > { %v5279_v45 = vsub.f32 1.0, %v5151_v32  ;;  %v4001_v59 = vmul.f32 %v3873_v43, %v13098_v20  ;;  %v3491_v51 = vmul.f32 1.0614054, %v13132_v62  ;;  %6111 = vmatmul.f32.gmra.mxu0 %v5917_v41  ;;  %v5790_v52 = vadd.f32 1.0, %v5662_v13  ;;  %v16555_v13 = vld [vmem:[#allocation149_spill] sm:$0xff] }
 0x51f   : > { %v5152_v0 = vmul.f32 %v16548_v29, %v4512_v37  ;;  %v3746_v31 = vmul.f32 %v3618_v8, %v13115_v35  ;;  %v2682_v57 = vadd.f32 %v16550_v48, %v16549_v40  ;;  %vm2698_vm9 = vweird.f32 %v16551_v42  ;;  %v16557_v40 = vld [vmem:[#allocation78_spill] sm:$0xff] }
 0x520   : > { %v5535_v9 = vsub.f32 0.0, %v5279_v45  ;;  %v4129_v60 = vadd.f32 -0.28449672, %v4001_v59  ;;  %v3619_v25 = vadd.f32 -1.4531521, %v3491_v51  ;;  %vm2684_vm10 = vweird.f32 %v16550_v48 }
 0x521   : > { %v5918_v46 = vmul.f32 %v5790_v52, %v16552_v54  ;;  %v5280_v53 = vsub.f32 1.0, %v5152_v0  ;;  %v3874_v5 = vadd.f32 1.4214138, %v3746_v31  ;;  %vm13147_vm11 = vmor %vm2683_vm3, %vm2684_vm10  ;;  %v2687_v43 = vand.u32 2147483647, %v16540_v44  ;;  %v6070_v31 = vpop.f32.mrf.mxu0  ;;  %v6406_v54 = vpop.f32.mrf.mxu3 }
 0x522   : > { %v5663_v50 = vsel %vm5407_vm4, %v5535_v9, %v5279_v45  ;;  %v4257_v41 = vmul.f32 %v4129_v60, %v13098_v20  ;;  %v3747_v37 = vmul.f32 %v3619_v25, %v13132_v62  ;;  %v2686_v8 = vsel %vm13147_vm11, %v16550_v48, %v2682_v57  ;;  %v16556_v45 = vld [vmem:[#allocation137_spill] sm:$0xff]  ;;  %v16558_v48 = vld [vmem:[#allocation100_spill] sm:$0xff] }
 0x523   : > { %vm2713_vm12 = vweird.f32 %v16555_v13  ;;  %6224 = vmatmul.f32.gmra.mxu1 %v5918_v46  ;;  %v5791_v59 = vadd.f32 1.0, %v5663_v50  ;;  %v5536_v51 = vsub.f32 0.0, %v5280_v53  ;;  %v4002_v52 = vmul.f32 %v3874_v5, %v13115_v35 }
 0x524   : > { %vm2688_vm13 = vcmp.eq.f32.partialorder %v2687_v43, 8.507059e+37  ;;  %v4385_v44 = vadd.f32 0.2548296, %v4257_v41  ;;  %v3875_v15 = vadd.f32 1.4214138, %v3747_v37  ;;  %v6294_v0 = vadd.f32 %v6293_v55, %v13075_v58  ;;  %v16559_v37 = vld [vmem:[#allocation131_spill] sm:$0xff] }
 0x525   : > { %v13162_v29 = vsel %vm2688_vm13, %v16556_v45, %v2686_v8  ;;  %vm5409_vm14 = vcmp.lt.f32.partialorder %v16557_v40, 0.0  ;;  %v5919_v57 = vmul.f32 %v5791_v59, %v16558_v48  ;;  %v5664_v9 = vsel %vm5408_vm7, %v5536_v51, %v5280_v53  ;;  %v16561_v8 = vld [vmem:[#allocation95_spill] sm:$0xff]  ;;  %v16562_v55 = vld [vmem:[#allocation106_spill] sm:$0xff] }
 0x526   : > { %v4130_v60 = vadd.f32 -0.28449672, %v4002_v52  ;;  %v3492_v25 = vmul.f32 1.0614054, %v13162_v29  ;;  %v5792_v46 = vadd.f32 1.0, %v5664_v9  ;;  %v4513_v5 = vmul.f32 %v4385_v44, %v13098_v20  ;;  %v16563_v51 = vld [vmem:[#allocation403_spill] sm:$0xff]  ;;  %v6183_v20 = vpop.f32.mrf.mxu1 }
 0x527   : > { %v4003_v32 = vmul.f32 %v3875_v15, %v13132_v62  ;;  %v6407_v43 = vadd.f32 %v6406_v54, %v6294_v0  ;;  %6337 = vmatmul.f32.gmra.mxu2 %v5919_v57  ;;  %v6071_v41 = vadd.f32 %v12742_v30, %v6070_v31  ;;  %v2697_v53 = vadd.f32 %v16560_v27, %v16559_v37  ;;  %v16564_v31 = vld [vmem:[#allocation113_spill] sm:$0xff]  ;;  %v16570_v37 = vld [vmem:[#allocation396_spill] sm:$0xff] }
 0x528   : > { %v4258_v58 = vmul.f32 %v4130_v60, %v13115_v35  ;;  %v3620_v50 = vadd.f32 -1.4531521, %v3492_v25  ;;  %vm2728_vm15 = vweird.f32 %v16561_v8  ;;  %v5920_v59 = vmul.f32 %v5792_v46, %v16562_v55  ;;  %v16565_v60 = vld [vmem:[#allocation136_spill] sm:$0xff]  ;;  %v16566_v25 = vld [vmem:[#allocation139_spill] sm:$0xff] }
 0x529   : > { %v5153_v52 = vmul.f32 %v16563_v51, %v4513_v5  ;;  %v4131_v45 = vadd.f32 -0.28449672, %v4003_v32  ;;  %6496 = vst [vmem:[%s12891_s28 + $0x18] sm:$0xff] %v6407_v43  ;;  %vm2699_vm0 = vweird.f32 %v16560_v27  ;;  %v13182_v0 = vadd.f32 %v6183_v20, %v6071_v41  ;;  %v16574_v20 = vld [vmem:[#allocation109_spill] sm:$0xff] }
 0x52a   : > { %v4386_v44 = vadd.f32 0.2548296, %v4258_v58  ;;  %v3748_v15 = vmul.f32 %v3620_v50, %v13162_v29  ;;  %vm2700_vm1 = vmor %vm2698_vm9, %vm2699_vm0  ;;  %v2702_v30 = vand.u32 2147483647, %v16551_v42  ;;  %vm5410_vm2 = vcmp.lt.f32.partialorder %v16564_v31, 0.0  ;;  %6450 = vmatmul.f32.gmra.mxu3 %v5920_v59  ;;  %v16567_v42 = vld [vmem:[#allocation79_spill] sm:$0xff] }
 0x52b   : > { %v5281_v48 = vsub.f32 1.0, %v5153_v52  ;;  %v4259_v57 = vmul.f32 %v4131_v45, %v13132_v62  ;;  %v2701_v9 = vsel %vm2700_vm1, %v16560_v27, %v2697_v53  ;;  %v2712_v54 = vadd.f32 %v16566_v25, %v16565_v60  ;;  %v16572_v27 = vld [vmem:[#allocation87_spill] sm:$0xff] }
 0x52c   : > { %v4514_v46 = vmul.f32 %v4386_v44, %v13115_v35  ;;  %v3876_v5 = vadd.f32 1.4214138, %v3748_v15  ;;  %vm2703_vm3 = vcmp.eq.f32.partialorder %v2702_v30, 8.507059e+37  ;;  %vm2714_vm4 = vweird.f32 %v16566_v25  ;;  %v16571_v35 = vld [vmem:[#allocation161_spill] sm:$0xff]  ;;  %v16575_v60 = vld [vmem:[#allocation151_spill] sm:$0xff] }
 0x52d   : > { %v5537_v32 = vsub.f32 0.0, %v5281_v48  ;;  %v4387_v43 = vadd.f32 0.2548296, %v4259_v57  ;;  %v13195_v58 = vsel %vm2703_vm3, %v16567_v42, %v2701_v9  ;;  %vm13199_vm5 = vmor %vm2713_vm12, %vm2714_vm4  ;;  %v2717_v41 = vand.u32 2147483647, %v16555_v13  ;;  %v16573_v13 = vld [vmem:[#allocation154_spill] sm:$0xff] }
 0x52e   : > { %vm5411_vm6 = vcmp.lt.f32.partialorder %v16570_v37, 0.0  ;;  %vm2743_vm7 = vweird.f32 %v16571_v35  ;;  %v5154_v53 = vmul.f32 %v16572_v27, %v4514_v46  ;;  %v4004_v55 = vmul.f32 %v3876_v5, %v13162_v29  ;;  %v16576_v5 = vld [vmem:[#allocation97_spill] sm:$0xff]  ;;  %v16578_v27 = vld [vmem:[#allocation122_spill] sm:$0xff] }
 0x52f   : > { %v3493_v59 = vmul.f32 1.0614054, %v13195_v58  ;;  %v2716_v51 = vsel %vm13199_vm5, %v16566_v25, %v2712_v54  ;;  %v5665_v52 = vsel %vm5409_vm14, %v5537_v32, %v5281_v48  ;;  %v4515_v45 = vmul.f32 %v4387_v43, %v13132_v62  ;;  %v16577_v48 = vld [vmem:[#allocation53_spill] sm:$0xff] }
 0x530   : > { %vm2718_vm8 = vcmp.eq.f32.partialorder %v2717_v41, 8.507059e+37  ;;  %v2727_v44 = vadd.f32 %v16574_v20, %v16573_v13  ;;  %v5793_v15 = vadd.f32 1.0, %v5665_v52  ;;  %v5282_v30 = vsub.f32 1.0, %v5154_v53 }
 0x531   : > { %v4132_v57 = vadd.f32 -0.28449672, %v4004_v55  ;;  %v3621_v9 = vadd.f32 -1.4531521, %v3493_v59  ;;  %v5155_v46 = vmul.f32 %v16575_v60, %v4515_v45  ;;  %v13219_v42 = vsel %vm2718_vm8, %v16576_v5, %v2716_v51  ;;  %v16579_v51 = vld [vmem:[#allocation124_spill] sm:$0xff]  ;;  %v16582_v60 = vld [vmem:[#allocation167_spill] sm:$0xff] }
 0x532   : > { %vm2729_vm9 = vweird.f32 %v16574_v20  ;;  %v2732_v40 = vand.u32 2147483647, %v16561_v8  ;;  %v5921_v25 = vmul.f32 %v5793_v15, %v16577_v48  ;;  %v5538_v62 = vsub.f32 0.0, %v5282_v30  ;;  %v16580_v45 = vld [vmem:[#allocation400_spill] sm:$0xff] }
 0x533   : > { %v4260_v54 = vmul.f32 %v4132_v57, %v13162_v29  ;;  %v3749_v32 = vmul.f32 %v3621_v9, %v13195_v58  ;;  %vm2730_vm10 = vmor %vm2728_vm15, %vm2729_vm9  ;;  %v5283_v43 = vsub.f32 1.0, %v5155_v46  ;;  %v3494_v50 = vmul.f32 1.0614054, %v13219_v42  ;;  %v16581_v9 = vld [vmem:[#allocation108_spill] sm:$0xff] }
 0x534   : > { %v2731_v41 = vsel %vm2730_vm10, %v16574_v20, %v2727_v44  ;;  %vm2733_vm11 = vcmp.eq.f32.partialorder %v2732_v40, 8.507059e+37  ;;  %vm2758_vm12 = vweird.f32 %v16578_v27  ;;  %6114 = vmatmul.f32.gmra.mxu0 %v5921_v25  ;;  %v5666_v53 = vsel %vm5410_vm2, %v5538_v62, %v5282_v30  ;;  %v16583_v30 = vld [vmem:[#allocation81_spill] sm:$0xff] }
 0x535   : > { %v4388_v55 = vadd.f32 0.2548296, %v4260_v54  ;;  %v3877_v59 = vadd.f32 1.4214138, %v3749_v32  ;;  %v13234_v52 = vsel %vm2733_vm11, %v16579_v51, %v2731_v41  ;;  %vm5412_vm13 = vcmp.lt.f32.partialorder %v16580_v45, 0.0  ;;  %v16587_v54 = vld [vmem:[#allocation76_spill] sm:$0xff] }
 0x536   : > { %v5794_v8 = vadd.f32 1.0, %v5666_v53  ;;  %v5539_v13 = vsub.f32 0.0, %v5283_v43  ;;  %v3622_v15 = vadd.f32 -1.4531521, %v3494_v50  ;;  %v3495_v57 = vmul.f32 1.0614054, %v13234_v52 }
 0x537   : > { %v4516_v20 = vmul.f32 %v4388_v55, %v13162_v29  ;;  %v4005_v44 = vmul.f32 %v3877_v59, %v13195_v58  ;;  %v2742_v31 = vadd.f32 %v16582_v60, %v16581_v9  ;;  %vm2744_vm14 = vweird.f32 %v16582_v60  ;;  %v16586_v29 = vld [vmem:[#allocation145_spill] sm:$0xff]  ;;  %v16588_v55 = vld [vmem:[#allocation152_spill] sm:$0xff]  ;;  %v16597_v45 = vld [vmem:[#allocation130_spill] sm:$0xff] }
 0x538   : > { %v5922_v46 = vmul.f32 %v5794_v8, %v16583_v30  ;;  %v5667_v5 = vsel %vm5411_vm6, %v5539_v13, %v5283_v43  ;;  %v3750_v40 = vmul.f32 %v3622_v15, %v13219_v42  ;;  %v3623_v48 = vadd.f32 -1.4531521, %v3495_v57  ;;  %vm13249_vm15 = vmor %vm2743_vm7, %vm2744_vm14  ;;  %v16589_v59 = vld [vmem:[#allocation148_spill] sm:$0xff]  ;;  %v16590_v8 = vld [vmem:[#allocation401_spill] sm:$0xff] }
 0x539   : > { %vm2773_vm0 = vweird.f32 %v16586_v29  ;;  %v5795_v62 = vadd.f32 1.0, %v5667_v5  ;;  %v5156_v32 = vmul.f32 %v16587_v54, %v4516_v20  ;;  %v4133_v50 = vadd.f32 -0.28449672, %v4005_v44  ;;  %v6296_v20 = vpop.f32.mrf.mxu2 }
 0x53a   : > { %v2746_v37 = vsel %vm13249_vm15, %v16582_v60, %v2742_v31  ;;  %6227 = vmatmul.f32.gmra.mxu1 %v5922_v46  ;;  %v3878_v43 = vadd.f32 1.4214138, %v3750_v40  ;;  %v3751_v41 = vmul.f32 %v3623_v48, %v13234_v52  ;;  %v2747_v53 = vand.u32 2147483647, %v16571_v35  ;;  %v6073_v31 = vpop.f32.mrf.mxu0  ;;  %v16591_v46 = vld [vmem:[#allocation146_spill] sm:$0xff]  ;;  %v6409_v40 = vpop.f32.mrf.mxu3 }
 0x53b   : > { %v2757_v51 = vadd.f32 %v16589_v59, %v16588_v55  ;;  %v5923_v13 = vmul.f32 %v5795_v62, %v16590_v8  ;;  %v5284_v15 = vsub.f32 1.0, %v5156_v32  ;;  %v4261_v57 = vmul.f32 %v4133_v50, %v13195_v58  ;;  %v13273_v48 = vld [vmem:[%s14512_s4] ss:$0 sm:$0xff] }
 0x53c   : > { %vm2759_vm1 = vweird.f32 %v16589_v59  ;;  %v4006_v44 = vmul.f32 %v3878_v43, %v13219_v42  ;;  %v3879_v9 = vadd.f32 1.4214138, %v3751_v41  ;;  %vm2748_vm2 = vcmp.eq.f32.partialorder %v2747_v53, 8.507059e+37  ;;  %v16592_v62 = vld [vmem:[#allocation102_spill] sm:$0xff]  ;;  %v6186_v43 = vpop.f32.mrf.mxu1  ;;  %v16595_v41 = vld [vmem:[#allocation111_spill] sm:$0xff] }
 0x53d   : > { %v6297_v60 = vadd.f32 %v6296_v20, %v13182_v0  ;;  %6340 = vmatmul.f32.gmra.mxu2 %v5923_v13  ;;  %v5540_v35 = vsub.f32 0.0, %v5284_v15  ;;  %v4389_v30 = vadd.f32 0.2548296, %v4261_v57  ;;  %v13268_v5 = vsel %vm2748_vm2, %v16591_v46, %v2746_v37  ;;  %vm13283_vm4 = vmor %vm2758_vm12, %vm2759_vm1 }
 0x53e   : > { %v6074_v25 = vadd.f32 %v13273_v48, %v6073_v31  ;;  %vm5413_vm3 = vcmp.lt.f32.partialorder %v16592_v62, 0.0  ;;  %v4134_v54 = vadd.f32 -0.28449672, %v4006_v44  ;;  %v4007_v0 = vmul.f32 %v3879_v9, %v13234_v52 }
 0x53f   : > { %v3496_v32 = vmul.f32 1.0614054, %v13268_v5  ;;  %v6410_v50 = vadd.f32 %v6409_v40, %v6297_v60  ;;  %vm2788_vm5 = vweird.f32 %v16595_v41  ;;  %v5668_v53 = vsel %vm5412_vm13, %v5540_v35, %v5284_v15  ;;  %v16596_v60 = vld [vmem:[#allocation142_spill] sm:$0xff]  ;;  %v16598_v15 = vld [vmem:[#allocation405_spill] sm:$0xff] }
 0x540   : > { %v4517_v55 = vmul.f32 %v4389_v30, %v13195_v58  ;;  %v13291_v8 = vadd.f32 %v6186_v43, %v6074_v25  ;;  %v2761_v13 = vsel %vm13283_vm4, %v16589_v59, %v2757_v51  ;;  %v5796_v57 = vadd.f32 1.0, %v5668_v53  ;;  %v16599_v58 = vld [vmem:[#allocation402_spill] sm:$0xff]  ;;  %v16603_v53 = vld [vmem:[#allocation157_spill] sm:$0xff]  ;;  %v16610_v25 = vld [vmem:[#allocation187_spill] sm:$0xff] }
 0x541   : > { %v4262_v20 = vmul.f32 %v4134_v54, %v13219_v42  ;;  %v4135_v44 = vadd.f32 -0.28449672, %v4007_v0  ;;  %v3624_v9 = vadd.f32 -1.4531521, %v3496_v32  ;;  %6497 = vst [vmem:[%s12891_s28 + $0x20] sm:$0xff] %v6410_v50  ;;  %v2772_v35 = vadd.f32 %v16598_v15, %v16597_v45  ;;  %v16602_v54 = vld [vmem:[#allocation117_spill] sm:$0xff] }
 0x542   : > { %v5157_v31 = vmul.f32 %v16596_v60, %v4517_v55  ;;  %v2762_v46 = vand.u32 2147483647, %v16578_v27  ;;  %vm2774_vm6 = vweird.f32 %v16598_v15  ;;  %v5924_v30 = vmul.f32 %v5796_v57, %v16599_v58  ;;  %v16604_v57 = vld [vmem:[#allocation121_spill] sm:$0xff]  ;;  %v16606_v60 = vld [vmem:[#allocation156_spill] sm:$0xff] }
 0x543   : > { %v4390_v40 = vadd.f32 0.2548296, %v4262_v20  ;;  %v4263_v59 = vmul.f32 %v4135_v44, %v13234_v52  ;;  %v3752_v51 = vmul.f32 %v3624_v9, %v13268_v5  ;;  %vm13308_vm7 = vmor %vm2773_vm0, %vm2774_vm6  ;;  %vm5414_vm8 = vcmp.lt.f32.partialorder %v16602_v54, 0.0  ;;  %v16605_v9 = vld [vmem:[#allocation186_spill] sm:$0xff] }
 0x544   : > { %v5285_v27 = vsub.f32 1.0, %v5157_v31  ;;  %vm2763_vm9 = vcmp.eq.f32.partialorder %v2762_v46, 8.507059e+37  ;;  %v2776_v0 = vsel %vm13308_vm7, %v16598_v15, %v2772_v35  ;;  %v2777_v32 = vand.u32 2147483647, %v16586_v29  ;;  %6453 = vmatmul.f32.gmra.mxu3 %v5924_v30  ;;  %v16607_v46 = vld [vmem:[#allocation128_spill] sm:$0xff]  ;;  %v16608_v29 = vld [vmem:[#allocation143_spill] sm:$0xff] }
 0x545   : > { %v4518_v50 = vmul.f32 %v4390_v40, %v13219_v42  ;;  %v4391_v43 = vadd.f32 0.2548296, %v4263_v59  ;;  %v3880_v37 = vadd.f32 1.4214138, %v3752_v51  ;;  %v13319_v55 = vsel %vm2763_vm9, %v16603_v53, %v2761_v13  ;;  %v16609_v35 = vld [vmem:[#allocation110_spill] sm:$0xff] }
 0x546   : > { %vm5415_vm10 = vcmp.lt.f32.partialorder %v16604_v57, 0.0  ;;  %v5541_v20 = vsub.f32 0.0, %v5285_v27  ;;  %v3497_v44 = vmul.f32 1.0614054, %v13319_v55  ;;  %vm2778_vm11 = vcmp.eq.f32.partialorder %v2777_v32, 8.507059e+37 }
 0x547   : > { %v2787_v31 = vadd.f32 %v16606_v60, %v16605_v9  ;;  %vm2803_vm12 = vweird.f32 %v16607_v46  ;;  %v5158_v45 = vmul.f32 %v16608_v29, %v4518_v50  ;;  %v4519_v42 = vmul.f32 %v4391_v43, %v13234_v52 }
 0x548   : > { %v4008_v15 = vmul.f32 %v3880_v37, %v13268_v5  ;;  %v13330_v13 = vsel %vm2778_vm11, %v16609_v35, %v2776_v0  ;;  %v5669_v58 = vsel %vm5413_vm3, %v5541_v20, %v5285_v27  ;;  %v3625_v30 = vadd.f32 -1.4531521, %v3497_v44  ;;  %v16613_v37 = vld [vmem:[#allocation134_spill] sm:$0xff] }
 0x549   : > { %v3498_v40 = vmul.f32 1.0614054, %v13330_v13  ;;  %vm2789_vm13 = vweird.f32 %v16606_v60  ;;  %v5797_v59 = vadd.f32 1.0, %v5669_v58  ;;  %v5286_v51 = vsub.f32 1.0, %v5158_v45 }
 0x54a   : > { %v5159_v32 = vmul.f32 %v16610_v25, %v4519_v42  ;;  %v4136_v50 = vadd.f32 -0.28449672, %v4008_v15  ;;  %vm13339_vm14 = vmor %vm2788_vm5, %vm2789_vm13  ;;  %v3753_v0 = vmul.f32 %v3625_v30, %v13319_v55  ;;  %v2792_v43 = vand.u32 2147483647, %v16595_v41  ;;  %v16614_v42 = vld [vmem:[#allocation190_spill] sm:$0xff]  ;;  %v16615_v15 = vld [vmem:[#allocation193_spill] sm:$0xff] }
 0x54b   : > { %v3626_v62 = vadd.f32 -1.4531521, %v3498_v40  ;;  %v2791_v27 = vsel %vm13339_vm14, %v16606_v60, %v2787_v31  ;;  %v5925_v53 = vmul.f32 %v5797_v59, %v16613_v37  ;;  %v5542_v20 = vsub.f32 0.0, %v5286_v51  ;;  %v16616_v41 = vld [vmem:[#allocation141_spill] sm:$0xff]  ;;  %v16618_v59 = vld [vmem:[#allocation206_spill] sm:$0xff] }
 0x54c   : > { %v5287_v44 = vsub.f32 1.0, %v5159_v32  ;;  %v4264_v9 = vmul.f32 %v4136_v50, %v13268_v5  ;;  %v3881_v29 = vadd.f32 1.4214138, %v3753_v0  ;;  %vm2793_vm15 = vcmp.eq.f32.partialorder %v2792_v43, 8.507059e+37  ;;  %v16617_v40 = vld [vmem:[#allocation125_spill] sm:$0xff] }
 0x54d   : > { %v3754_v45 = vmul.f32 %v3626_v62, %v13330_v13  ;;  %v2802_v35 = vadd.f32 %v16615_v15, %v16614_v42  ;;  %6117 = vmatmul.f32.gmra.mxu0 %v5925_v53  ;;  %v5670_v58 = vsel %vm5414_vm8, %v5542_v20, %v5286_v51  ;;  %v13356_v30 = vsel %vm2793_vm15, %v16616_v41, %v2791_v27  ;;  %v16619_v62 = vld [vmem:[#allocation129_spill] sm:$0xff]  ;;  %v6299_v20 = vpop.f32.mrf.mxu2 }
 0x54e   : > { %v5543_v60 = vsub.f32 0.0, %v5287_v44  ;;  %v4392_v31 = vadd.f32 0.2548296, %v4264_v9  ;;  %vm5416_vm0 = vcmp.lt.f32.partialorder %v16617_v40, 0.0  ;;  %vm2818_vm1 = vweird.f32 %v16618_v59  ;;  %v16620_v9 = vld [vmem:[#allocation168_spill] sm:$0xff] }
 0x54f   : > { %v5798_v25 = vadd.f32 1.0, %v5670_v58  ;;  %v4009_v32 = vmul.f32 %v3881_v29, %v13319_v55  ;;  %v3882_v50 = vadd.f32 1.4214138, %v3754_v45  ;;  %v3499_v52 = vmul.f32 1.0614054, %v13356_v30  ;;  %v16621_v45 = vld [vmem:[#allocation103_spill] sm:$0xff] }
 0x550   : > { %v5671_v0 = vsel %vm5415_vm10, %v5543_v60, %v5287_v44  ;;  %v4520_v54 = vmul.f32 %v4392_v31, %v13268_v5  ;;  %vm2804_vm2 = vweird.f32 %v16615_v15  ;;  %v2807_v51 = vand.u32 2147483647, %v16607_v46  ;;  %v6076_v5 = vpop.f32.mrf.mxu0  ;;  %v16622_v31 = vld [vmem:[#allocation176_spill] sm:$0xff] }
 0x551   : > { %v5926_v27 = vmul.f32 %v5798_v25, %v16619_v62  ;;  %v5799_v43 = vadd.f32 1.0, %v5671_v0  ;;  %v4137_v37 = vadd.f32 -0.28449672, %v4009_v32  ;;  %v4010_v53 = vmul.f32 %v3882_v50, %v13330_v13  ;;  %vm2805_vm3 = vmor %vm2803_vm12, %vm2804_vm2  ;;  %v16623_v25 = vld [vmem:[#allocation208_spill] sm:$0xff]  ;;  %v6412_v0 = vpop.f32.mrf.mxu3  ;;  %v16624_v62 = vld [vmem:[#allocation127_spill] sm:$0xff] }
 0x552   : > { %v5160_v29 = vmul.f32 %v16620_v9, %v4520_v54  ;;  %v3627_v57 = vadd.f32 -1.4531521, %v3499_v52  ;;  %v2806_v44 = vsel %vm2805_vm3, %v16615_v15, %v2802_v35  ;;  %vm2808_vm4 = vcmp.eq.f32.partialorder %v2807_v51, 8.507059e+37  ;;  %v6189_v9 = vpop.f32.mrf.mxu1 }
 0x553   : > { %6230 = vmatmul.f32.gmra.mxu1 %v5926_v27  ;;  %v5927_v42 = vmul.f32 %v5799_v43, %v16621_v45  ;;  %v4265_v58 = vmul.f32 %v4137_v37, %v13319_v55  ;;  %v4138_v60 = vadd.f32 -0.28449672, %v4010_v53  ;;  %v13376_v41 = vsel %vm2808_vm4, %v16622_v31, %v2806_v44 }
 0x554   : > { %vm2833_vm5 = vweird.f32 %v16623_v25  ;;  %v5288_v46 = vsub.f32 1.0, %v5160_v29  ;;  %v3755_v32 = vmul.f32 %v3627_v57, %v13356_v30  ;;  %v3500_v50 = vmul.f32 1.0614054, %v13376_v41  ;;  %v16625_v57 = vld [vmem:[#allocation155_spill] sm:$0xff] }
 0x555   : > { %v6300_v15 = vadd.f32 %v6299_v20, %v13291_v8  ;;  %6343 = vmatmul.f32.gmra.mxu2 %v5927_v42  ;;  %v4393_v35 = vadd.f32 0.2548296, %v4265_v58  ;;  %v4266_v52 = vmul.f32 %v4138_v60, %v13330_v13  ;;  %v6077_v54 = vadd.f32 %v13273_v48, %v6076_v5  ;;  %v16626_v42 = vld [vmem:[#allocation175_spill] sm:$0xff] }
 0x556   : > { %v2817_v51 = vadd.f32 %v10906_v18, %v10969_v26  ;;  %vm5417_vm6 = vcmp.lt.f32.partialorder %v16624_v62, 0.0  ;;  %v5544_v27 = vsub.f32 0.0, %v5288_v46  ;;  %v3883_v43 = vadd.f32 1.4214138, %v3755_v32 }
 0x557   : > { %v3628_v37 = vadd.f32 -1.4531521, %v3500_v50  ;;  %v6413_v53 = vadd.f32 %v6412_v0, %v6300_v15  ;;  %vm2848_vm7 = vweird.f32 %v10922_v56  ;;  %v4521_v8 = vmul.f32 %v4393_v35, %v13319_v55  ;;  %v16628_v15 = vld [vmem:[#allocation404_spill] sm:$0xff] }
 0x558   : > { %v4394_v20 = vadd.f32 0.2548296, %v4266_v52  ;;  %v13389_v29 = vadd.f32 %v6189_v9, %v6077_v54  ;;  %vm2819_vm8 = vweird.f32 %v10906_v18  ;;  %vm5418_vm9 = vcmp.lt.f32.partialorder %v16625_v57, 0.0  ;;  %v16629_v0 = vld [vmem:[#allocation188_spill] sm:$0xff] }
 0x559   : > { %v5672_v26 = vsel %vm5416_vm0, %v5544_v27, %v5288_v46  ;;  %v4011_v44 = vmul.f32 %v3883_v43, %v13356_v30  ;;  %v3756_v5 = vmul.f32 %v3628_v37, %v13376_v41  ;;  %6498 = vst [vmem:[%s12891_s28 + $0x28] sm:$0xff] %v6413_v53  ;;  %vm2820_vm10 = vmor %vm2818_vm1, %vm2819_vm8  ;;  %v2822_v55 = vand.u32 2147483647, %v16618_v59  ;;  %v16627_v46 = vld [vmem:[#allocation198_spill] sm:$0xff] }
 0x55a   : > { %v5800_v45 = vadd.f32 1.0, %v5672_v26  ;;  %v5161_v58 = vmul.f32 %v16626_v42, %v4521_v8  ;;  %v4522_v60 = vmul.f32 %v4394_v20, %v13330_v13  ;;  %v2821_v31 = vsel %vm2820_vm10, %v10906_v18, %v2817_v51  ;;  %v16630_v27 = vld [vmem:[#allocation138_spill] sm:$0xff]  ;;  %v16634_v8 = vld [vmem:[#allocation199_spill] sm:$0xff] }
 0x55b   : > { %v4139_v32 = vadd.f32 -0.28449672, %v4011_v44  ;;  %v3884_v40 = vadd.f32 1.4214138, %v3756_v5  ;;  %vm2823_vm11 = vcmp.eq.f32.partialorder %v2822_v55, 8.507059e+37  ;;  %v2832_v50 = vadd.f32 %v16627_v46, %v10982_v49  ;;  %v16631_v51 = vld [vmem:[#allocation182_spill] sm:$0xff] }
 0x55c   : > { %v5928_v35 = vmul.f32 %v5800_v45, %v16628_v15  ;;  %v5289_v52 = vsub.f32 1.0, %v5161_v58  ;;  %v5162_v54 = vmul.f32 %v16629_v0, %v4522_v60  ;;  %v13409_v59 = vsel %vm2823_vm11, %v16630_v27, %v2821_v31  ;;  %v16635_v20 = vld [vmem:[#allocation162_spill] sm:$0xff]  ;;  %v16636_v42 = vld [vmem:[#allocation159_spill] sm:$0xff]  ;;  %v16641_v0 = vld [vmem:[#allocation164_spill] sm:$0xff] }
 0x55d   : > { %v4267_v43 = vmul.f32 %v4139_v32, %v13356_v30  ;;  %v4012_v13 = vmul.f32 %v3884_v40, %v13376_v41  ;;  %v3501_v18 = vmul.f32 1.0614054, %v13409_v59  ;;  %vm2834_vm12 = vweird.f32 %v16627_v46 }
 0x55e   : > { %vm2863_vm13 = vweird.f32 %v16631_v51  ;;  %6456 = vmatmul.f32.gmra.mxu3 %v5928_v35  ;;  %v5545_v49 = vsub.f32 0.0, %v5289_v52  ;;  %v5290_v37 = vsub.f32 1.0, %v5162_v54  ;;  %vm13418_vm14 = vmor %vm2833_vm5, %vm2834_vm12  ;;  %v2837_v9 = vand.u32 2147483647, %v16623_v25  ;;  %v16637_v25 = vld [vmem:[#allocation189_spill] sm:$0xff] }
 0x55f   : > { %v2847_v26 = vadd.f32 %v16635_v20, %v16634_v8  ;;  %v4395_v44 = vadd.f32 0.2548296, %v4267_v43  ;;  %v4140_v5 = vadd.f32 -0.28449672, %v4012_v13  ;;  %v3629_v55 = vadd.f32 -1.4531521, %v3501_v18 }
 0x560   : > { %v2836_v45 = vsel %vm13418_vm14, %v16627_v46, %v2832_v50  ;;  %vm5419_vm15 = vcmp.lt.f32.partialorder %v16636_v42, 0.0  ;;  %v5673_v58 = vsel %vm5417_vm6, %v5545_v49, %v5289_v52  ;;  %v5546_v60 = vsub.f32 0.0, %v5290_v37  ;;  %v16640_v50 = vld [vmem:[#allocation173_spill] sm:$0xff]  ;;  %v16642_v43 = vld [vmem:[#allocation172_spill] sm:$0xff]  ;;  %v16643_v49 = vld [vmem:[#allocation406_spill] sm:$0xff] }
 0x561   : > { %vm2838_vm0 = vcmp.eq.f32.partialorder %v2837_v9, 8.507059e+37  ;;  %vm2849_vm1 = vweird.f32 %v16635_v20  ;;  %vm2878_vm2 = vweird.f32 %v16637_v25  ;;  %v5801_v31 = vadd.f32 1.0, %v5673_v58  ;;  %v16645_v9 = vld [vmem:[#allocation209_spill] sm:$0xff]  ;;  %v16651_v46 = vld [vmem:[#allocation219_spill] sm:$0xff] }
 0x562   : > { %v4523_v32 = vmul.f32 %v4395_v44, %v13356_v30  ;;  %v4268_v40 = vmul.f32 %v4140_v5, %v13376_v41  ;;  %v3757_v15 = vmul.f32 %v3629_v55, %v13409_v59  ;;  %vm13438_vm3 = vmor %vm2848_vm7, %vm2849_vm1  ;;  %v5674_v62 = vsel %vm5418_vm9, %v5546_v60, %v5290_v37  ;;  %v16644_v37 = vld [vmem:[#allocation177_spill] sm:$0xff]  ;;  %v16646_v44 = vld [vmem:[#allocation163_spill] sm:$0xff] }
 0x563   : > { %v13445_v35 = vsel %vm2838_vm0, %v16640_v50, %v2836_v45  ;;  %v2851_v30 = vsel %vm13438_vm3, %v16635_v20, %v2847_v26  ;;  %v2852_v52 = vand.u32 2147483647, %v10922_v56  ;;  %v5929_v54 = vmul.f32 %v5801_v31, %v16641_v0  ;;  %v16647_v5 = vld [vmem:[#allocation150_spill] sm:$0xff]  ;;  %v16656_v42 = vld [vmem:[#allocation195_spill] sm:$0xff] }
 0x564   : > { %v5802_v27 = vadd.f32 1.0, %v5674_v62  ;;  %v5163_v13 = vmul.f32 %v16642_v43, %v4523_v32  ;;  %v4396_v18 = vadd.f32 0.2548296, %v4268_v40  ;;  %vm5420_vm4 = vcmp.lt.f32.partialorder %v16643_v49, 0.0  ;;  %v16648_v32 = vld [vmem:[#allocation178_spill] sm:$0xff]  ;;  %v16652_v62 = vld [vmem:[#allocation205_spill] sm:$0xff] }
 0x565   : > { %v3885_v53 = vadd.f32 1.4214138, %v3757_v15  ;;  %v3502_v57 = vmul.f32 1.0614054, %v13445_v35  ;;  %vm2853_vm5 = vcmp.eq.f32.partialorder %v2852_v52, 8.507059e+37  ;;  %v2862_v8 = vadd.f32 %v16645_v9, %v16644_v37  ;;  %6120 = vmatmul.f32.gmra.mxu0 %v5929_v54  ;;  %v6302_v37 = vpop.f32.mrf.mxu2 }
 0x566   : > { %v5930_v20 = vmul.f32 %v5802_v27, %v16646_v44  ;;  %v5291_v26 = vsub.f32 1.0, %v5163_v13  ;;  %v4524_v56 = vmul.f32 %v4396_v18, %v13376_v41  ;;  %v13460_v55 = vsel %vm2853_vm5, %v16647_v5, %v2851_v30  ;;  %v16653_v27 = vld [vmem:[#allocation201_spill] sm:$0xff]  ;;  %v16657_v5 = vld [vmem:[#allocation160_spill] sm:$0xff] }
 0x567   : > { %v4013_v45 = vmul.f32 %v3885_v53, %v13409_v59  ;;  %v3630_v58 = vadd.f32 -1.4531521, %v3502_v57  ;;  %v3503_v60 = vmul.f32 1.0614054, %v13460_v55  ;;  %vm2864_vm6 = vweird.f32 %v16645_v9 }
 0x568   : > { %6233 = vmatmul.f32.gmra.mxu1 %v5930_v20  ;;  %v5547_v31 = vsub.f32 0.0, %v5291_v26  ;;  %v5164_v40 = vmul.f32 %v16648_v32, %v4524_v56  ;;  %vm13468_vm7 = vmor %vm2863_vm13, %vm2864_vm6  ;;  %v2867_v41 = vand.u32 2147483647, %v16631_v51  ;;  %v2877_v50 = vadd.f32 %v16652_v62, %v16651_v46  ;;  %v6415_v32 = vpop.f32.mrf.mxu3 }
 0x569   : > { %v4141_v30 = vadd.f32 -0.28449672, %v4013_v45  ;;  %v3758_v52 = vmul.f32 %v3630_v58, %v13445_v35  ;;  %v3631_v0 = vadd.f32 -1.4531521, %v3503_v60  ;;  %v2866_v54 = vsel %vm13468_vm7, %v16645_v9, %v2862_v8  ;;  %v16663_v9 = vld [vmem:[#allocation192_spill] sm:$0xff] }
 0x56a   : > { %vm2893_vm8 = vweird.f32 %v16653_v27  ;;  %v5675_v43 = vsel %vm5419_vm15, %v5547_v31, %v5291_v26  ;;  %v5292_v13 = vsub.f32 1.0, %v5164_v40  ;;  %vm2868_vm9 = vcmp.eq.f32.partialorder %v2867_v41, 8.507059e+37  ;;  %v6079_v26 = vpop.f32.mrf.mxu0  ;;  %v16658_v40 = vld [vmem:[#allocation166_spill] sm:$0xff] }
 0x56b   : > { %vm2879_vm10 = vweird.f32 %v16652_v62  ;;  %v5803_v51 = vadd.f32 1.0, %v5675_v43  ;;  %v4269_v18 = vmul.f32 %v4141_v30, %v13409_v59  ;;  %v3886_v53 = vadd.f32 1.4214138, %v3758_v52  ;;  %v16659_v30 = vld [vmem:[#allocation218_spill] sm:$0xff] }
 0x56c   : > { %v3759_v57 = vmul.f32 %v3631_v0, %v13460_v55  ;;  %vm13487_vm11 = vmor %vm2878_vm2, %vm2879_vm10  ;;  %v5548_v8 = vsub.f32 0.0, %v5292_v13  ;;  %v13492_v44 = vsel %vm2868_vm9, %v16656_v42, %v2866_v54  ;;  %v6303_v20 = vadd.f32 %v6302_v37, %v13389_v29  ;;  %v6192_v54 = vpop.f32.mrf.mxu1 }
 0x56d   : > { %v2881_v56 = vsel %vm13487_vm11, %v16652_v62, %v2877_v50  ;;  %v5931_v45 = vmul.f32 %v5803_v51, %v16657_v5  ;;  %v4397_v58 = vadd.f32 0.2548296, %v4269_v18  ;;  %v4014_v60 = vmul.f32 %v3886_v53, %v13445_v35  ;;  %v16661_v18 = vld [vmem:[#allocation215_spill] sm:$0xff] }
 0x56e   : > { %v3887_v31 = vadd.f32 1.4214138, %v3759_v57  ;;  %vm5421_vm12 = vcmp.lt.f32.partialorder %v16658_v40, 0.0  ;;  %v5676_v15 = vsel %vm5420_vm4, %v5548_v8, %v5292_v13  ;;  %v3504_v29 = vmul.f32 1.0614054, %v13492_v44  ;;  %v16660_v13 = vld [vmem:[#allocation412_spill] sm:$0xff] }
 0x56f   : > { %v6416_v41 = vadd.f32 %v6415_v32, %v6303_v20  ;;  %v6080_v46 = vadd.f32 %v13273_v48, %v6079_v26  ;;  %vm2908_vm13 = vweird.f32 %v16659_v30  ;;  %6346 = vmatmul.f32.gmra.mxu2 %v5931_v45  ;;  %v5804_v62 = vadd.f32 1.0, %v5676_v15  ;;  %v16662_v57 = vld [vmem:[#allocation180_spill] sm:$0xff]  ;;  %v16674_v40 = vld [vmem:[#allocation207_spill] sm:$0xff] }
 0x570   : > { %v4525_v50 = vmul.f32 %v4397_v58, %v13409_v59  ;;  %v4142_v52 = vadd.f32 -0.28449672, %v4014_v60  ;;  %v4015_v0 = vmul.f32 %v3887_v31, %v13460_v55  ;;  %v3632_v43 = vadd.f32 -1.4531521, %v3504_v29  ;;  %v16664_v58 = vld [vmem:[#allocation238_spill] sm:$0xff]  ;;  %v16665_v31 = vld [vmem:[#allocation135_spill] sm:$0xff] }
 0x571   : > { %6499 = vst [vmem:[%s12891_s28 + $0x30] sm:$0xff] %v6416_v41  ;;  %v13509_v51 = vadd.f32 %v6192_v54, %v6080_v46  ;;  %v2882_v49 = vand.u32 2147483647, %v16637_v25  ;;  %v2892_v53 = vadd.f32 %v16661_v18, %v16660_v13  ;;  %v5932_v37 = vmul.f32 %v5804_v62, %v16662_v57  ;;  %v16666_v41 = vld [vmem:[#allocation408_spill] sm:$0xff]  ;;  %v16670_v13 = vld [vmem:[#allocation411_spill] sm:$0xff] }
 0x572   : > { %v5165_v8 = vmul.f32 %v16663_v9, %v4525_v50  ;;  %v4270_v42 = vmul.f32 %v4142_v52, %v13445_v35  ;;  %v4143_v59 = vadd.f32 -0.28449672, %v4015_v0  ;;  %v3760_v20 = vmul.f32 %v3632_v43, %v13492_v44  ;;  %v16667_v52 = vld [vmem:[#allocation220_spill] sm:$0xff]  ;;  %v16671_v57 = vld [vmem:[#allocation147_spill] sm:$0xff] }
 0x573   : > { %vm2883_vm14 = vcmp.eq.f32.partialorder %v2882_v49, 8.507059e+37  ;;  %vm2894_vm15 = vweird.f32 %v16661_v18  ;;  %v2897_v26 = vand.u32 2147483647, %v16653_v27  ;;  %6459 = vmatmul.f32.gmra.mxu3 %v5932_v37  ;;  %vm5422_vm1 = vcmp.lt.f32.partialorder %v16665_v31, 0.0  ;;  %v16668_v0 = vld [vmem:[#allocation184_spill] sm:$0xff] }
 0x574   : > { %v5293_v5 = vsub.f32 1.0, %v5165_v8  ;;  %v4398_v25 = vadd.f32 0.2548296, %v4270_v42  ;;  %v4271_v45 = vmul.f32 %v4143_v59, %v13460_v55  ;;  %v13522_v60 = vsel %vm2883_vm14, %v16664_v58, %v2881_v56  ;;  %vm2895_vm0 = vmor %vm2893_vm8, %vm2894_vm15  ;;  %v16669_v49 = vld [vmem:[#allocation216_spill] sm:$0xff] }
 0x575   : > { %v3888_v32 = vadd.f32 1.4214138, %v3760_v20  ;;  %v3505_v15 = vmul.f32 1.0614054, %v13522_v60  ;;  %v2896_v29 = vsel %vm2895_vm0, %v16661_v18, %v2892_v53  ;;  %vm2898_vm2 = vcmp.eq.f32.partialorder %v2897_v26, 8.507059e+37  ;;  %v16689_v20 = vld [vmem:[#allocation248_spill] sm:$0xff] }
 0x576   : > { %vm2923_vm3 = vweird.f32 %v16666_v41  ;;  %v5549_v46 = vsub.f32 0.0, %v5293_v5  ;;  %v4526_v62 = vmul.f32 %v4398_v25, %v13445_v35  ;;  %v4399_v50 = vadd.f32 0.2548296, %v4271_v45  ;;  %v16675_v45 = vld [vmem:[#allocation169_spill] sm:$0xff] }
 0x577   : > { %v13532_v56 = vsel %vm2898_vm2, %v16667_v52, %v2896_v29  ;;  %vm5423_vm4 = vcmp.lt.f32.partialorder %v16668_v0, 0.0  ;;  %v4016_v27 = vmul.f32 %v3888_v32, %v13492_v44  ;;  %v3633_v54 = vadd.f32 -1.4531521, %v3505_v15  ;;  %v16677_v52 = vld [vmem:[#allocation183_spill] sm:$0xff] }
 0x578   : > { %v3506_v43 = vmul.f32 1.0614054, %v13532_v56  ;;  %v2907_v18 = vadd.f32 %v16670_v13, %v16669_v49  ;;  %v5677_v53 = vsel %vm5421_vm12, %v5549_v46, %v5293_v5  ;;  %v5166_v37 = vmul.f32 %v16671_v57, %v4526_v62 }
 0x579   : > { %v4527_v35 = vmul.f32 %v4399_v50, %v13460_v55  ;;  %vm2909_vm5 = vweird.f32 %v16670_v13  ;;  %v5805_v9 = vadd.f32 1.0, %v5677_v53  ;;  %v4144_v8 = vadd.f32 -0.28449672, %v4016_v27  ;;  %v16676_v50 = vld [vmem:[#allocation232_spill] sm:$0xff] }
 0x57a   : > { %v3761_v42 = vmul.f32 %v3633_v54, %v13522_v60  ;;  %v3634_v59 = vadd.f32 -1.4531521, %v3506_v43  ;;  %vm13547_vm6 = vmor %vm2908_vm13, %vm2909_vm5  ;;  %v5294_v26 = vsub.f32 1.0, %v5166_v37  ;;  %v2912_v25 = vand.u32 2147483647, %v16659_v30 }
 0x57b   : > { %v5167_v5 = vmul.f32 %v16674_v40, %v4527_v35  ;;  %v2911_v55 = vsel %vm13547_vm6, %v16670_v13, %v2907_v18  ;;  %v5933_v58 = vmul.f32 %v5805_v9, %v16675_v45  ;;  %v4272_v32 = vmul.f32 %v4144_v8, %v13492_v44  ;;  %v16678_v13 = vld [vmem:[#allocation179_spill] sm:$0xff]  ;;  %v16679_v18 = vld [vmem:[#allocation158_spill] sm:$0xff]  ;;  %v16680_v35 = vld [vmem:[#allocation228_spill] sm:$0xff] }
 0x57c   : > { %v3889_v15 = vadd.f32 1.4214138, %v3761_v42  ;;  %v3762_v29 = vmul.f32 %v3634_v59, %v13532_v56  ;;  %v5550_v46 = vsub.f32 0.0, %v5294_v26  ;;  %vm2913_vm7 = vcmp.eq.f32.partialorder %v2912_v25, 8.507059e+37  ;;  %v16684_v45 = vld [vmem:[#allocation181_spill] sm:$0xff] }
 0x57d   : > { %v5295_v62 = vsub.f32 1.0, %v5167_v5  ;;  %v2922_v27 = vadd.f32 %v16677_v52, %v16676_v50  ;;  %6123 = vmatmul.f32.gmra.mxu0 %v5933_v58  ;;  %v4400_v54 = vadd.f32 0.2548296, %v4272_v32  ;;  %v13563_v30 = vsel %vm2913_vm7, %v16678_v13, %v2911_v55  ;;  %v16685_v50 = vld [vmem:[#allocation217_spill] sm:$0xff]  ;;  %v6418_v13 = vpop.f32.mrf.mxu3 }
 0x57e   : > { %v4017_v43 = vmul.f32 %v3889_v15, %v13522_v60  ;;  %v3890_v49 = vadd.f32 1.4214138, %v3762_v29  ;;  %vm5424_vm8 = vcmp.lt.f32.partialorder %v16679_v18, 0.0  ;;  %v5678_v53 = vsel %vm5422_vm1, %v5550_v46, %v5294_v26  ;;  %v6305_v15 = vpop.f32.mrf.mxu2  ;;  %v16694_v18 = vld [vmem:[#allocation414_spill] sm:$0xff] }
 0x57f   : > { %v5551_v57 = vsub.f32 0.0, %v5295_v62  ;;  %v3507_v37 = vmul.f32 1.0614054, %v13563_v30  ;;  %vm2924_vm9 = vweird.f32 %v16677_v52  ;;  %vm2938_vm10 = vweird.f32 %v16680_v35 }
 0x580   : > { %v5806_v9 = vadd.f32 1.0, %v5678_v53  ;;  %v4528_v8 = vmul.f32 %v4400_v54, %v13492_v44  ;;  %v4145_v42 = vadd.f32 -0.28449672, %v4017_v43  ;;  %v4018_v59 = vmul.f32 %v3890_v49, %v13532_v56  ;;  %vm13575_vm11 = vmor %vm2923_vm3, %vm2924_vm9  ;;  %v16683_v44 = vld [vmem:[#allocation170_spill] sm:$0xff]  ;;  %v16687_v43 = vld [vmem:[#allocation211_spill] sm:$0xff] }
 0x581   : > { %v5679_v31 = vsel %vm5423_vm4, %v5551_v57, %v5295_v62  ;;  %v3635_v26 = vadd.f32 -1.4531521, %v3507_v37  ;;  %v2926_v40 = vsel %vm13575_vm11, %v16677_v52, %v2922_v27  ;;  %v2927_v5 = vand.u32 2147483647, %v16666_v41  ;;  %v6082_v62 = vpop.f32.mrf.mxu0  ;;  %v16686_v52 = vld [vmem:[#allocation407_spill] sm:$0xff]  ;;  %v16688_v53 = vld [vmem:[#allocation132_spill] sm:$0xff] }
 0x582   : > { %v5934_v55 = vmul.f32 %v5806_v9, %v16683_v44  ;;  %v5807_v25 = vadd.f32 1.0, %v5679_v31  ;;  %v5168_v58 = vmul.f32 %v16684_v45, %v4528_v8  ;;  %v4273_v32 = vmul.f32 %v4145_v42, %v13522_v60  ;;  %v16690_v31 = vld [vmem:[#allocation225_spill] sm:$0xff]  ;;  %v16692_v45 = vld [vmem:[#allocation231_spill] sm:$0xff] }
 0x583   : > { %v4146_v29 = vadd.f32 -0.28449672, %v4018_v59  ;;  %v3763_v46 = vmul.f32 %v3635_v26, %v13563_v30  ;;  %vm2928_vm12 = vcmp.eq.f32.partialorder %v2927_v5, 8.507059e+37  ;;  %v6306_v0 = vadd.f32 %v6305_v15, %v13509_v51 }
 0x584   : > { %vm2953_vm13 = vweird.f32 %v16685_v50  ;;  %6236 = vmatmul.f32.gmra.mxu1 %v5934_v55  ;;  %v5935_v41 = vmul.f32 %v5807_v25, %v16686_v52  ;;  %v5296_v27 = vsub.f32 1.0, %v5168_v58  ;;  %v4401_v54 = vadd.f32 0.2548296, %v4273_v32  ;;  %v6195_v55 = vpop.f32.mrf.mxu1  ;;  %v16691_v25 = vld [vmem:[#allocation202_spill] sm:$0xff] }
 0x585   : > { %v13593_v49 = vsel %vm2928_vm12, %v16687_v43, %v2926_v40  ;;  %vm5425_vm14 = vcmp.lt.f32.partialorder %v16688_v53, 0.0  ;;  %v4274_v57 = vmul.f32 %v4146_v29, %v13532_v56  ;;  %v3891_v37 = vadd.f32 1.4214138, %v3763_v46  ;;  %v16693_v58 = vld [vmem:[#allocation214_spill] sm:$0xff] }
 0x586   : > { %v3508_v51 = vmul.f32 1.0614054, %v13593_v49  ;;  %v6419_v9 = vadd.f32 %v6418_v13, %v6306_v0  ;;  %6349 = vmatmul.f32.gmra.mxu2 %v5935_v41  ;;  %v5552_v8 = vsub.f32 0.0, %v5296_v27  ;;  %v4529_v42 = vmul.f32 %v4401_v54, %v13522_v60  ;;  %v16696_v13 = vld [vmem:[#allocation165_spill] sm:$0xff] }
 0x587   : > { %v6083_v59 = vadd.f32 %v13273_v48, %v6082_v62  ;;  %v2937_v26 = vadd.f32 %v16690_v31, %v16689_v20  ;;  %v4402_v40 = vadd.f32 0.2548296, %v4274_v57  ;;  %v4019_v5 = vmul.f32 %v3891_v37, %v13563_v30  ;;  %v16697_v37 = vld [vmem:[#allocation410_spill] sm:$0xff]  ;;  %v16699_v20 = vld [vmem:[#allocation256_spill] sm:$0xff] }
 0x588   : > { %v3636_v44 = vadd.f32 -1.4531521, %v3508_v51  ;;  %6500 = vst [vmem:[%s12891_s28 + $0x38] sm:$0xff] %v6419_v9  ;;  %vm2939_vm15 = vweird.f32 %v16690_v31  ;;  %vm5426_vm0 = vcmp.lt.f32.partialorder %v16691_v25, 0.0  ;;  %vm2968_vm1 = vweird.f32 %v16692_v45  ;;  %v16706_v25 = vld [vmem:[#allocation224_spill] sm:$0xff] }
 0x589   : > { %v5680_v60 = vsel %vm5424_vm8, %v5552_v8, %v5296_v27  ;;  %v5169_v32 = vmul.f32 %v16693_v58, %v4529_v42  ;;  %v13610_v15 = vadd.f32 %v6195_v55, %v6083_v59  ;;  %v2942_v29 = vand.u32 2147483647, %v16680_v35  ;;  %vm2940_vm2 = vmor %vm2938_vm10, %vm2939_vm15  ;;  %v16695_v27 = vld [vmem:[#allocation230_spill] sm:$0xff]  ;;  %v16698_v42 = vld [vmem:[#allocation203_spill] sm:$0xff] }
 0x58a   : > { %v5808_v46 = vadd.f32 1.0, %v5680_v60  ;;  %v4530_v0 = vmul.f32 %v4402_v40, %v13532_v56  ;;  %v4147_v62 = vadd.f32 -0.28449672, %v4019_v5  ;;  %v3764_v52 = vmul.f32 %v3636_v44, %v13593_v49  ;;  %v16700_v44 = vld [vmem:[#allocation226_spill] sm:$0xff]  ;;  %v16701_v58 = vld [vmem:[#allocation204_spill] sm:$0xff] }
 0x58b   : > { %v5297_v41 = vsub.f32 1.0, %v5169_v32  ;;  %v2941_v54 = vsel %vm2940_vm2, %v16690_v31, %v2937_v26  ;;  %vm2943_vm3 = vcmp.eq.f32.partialorder %v2942_v29, 8.507059e+37  ;;  %v2952_v43 = vadd.f32 %v16695_v27, %v16694_v18  ;;  %v16702_v32 = vld [vmem:[#allocation415_spill] sm:$0xff] }
 0x58c   : > { %v5936_v57 = vmul.f32 %v5808_v46, %v16696_v13  ;;  %v5170_v51 = vmul.f32 %v16697_v37, %v4530_v0  ;;  %v4275_v9 = vmul.f32 %v4147_v62, %v13563_v30  ;;  %v3892_v56 = vadd.f32 1.4214138, %v3764_v52  ;;  %v16703_v18 = vld [vmem:[#allocation251_spill] sm:$0xff] }
 0x58d   : > { %v5553_v8 = vsub.f32 0.0, %v5297_v41  ;;  %v13624_v59 = vsel %vm2943_vm3, %v16698_v42, %v2941_v54  ;;  %vm2954_vm4 = vweird.f32 %v16695_v27  ;;  %v2957_v35 = vand.u32 2147483647, %v16685_v50 }
 0x58e   : > { %vm2983_vm5 = vweird.f32 %v16699_v20  ;;  %6462 = vmatmul.f32.gmra.mxu3 %v5936_v57  ;;  %v5298_v31 = vsub.f32 1.0, %v5170_v51  ;;  %v4403_v26 = vadd.f32 0.2548296, %v4275_v9  ;;  %v4020_v40 = vmul.f32 %v3892_v56, %v13593_v49  ;;  %vm2955_vm6 = vmor %vm2953_vm13, %vm2954_vm4 }
 0x58f   : > { %v3509_v5 = vmul.f32 1.0614054, %v13624_v59  ;;  %vm5427_vm7 = vcmp.lt.f32.partialorder %v16700_v44, 0.0  ;;  %v5681_v55 = vsel %vm5425_vm14, %v5553_v8, %v5297_v41  ;;  %v2956_v60 = vsel %vm2955_vm6, %v16695_v27, %v2952_v43  ;;  %v16704_v41 = vld [vmem:[#allocation194_spill] sm:$0xff]  ;;  %v16705_v43 = vld [vmem:[#allocation413_spill] sm:$0xff] }
 0x590   : > { %vm2958_vm8 = vcmp.eq.f32.partialorder %v2957_v35, 8.507059e+37  ;;  %v2967_v29 = vadd.f32 %v16702_v32, %v16701_v58  ;;  %v5809_v46 = vadd.f32 1.0, %v5681_v55  ;;  %v5554_v0 = vsub.f32 0.0, %v5298_v31  ;;  %v16707_v35 = vld [vmem:[#allocation212_spill] sm:$0xff]  ;;  %v16718_v44 = vld [vmem:[#allocation234_spill] sm:$0xff] }
 0x591   : > { %v4531_v62 = vmul.f32 %v4403_v26, %v13563_v30  ;;  %v4148_v52 = vadd.f32 -0.28449672, %v4020_v40  ;;  %v3637_v54 = vadd.f32 -1.4531521, %v3509_v5  ;;  %v13641_v50 = vsel %vm2958_vm8, %v16703_v18, %v2956_v60  ;;  %v16708_v26 = vld [vmem:[#allocation229_spill] sm:$0xff]  ;;  %v16709_v40 = vld [vmem:[#allocation210_spill] sm:$0xff] }
 0x592   : > { %vm2969_vm9 = vweird.f32 %v16702_v32  ;;  %v2972_v53 = vand.u32 2147483647, %v16692_v45  ;;  %v5937_v13 = vmul.f32 %v5809_v46, %v16704_v41  ;;  %v5682_v27 = vsel %vm5426_vm0, %v5554_v0, %v5298_v31  ;;  %v16710_v60 = vld [vmem:[#allocation240_spill] sm:$0xff]  ;;  %v16711_v46 = vld [vmem:[#allocation246_spill] sm:$0xff]  ;;  %v16715_v41 = vld [vmem:[#allocation223_spill] sm:$0xff] }
 0x593   : > { %v5171_v57 = vmul.f32 %v16705_v43, %v4531_v62  ;;  %v4276_v37 = vmul.f32 %v4148_v52, %v13593_v49  ;;  %vm2970_vm10 = vmor %vm2968_vm1, %vm2969_vm9  ;;  %v5810_v30 = vadd.f32 1.0, %v5682_v27  ;;  %v3765_v51 = vmul.f32 %v3637_v54, %v13624_v59  ;;  %v16716_v27 = vld [vmem:[#allocation200_spill] sm:$0xff] }
 0x594   : > { %v3510_v9 = vmul.f32 1.0614054, %v13641_v50  ;;  %v2971_v56 = vsel %vm2970_vm10, %v16702_v32, %v2967_v29  ;;  %6126 = vmatmul.f32.gmra.mxu0 %v5937_v13  ;;  %vm2973_vm11 = vcmp.eq.f32.partialorder %v2972_v53, 8.507059e+37  ;;  %v2982_v31 = vadd.f32 %v16707_v35, %v16706_v25  ;;  %v16714_v53 = vld [vmem:[#allocation288_spill] sm:$0xff] }
 0x595   : > { %v5299_v8 = vsub.f32 1.0, %v5171_v57  ;;  %v4404_v42 = vadd.f32 0.2548296, %v4276_v37  ;;  %vm5428_vm12 = vcmp.lt.f32.partialorder %v16708_v26, 0.0  ;;  %v5938_v5 = vmul.f32 %v5810_v30, %v16709_v40  ;;  %v6308_v30 = vpop.f32.mrf.mxu2 }
 0x596   : > { %v3893_v45 = vadd.f32 1.4214138, %v3765_v51  ;;  %v3638_v55 = vadd.f32 -1.4531521, %v3510_v9  ;;  %v13660_v58 = vsel %vm2973_vm11, %v16710_v60, %v2971_v56  ;;  %vm2998_vm13 = vweird.f32 %v16711_v46 }
 0x597   : > { %v5555_v0 = vsub.f32 0.0, %v5299_v8  ;;  %v4532_v32 = vmul.f32 %v4404_v42, %v13593_v49  ;;  %v3511_v29 = vmul.f32 1.0614054, %v13660_v58  ;;  %vm2984_vm14 = vweird.f32 %v16707_v35  ;;  %6239 = vmatmul.f32.gmra.mxu1 %v5938_v5  ;;  %v6085_v42 = vpop.f32.mrf.mxu0 }
 0x598   : > { %v4021_v62 = vmul.f32 %v3893_v45, %v13624_v59  ;;  %v3766_v52 = vmul.f32 %v3638_v55, %v13641_v50  ;;  %vm13670_vm15 = vmor %vm2983_vm5, %vm2984_vm14  ;;  %v2987_v18 = vand.u32 2147483647, %v16699_v20  ;;  %v2997_v49 = vadd.f32 %v16715_v41, %v16714_v53  ;;  %v16717_v20 = vld [vmem:[#allocation264_spill] sm:$0xff]  ;;  %v16719_v45 = vld [vmem:[#allocation171_spill] sm:$0xff] }
 0x599   : > { %v5683_v13 = vsel %vm5427_vm7, %v5555_v0, %v5299_v8  ;;  %v5172_v43 = vmul.f32 %v16716_v27, %v4532_v32  ;;  %v3639_v57 = vadd.f32 -1.4531521, %v3511_v29  ;;  %v2986_v37 = vsel %vm13670_vm15, %v16707_v35, %v2982_v31  ;;  %v6421_v0 = vpop.f32.mrf.mxu3  ;;  %v16721_v27 = vld [vmem:[#allocation258_spill] sm:$0xff] }
 0x59a   : > { %v5811_v51 = vadd.f32 1.0, %v5683_v13  ;;  %v4149_v9 = vadd.f32 -0.28449672, %v4021_v62  ;;  %v3894_v56 = vadd.f32 1.4214138, %v3766_v52  ;;  %vm2988_vm0 = vcmp.eq.f32.partialorder %v2987_v18, 8.507059e+37 }
 0x59b   : > { %vm3013_vm1 = vweird.f32 %v16717_v20  ;;  %v5300_v25 = vsub.f32 1.0, %v5172_v43  ;;  %v3767_v40 = vmul.f32 %v3639_v57, %v13660_v58  ;;  %v13686_v8 = vsel %vm2988_vm0, %v16718_v44, %v2986_v37  ;;  %v16720_v13 = vld [vmem:[#allocation153_spill] sm:$0xff] }
 0x59c   : > { %v6309_v5 = vadd.f32 %v6308_v30, %v13610_v15  ;;  %v5939_v55 = vmul.f32 %v5811_v51, %v16719_v45  ;;  %v4277_v35 = vmul.f32 %v4149_v9, %v13624_v59  ;;  %v4022_v31 = vmul.f32 %v3894_v56, %v13641_v50  ;;  %v6198_v15 = vpop.f32.mrf.mxu1 }
 0x59d   : > { %v3512_v60 = vmul.f32 1.0614054, %v13686_v8  ;;  %v5556_v32 = vsub.f32 0.0, %v5300_v25  ;;  %v3895_v29 = vadd.f32 1.4214138, %v3767_v40  ;;  %v6086_v52 = vadd.f32 %v13273_v48, %v6085_v42  ;;  %v16723_v40 = vld [vmem:[#allocation257_spill] sm:$0xff] }
 0x59e   : > { %v6422_v62 = vadd.f32 %v6421_v0, %v6309_v5  ;;  %6352 = vmatmul.f32.gmra.mxu2 %v5939_v55  ;;  %v4405_v54 = vadd.f32 0.2548296, %v4277_v35  ;;  %v4150_v18 = vadd.f32 -0.28449672, %v4022_v31  ;;  %vm2999_vm2 = vweird.f32 %v16715_v41  ;;  %v16724_v5 = vld [vmem:[#allocation409_spill] sm:$0xff]  ;;  %v16725_v55 = vld [vmem:[#allocation239_spill] sm:$0xff] }
 0x59f   : > { %v3640_v53 = vadd.f32 -1.4531521, %v3512_v60  ;;  %vm5429_vm3 = vcmp.lt.f32.partialorder %v16720_v13, 0.0  ;;  %vm3028_vm4 = vweird.f32 %v16721_v27  ;;  %v5684_v43 = vsel %vm5428_vm12, %v5556_v32, %v5300_v25  ;;  %vm3000_vm5 = vmor %vm2998_vm13, %vm2999_vm2  ;;  %v16722_v25 = vld [vmem:[#allocation291_spill] sm:$0xff]  ;;  %v16726_v60 = vld [vmem:[#allocation174_spill] sm:$0xff] }
 0x5a0   : > { %v4023_v57 = vmul.f32 %v3895_v29, %v13660_v58  ;;  %6501 = vst [vmem:[%s12891_s28 + $0x40] sm:$0xff] %v6422_v62  ;;  %v13701_v37 = vadd.f32 %v6198_v15, %v6086_v52  ;;  %v3002_v48 = vand.u32 2147483647, %v16711_v46  ;;  %v5812_v30 = vadd.f32 1.0, %v5684_v43  ;;  %v16727_v32 = vld [vmem:[#allocation227_spill] sm:$0xff]  ;;  %v16729_v15 = vld [vmem:[#allocation418_spill] sm:$0xff] }
 0x5a1   : > { %v4533_v51 = vmul.f32 %v4405_v54, %v13624_v59  ;;  %v4278_v9 = vmul.f32 %v4150_v18, %v13641_v50  ;;  %v3768_v56 = vmul.f32 %v3640_v53, %v13686_v8  ;;  %v3001_v26 = vsel %vm3000_vm5, %v16715_v41, %v2997_v49  ;;  %v16728_v53 = vld [vmem:[#allocation237_spill] sm:$0xff]  ;;  %v16735_v13 = vld [vmem:[#allocation250_spill] sm:$0xff] }
 0x5a2   : > { %v4151_v42 = vadd.f32 -0.28449672, %v4023_v57  ;;  %vm3003_vm6 = vcmp.eq.f32.partialorder %v3002_v48, 8.507059e+37  ;;  %v3012_v44 = vadd.f32 %v16723_v40, %v16722_v25  ;;  %v5940_v45 = vmul.f32 %v5812_v30, %v16724_v5  ;;  %v16730_v57 = vld [vmem:[#allocation236_spill] sm:$0xff] }
 0x5a3   : > { %v5173_v35 = vmul.f32 %v16725_v55, %v4533_v51  ;;  %v4406_v31 = vadd.f32 0.2548296, %v4278_v9  ;;  %v3896_v59 = vadd.f32 1.4214138, %v3768_v56  ;;  %vm5430_vm7 = vcmp.lt.f32.partialorder %v16726_v60, 0.0  ;;  %v16731_v30 = vld [vmem:[#allocation416_spill] sm:$0xff] }
 0x5a4   : > { %v4279_v0 = vmul.f32 %v4151_v42, %v13660_v58  ;;  %v13717_v46 = vsel %vm3003_vm6, %v16727_v32, %v3001_v26  ;;  %vm3014_vm8 = vweird.f32 %v16723_v40  ;;  %v3017_v41 = vand.u32 2147483647, %v16717_v20  ;;  %6465 = vmatmul.f32.gmra.mxu3 %v5940_v45  ;;  %v16732_v56 = vld [vmem:[#allocation260_spill] sm:$0xff]  ;;  %v16733_v20 = vld [vmem:[#allocation277_spill] sm:$0xff] }
 0x5a5   : > { %v5301_v49 = vsub.f32 1.0, %v5173_v35  ;;  %v4534_v29 = vmul.f32 %v4406_v31, %v13641_v50  ;;  %v4024_v62 = vmul.f32 %v3896_v59, %v13686_v8  ;;  %v3513_v52 = vmul.f32 1.0614054, %v13717_v46  ;;  %vm3015_vm9 = vmor %vm3013_vm1, %vm3014_vm8 }
 0x5a6   : > { %v4407_v54 = vadd.f32 0.2548296, %v4279_v0  ;;  %v3016_v18 = vsel %vm3015_vm9, %v16723_v40, %v3012_v44  ;;  %vm3018_vm10 = vcmp.eq.f32.partialorder %v3017_v41, 8.507059e+37  ;;  %v3027_v43 = vadd.f32 %v16729_v15, %v16728_v53 }
 0x5a7   : > { %vm5431_vm11 = vcmp.lt.f32.partialorder %v16730_v57, 0.0  ;;  %v5557_v48 = vsub.f32 0.0, %v5301_v49  ;;  %v5174_v51 = vmul.f32 %v16731_v30, %v4534_v29  ;;  %v4152_v50 = vadd.f32 -0.28449672, %v4024_v62 }
 0x5a8   : > { %v3641_v9 = vadd.f32 -1.4531521, %v3513_v52  ;;  %vm3043_vm12 = vweird.f32 %v16732_v56  ;;  %v4535_v42 = vmul.f32 %v4407_v54, %v13660_v58  ;;  %v13734_v26 = vsel %vm3018_vm10, %v16733_v20, %v3016_v18  ;;  %v16734_v58 = vld [vmem:[#allocation252_spill] sm:$0xff]  ;;  %v16737_v54 = vld [vmem:[#allocation266_spill] sm:$0xff]  ;;  %v16740_v20 = vld [vmem:[#allocation235_spill] sm:$0xff] }
 0x5a9   : > { %vm3029_vm13 = vweird.f32 %v16729_v15  ;;  %v3032_v25 = vand.u32 2147483647, %v16721_v27  ;;  %v5685_v40 = vsel %vm5429_vm3, %v5557_v48, %v5301_v49  ;;  %v5302_v44 = vsub.f32 1.0, %v5174_v51  ;;  %v16736_v49 = vld [vmem:[#allocation222_spill] sm:$0xff] }
 0x5aa   : > { %v4280_v5 = vmul.f32 %v4152_v50, %v13686_v8  ;;  %v3769_v45 = vmul.f32 %v3641_v9, %v13717_v46  ;;  %vm3030_vm14 = vmor %vm3028_vm4, %vm3029_vm13  ;;  %v5813_v55 = vadd.f32 1.0, %v5685_v40  ;;  %v5175_v35 = vmul.f32 %v16734_v58, %v4535_v42  ;;  %v16738_v50 = vld [vmem:[#allocation287_spill] sm:$0xff]  ;;  %v16739_v9 = vld [vmem:[#allocation221_spill] sm:$0xff] }
 0x5ab   : > { %v3514_v31 = vmul.f32 1.0614054, %v13734_v26  ;;  %v3031_v59 = vsel %vm3030_vm14, %v16729_v15, %v3027_v43  ;;  %v5558_v0 = vsub.f32 0.0, %v5302_v44  ;;  %vm3033_vm15 = vcmp.eq.f32.partialorder %v3032_v25, 8.507059e+37  ;;  %v16741_v25 = vld [vmem:[#allocation269_spill] sm:$0xff] }
 0x5ac   : > { %v4408_v32 = vadd.f32 0.2548296, %v4280_v5  ;;  %v3897_v41 = vadd.f32 1.4214138, %v3769_v45  ;;  %vm5432_vm0 = vcmp.lt.f32.partialorder %v16735_v13, 0.0  ;;  %v5941_v29 = vmul.f32 %v5813_v55, %v16736_v49 }
 0x5ad   : > { %v5303_v62 = vsub.f32 1.0, %v5175_v35  ;;  %v3642_v52 = vadd.f32 -1.4531521, %v3514_v31  ;;  %v13750_v27 = vsel %vm3033_vm15, %v16737_v54, %v3031_v59  ;;  %v5686_v18 = vsel %vm5430_vm7, %v5558_v0, %v5302_v44 }
 0x5ae   : > { %v4536_v53 = vmul.f32 %v4408_v32, %v13686_v8  ;;  %v4025_v15 = vmul.f32 %v3897_v41, %v13717_v46  ;;  %v3515_v43 = vmul.f32 1.0614054, %v13750_v27  ;;  %6129 = vmatmul.f32.gmra.mxu0 %v5941_v29  ;;  %v5814_v48 = vadd.f32 1.0, %v5686_v18  ;;  %v16742_v8 = vld [vmem:[#allocation185_spill] sm:$0xff]  ;;  %v16745_v41 = vld [vmem:[#allocation268_spill] sm:$0xff]  ;;  %v6311_v29 = vpop.f32.mrf.mxu2 }
 0x5af   : > { %v5559_v30 = vsub.f32 0.0, %v5303_v62  ;;  %v3770_v51 = vmul.f32 %v3642_v52, %v13734_v26  ;;  %v3042_v42 = vadd.f32 %v16739_v9, %v16738_v50  ;;  %vm3058_vm1 = vweird.f32 %v16740_v20  ;;  %v16746_v52 = vld [vmem:[#allocation241_spill] sm:$0xff] }
 0x5b0   : > { %v5176_v40 = vmul.f32 %v16741_v25, %v4536_v53  ;;  %v4153_v60 = vadd.f32 -0.28449672, %v4025_v15  ;;  %v3643_v44 = vadd.f32 -1.4531521, %v3515_v43  ;;  %vm3044_vm2 = vweird.f32 %v16739_v9  ;;  %v6088_v15 = vpop.f32.mrf.mxu0  ;;  %v16747_v43 = vld [vmem:[#allocation233_spill] sm:$0xff] }
 0x5b1   : > { %v5942_v5 = vmul.f32 %v5814_v48, %v16742_v8  ;;  %v5687_v45 = vsel %vm5431_vm11, %v5559_v30, %v5303_v62  ;;  %v3898_v55 = vadd.f32 1.4214138, %v3770_v51  ;;  %v3047_v58 = vand.u32 2147483647, %v16732_v56  ;;  %vm13771_vm3 = vmor %vm3043_vm12, %vm3044_vm2  ;;  %v16748_v30 = vld [vmem:[#allocation262_spill] sm:$0xff] }
 0x5b2   : > { %v5815_v35 = vadd.f32 1.0, %v5687_v45  ;;  %v5304_v31 = vsub.f32 1.0, %v5176_v40  ;;  %v4281_v59 = vmul.f32 %v4153_v60, %v13717_v46  ;;  %v3771_v0 = vmul.f32 %v3643_v44, %v13750_v27  ;;  %v6424_v44 = vpop.f32.mrf.mxu3 }
 0x5b3   : > { %vm3073_vm4 = vweird.f32 %v16745_v41  ;;  %6242 = vmatmul.f32.gmra.mxu1 %v5942_v5  ;;  %v4026_v57 = vmul.f32 %v3898_v55, %v13734_v26  ;;  %v3046_v49 = vsel %vm13771_vm3, %v16739_v9, %v3042_v42  ;;  %vm3048_vm5 = vcmp.eq.f32.partialorder %v3047_v58, 8.507059e+37  ;;  %v13791_v9 = vld [vmem:[%s14512_s4] ss:$0 sm:$0xff]  ;;  %v16749_v58 = vld [vmem:[#allocation289_spill] sm:$0xff] }
 0x5b4   : > { %v3057_v62 = vadd.f32 %v11667_v61, %v11787_v21  ;;  %v5943_v56 = vmul.f32 %v5815_v35, %v16746_v52  ;;  %v5560_v54 = vsub.f32 0.0, %v5304_v31  ;;  %v4409_v18 = vadd.f32 0.2548296, %v4281_v59  ;;  %v16750_v35 = vld [vmem:[#allocation259_spill] sm:$0xff]  ;;  %v16755_v52 = vld [vmem:[#allocation245_spill] sm:$0xff] }
 0x5b5   : > { %v3899_v53 = vadd.f32 1.4214138, %v3771_v0  ;;  %vm5433_vm6 = vcmp.lt.f32.partialorder %v16747_v43, 0.0  ;;  %v4154_v48 = vadd.f32 -0.28449672, %v4026_v57  ;;  %v13785_v51 = vsel %vm3048_vm5, %v16748_v30, %v3046_v49  ;;  %v16763_v43 = vld [vmem:[#allocation197_spill] sm:$0xff] }
 0x5b6   : > { %v6312_v50 = vadd.f32 %v6311_v29, %v13701_v37  ;;  %v6089_v21 = vadd.f32 %v13791_v9, %v6088_v15  ;;  %6355 = vmatmul.f32.gmra.mxu2 %v5943_v56  ;;  %v5688_v42 = vsel %vm5432_vm0, %v5560_v54, %v5304_v31  ;;  %v4537_v25 = vmul.f32 %v4409_v18, %v13717_v46  ;;  %v6201_v37 = vpop.f32.mrf.mxu1  ;;  %v16751_v46 = vld [vmem:[#allocation196_spill] sm:$0xff]  ;;  %v16754_v29 = vld [vmem:[#allocation310_spill] sm:$0xff]  ;;  %v16756_v54 = vld [vmem:[#allocation191_spill] sm:$0xff] }
 0x5b7   : > { %v4027_v40 = vmul.f32 %v3899_v53, %v13750_v27  ;;  %v3516_v60 = vmul.f32 1.0614054, %v13785_v51  ;;  %v5816_v8 = vadd.f32 1.0, %v5688_v42  ;;  %v4282_v5 = vmul.f32 %v4154_v48, %v13734_v26 }
 0x5b8   : > { %v6425_v45 = vadd.f32 %v6424_v44, %v6312_v50  ;;  %v13800_v55 = vadd.f32 %v6201_v37, %v6089_v21  ;;  %vm3088_vm7 = vweird.f32 %v16749_v58  ;;  %v5177_v13 = vmul.f32 %v16750_v35, %v4537_v25  ;;  %v16757_v25 = vld [vmem:[#allocation275_spill] sm:$0xff] }
 0x5b9   : > { %v4155_v31 = vadd.f32 -0.28449672, %v4027_v40  ;;  %v3644_v59 = vadd.f32 -1.4531521, %v3516_v60  ;;  %vm3059_vm8 = vweird.f32 %v11667_v61  ;;  %v5944_v0 = vmul.f32 %v5816_v8, %v16751_v46  ;;  %v16758_v60 = vld [vmem:[#allocation242_spill] sm:$0xff] }
 0x5ba   : > { %v4410_v32 = vadd.f32 0.2548296, %v4282_v5  ;;  %6502 = vst [vmem:[%s12891_s28 + $0x48] sm:$0xff] %v6425_v45  ;;  %vm13809_vm9 = vmor %vm3058_vm1, %vm3059_vm8  ;;  %v3062_v49 = vand.u32 2147483647, %v16740_v20  ;;  %v3072_v56 = vadd.f32 %v16755_v52, %v16754_v29  ;;  %vm5434_vm10 = vcmp.lt.f32.partialorder %v16756_v54, 0.0 }
 0x5bb   : > { %v5305_v18 = vsub.f32 1.0, %v5177_v13  ;;  %v4283_v53 = vmul.f32 %v4155_v31, %v13750_v27  ;;  %v3772_v15 = vmul.f32 %v3644_v59, %v13785_v51  ;;  %v3061_v48 = vsel %vm13809_vm9, %v11667_v61, %v3057_v62  ;;  %6468 = vmatmul.f32.gmra.mxu3 %v5944_v0  ;;  %v16759_v61 = vld [vmem:[#allocation283_spill] sm:$0xff]  ;;  %v16760_v62 = vld [vmem:[#allocation270_spill] sm:$0xff]  ;;  %v16771_v54 = vld [vmem:[#allocation249_spill] sm:$0xff] }
 0x5bc   : > { %v4538_v30 = vmul.f32 %v4410_v32, %v13734_v26  ;;  %vm3063_vm11 = vcmp.eq.f32.partialorder %v3062_v49, 8.507059e+37  ;;  %vm3074_vm12 = vweird.f32 %v16755_v52  ;;  %v3077_v20 = vand.u32 2147483647, %v16745_v41  ;;  %v16761_v41 = vld [vmem:[#allocation309_spill] sm:$0xff]  ;;  %v16762_v0 = vld [vmem:[#allocation282_spill] sm:$0xff] }
 0x5bd   : > { %v5561_v50 = vsub.f32 0.0, %v5305_v18  ;;  %v4411_v21 = vadd.f32 0.2548296, %v4283_v53  ;;  %v3900_v42 = vadd.f32 1.4214138, %v3772_v15  ;;  %v13826_v40 = vsel %vm3063_vm11, %v16757_v25, %v3061_v48  ;;  %vm3075_vm13 = vmor %vm3073_vm4, %vm3074_vm12  ;;  %v16768_v25 = vld [vmem:[#allocation261_spill] sm:$0xff] }
 0x5be   : > { %vm5435_vm14 = vcmp.lt.f32.partialorder %v16758_v60, 0.0  ;;  %vm3103_vm15 = vweird.f32 %v16759_v61  ;;  %v5178_v26 = vmul.f32 %v16760_v62, %v4538_v30  ;;  %v3517_v44 = vmul.f32 1.0614054, %v13826_v40  ;;  %v16766_v30 = vld [vmem:[#allocation290_spill] sm:$0xff]  ;;  %v16774_v60 = vld [vmem:[#allocation303_spill] sm:$0xff] }
 0x5bf   : > { %v3076_v37 = vsel %vm3075_vm13, %v16755_v52, %v3072_v56  ;;  %vm3078_vm0 = vcmp.eq.f32.partialorder %v3077_v20, 8.507059e+37  ;;  %v5689_v8 = vsel %vm5433_vm6, %v5561_v50, %v5305_v18  ;;  %v4539_v5 = vmul.f32 %v4411_v21, %v13750_v27 }
 0x5c0   : > { %v4028_v45 = vmul.f32 %v3900_v42, %v13785_v51  ;;  %v13840_v35 = vsel %vm3078_vm0, %v16761_v41, %v3076_v37  ;;  %v5817_v13 = vadd.f32 1.0, %v5689_v8  ;;  %v5306_v31 = vsub.f32 1.0, %v5178_v26  ;;  %v16767_v42 = vld [vmem:[#allocation419_spill] sm:$0xff]  ;;  %v16769_v8 = vld [vmem:[#allocation253_spill] sm:$0xff] }
 0x5c1   : > { %v3645_v59 = vadd.f32 -1.4531521, %v3517_v44  ;;  %v3518_v46 = vmul.f32 1.0614054, %v13840_v35  ;;  %v5179_v32 = vmul.f32 %v16762_v0, %v4539_v5  ;;  %v3087_v49 = vadd.f32 %v11802_v47, %v11873_v28  ;;  %v16770_v5 = vld [vmem:[#allocation300_spill] sm:$0xff] }
 0x5c2   : > { %v4156_v57 = vadd.f32 -0.28449672, %v4028_v45  ;;  %vm3089_vm1 = vweird.f32 %v11802_v47  ;;  %v5945_v27 = vmul.f32 %v5817_v13, %v16763_v43  ;;  %v5562_v29 = vsub.f32 0.0, %v5306_v31 }
 0x5c3   : > { %v3773_v52 = vmul.f32 %v3645_v59, %v13826_v40  ;;  %v3646_v56 = vadd.f32 -1.4531521, %v3518_v46  ;;  %vm13851_vm2 = vmor %vm3088_vm7, %vm3089_vm1  ;;  %v5307_v53 = vsub.f32 1.0, %v5179_v32  ;;  %v3092_v48 = vand.u32 2147483647, %v16749_v58 }
 0x5c4   : > { %v4284_v15 = vmul.f32 %v4156_v57, %v13785_v51  ;;  %v3091_v28 = vsel %vm13851_vm2, %v11802_v47, %v3087_v49  ;;  %vm3118_vm3 = vweird.f32 %v16766_v30  ;;  %6132 = vmatmul.f32.gmra.mxu0 %v5945_v27  ;;  %v5690_v20 = vsel %vm5434_vm10, %v5562_v29, %v5306_v31 }
 0x5c5   : > { %v3901_v50 = vadd.f32 1.4214138, %v3773_v52  ;;  %v3774_v21 = vmul.f32 %v3646_v56, %v13840_v35  ;;  %v3102_v62 = vadd.f32 %v16768_v25, %v16767_v42  ;;  %v5818_v26 = vadd.f32 1.0, %v5690_v20  ;;  %v16776_v52 = vld [vmem:[#allocation307_spill] sm:$0xff]  ;;  %v16777_v56 = vld [vmem:[#allocation302_spill] sm:$0xff]  ;;  %v6314_v20 = vpop.f32.mrf.mxu2 }
 0x5c6   : > { %v5563_v44 = vsub.f32 0.0, %v5307_v53  ;;  %v4412_v37 = vadd.f32 0.2548296, %v4284_v15  ;;  %vm3093_vm4 = vcmp.eq.f32.partialorder %v3092_v48, 8.507059e+37  ;;  %vm5436_vm5 = vcmp.lt.f32.partialorder %v16769_v8, 0.0  ;;  %v16788_v8 = vld [vmem:[#allocation280_spill] sm:$0xff] }
 0x5c7   : > { %v4029_v47 = vmul.f32 %v3901_v50, %v13826_v40  ;;  %v3902_v58 = vadd.f32 1.4214138, %v3774_v21  ;;  %v13869_v45 = vsel %vm3093_vm4, %v16770_v5, %v3091_v28  ;;  %vm3104_vm6 = vweird.f32 %v16768_v25 }
 0x5c8   : > { %v5946_v41 = vmul.f32 %v5818_v26, %v16771_v54  ;;  %v5691_v13 = vsel %vm5435_vm14, %v5563_v44, %v5307_v53  ;;  %v4540_v31 = vmul.f32 %v4412_v37, %v13785_v51  ;;  %v3519_v59 = vmul.f32 1.0614054, %v13869_v45  ;;  %vm13879_vm7 = vmor %vm3103_vm15, %vm3104_vm6  ;;  %v16775_v51 = vld [vmem:[#allocation298_spill] sm:$0xff]  ;;  %v16778_v53 = vld [vmem:[#allocation272_spill] sm:$0xff]  ;;  %v6427_v37 = vpop.f32.mrf.mxu3 }
 0x5c9   : > { %v5819_v0 = vadd.f32 1.0, %v5691_v13  ;;  %v4157_v32 = vadd.f32 -0.28449672, %v4029_v47  ;;  %v4030_v57 = vmul.f32 %v3902_v58, %v13840_v35  ;;  %v3106_v49 = vsel %vm13879_vm7, %v16768_v25, %v3102_v62  ;;  %v6091_v25 = vpop.f32.mrf.mxu0  ;;  %v16779_v26 = vld [vmem:[#allocation292_spill] sm:$0xff]  ;;  %v16780_v58 = vld [vmem:[#allocation271_spill] sm:$0xff] }
 0x5ca   : > { %vm3133_vm8 = vweird.f32 %v16774_v60  ;;  %6245 = vmatmul.f32.gmra.mxu1 %v5946_v41  ;;  %v5180_v43 = vmul.f32 %v16775_v51, %v4540_v31  ;;  %v3647_v27 = vadd.f32 -1.4531521, %v3519_v59  ;;  %v3107_v29 = vand.u32 2147483647, %v16759_v61  ;;  %v16783_v59 = vld [vmem:[#allocation313_spill] sm:$0xff]  ;;  %v16795_v31 = vld [vmem:[#allocation334_spill] sm:$0xff] }
 0x5cb   : > { %v3117_v18 = vadd.f32 %v16777_v56, %v16776_v52  ;;  %v5947_v15 = vmul.f32 %v5819_v0, %v16778_v53  ;;  %v4285_v28 = vmul.f32 %v4157_v32, %v13826_v40  ;;  %v4158_v48 = vadd.f32 -0.28449672, %v4030_v57 }
 0x5cc   : > { %vm3119_vm9 = vweird.f32 %v16777_v56  ;;  %v5308_v50 = vsub.f32 1.0, %v5180_v43  ;;  %v3775_v21 = vmul.f32 %v3647_v27, %v13869_v45  ;;  %vm3108_vm10 = vcmp.eq.f32.partialorder %v3107_v29, 8.507059e+37 }
 0x5cd   : > { %v6315_v42 = vadd.f32 %v6314_v20, %v13800_v55  ;;  %6358 = vmatmul.f32.gmra.mxu2 %v5947_v15  ;;  %v4413_v61 = vadd.f32 0.2548296, %v4285_v28  ;;  %v4286_v62 = vmul.f32 %v4158_v48, %v13840_v35  ;;  %v13899_v44 = vsel %vm3108_vm10, %v16779_v26, %v3106_v49  ;;  %v6204_v55 = vpop.f32.mrf.mxu1  ;;  %vm13908_vm12 = vmor %vm3118_vm3, %vm3119_vm9  ;;  %v16784_v49 = vld [vmem:[#allocation417_spill] sm:$0xff] }
 0x5ce   : > { %v6092_v47 = vadd.f32 %v13791_v9, %v6091_v25  ;;  %vm5437_vm11 = vcmp.lt.f32.partialorder %v16780_v58, 0.0  ;;  %v5564_v5 = vsub.f32 0.0, %v5308_v50  ;;  %v3903_v54 = vadd.f32 1.4214138, %v3775_v21  ;;  %v16786_v28 = vld [vmem:[#allocation333_spill] sm:$0xff] }
 0x5cf   : > { %v3520_v41 = vmul.f32 1.0614054, %v13899_v44  ;;  %v6428_v13 = vadd.f32 %v6427_v37, %v6315_v42  ;;  %vm3148_vm13 = vweird.f32 %v16783_v59  ;;  %v4541_v46 = vmul.f32 %v4413_v61, %v13826_v40  ;;  %v16785_v40 = vld [vmem:[#allocation281_spill] sm:$0xff]  ;;  %v16789_v42 = vld [vmem:[#allocation243_spill] sm:$0xff] }
 0x5d0   : > { %v4414_v0 = vadd.f32 0.2548296, %v4286_v62  ;;  %v13914_v32 = vadd.f32 %v6204_v55, %v6092_v47  ;;  %v3121_v57 = vsel %vm13908_vm12, %v16777_v56, %v3117_v18  ;;  %vm5438_vm14 = vcmp.lt.f32.partialorder %v16784_v49, 0.0  ;;  %v16787_v48 = vld [vmem:[#allocation305_spill] sm:$0xff]  ;;  %v16794_v55 = vld [vmem:[#allocation276_spill] sm:$0xff]  ;;  %v16801_v49 = vld [vmem:[#allocation326_spill] sm:$0xff] }
 0x5d1   : > { %v5692_v51 = vsel %vm5436_vm5, %v5564_v5, %v5308_v50  ;;  %v4031_v43 = vmul.f32 %v3903_v54, %v13869_v45  ;;  %v3648_v27 = vadd.f32 -1.4531521, %v3520_v41  ;;  %6503 = vst [vmem:[%s12891_s28 + $0x50] sm:$0xff] %v6428_v13  ;;  %v3122_v29 = vand.u32 2147483647, %v16766_v30  ;;  %v16790_v30 = vld [vmem:[#allocation295_spill] sm:$0xff] }
 0x5d2   : > { %v5820_v52 = vadd.f32 1.0, %v5692_v51  ;;  %v5181_v53 = vmul.f32 %v16785_v40, %v4541_v46  ;;  %v4542_v15 = vmul.f32 %v4414_v0, %v13840_v35  ;;  %v3132_v20 = vadd.f32 %v16787_v48, %v16786_v28  ;;  %v16793_v5 = vld [vmem:[#allocation422_spill] sm:$0xff]  ;;  %v16802_v35 = vld [vmem:[#allocation345_spill] sm:$0xff] }
 0x5d3   : > { %v4159_v56 = vadd.f32 -0.28449672, %v4031_v43  ;;  %v3776_v18 = vmul.f32 %v3648_v27, %v13899_v44  ;;  %vm3123_vm15 = vcmp.eq.f32.partialorder %v3122_v29, 8.507059e+37  ;;  %vm3134_vm0 = vweird.f32 %v16787_v48  ;;  %v16796_v43 = vld [vmem:[#allocation279_spill] sm:$0xff] }
 0x5d4   : > { %v5948_v50 = vmul.f32 %v5820_v52, %v16788_v8  ;;  %v5309_v21 = vsub.f32 1.0, %v5181_v53  ;;  %v5182_v25 = vmul.f32 %v16789_v42, %v4542_v15  ;;  %v13934_v61 = vsel %vm3123_vm15, %v16790_v30, %v3121_v57  ;;  %vm13938_vm1 = vmor %vm3133_vm8, %vm3134_vm0 }
 0x5d5   : > { %v4287_v62 = vmul.f32 %v4159_v56, %v13869_v45  ;;  %v3904_v26 = vadd.f32 1.4214138, %v3776_v18  ;;  %v3521_v37 = vmul.f32 1.0614054, %v13934_v61  ;;  %v3136_v47 = vsel %vm13938_vm1, %v16787_v48, %v3132_v20  ;;  %v16797_v48 = vld [vmem:[#allocation297_spill] sm:$0xff] }
 0x5d6   : > { %vm3163_vm2 = vweird.f32 %v16793_v5  ;;  %6471 = vmatmul.f32.gmra.mxu3 %v5948_v50  ;;  %v5565_v54 = vsub.f32 0.0, %v5309_v21  ;;  %v5310_v41 = vsub.f32 1.0, %v5182_v25  ;;  %v3137_v13 = vand.u32 2147483647, %v16774_v60  ;;  %v16798_v56 = vld [vmem:[#allocation213_spill] sm:$0xff]  ;;  %v16800_v25 = vld [vmem:[#allocation331_spill] sm:$0xff] }
 0x5d7   : > { %v3147_v46 = vadd.f32 %v16795_v31, %v16794_v55  ;;  %v4415_v0 = vadd.f32 0.2548296, %v4287_v62  ;;  %v4032_v57 = vmul.f32 %v3904_v26, %v13899_v44  ;;  %v3649_v51 = vadd.f32 -1.4531521, %v3521_v37  ;;  %v16799_v50 = vld [vmem:[#allocation293_spill] sm:$0xff] }
 0x5d8   : > { %vm3149_vm3 = vweird.f32 %v16795_v31  ;;  %vm5439_vm4 = vcmp.lt.f32.partialorder %v16796_v43, 0.0  ;;  %v5693_v27 = vsel %vm5437_vm11, %v5565_v54, %v5309_v21  ;;  %v5566_v29 = vsub.f32 0.0, %v5310_v41  ;;  %v16803_v26 = vld [vmem:[#allocation273_spill] sm:$0xff] }
 0x5d9   : > { %vm3138_vm5 = vcmp.eq.f32.partialorder %v3137_v13, 8.507059e+37  ;;  %v3152_v52 = vand.u32 2147483647, %v16783_v59  ;;  %v5821_v40 = vadd.f32 1.0, %v5693_v27  ;;  %v4543_v60 = vmul.f32 %v4415_v0, %v13869_v45  ;;  %vm3150_vm6 = vmor %vm3148_vm13, %vm3149_vm3  ;;  %v16804_v13 = vld [vmem:[#allocation244_spill] sm:$0xff]  ;;  %v16805_v0 = vld [vmem:[#allocation321_spill] sm:$0xff] }
 0x5da   : > { %v4160_v53 = vadd.f32 -0.28449672, %v4032_v57  ;;  %v3777_v15 = vmul.f32 %v3649_v51, %v13934_v61  ;;  %v5694_v28 = vsel %vm5438_vm14, %v5566_v29, %v5310_v41  ;;  %v13964_v20 = vsel %vm3138_vm5, %v16797_v48, %v3136_v47  ;;  %v16807_v48 = vld [vmem:[#allocation265_spill] sm:$0xff] }
 0x5db   : > { %v3151_v58 = vsel %vm3150_vm6, %v16795_v31, %v3147_v46  ;;  %vm3153_vm7 = vcmp.eq.f32.partialorder %v3152_v52, 8.507059e+37  ;;  %v5949_v18 = vmul.f32 %v5821_v40, %v16798_v56  ;;  %v5822_v8 = vadd.f32 1.0, %v5694_v28  ;;  %v16806_v28 = vld [vmem:[#allocation322_spill] sm:$0xff]  ;;  %v16808_v56 = vld [vmem:[#allocation335_spill] sm:$0xff] }
 0x5dc   : > { %v5183_v45 = vmul.f32 %v16799_v50, %v4543_v60  ;;  %v4288_v21 = vmul.f32 %v4160_v53, %v13899_v44  ;;  %v3905_v42 = vadd.f32 1.4214138, %v3777_v15  ;;  %v3522_v59 = vmul.f32 1.0614054, %v13964_v20  ;;  %v6317_v53 = vpop.f32.mrf.mxu2  ;;  %v6094_v15 = vpop.f32.mrf.mxu0 }
 0x5dd   : > { %v13972_v30 = vsel %vm3153_vm7, %v16800_v25, %v3151_v58  ;;  %v3162_v62 = vadd.f32 %v16802_v35, %v16801_v49  ;;  %6135 = vmatmul.f32.gmra.mxu0 %v5949_v18  ;;  %v5950_v37 = vmul.f32 %v5822_v8, %v16803_v26  ;;  %vm5440_vm8 = vcmp.lt.f32.partialorder %v16804_v13, 0.0  ;;  %v16809_v25 = vld [vmem:[#allocation320_spill] sm:$0xff] }
 0x5de   : > { %v5311_v47 = vsub.f32 1.0, %v5183_v45  ;;  %v4416_v54 = vadd.f32 0.2548296, %v4288_v21  ;;  %v3523_v41 = vmul.f32 1.0614054, %v13972_v30  ;;  %v4033_v55 = vmul.f32 %v3905_v42, %v13934_v61 }
 0x5df   : > { %v3650_v31 = vadd.f32 -1.4531521, %v3522_v59  ;;  %vm3164_vm9 = vweird.f32 %v16802_v35  ;;  %v3167_v46 = vand.u32 2147483647, %v16793_v5  ;;  %vm3178_vm10 = vweird.f32 %v16805_v0  ;;  %6248 = vmatmul.f32.gmra.mxu1 %v5950_v37  ;;  %v6430_v37 = vpop.f32.mrf.mxu3 }
 0x5e0   : > { %v5567_v57 = vsub.f32 0.0, %v5311_v47  ;;  %v4544_v51 = vmul.f32 %v4416_v54, %v13899_v44  ;;  %v3651_v27 = vadd.f32 -1.4531521, %v3523_v41  ;;  %vm3165_vm11 = vmor %vm3163_vm2, %vm3164_vm9  ;;  %v3177_v29 = vadd.f32 %v12076_v33, %v12132_v7  ;;  %v16810_v54 = vld [vmem:[#allocation247_spill] sm:$0xff] }
 0x5e1   : > { %v4161_v52 = vadd.f32 -0.28449672, %v4033_v55  ;;  %v3778_v40 = vmul.f32 %v3650_v31, %v13964_v20  ;;  %v3166_v60 = vsel %vm3165_vm11, %v16802_v35, %v3162_v62  ;;  %vm3168_vm12 = vcmp.eq.f32.partialorder %v3167_v46, 8.507059e+37 }
 0x5e2   : > { %vm3193_vm13 = vweird.f32 %v16806_v28  ;;  %v5695_v44 = vsel %vm5439_vm4, %v5567_v57, %v5311_v47  ;;  %v5184_v58 = vmul.f32 %v16807_v48, %v4544_v51  ;;  %v3779_v5 = vmul.f32 %v3651_v27, %v13972_v30  ;;  %v6207_v47 = vpop.f32.mrf.mxu1 }
 0x5e3   : > { %v13996_v18 = vsel %vm3168_vm12, %v16808_v56, %v3166_v60  ;;  %v5823_v7 = vadd.f32 1.0, %v5695_v44  ;;  %v4289_v8 = vmul.f32 %v4161_v52, %v13934_v61  ;;  %v3906_v50 = vadd.f32 1.4214138, %v3778_v40 }
 0x5e4   : > { %v3524_v45 = vmul.f32 1.0614054, %v13996_v18  ;;  %v5312_v21 = vsub.f32 1.0, %v5184_v58  ;;  %v3907_v42 = vadd.f32 1.4214138, %v3779_v5  ;;  %v6318_v59 = vadd.f32 %v6317_v53, %v13914_v32  ;;  %v16812_v5 = vld [vmem:[#allocation301_spill] sm:$0xff] }
 0x5e5   : > { %v6095_v43 = vadd.f32 %v13791_v9, %v6094_v15  ;;  %v5951_v49 = vmul.f32 %v5823_v7, %v16809_v25  ;;  %v4417_v35 = vadd.f32 0.2548296, %v4289_v8  ;;  %v4034_v62 = vmul.f32 %v3906_v50, %v13964_v20  ;;  %v16811_v15 = vld [vmem:[#allocation420_spill] sm:$0xff] }
 0x5e6   : > { %v3652_v26 = vadd.f32 -1.4531521, %v3524_v45  ;;  %vm5441_vm14 = vcmp.lt.f32.partialorder %v16810_v54, 0.0  ;;  %vm3208_vm15 = vweird.f32 %v12121_v6  ;;  %v5568_v41 = vsub.f32 0.0, %v5312_v21 }
 0x5e7   : > { %v4035_v55 = vmul.f32 %v3907_v42, %v13972_v30  ;;  %v6431_v31 = vadd.f32 %v6430_v37, %v6318_v59  ;;  %v14007_v32 = vadd.f32 %v6207_v47, %v6095_v43  ;;  %6361 = vmatmul.f32.gmra.mxu2 %v5951_v49  ;;  %v4545_v46 = vmul.f32 %v4417_v35, %v13934_v61  ;;  %v16817_v59 = vld [vmem:[#allocation255_spill] sm:$0xff]  ;;  %v16819_v37 = vld [vmem:[#allocation308_spill] sm:$0xff] }
 0x5e8   : > { %v4162_v57 = vadd.f32 -0.28449672, %v4034_v62  ;;  %v3780_v51 = vmul.f32 %v3652_v26, %v13996_v18  ;;  %vm3179_vm0 = vweird.f32 %v12076_v33  ;;  %v5696_v27 = vsel %vm5440_vm8, %v5568_v41, %v5312_v21  ;;  %v16818_v26 = vld [vmem:[#allocation425_spill] sm:$0xff] }
 0x5e9   : > { %v4163_v52 = vadd.f32 -0.28449672, %v4035_v55  ;;  %6504 = vst [vmem:[%s12891_s28 + $0x58] sm:$0xff] %v6431_v31  ;;  %v3182_v40 = vand.u32 2147483647, %v16805_v0  ;;  %v3192_v60 = vadd.f32 %v12082_v34, %v12144_v24  ;;  %v5824_v53 = vadd.f32 1.0, %v5696_v27  ;;  %vm3180_vm1 = vmor %vm3178_vm10, %vm3179_vm0 }
 0x5ea   : > { %v5185_v44 = vmul.f32 %v16811_v15, %v4545_v46  ;;  %v4290_v61 = vmul.f32 %v4162_v57, %v13964_v20  ;;  %v3908_v48 = vadd.f32 1.4214138, %v3780_v51  ;;  %v3181_v13 = vsel %vm3180_vm1, %v12076_v33, %v3177_v29  ;;  %v16815_v0 = vld [vmem:[#allocation299_spill] sm:$0xff]  ;;  %v16816_v29 = vld [vmem:[#allocation294_spill] sm:$0xff]  ;;  %v16823_v46 = vld [vmem:[#allocation324_spill] sm:$0xff] }
 0x5eb   : > { %v4291_v58 = vmul.f32 %v4163_v52, %v13972_v30  ;;  %vm3183_vm2 = vcmp.eq.f32.partialorder %v3182_v40, 8.507059e+37  ;;  %vm3194_vm3 = vweird.f32 %v12082_v34  ;;  %v5952_v56 = vmul.f32 %v5824_v53, %v16812_v5  ;;  %v16824_v51 = vld [vmem:[#allocation329_spill] sm:$0xff]  ;;  %v16825_v15 = vld [vmem:[#allocation267_spill] sm:$0xff] }
 0x5ec   : > { %v5313_v7 = vsub.f32 1.0, %v5185_v44  ;;  %v4418_v24 = vadd.f32 0.2548296, %v4290_v61  ;;  %v4036_v8 = vmul.f32 %v3908_v48, %v13996_v18  ;;  %vm14029_vm4 = vmor %vm3193_vm13, %vm3194_vm3  ;;  %vm5442_vm5 = vcmp.lt.f32.partialorder %v16815_v0, 0.0  ;;  %v16826_v44 = vld [vmem:[#allocation254_spill] sm:$0xff]  ;;  %v16828_v5 = vld [vmem:[#allocation341_spill] sm:$0xff] }
 0x5ed   : > { %vm3223_vm6 = vweird.f32 %v12155_v14  ;;  %v4419_v33 = vadd.f32 0.2548296, %v4291_v58  ;;  %v14036_v45 = vsel %vm3183_vm2, %v16816_v29, %v3181_v13  ;;  %v3196_v21 = vsel %vm14029_vm4, %v12082_v34, %v3192_v60  ;;  %6474 = vmatmul.f32.gmra.mxu3 %v5952_v56  ;;  %v16827_v13 = vld [vmem:[#allocation304_spill] sm:$0xff] }
 0x5ee   : > { %v3197_v42 = vand.u32 2147483647, %v16806_v28  ;;  %vm5443_vm7 = vcmp.lt.f32.partialorder %v16817_v59, 0.0  ;;  %v5569_v43 = vsub.f32 0.0, %v5313_v7  ;;  %v4546_v25 = vmul.f32 %v4418_v24, %v13964_v20  ;;  %v16820_v28 = vld [vmem:[#allocation285_spill] sm:$0xff]  ;;  %v6320_v59 = vpop.f32.mrf.mxu2 }
 0x5ef   : > { %v4164_v49 = vadd.f32 -0.28449672, %v4036_v8  ;;  %v3525_v35 = vmul.f32 1.0614054, %v14036_v45  ;;  %v4547_v62 = vmul.f32 %v4419_v33, %v13972_v30  ;;  %v3207_v47 = vadd.f32 %v16819_v37, %v16818_v26  ;;  %v16833_v26 = vld [vmem:[#allocation347_spill] sm:$0xff] }
 0x5f0   : > { %vm3198_vm8 = vcmp.eq.f32.partialorder %v3197_v42, 8.507059e+37  ;;  %vm3209_vm9 = vweird.f32 %v16819_v37  ;;  %v5697_v34 = vsel %vm5441_vm14, %v5569_v43, %v5313_v7  ;;  %v5186_v41 = vmul.f32 %v16820_v28, %v4546_v25  ;;  %v16830_v42 = vld [vmem:[#allocation286_spill] sm:$0xff] }
 0x5f1   : > { %v4292_v55 = vmul.f32 %v4164_v49, %v13996_v18  ;;  %v3653_v31 = vadd.f32 -1.4531521, %v3525_v35  ;;  %vm14055_vm10 = vmor %vm3208_vm15, %vm3209_vm9  ;;  %v5825_v30 = vadd.f32 1.0, %v5697_v34  ;;  %v5187_v57 = vmul.f32 %v16823_v46, %v4547_v62  ;;  %v16836_v46 = vld [vmem:[#allocation284_spill] sm:$0xff] }
 0x5f2   : > { %v14061_v27 = vsel %vm3198_vm8, %v16824_v51, %v3196_v21  ;;  %v3211_v54 = vsel %vm14055_vm10, %v16819_v37, %v3207_v47  ;;  %v5314_v52 = vsub.f32 1.0, %v5186_v41  ;;  %vm5444_vm11 = vcmp.lt.f32.partialorder %v16825_v15, 0.0  ;;  %v16829_v21 = vld [vmem:[#allocation338_spill] sm:$0xff] }
 0x5f3   : > { %v4420_v40 = vadd.f32 0.2548296, %v4292_v55  ;;  %v3781_v60 = vmul.f32 %v3653_v31, %v14036_v45  ;;  %v3526_v53 = vmul.f32 1.0614054, %v14061_v27  ;;  %v5953_v61 = vmul.f32 %v5825_v30, %v16826_v44  ;;  %v16835_v55 = vld [vmem:[#allocation263_spill] sm:$0xff] }
 0x5f4   : > { %v5315_v48 = vsub.f32 1.0, %v5187_v57  ;;  %v3212_v58 = vand.u32 2147483647, %v12121_v6  ;;  %v3222_v56 = vadd.f32 %v16828_v5, %v16827_v13  ;;  %v5570_v7 = vsub.f32 0.0, %v5314_v52 }
 0x5f5   : > { %v4548_v24 = vmul.f32 %v4420_v40, %v13996_v18  ;;  %v3909_v8 = vadd.f32 1.4214138, %v3781_v60  ;;  %v3654_v50 = vadd.f32 -1.4531521, %v3526_v53  ;;  %6138 = vmatmul.f32.gmra.mxu0 %v5953_v61  ;;  %vm3224_vm13 = vweird.f32 %v16828_v5  ;;  %v6097_v40 = vpop.f32.mrf.mxu0  ;;  %v16837_v53 = vld [vmem:[#allocation349_spill] sm:$0xff] }
 0x5f6   : > { %v5571_v33 = vsub.f32 0.0, %v5315_v48  ;;  %vm3213_vm12 = vcmp.eq.f32.partialorder %v3212_v58, 8.507059e+37  ;;  %v3227_v29 = vand.u32 2147483647, %v12155_v14  ;;  %vm3238_vm14 = vweird.f32 %v16829_v21  ;;  %vm14084_vm15 = vmor %vm3223_vm6, %vm3224_vm13  ;;  %v16834_v14 = vld [vmem:[#allocation352_spill] sm:$0xff] }
 0x5f7   : > { %v5698_v6 = vsel %vm5442_vm5, %v5570_v7, %v5314_v52  ;;  %v5188_v43 = vmul.f32 %v16830_v42, %v4548_v24  ;;  %v4037_v25 = vmul.f32 %v3909_v8, %v14036_v45  ;;  %v3782_v18 = vmul.f32 %v3654_v50, %v14061_v27  ;;  %v6210_v7 = vpop.f32.mrf.mxu1  ;;  %v16838_v24 = vld [vmem:[#allocation316_spill] sm:$0xff] }
 0x5f8   : > { %v5826_v35 = vadd.f32 1.0, %v5698_v6  ;;  %v5699_v62 = vsel %vm5443_vm7, %v5571_v33, %v5315_v48  ;;  %v14091_v37 = vsel %vm3213_vm12, %v16833_v26, %v3211_v54  ;;  %v3226_v0 = vsel %vm14084_vm15, %v16828_v5, %v3222_v56  ;;  %v6433_v56 = vpop.f32.mrf.mxu3  ;;  %v16839_v42 = vld [vmem:[#allocation312_spill] sm:$0xff] }
 0x5f9   : > { %v5827_v47 = vadd.f32 1.0, %v5699_v62  ;;  %v5316_v34 = vsub.f32 1.0, %v5188_v43  ;;  %v4165_v28 = vadd.f32 -0.28449672, %v4037_v25  ;;  %v3910_v41 = vadd.f32 1.4214138, %v3782_v18 }
 0x5fa   : > { %vm3253_vm0 = vweird.f32 %v16834_v14  ;;  %v5954_v31 = vmul.f32 %v5826_v35, %v16835_v55  ;;  %v3527_v20 = vmul.f32 1.0614054, %v14091_v37  ;;  %vm3228_vm1 = vcmp.eq.f32.partialorder %v3227_v29, 8.507059e+37  ;;  %v16842_v35 = vld [vmem:[#allocation323_spill] sm:$0xff] }
 0x5fb   : > { %v3237_v30 = vadd.f32 %v12272_v38, %v12328_v3  ;;  %v5955_v57 = vmul.f32 %v5827_v47, %v16836_v46  ;;  %v5572_v51 = vsub.f32 0.0, %v5316_v34  ;;  %v4293_v54 = vmul.f32 %v4165_v28, %v14036_v45 }
 0x5fc   : > { %v4038_v52 = vmul.f32 %v3910_v41, %v14061_v27  ;;  %6251 = vmatmul.f32.gmra.mxu1 %v5954_v31  ;;  %v3655_v60 = vadd.f32 -1.4531521, %v3527_v20  ;;  %v14105_v44 = vsel %vm3228_vm1, %v16837_v53, %v3226_v0  ;;  %v6321_v61 = vadd.f32 %v6320_v59, %v14007_v32  ;;  %v16844_v31 = vld [vmem:[#allocation348_spill] sm:$0xff] }
 0x5fd   : > { %v6098_v48 = vadd.f32 %v13791_v9, %v6097_v40  ;;  %6364 = vmatmul.f32.gmra.mxu2 %v5955_v57  ;;  %v5700_v3 = vsel %vm5444_vm11, %v5572_v51, %v5316_v34  ;;  %v4421_v58 = vadd.f32 0.2548296, %v4293_v54  ;;  %v3528_v5 = vmul.f32 1.0614054, %v14105_v44  ;;  %v16843_v34 = vld [vmem:[#allocation421_spill] sm:$0xff]  ;;  %v16845_v57 = vld [vmem:[#allocation306_spill] sm:$0xff] }
 0x5fe   : > { %v4166_v13 = vadd.f32 -0.28449672, %v4038_v52  ;;  %vm5445_vm2 = vcmp.lt.f32.partialorder %v16838_v24, 0.0  ;;  %v5828_v8 = vadd.f32 1.0, %v5700_v3  ;;  %v3783_v50 = vmul.f32 %v3655_v60, %v14091_v37  ;;  %v16846_v54 = vld [vmem:[#allocation350_spill] sm:$0xff] }
 0x5ff   : > { %v6434_v33 = vadd.f32 %v6433_v56, %v6321_v61  ;;  %v14114_v32 = vadd.f32 %v6210_v7, %v6098_v48  ;;  %vm3268_vm3 = vweird.f32 %v12314_v36  ;;  %v4549_v15 = vmul.f32 %v4421_v58, %v14036_v45  ;;  %v16849_v7 = vld [vmem:[#allocation274_spill] sm:$0xff] }
 0x600   : > { %v4294_v29 = vmul.f32 %v4166_v13, %v14061_v27  ;;  %v3656_v6 = vadd.f32 -1.4531521, %v3528_v5  ;;  %vm3239_vm4 = vweird.f32 %v12272_v38  ;;  %v5956_v43 = vmul.f32 %v5828_v8, %v16839_v42 }
 0x601   : > { %v3911_v25 = vadd.f32 1.4214138, %v3783_v50  ;;  %6505 = vst [vmem:[%s12891_s28 + $0x60] sm:$0xff] %v6434_v33  ;;  %vm14124_vm5 = vmor %vm3238_vm14, %vm3239_vm4  ;;  %v3242_v49 = vand.u32 2147483647, %v16829_v21  ;;  %v3252_v45 = vadd.f32 %v12302_v12, %v12361_v63  ;;  %v5189_v62 = vmul.f32 %v16842_v35, %v4549_v15  ;;  %v16850_v33 = vld [vmem:[#allocation315_spill] sm:$0xff] }
 0x602   : > { %v4422_v26 = vadd.f32 0.2548296, %v4294_v29  ;;  %v3784_v0 = vmul.f32 %v3656_v6, %v14105_v44  ;;  %v3241_v47 = vsel %vm14124_vm5, %v12272_v38, %v3237_v30  ;;  %vm5446_vm6 = vcmp.lt.f32.partialorder %v16843_v34, 0.0  ;;  %6477 = vmatmul.f32.gmra.mxu3 %v5956_v43 }
 0x603   : > { %v4039_v28 = vmul.f32 %v3911_v25, %v14091_v37  ;;  %vm3243_vm7 = vcmp.eq.f32.partialorder %v3242_v49, 8.507059e+37  ;;  %vm3254_vm8 = vweird.f32 %v12302_v12  ;;  %v3257_v21 = vand.u32 2147483647, %v16834_v14  ;;  %v16851_v49 = vld [vmem:[#allocation278_spill] sm:$0xff] }
 0x604   : > { %v5317_v63 = vsub.f32 1.0, %v5189_v62  ;;  %v4550_v41 = vmul.f32 %v4422_v26, %v14061_v27  ;;  %v3912_v55 = vadd.f32 1.4214138, %v3784_v0  ;;  %v14142_v20 = vsel %vm3243_vm7, %v16844_v31, %v3241_v47  ;;  %vm3255_vm9 = vmor %vm3253_vm0, %vm3254_vm8  ;;  %v16853_v47 = vld [vmem:[#allocation423_spill] sm:$0xff]  ;;  %v6100_v31 = vpop.f32.mrf.mxu0 }
 0x605   : > { %v4167_v38 = vadd.f32 -0.28449672, %v4039_v28  ;;  %v3529_v59 = vmul.f32 1.0614054, %v14142_v20  ;;  %v3256_v30 = vsel %vm3255_vm9, %v12302_v12, %v3252_v45  ;;  %vm3258_vm10 = vcmp.eq.f32.partialorder %v3257_v21, 8.507059e+37 }
 0x606   : > { %vm3283_vm11 = vweird.f32 %v12335_v11  ;;  %v5573_v46 = vsub.f32 0.0, %v5317_v63  ;;  %v5190_v51 = vmul.f32 %v16845_v57, %v4550_v41  ;;  %v4040_v27 = vmul.f32 %v3912_v55, %v14105_v44 }
 0x607   : > { %v14152_v52 = vsel %vm3258_vm10, %v16846_v54, %v3256_v30  ;;  %v4295_v40 = vmul.f32 %v4167_v38, %v14091_v37  ;;  %v3657_v14 = vadd.f32 -1.4531521, %v3529_v59  ;;  %v3267_v53 = vadd.f32 %v12372_v2, %v12462_v4 }
 0x608   : > { %v3530_v60 = vmul.f32 1.0614054, %v14152_v52  ;;  %v5701_v12 = vsel %vm5445_vm2, %v5573_v46, %v5317_v63  ;;  %v5318_v61 = vsub.f32 1.0, %v5190_v51  ;;  %v4168_v48 = vadd.f32 -0.28449672, %v4040_v27  ;;  %v6323_v63 = vpop.f32.mrf.mxu2  ;;  %v16855_v46 = vld [vmem:[#allocation330_spill] sm:$0xff] }
 0x609   : > { %vm3269_vm12 = vweird.f32 %v12372_v2  ;;  %v5829_v3 = vadd.f32 1.0, %v5701_v12  ;;  %v4423_v58 = vadd.f32 0.2548296, %v4295_v40  ;;  %v3785_v13 = vmul.f32 %v3657_v14, %v14142_v20  ;;  %v16856_v40 = vld [vmem:[#allocation362_spill] sm:$0xff] }
 0x60a   : > { %v3658_v5 = vadd.f32 -1.4531521, %v3530_v60  ;;  %vm14164_vm13 = vmor %vm3268_vm3, %vm3269_vm12  ;;  %vm5447_vm14 = vcmp.lt.f32.partialorder %v16849_v7, 0.0  ;;  %v5574_v4 = vsub.f32 0.0, %v5318_v61  ;;  %v4296_v24 = vmul.f32 %v4168_v48, %v14105_v44  ;;  %v16857_v12 = vld [vmem:[#allocation318_spill] sm:$0xff] }
 0x60b   : > { %v3271_v8 = vsel %vm14164_vm13, %v12372_v2, %v3267_v53  ;;  %v3272_v50 = vand.u32 2147483647, %v12314_v36  ;;  %v5957_v15 = vmul.f32 %v5829_v3, %v16850_v33  ;;  %v4551_v29 = vmul.f32 %v4423_v58, %v14091_v37  ;;  %v16852_v36 = vld [vmem:[#allocation337_spill] sm:$0xff] }
 0x60c   : > { %v3913_v6 = vadd.f32 1.4214138, %v3785_v13  ;;  %v3786_v42 = vmul.f32 %v3658_v5, %v14152_v52  ;;  %v5702_v43 = vsel %vm5446_vm6, %v5574_v4, %v5318_v61  ;;  %v4424_v25 = vadd.f32 0.2548296, %v4296_v24  ;;  %v6436_v13 = vpop.f32.mrf.mxu3  ;;  %v16858_v24 = vld [vmem:[#allocation311_spill] sm:$0xff] }
 0x60d   : > { %vm3273_vm15 = vcmp.eq.f32.partialorder %v3272_v50, 8.507059e+37  ;;  %v3282_v18 = vadd.f32 %v12407_v1, %v12503_v17  ;;  %vm5448_vm0 = vcmp.lt.f32.partialorder %v16851_v49, 0.0  ;;  %6141 = vmatmul.f32.gmra.mxu0 %v5957_v15  ;;  %v5830_v2 = vadd.f32 1.0, %v5702_v43  ;;  %v16861_v43 = vld [vmem:[#allocation336_spill] sm:$0xff] }
 0x60e   : > { %v5191_v45 = vmul.f32 %v16852_v36, %v4551_v29  ;;  %v4041_v35 = vmul.f32 %v3913_v6, %v14142_v20  ;;  %v3914_v37 = vadd.f32 1.4214138, %v3786_v42  ;;  %v4552_v62 = vmul.f32 %v4424_v25, %v14105_v44  ;;  %v16854_v44 = vld [vmem:[#allocation427_spill] sm:$0xff]  ;;  %v16860_v6 = vld [vmem:[#allocation314_spill] sm:$0xff] }
 0x60f   : > { %v14186_v26 = vsel %vm3273_vm15, %v12396_v39, %v3271_v8  ;;  %vm3284_vm1 = vweird.f32 %v12407_v1  ;;  %v3287_v0 = vand.u32 2147483647, %v12335_v11  ;;  %v5958_v17 = vmul.f32 %v5830_v2, %v16853_v47  ;;  %v16859_v8 = vld [vmem:[#allocation343_spill] sm:$0xff] }
 0x610   : > { %v5319_v34 = vsub.f32 1.0, %v5191_v45  ;;  %v4169_v28 = vadd.f32 -0.28449672, %v4041_v35  ;;  %v4042_v21 = vmul.f32 %v3914_v37, %v14152_v52  ;;  %vm3285_vm2 = vmor %vm3283_vm11, %vm3284_vm1  ;;  %vm3298_vm3 = vweird.f32 %v12418_v22  ;;  %v16862_v25 = vld [vmem:[#allocation367_spill] sm:$0xff]  ;;  %v16863_v45 = vld [vmem:[#allocation332_spill] sm:$0xff] }
 0x611   : > { %v5192_v41 = vmul.f32 %v16854_v44, %v4552_v62  ;;  %v3531_v39 = vmul.f32 1.0614054, %v14186_v26  ;;  %v3286_v55 = vsel %vm3285_vm2, %v12407_v1, %v3282_v18  ;;  %vm3288_vm4 = vcmp.eq.f32.partialorder %v3287_v0, 8.507059e+37  ;;  %6254 = vmatmul.f32.gmra.mxu1 %v5958_v17  ;;  %v16864_v62 = vld [vmem:[#allocation358_spill] sm:$0xff]  ;;  %v16866_v44 = vld [vmem:[#allocation319_spill] sm:$0xff] }
 0x612   : > { %v5575_v38 = vsub.f32 0.0, %v5319_v34  ;;  %v4297_v59 = vmul.f32 %v4169_v28, %v14142_v20  ;;  %v4170_v30 = vadd.f32 -0.28449672, %v4042_v21  ;;  %v14200_v57 = vsel %vm3288_vm4, %v16855_v46, %v3286_v55  ;;  %v16865_v28 = vld [vmem:[#allocation377_spill] sm:$0xff]  ;;  %v16869_v46 = vld [vmem:[#allocation27_spill] sm:$0xff] }
 0x613   : > { %v5320_v11 = vsub.f32 1.0, %v5192_v41  ;;  %v3659_v51 = vadd.f32 -1.4531521, %v3531_v39  ;;  %v3532_v27 = vmul.f32 1.0614054, %v14200_v57  ;;  %v6324_v54 = vadd.f32 %v6323_v63, %v14114_v32  ;;  %v6213_v32 = vpop.f32.mrf.mxu1 }
 0x614   : > { %vm3313_vm5 = vweird.f32 %v16856_v40  ;;  %v5703_v1 = vsel %vm5447_vm14, %v5575_v38, %v5319_v34  ;;  %v4425_v14 = vadd.f32 0.2548296, %v4297_v59  ;;  %v4298_v60 = vmul.f32 %v4170_v30, %v14152_v52 }
 0x615   : > { %v6101_v53 = vadd.f32 %v13791_v9, %v6100_v31  ;;  %vm5449_vm6 = vcmp.lt.f32.partialorder %v16857_v12, 0.0  ;;  %v5831_v61 = vadd.f32 1.0, %v5703_v1  ;;  %v5576_v48 = vsub.f32 0.0, %v5320_v11  ;;  %v16872_v12 = vld [vmem:[#allocation351_spill] sm:$0xff] }
 0x616   : > { %v3787_v3 = vmul.f32 %v3659_v51, %v14186_v26  ;;  %v3660_v58 = vadd.f32 -1.4531521, %v3532_v27  ;;  %v4553_v5 = vmul.f32 %v4425_v14, %v14142_v20  ;;  %v4426_v56 = vadd.f32 0.2548296, %v4298_v60  ;;  %v16871_v60 = vld [vmem:[#allocation424_spill] sm:$0xff] }
 0x617   : > { %v6437_v7 = vadd.f32 %v6436_v13, %v6324_v54  ;;  %v14212_v4 = vadd.f32 %v6213_v32, %v6101_v53  ;;  %vm5450_vm7 = vcmp.lt.f32.partialorder %v16858_v24, 0.0  ;;  %v5959_v9 = vmul.f32 %v5831_v61, %v16859_v8  ;;  %v16874_v32 = vld [vmem:[#allocation368_spill] sm:$0xff]  ;;  %v16876_v8 = vld [vmem:[#allocation342_spill] sm:$0xff] }
 0x618   : > { %v5704_v50 = vsel %vm5448_vm0, %v5576_v48, %v5320_v11  ;;  %v3915_v33 = vadd.f32 1.4214138, %v3787_v3  ;;  %v3788_v15 = vmul.f32 %v3660_v58, %v14200_v57  ;;  %vm3328_vm8 = vweird.f32 %v12540_v16  ;;  %v16870_v11 = vld [vmem:[#allocation339_spill] sm:$0xff]  ;;  %v16873_v58 = vld [vmem:[#allocation296_spill] sm:$0xff] }
 0x619   : > { %v5832_v29 = vadd.f32 1.0, %v5704_v50  ;;  %v5193_v42 = vmul.f32 %v16860_v6, %v4553_v5  ;;  %v4554_v20 = vmul.f32 %v4426_v56, %v14152_v52  ;;  %6506 = vst [vmem:[%s12891_s28 + $0x68] sm:$0xff] %v6437_v7  ;;  %v3297_v18 = vadd.f32 %v16862_v25, %v16861_v43  ;;  %6367 = vmatmul.f32.gmra.mxu2 %v5959_v9  ;;  %v16875_v7 = vld [vmem:[#allocation426_spill] sm:$0xff]  ;;  %v16877_v50 = vld [vmem:[#allocation371_spill] sm:$0xff]  ;;  %v16879_v6 = vld [vmem:[#allocation384_spill] sm:$0xff] }
 0x61a   : > { %v4043_v2 = vmul.f32 %v3915_v33, %v14186_v26  ;;  %v3916_v36 = vadd.f32 1.4214138, %v3788_v15  ;;  %vm3299_vm9 = vweird.f32 %v16862_v25  ;;  %v3302_v49 = vand.u32 2147483647, %v12418_v22  ;;  %v16878_v15 = vld [vmem:[#allocation15_spill] sm:$0xff] }
 0x61b   : > { %v5960_v35 = vmul.f32 %v5832_v29, %v16863_v45  ;;  %v5321_v37 = vsub.f32 1.0, %v5193_v42  ;;  %v5194_v0 = vmul.f32 %v16864_v62, %v4554_v20  ;;  %vm3300_vm10 = vmor %vm3298_vm3, %vm3299_vm9  ;;  %v3312_v52 = vadd.f32 %v12513_v23, %v12585_v19  ;;  %v16880_v42 = vld [vmem:[#allocation372_spill] sm:$0xff]  ;;  %v16885_v62 = vld [vmem:[#allocation374_spill] sm:$0xff] }
 0x61c   : > { %v4171_v47 = vadd.f32 -0.28449672, %v4043_v2  ;;  %v4044_v17 = vmul.f32 %v3916_v36, %v14200_v57  ;;  %v3301_v34 = vsel %vm3300_vm10, %v16862_v25, %v3297_v18  ;;  %vm3303_vm11 = vcmp.eq.f32.partialorder %v3302_v49, 8.507059e+37  ;;  %v16881_v25 = vld [vmem:[#allocation364_spill] sm:$0xff] }
 0x61d   : > { %vm3343_vm12 = vweird.f32 %v16865_v28  ;;  %6480 = vmatmul.f32.gmra.mxu3 %v5960_v35  ;;  %v5577_v21 = vsub.f32 0.0, %v5321_v37  ;;  %v5322_v63 = vsub.f32 1.0, %v5194_v0  ;;  %v14238_v41 = vsel %vm3303_vm11, %v16866_v44, %v3301_v34  ;;  %v6326_v44 = vpop.f32.mrf.mxu2 }
 0x61e   : > { %vm3314_vm13 = vweird.f32 %v12513_v23  ;;  %v4299_v22 = vmul.f32 %v4171_v47, %v14186_v26  ;;  %v4172_v39 = vadd.f32 -0.28449672, %v4044_v17  ;;  %v3533_v19 = vmul.f32 1.0614054, %v14238_v41 }
 0x61f   : > { %vm14245_vm14 = vmor %vm3313_vm5, %vm3314_vm13  ;;  %v3317_v31 = vand.u32 2147483647, %v16856_v40  ;;  %v5705_v38 = vsel %vm5449_vm6, %v5577_v21, %v5321_v37  ;;  %v5578_v59 = vsub.f32 0.0, %v5322_v63  ;;  %v3327_v51 = vadd.f32 %v16870_v11, %v16869_v46  ;;  %v16884_v37 = vld [vmem:[#allocation47_spill] sm:$0xff]  ;;  %v16886_v21 = vld [vmem:[#allocation24_spill] sm:$0xff] }
 0x620   : > { %v3316_v30 = vsel %vm14245_vm14, %v12513_v23, %v3312_v52  ;;  %v5833_v27 = vadd.f32 1.0, %v5705_v38  ;;  %v4427_v54 = vadd.f32 0.2548296, %v4299_v22  ;;  %v4300_v1 = vmul.f32 %v4172_v39, %v14200_v57 }
 0x621   : > { %v3661_v14 = vadd.f32 -1.4531521, %v3533_v19  ;;  %vm5451_vm15 = vcmp.lt.f32.partialorder %v16871_v60, 0.0  ;;  %v5706_v40 = vsel %vm5450_vm7, %v5578_v59, %v5322_v63  ;;  %vm3318_vm0 = vcmp.eq.f32.partialorder %v3317_v31, 8.507059e+37  ;;  %v16887_v59 = vld [vmem:[#allocation375_spill] sm:$0xff]  ;;  %v16888_v60 = vld [vmem:[#allocation356_spill] sm:$0xff] }
 0x622   : > { %vm3329_vm1 = vweird.f32 %v16870_v11  ;;  %v3332_v53 = vand.u32 2147483647, %v12540_v16  ;;  %v5961_v23 = vmul.f32 %v5833_v27, %v16872_v12  ;;  %v5834_v61 = vadd.f32 1.0, %v5706_v40 }
 0x623   : > { %v4555_v48 = vmul.f32 %v4427_v54, %v14186_v26  ;;  %v4428_v3 = vadd.f32 0.2548296, %v4300_v1  ;;  %vm3330_vm2 = vmor %vm3328_vm8, %vm3329_vm1  ;;  %vm5452_vm3 = vcmp.lt.f32.partialorder %v16873_v58, 0.0  ;;  %v3789_v13 = vmul.f32 %v3661_v14, %v14238_v41  ;;  %v6439_v14 = vpop.f32.mrf.mxu3  ;;  %v14322_v58 = vld [vmem:[%s14512_s4] ss:$0 sm:$0xff] }
 0x624   : > { %v14270_v5 = vsel %vm3318_vm0, %v16874_v32, %v3316_v30  ;;  %v3331_v56 = vsel %vm3330_vm2, %v16870_v11, %v3327_v51  ;;  %vm3333_vm4 = vcmp.eq.f32.partialorder %v3332_v53, 8.507059e+37  ;;  %6144 = vmatmul.f32.gmra.mxu0 %v5961_v23  ;;  %v5962_v24 = vmul.f32 %v5834_v61, %v16875_v7  ;;  %v6103_v11 = vpop.f32.mrf.mxu0  ;;  %v16889_v61 = vld [vmem:[#allocation317_spill] sm:$0xff]  ;;  %v16890_v32 = vld [vmem:[#allocation340_spill] sm:$0xff] }
 0x625   : > { %v5195_v9 = vmul.f32 %v16876_v8, %v4555_v48  ;;  %v4556_v26 = vmul.f32 %v4428_v3, %v14200_v57  ;;  %v3534_v16 = vmul.f32 1.0614054, %v14270_v5  ;;  %vm3358_vm5 = vweird.f32 %v16877_v50 }
 0x626   : > { %v3917_v33 = vadd.f32 1.4214138, %v3789_v13  ;;  %v14279_v29 = vsel %vm3333_vm4, %v16878_v15, %v3331_v56  ;;  %v3342_v20 = vadd.f32 %v16880_v42, %v16879_v6  ;;  %vm3344_vm6 = vweird.f32 %v16880_v42  ;;  %6257 = vmatmul.f32.gmra.mxu1 %v5962_v24  ;;  %v6216_v24 = vpop.f32.mrf.mxu1  ;;  %v16892_v6 = vld [vmem:[#allocation359_spill] sm:$0xff] }
 0x627   : > { %v5323_v43 = vsub.f32 1.0, %v5195_v9  ;;  %v5196_v18 = vmul.f32 %v16881_v25, %v4556_v26  ;;  %v3662_v2 = vadd.f32 -1.4531521, %v3534_v16  ;;  %v3535_v57 = vmul.f32 1.0614054, %v14279_v29  ;;  %vm14288_vm7 = vmor %vm3343_vm12, %vm3344_vm6 }
 0x628   : > { %v4045_v49 = vmul.f32 %v3917_v33, %v14238_v41  ;;  %v3346_v45 = vsel %vm14288_vm7, %v16880_v42, %v3342_v20  ;;  %v3347_v35 = vand.u32 2147483647, %v16865_v28  ;;  %v3357_v0 = vadd.f32 %v16885_v62, %v16884_v37  ;;  %v16893_v20 = vld [vmem:[#allocation387_spill] sm:$0xff] }
 0x629   : > { %v5579_v52 = vsub.f32 0.0, %v5323_v43  ;;  %v5324_v47 = vsub.f32 1.0, %v5196_v18  ;;  %v3790_v17 = vmul.f32 %v3662_v2, %v14270_v5  ;;  %v3663_v34 = vadd.f32 -1.4531521, %v3535_v57 }
 0x62a   : > { %vm3373_vm8 = vweird.f32 %v16886_v21  ;;  %v4173_v63 = vadd.f32 -0.28449672, %v4045_v49  ;;  %vm3348_vm9 = vcmp.eq.f32.partialorder %v3347_v35, 8.507059e+37  ;;  %vm3359_vm10 = vweird.f32 %v16885_v62  ;;  %v16897_v49 = vld [vmem:[#allocation327_spill] sm:$0xff] }
 0x62b   : > { %v3362_v22 = vand.u32 2147483647, %v16877_v50  ;;  %v5707_v28 = vsel %vm5451_vm15, %v5579_v52, %v5323_v43  ;;  %v5580_v39 = vsub.f32 0.0, %v5324_v47  ;;  %v3918_v19 = vadd.f32 1.4214138, %v3790_v17  ;;  %vm3360_vm13 = vmor %vm3358_vm5, %vm3359_vm10  ;;  %v16891_v50 = vld [vmem:[#allocation325_spill] sm:$0xff] }
 0x62c   : > { %v3791_v55 = vmul.f32 %v3663_v34, %v14279_v29  ;;  %v5835_v31 = vadd.f32 1.0, %v5707_v28  ;;  %v4301_v38 = vmul.f32 %v4173_v63, %v14238_v41  ;;  %v14308_v30 = vsel %vm3348_vm9, %v16887_v59, %v3346_v45  ;;  %v16903_v59 = vld [vmem:[#allocation20_spill] sm:$0xff] }
 0x62d   : > { %v6327_v46 = vadd.f32 %v6326_v44, %v14212_v4  ;;  %v5708_v51 = vsel %vm5452_vm3, %v5580_v39, %v5324_v47  ;;  %v4046_v27 = vmul.f32 %v3918_v19, %v14270_v5  ;;  %v3536_v1 = vmul.f32 1.0614054, %v14308_v30  ;;  %v16900_v47 = vld [vmem:[#allocation31_spill] sm:$0xff] }
 0x62e   : > { %v3919_v54 = vadd.f32 1.4214138, %v3791_v55  ;;  %vm3388_vm11 = vweird.f32 %v12754_v10  ;;  %v5963_v40 = vmul.f32 %v5835_v31, %v16888_v60  ;;  %v5836_v53 = vadd.f32 1.0, %v5708_v51 }
 0x62f   : > { %v4429_v12 = vadd.f32 0.2548296, %v4301_v38  ;;  %v6440_v23 = vadd.f32 %v6439_v14, %v6327_v46  ;;  %vm5453_vm12 = vcmp.lt.f32.partialorder %v16889_v61, 0.0  ;;  %v4174_v4 = vadd.f32 -0.28449672, %v4046_v27  ;;  %v16908_v61 = vld [vmem:[#allocation328_spill] sm:$0xff] }
 0x630   : > { %v4047_v48 = vmul.f32 %v3919_v54, %v14279_v29  ;;  %v3664_v3 = vadd.f32 -1.4531521, %v3536_v1  ;;  %v6104_v13 = vadd.f32 %v14322_v58, %v6103_v11  ;;  %6370 = vmatmul.f32.gmra.mxu2 %v5963_v40  ;;  %v5964_v56 = vmul.f32 %v5836_v53, %v16890_v32  ;;  %v16904_v54 = vld [vmem:[#allocation355_spill] sm:$0xff]  ;;  %v16906_v53 = vld [vmem:[#allocation70_spill] sm:$0xff] }
 0x631   : > { %v4557_v7 = vmul.f32 %v4429_v12, %v14238_v41  ;;  %6507 = vst [vmem:[%s12891_s28 + $0x70] sm:$0xff] %v6440_v23  ;;  %v3361_v8 = vsel %vm3360_vm13, %v16885_v62, %v3357_v0  ;;  %vm3363_vm14 = vcmp.eq.f32.partialorder %v3362_v22, 8.507059e+37  ;;  %v4302_v9 = vmul.f32 %v4174_v4, %v14270_v5  ;;  %v16894_v41 = vld [vmem:[#allocation16_spill] sm:$0xff]  ;;  %v16899_v0 = vld [vmem:[#allocation37_spill] sm:$0xff] }
 0x632   : > { %v4175_v26 = vadd.f32 -0.28449672, %v4047_v48  ;;  %v3792_v16 = vmul.f32 %v3664_v3, %v14308_v30  ;;  %v14335_v33 = vadd.f32 %v6216_v24, %v6104_v13  ;;  %6483 = vmatmul.f32.gmra.mxu3 %v5964_v56  ;;  %v14339_v42 = vsel %vm3363_vm14, %v16892_v6, %v3361_v8  ;;  %v16898_v62 = vld [vmem:[#allocation388_spill] sm:$0xff] }
 0x633   : > { %v5197_v15 = vmul.f32 %v16891_v50, %v4557_v7  ;;  %v3372_v43 = vadd.f32 %v16894_v41, %v16893_v20  ;;  %vm3374_vm15 = vweird.f32 %v16894_v41  ;;  %v4430_v25 = vadd.f32 0.2548296, %v4302_v9  ;;  %v16901_v22 = vld [vmem:[#allocation428_spill] sm:$0xff] }
 0x634   : > { %v4303_v18 = vmul.f32 %v4175_v26, %v14279_v29  ;;  %v3920_v2 = vadd.f32 1.4214138, %v3792_v16  ;;  %v3537_v57 = vmul.f32 1.0614054, %v14339_v42  ;;  %vm14348_vm0 = vmor %vm3373_vm8, %vm3374_vm15  ;;  %vm5454_vm1 = vcmp.lt.f32.partialorder %v16897_v49, 0.0  ;;  %v16907_v12 = vld [vmem:[#allocation360_spill] sm:$0xff] }
 0x635   : > { %v5325_v45 = vsub.f32 1.0, %v5197_v15  ;;  %v3376_v35 = vsel %vm14348_vm0, %v16894_v41, %v3372_v43  ;;  %v3377_v37 = vand.u32 2147483647, %v16886_v21  ;;  %v3387_v52 = vadd.f32 %v16899_v0, %v16898_v62  ;;  %v16902_v21 = vld [vmem:[#allocation389_spill] sm:$0xff]  ;;  %v16911_v43 = vld [vmem:[#allocation376_spill] sm:$0xff]  ;;  %v6219_v62 = vpop.f32.mrf.mxu1 }
 0x636   : > { %vm3403_vm2 = vweird.f32 %v16900_v47  ;;  %v4558_v17 = vmul.f32 %v4430_v25, %v14270_v5  ;;  %v4431_v34 = vadd.f32 0.2548296, %v4303_v18  ;;  %v4048_v63 = vmul.f32 %v3920_v2, %v14308_v30  ;;  %v6329_v18 = vpop.f32.mrf.mxu2  ;;  %v6442_v2 = vpop.f32.mrf.mxu3 }
 0x637   : > { %v3665_v44 = vadd.f32 -1.4531521, %v3537_v57  ;;  %vm5455_vm3 = vcmp.lt.f32.partialorder %v16901_v22, 0.0  ;;  %v5581_v28 = vsub.f32 0.0, %v5325_v45  ;;  %vm3378_vm4 = vcmp.eq.f32.partialorder %v3377_v37, 8.507059e+37  ;;  %v16912_v57 = vld [vmem:[#allocation353_spill] sm:$0xff]  ;;  %v6106_v37 = vpop.f32.mrf.mxu0 }
 0x638   : > { %vm3389_vm5 = vweird.f32 %v16899_v0  ;;  %v3392_v39 = vand.u32 2147483647, %v12754_v10  ;;  %v5198_v19 = vmul.f32 %v16902_v21, %v4558_v17  ;;  %v4559_v55 = vmul.f32 %v4431_v34, %v14279_v29  ;;  %v16905_v10 = vld [vmem:[#allocation363_spill] sm:$0xff] }
 0x639   : > { %v4176_v31 = vadd.f32 -0.28449672, %v4048_v63  ;;  %v3793_v38 = vmul.f32 %v3665_v44, %v14339_v42  ;;  %vm3390_vm6 = vmor %vm3388_vm11, %vm3389_vm5  ;;  %v5709_v5 = vsel %vm5453_vm12, %v5581_v28, %v5325_v45  ;;  %v14373_v46 = vsel %vm3378_vm4, %v16903_v59, %v3376_v35  ;;  %v16914_v63 = vld [vmem:[#allocation373_spill] sm:$0xff] }
 0x63a   : > { %v3391_v11 = vsel %vm3390_vm6, %v16899_v0, %v3387_v52  ;;  %vm3393_vm7 = vcmp.eq.f32.partialorder %v3392_v39, 8.507059e+37  ;;  %v5837_v51 = vadd.f32 1.0, %v5709_v5  ;;  %v5326_v27 = vsub.f32 1.0, %v5198_v19 }
 0x63b   : > { %v5199_v1 = vmul.f32 %v16904_v54, %v4559_v55  ;;  %v4304_v29 = vmul.f32 %v4176_v31, %v14308_v30  ;;  %v3921_v14 = vadd.f32 1.4214138, %v3793_v38  ;;  %v3538_v60 = vmul.f32 1.0614054, %v14373_v46  ;;  %v16915_v38 = vld [vmem:[#allocation429_spill] sm:$0xff] }
 0x63c   : > { %v14380_v40 = vsel %vm3393_vm7, %v16905_v10, %v3391_v11  ;;  %v3402_v23 = vadd.f32 %v16907_v12, %v16906_v53  ;;  %v5965_v4 = vmul.f32 %v5837_v51, %v16908_v61  ;;  %v5582_v48 = vsub.f32 0.0, %v5326_v27  ;;  %v16916_v11 = vld [vmem:[#allocation44_spill] sm:$0xff]  ;;  %v16917_v51 = vld [vmem:[#allocation357_spill] sm:$0xff] }
 0x63d   : > { %v5327_v3 = vsub.f32 1.0, %v5199_v1  ;;  %v4432_v13 = vadd.f32 0.2548296, %v4304_v29  ;;  %v4049_v32 = vmul.f32 %v3921_v14, %v14339_v42  ;;  %v3666_v56 = vadd.f32 -1.4531521, %v3538_v60  ;;  %v16919_v60 = vld [vmem:[#allocation21_spill] sm:$0xff] }
 0x63e   : > { %v3539_v7 = vmul.f32 1.0614054, %v14380_v40  ;;  %vm3404_vm8 = vweird.f32 %v16907_v12  ;;  %6147 = vmatmul.f32.gmra.mxu0 %v5965_v4  ;;  %v5710_v24 = vsel %vm5454_vm1, %v5582_v48, %v5326_v27  ;;  %v3407_v26 = vand.u32 2147483647, %v16900_v47  ;;  %v16913_v47 = vld [vmem:[#allocation46_spill] sm:$0xff]  ;;  %v6332_v4 = vpop.f32.mrf.mxu2  ;;  %v6445_v48 = vpop.f32.mrf.mxu3 }
 0x63f   : > { %v5583_v8 = vsub.f32 0.0, %v5327_v3  ;;  %v4560_v9 = vmul.f32 %v4432_v13, %v14308_v30  ;;  %v5838_v16 = vadd.f32 1.0, %v5710_v24  ;;  %v4177_v50 = vadd.f32 -0.28449672, %v4049_v32  ;;  %vm14395_vm9 = vmor %vm3403_vm2, %vm3404_vm8  ;;  %v6109_v24 = vpop.f32.mrf.mxu0 }
 0x640   : > { %v3794_v15 = vmul.f32 %v3666_v56, %v14373_v46  ;;  %v3667_v6 = vadd.f32 -1.4531521, %v3539_v7  ;;  %v3406_v30 = vsel %vm14395_vm9, %v16907_v12, %v3402_v23  ;;  %vm3408_vm10 = vcmp.eq.f32.partialorder %v3407_v26, 8.507059e+37 }
 0x641   : > { %v5711_v41 = vsel %vm5455_vm3, %v5583_v8, %v5327_v3  ;;  %v5200_v25 = vmul.f32 %v16911_v43, %v4560_v9  ;;  %v5966_v36 = vmul.f32 %v5838_v16, %v16912_v57  ;;  %v4305_v45 = vmul.f32 %v4177_v50, %v14339_v42  ;;  %v16921_v3 = vld [vmem:[#allocation382_spill] sm:$0xff]  ;;  %v6222_v8 = vpop.f32.mrf.mxu1 }
 0x642   : > { %v5839_v49 = vadd.f32 1.0, %v5711_v41  ;;  %v3922_v35 = vadd.f32 1.4214138, %v3794_v15  ;;  %v3795_v52 = vmul.f32 %v3667_v6, %v14380_v40  ;;  %v14409_v17 = vsel %vm3408_vm10, %v16913_v47, %v3406_v30  ;;  %v16922_v43 = vld [vmem:[#allocation370_spill] sm:$0xff] }
 0x643   : > { %v5328_v0 = vsub.f32 1.0, %v5200_v25  ;;  %v6330_v34 = vadd.f32 %v6329_v18, %v14335_v33  ;;  %6260 = vmatmul.f32.gmra.mxu1 %v5966_v36  ;;  %v4433_v22 = vadd.f32 0.2548296, %v4305_v45  ;;  %v3540_v39 = vmul.f32 1.0614054, %v14409_v17 }
 0x644   : > { %v5967_v44 = vmul.f32 %v5839_v49, %v16914_v63  ;;  %v4050_v28 = vmul.f32 %v3922_v35, %v14373_v46  ;;  %v3923_v19 = vadd.f32 1.4214138, %v3795_v52  ;;  %v6107_v31 = vadd.f32 %v14322_v58, %v6106_v37  ;;  %v16923_v49 = vld [vmem:[#allocation361_spill] sm:$0xff] }
 0x645   : > { %v5584_v21 = vsub.f32 0.0, %v5328_v0  ;;  %v6443_v55 = vadd.f32 %v6442_v2, %v6330_v34  ;;  %vm5456_vm11 = vcmp.lt.f32.partialorder %v16915_v38, 0.0  ;;  %v4561_v5 = vmul.f32 %v4433_v22, %v14339_v42  ;;  %v16920_v42 = vld [vmem:[#allocation39_spill] sm:$0xff] }
 0x646   : > { %6373 = vmatmul.f32.gmra.mxu2 %v5967_v44  ;;  %v4178_v33 = vadd.f32 -0.28449672, %v4050_v28  ;;  %v3668_v59 = vadd.f32 -1.4531521, %v3540_v39  ;;  %7255 = vpow2.f32 %v16916_v11  ;;  %v16918_v27 = vsub.f32 0.0, %v16917_v51  ;;  %v6335_v34 = vpop.f32.mrf.mxu2  ;;  %v6448_v63 = vpop.f32.mrf.mxu3 }
 0x647   : > { %v5712_v1 = vsel %vm5456_vm11, %v5584_v21, %v5328_v0  ;;  %v4051_v29 = vmul.f32 %v3923_v19, %v14380_v40  ;;  %6508 = vst [vmem:[%s12891_s28 + $0x78] sm:$0xff] %v6443_v55  ;;  %v5201_v10 = vmul.f32 %v16919_v60, %v4561_v5  ;;  %7257 = vpow2.f32 %v16920_v42  ;;  %v6112_v39 = vpop.f32.mrf.mxu0  ;;  %v16924_v19 = vld [vmem:[#allocation346_spill] sm:$0xff]  ;;  %v16927_v60 = vld [vmem:[#allocation380_spill] sm:$0xff] }
 0x648   : > { %v4820_v54 = vmul.f32 %v16918_v27, %v16917_v51  ;;  %v5840_v14 = vadd.f32 1.0, %v5712_v1  ;;  %v4306_v53 = vmul.f32 %v4178_v33, %v14373_v46  ;;  %v3796_v12 = vmul.f32 %v3668_v59, %v14409_v17  ;;  %v16925_v59 = vld [vmem:[#allocation344_spill] sm:$0xff] }
 0x649   : > { %v4179_v23 = vadd.f32 -0.28449672, %v4051_v29  ;;  %v6220_v61 = vadd.f32 %v6219_v62, %v6107_v31  ;;  %v5329_v32 = vsub.f32 1.0, %v5201_v10  ;;  %v6110_v20 = vadd.f32 %v14322_v58, %v6109_v24  ;;  %v6225_v21 = vpop.f32.mrf.mxu1 }
 0x64a   : > { %v5968_v13 = vmul.f32 %v5840_v14, %v16921_v3  ;;  %v4434_v56 = vadd.f32 0.2548296, %v4306_v53  ;;  %v3924_v7 = vadd.f32 1.4214138, %v3796_v12  ;;  %v5075_v9 = vmul.f32 1.442695, %v4820_v54 }
 0x64b   : > { %v4307_v26 = vmul.f32 %v4179_v23, %v14380_v40  ;;  %v6333_v16 = vadd.f32 %v6332_v4, %v6220_v61  ;;  %v5585_v50 = vsub.f32 0.0, %v5329_v32  ;;  %vm5457_vm12 = vcmp.lt.f32.partialorder %v16922_v43, 0.0  ;;  %v16926_v54 = vld [vmem:[#allocation17_spill] sm:$0xff] }
 0x64c   : > { %6486 = vmatmul.f32.gmra.mxu3 %v5968_v13  ;;  %v4562_v15 = vmul.f32 %v4434_v56, %v14373_v46  ;;  %v4052_v6 = vmul.f32 %v3924_v7, %v14409_v17  ;;  %v7256_v41 = vpop.eup %7255  ;;  %v977_v45 = vmul.f32 0.5, %v16923_v49  ;;  %7259 = vpow2.f32 %v5075_v9 }
 0x64d   : > { %v4435_v25 = vadd.f32 0.2548296, %v4307_v26  ;;  %v6446_v30 = vadd.f32 %v6445_v48, %v6333_v16  ;;  %v5713_v18 = vsel %vm5457_vm12, %v5585_v50, %v5329_v32  ;;  %v7258_v36 = vpop.eup %7257  ;;  %v6223_v0 = vadd.f32 %v6222_v8, %v6110_v20  ;;  %v16928_v32 = vld [vmem:[#allocation378_spill] sm:$0xff] }
 0x64e   : > { %v5202_v2 = vmul.f32 %v7256_v41, %v4562_v15  ;;  %v4180_v57 = vadd.f32 -0.28449672, %v4052_v6  ;;  %v5841_v35 = vadd.f32 1.0, %v5713_v18  ;;  %vm5458_vm13 = vcmp.lt.f32.partialorder %v16924_v19, 0.0  ;;  %v6451_v23 = vpop.f32.mrf.mxu3  ;;  %v16929_v8 = vld [vmem:[#allocation354_spill] sm:$0xff] }
 0x64f   : > { %v4563_v37 = vmul.f32 %v4435_v25, %v14380_v40  ;;  %6509 = vst [vmem:[%s12891_s28 + $0x80] sm:$0xff] %v6446_v30  ;;  %v6336_v28 = vadd.f32 %v6335_v34, %v6223_v0  ;;  %v6113_v5 = vadd.f32 %v14322_v58, %v6112_v39  ;;  %v978_v11 = vmul.f32 0.5, %v16925_v59  ;;  %v6115_v3 = vpop.f32.mrf.mxu0 }
 0x650   : > { %v5330_v46 = vsub.f32 1.0, %v5202_v2  ;;  %v4308_v62 = vmul.f32 %v4180_v57, %v14409_v17  ;;  %v5969_v52 = vmul.f32 %v5841_v35, %v977_v45  ;;  %vm5459_vm14 = vcmp.lt.f32.partialorder %v16926_v54, 0.0 }
 0x651   : > { %v5203_v47 = vmul.f32 %v7258_v36, %v4563_v37  ;;  %v6449_v38 = vadd.f32 %v6448_v63, %v6336_v28  ;;  %v979_v10 = vmul.f32 0.5, %v16927_v60  ;;  %v6226_v42 = vadd.f32 %v6225_v21, %v6113_v5  ;;  %v6228_v13 = vpop.f32.mrf.mxu1 }
 0x652   : > { %v5586_v44 = vsub.f32 0.0, %v5330_v46  ;;  %v4436_v22 = vadd.f32 0.2548296, %v4308_v62  ;;  %6150 = vmatmul.f32.gmra.mxu0 %v5969_v52  ;;  %v7260_v33 = vpop.eup %7259  ;;  %vm5460_vm15 = vcmp.lt.f32.partialorder %v16928_v32, 0.0  ;;  %v6116_v24 = vadd.f32 %v14322_v58, %v6115_v3 }
 0x653   : > { %v5331_v55 = vsub.f32 1.0, %v5203_v47  ;;  %6510 = vst [vmem:[%s12891_s28 + $0x88] sm:$0xff] %v6449_v38  ;;  %v980_v9 = vmul.f32 0.5, %v16929_v8 }
 0x654   : > { %v5714_v40 = vsel %vm5458_vm13, %v5586_v44, %v5330_v46  ;;  %v4564_v31 = vmul.f32 %v4436_v22, %v14409_v17  ;;  %v6338_v17 = vpop.f32.mrf.mxu2  ;;  %v6229_v50 = vadd.f32 %v6228_v13, %v6116_v24 }
 0x655   : > { %v5842_v51 = vadd.f32 1.0, %v5714_v40  ;;  %v5587_v27 = vsub.f32 0.0, %v5331_v55  ;;  %v6339_v48 = vadd.f32 %v6338_v17, %v6226_v42 }
 0x656   : > { %v5204_v1 = vmul.f32 %v7260_v33, %v4564_v31  ;;  %v6454_v6 = vpop.f32.mrf.mxu3 }
 0x657   : > { %v5970_v29 = vmul.f32 %v5842_v51, %v978_v11  ;;  %v5715_v14 = vsel %vm5459_vm14, %v5587_v27, %v5331_v55  ;;  %v6452_v7 = vadd.f32 %v6451_v23, %v6339_v48  ;;  %v6118_v41 = vpop.f32.mrf.mxu0 }
 0x658   : > { %v5843_v53 = vadd.f32 1.0, %v5715_v14  ;;  %v5332_v12 = vsub.f32 1.0, %v5204_v1  ;;  %v6119_v30 = vadd.f32 %v14322_v58, %v6118_v41 }
 0x659   : > { %6263 = vmatmul.f32.gmra.mxu1 %v5970_v29  ;;  %6511 = vst [vmem:[%s12891_s28 + $0x90] sm:$0xff] %v6452_v7  ;;  %v6231_v43 = vpop.f32.mrf.mxu1 }
 0x65a   : > { %v5971_v61 = vmul.f32 %v5843_v53, %v979_v10  ;;  %v5588_v4 = vsub.f32 0.0, %v5332_v12  ;;  %v6232_v18 = vadd.f32 %v6231_v43, %v6119_v30 }
 0x65c   : > { %6376 = vmatmul.f32.gmra.mxu2 %v5971_v61  ;;  %v5716_v56 = vsel %vm5460_vm15, %v5588_v4, %v5332_v12  ;;  %v6341_v15 = vpop.f32.mrf.mxu2 }
 0x65d   : > { %v5844_v26 = vadd.f32 1.0, %v5716_v56  ;;  %v6342_v20 = vadd.f32 %v6341_v15, %v6229_v50 }
 0x65e   : > { %v6457_v57 = vpop.f32.mrf.mxu3 }
 0x65f   : > { %v5972_v16 = vmul.f32 %v5844_v26, %v980_v9  ;;  %v6455_v25 = vadd.f32 %v6454_v6, %v6342_v20  ;;  %v6121_v49 = vpop.f32.mrf.mxu0 }
 0x660   : > { %v6122_v37 = vadd.f32 %v14322_v58, %v6121_v49 }
 0x661   : > { %6489 = vmatmul.f32.gmra.mxu3 %v5972_v16  ;;  %6512 = vst [vmem:[%s12891_s28 + $0x98] sm:$0xff] %v6455_v25  ;;  %v6234_v45 = vpop.f32.mrf.mxu1 }
 0x662   : > { %v6235_v46 = vadd.f32 %v6234_v45, %v6122_v37 }
 0x664   : > { %v6344_v2 = vpop.f32.mrf.mxu2 }
 0x665   : > { %v6345_v36 = vadd.f32 %v6344_v2, %v6232_v18 }
 0x666   : > { %v6460_v0 = vpop.f32.mrf.mxu3 }
 0x667   : > { %v6458_v35 = vadd.f32 %v6457_v57, %v6345_v36  ;;  %v6124_v47 = vpop.f32.mrf.mxu0 }
 0x668   : > { %v6125_v44 = vadd.f32 %v14322_v58, %v6124_v47 }
 0x669   : > { %6513 = vst [vmem:[%s12891_s28 + $0xa0] sm:$0xff] %v6458_v35  ;;  %v6237_v34 = vpop.f32.mrf.mxu1 }
 0x66a   : > { %v6238_v22 = vadd.f32 %v6237_v34, %v6125_v44 }
 0x66c   : > { %v6347_v62 = vpop.f32.mrf.mxu2 }
 0x66d   : > { %v6348_v52 = vadd.f32 %v6347_v62, %v6235_v46 }
 0x66e   : > { %v6463_v39 = vpop.f32.mrf.mxu3 }
 0x66f   : > { %v6461_v63 = vadd.f32 %v6460_v0, %v6348_v52  ;;  %v6127_v19 = vpop.f32.mrf.mxu0 }
 0x670   : > { %v6128_v31 = vadd.f32 %v14322_v58, %v6127_v19 }
 0x671   : > { %6514 = vst [vmem:[%s12891_s28 + $0xa8] sm:$0xff] %v6461_v63  ;;  %v6240_v55 = vpop.f32.mrf.mxu1 }
 0x672   : > { %v6241_v38 = vadd.f32 %v6240_v55, %v6128_v31 }
 0x674   : > { %v6350_v28 = vpop.f32.mrf.mxu2 }
 0x675   : > { %v6351_v21 = vadd.f32 %v6350_v28, %v6238_v22 }
 0x676   : > { %v6466_v33 = vpop.f32.mrf.mxu3 }
 0x677   : > { %v6464_v40 = vadd.f32 %v6463_v39, %v6351_v21  ;;  %v6130_v11 = vpop.f32.mrf.mxu0 }
 0x678   : > { %v6131_v54 = vadd.f32 %v14322_v58, %v6130_v11 }
 0x679   : > { %6515 = vst [vmem:[%s12891_s28 + $0xb0] sm:$0xff] %v6464_v40  ;;  %v6243_v51 = vpop.f32.mrf.mxu1 }
 0x67a   : > { %v6244_v1 = vadd.f32 %v6243_v51, %v6131_v54 }
 0x67c   : > { %v6353_v5 = vpop.f32.mrf.mxu2 }
 0x67d   : > { %v6354_v59 = vadd.f32 %v6353_v5, %v6241_v38 }
 0x67e   : > { %v6469_v14 = vpop.f32.mrf.mxu3 }
 0x67f   : > { %v6467_v27 = vadd.f32 %v6466_v33, %v6354_v59  ;;  %v6133_v10 = vpop.f32.mrf.mxu0 }
 0x680   : > { %v6134_v42 = vadd.f32 %v14322_v58, %v6133_v10 }
 0x681   : > { %6516 = vst [vmem:[%s12891_s28 + $0xb8] sm:$0xff] %v6467_v27  ;;  %v6246_v53 = vpop.f32.mrf.mxu1 }
 0x682   : > { %v6247_v17 = vadd.f32 %v6246_v53, %v6134_v42 }
 0x684   : > { %v6356_v29 = vpop.f32.mrf.mxu2 }
 0x685   : > { %v6357_v60 = vadd.f32 %v6356_v29, %v6244_v1 }
 0x686   : > { %v6472_v61 = vpop.f32.mrf.mxu3 }
 0x687   : > { %v6470_v12 = vadd.f32 %v6469_v14, %v6357_v60  ;;  %v6136_v48 = vpop.f32.mrf.mxu0 }
 0x688   : > { %v6137_v32 = vadd.f32 %v14322_v58, %v6136_v48 }
 0x689   : > { %6517 = vst [vmem:[%s12891_s28 + $0xc0] sm:$0xff] %v6470_v12  ;;  %v6249_v3 = vpop.f32.mrf.mxu1 }
 0x68a   : > { %v6250_v56 = vadd.f32 %v6249_v3, %v6137_v32 }
 0x68c   : > { %v6359_v23 = vpop.f32.mrf.mxu2 }
 0x68d   : > { %v6360_v4 = vadd.f32 %v6359_v23, %v6247_v17 }
 0x68e   : > { %v6475_v24 = vpop.f32.mrf.mxu3 }
 0x68f   : > { %v6473_v13 = vadd.f32 %v6472_v61, %v6360_v4  ;;  %v6139_v9 = vpop.f32.mrf.mxu0 }
 0x690   : > { %v6140_v16 = vadd.f32 %v14322_v58, %v6139_v9 }
 0x691   : > { %6518 = vst [vmem:[%s12891_s28 + $0xc8] sm:$0xff] %v6473_v13  ;;  %v6252_v50 = vpop.f32.mrf.mxu1 }
 0x692   : > { %v6253_v15 = vadd.f32 %v6252_v50, %v6140_v16 }
 0x694   : > { %v6362_v7 = vpop.f32.mrf.mxu2 }
 0x695   : > { %v6363_v8 = vadd.f32 %v6362_v7, %v6250_v56 }
 0x696   : > { %v6478_v20 = vpop.f32.mrf.mxu3 }
 0x697   : > { %v6476_v26 = vadd.f32 %v6475_v24, %v6363_v8  ;;  %v6142_v43 = vpop.f32.mrf.mxu0 }
 0x698   : > { %v6143_v30 = vadd.f32 %v14322_v58, %v6142_v43 }
 0x699   : > { %6519 = vst [vmem:[%s12891_s28 + $0xd0] sm:$0xff] %v6476_v26  ;;  %v6255_v18 = vpop.f32.mrf.mxu1 }
 0x69a   : > { %v6256_v2 = vadd.f32 %v6255_v18, %v6143_v30 }
 0x69c   : > { %v6365_v6 = vpop.f32.mrf.mxu2 }
 0x69d   : > { %v6366_v41 = vadd.f32 %v6365_v6, %v6253_v15 }
 0x69f   : > { %v6479_v25 = vadd.f32 %v6478_v20, %v6366_v41 }
 0x6a0   : > { %v6481_v49 = vpop.f32.mrf.mxu3 }
 0x6a1   : > { %6520 = vst [vmem:[%s12891_s28 + $0xd8] sm:$0xff] %v6479_v25  ;;  %v6145_v35 = vpop.f32.mrf.mxu0 }
 0x6a2   : > { %v6146_v37 = vadd.f32 %v14322_v58, %v6145_v35 }
 0x6a3   : > { %v6258_v46 = vpop.f32.mrf.mxu1 }
 0x6a4   : > { %v6368_v57 = vpop.f32.mrf.mxu2  ;;  %v6259_v62 = vadd.f32 %v6258_v46, %v6146_v37 }
 0x6a5   : > { %v6369_v36 = vadd.f32 %v6368_v57, %v6256_v2 }
 0x6a7   : > { %v6482_v45 = vadd.f32 %v6481_v49, %v6369_v36 }
 0x6a9   : > { %6521 = vst [vmem:[%s12891_s28 + $0xe0] sm:$0xff] %v6482_v45 }
 0x6b3   : > { %v6371_v0 = vpop.f32.mrf.mxu2 }
 0x6b4   : > { %v6372_v52 = vadd.f32 %v6371_v0, %v6259_v62 }
 0x6b5   : > { %v6484_v47 = vpop.f32.mrf.mxu3 }
 0x6b6   : > { %v6485_v34 = vadd.f32 %v6484_v47, %v6372_v52 }
 0x6b8   : > { %6522 = vst [vmem:[%s12891_s28 + $0xe8] sm:$0xff] %v6485_v34 }
 0x6bb   : > { %v6148_v63 = vpop.f32.mrf.mxu0 }
 0x6bc   : > { %v6149_v44 = vadd.f32 %v14322_v58, %v6148_v63 }
 0x6c0   : > { %v6261_v22 = vpop.f32.mrf.mxu1 }
 0x6c1   : > { %v6262_v39 = vadd.f32 %v6261_v22, %v6149_v44 }
 0x6c9   : > { %v6374_v28 = vpop.f32.mrf.mxu2 }
 0x6ca   : > { %v6375_v21 = vadd.f32 %v6374_v28, %v6262_v39 }
 0x6cf   : > { %v6487_v19 = vpop.f32.mrf.mxu3  ;;  %v6151_v40 = vpop.f32.mrf.mxu0 }
 0x6d0   : > { %v6488_v55 = vadd.f32 %v6487_v19, %v6375_v21  ;;  %v6152_v31 = vadd.f32 %v14322_v58, %v6151_v40 }
 0x6d2   : > { %6523 = vst [vmem:[%s12891_s28 + $0xf0] sm:$0xff] %v6488_v55 }
 0x6d6   : > { %v6264_v38 = vpop.f32.mrf.mxu1 }
 0x6d7   : > { %v6265_v5 = vadd.f32 %v6264_v38, %v6152_v31 }
 0x6df   : > { %v6377_v33 = vpop.f32.mrf.mxu2 }
 0x6e0   : > { %v6378_v59 = vadd.f32 %v6377_v33, %v6265_v5 }
 0x6e4   : > { %v6490_v11 = vpop.f32.mrf.mxu3 }
 0x6e5   : > { %v6491_v51 = vadd.f32 %v6490_v11, %v6378_v59 }
 0x6e7   : > { %6524 = vst [vmem:[%s12891_s28 + $0xf8] sm:$0xff] %v6491_v51 }
 0x6e8   : > { %7411 = shalt.err (!%p7408_p10)
}
 0x6e9   : > { %s7467_s17 = smov 128   ;;  %s7468_s28 = smov 8  }
 0x6ea   : > { %6679 = dma.vmem_to_hbm [thread:$0]  (%p7584_p3), %s6539_s8, 4096, %s6541_s11, %s6526_s24, %s7467_s17, %s7467_s17, %s7468_s28  }
 0x6eb PF: > { %s6555_s12 = sand.u32 1, %s7446_s18   ;;  %p16930_p12 = scmp.ge.s32.totalorder %s7458_s21, 2 }
 0x6ec   : > { %s6556_s14 = scalar_lea.sflag [#allocation4], %s6555_s12 }
 0x6ed   : > { %p6696_p13 = pnand %p16930_p12, %p7534_p6 }
 0x6ef   : > { %p6697_p0 = pneg %p6696_p13 }
 0x6f1   : > { %7441 = dma.done.wait (%p6697_p0), %s6556_s14, 4096  }
 0x6f2   : > { %7443 = vsyncadd (%p6697_p0), %s6556_s14, 4294963200  ;;  %p20_p5 = scmp.ge.s32.totalorder %s7571_s30, 4   ;;  %s16931_s18 = smov %s7450_s19 }
 0x6f3   : > { %s16932_s19 = smov %s7454_s20  ;;  %s16933_s20 = smov %s7580_s9 }
 0x6f4   : > { %s16934_s21 = smov %s7571_s30  ;;  %22 = sbr.rel (!%p20_p5) target bundleno = 7 (0x7), region = 97 }
 0x6f9   :  { %6562 = vsyncpa [#allocation3], 1 }
 0x6fa   :  { %6564 = vsyncpa [#allocation3 + $0x1], 1 }
 0x6fb   :  { %6565 = vsyncpa [#allocation6], 1 }
 0x6fc   :  { %6566 = vsyncpa [#allocation9], 1 }
 0x6fd   :  { %6567 = vsyncpa [#allocation4], 1 }
 0x6fe   :  { %6569 = vsyncpa [#allocation4 + $0x1], 1 }

</bundles_post_ra>
